<compile_context>
chip_gen: v7x
topology: tpu7x:2x2x1
jax: 0.10.0
libtpu: 0.0.40
codegen_flags: <defaults>
</compile_context>

<pallas_src>
import functools

import jax
import jax.numpy as jnp
import numpy as np
from jax.experimental import pallas as pl
from jax.experimental.pallas import tpu as pltpu

EPS = 1e-5  # torch.nn.LayerNorm default


def _layer_norm(x, gamma, beta):
    mean = jnp.mean(x, axis=-1, keepdims=True)
    var = jnp.mean((x - mean) ** 2, axis=-1, keepdims=True)
    return (x - mean) * jax.lax.rsqrt(var + EPS) * gamma + beta


# ---------------------------------------------------------------------------
# Kernel 1: per-class dynamic interaction (both stages, all boxes at once)
# ---------------------------------------------------------------------------
def _grouped_ln_relu(x, avg, gamma, beta):
    """LayerNorm over lane groups (avg = block-diag of 1/G) + ReLU.

    One-pass stats (var = E[x^2] - mean^2) so both stat matmuls issue
    back-to-back with no serial dependency.
    """
    mean = jnp.dot(x, avg, preferred_element_type=jnp.float32)
    meansq = jnp.dot(x * x, avg, preferred_element_type=jnp.float32)
    var = meansq - mean * mean
    y = (x - mean) * jax.lax.rsqrt(var + EPS) * gamma + beta
    return jnp.maximum(y, 0.0)


def _interact_kernel(roi_ref, bd1_ref, bd2_ref, a1_ref, a2_ref,
                     g1_ref, b1_ref, g2_ref, b2_ref, o_ref):
    # roi_ref: (S, B*d)   box-major lanes (free view of the original (S,B,d))
    # bd1_ref: (B*d, B*Dd)   block-diagonal stage-1 dynamic weights
    # bd2_ref: (B*Dd, B*d)   block-diagonal stage-2 dynamic weights
    # a1/a2  : constant block-diag averaging matrices for grouped LayerNorm
    # g*/b*  : (1, L) tiled LayerNorm affine rows (implicit sublane broadcast)
    x = roi_ref[...]                                                       # (S, B*d)
    f1 = jnp.dot(x, bd1_ref[...], preferred_element_type=jnp.float32)     # (S, B*Dd)
    f1 = _grouped_ln_relu(f1, a1_ref[...], g1_ref[...], b1_ref[...])
    f2 = jnp.dot(f1, bd2_ref[...], preferred_element_type=jnp.float32)    # (S, B*d)
    o_ref[...] = _grouped_ln_relu(f2, a2_ref[...], g2_ref[...], b2_ref[...])


# ---------------------------------------------------------------------------
# Kernel 2: out_layer + norm3 + ReLU as one shared K = S*d contraction
# (Wo pushed once for all classes * boxes)
# ---------------------------------------------------------------------------
def _out_kernel(flat_ref, wo_ref, bo_ref, g3_ref, b3_ref, o_ref):
    # flat_ref: (N_c*B, S*d), wo_ref: (S*d, d)
    acc = jnp.dot(flat_ref[...], wo_ref[...], preferred_element_type=jnp.float32)
    acc = acc + bo_ref[...]
    o_ref[...] = jnp.maximum(_layer_norm(acc, g3_ref[...], b3_ref[...]), 0.0)


# ---------------------------------------------------------------------------
# Wrapper
# ---------------------------------------------------------------------------
@functools.partial(jax.jit, static_argnames=("dim_dynamic",))
def class_dynamic_conv(pro_features, class_roi_features, params, *, dim_dynamic):
    N_c, B, d = pro_features.shape
    S = class_roi_features.shape[1]
    Dd = dim_dynamic
    P = d * Dd

    # ---- dynamic_layer (tiny; XLA fuses matmul + bias + split + reshape) ----
    dyn = pro_features @ params["Wd_T"] + params["bd"]            # (N_c, B, 2P)
    param1 = dyn[..., :P].reshape(N_c, B, d, Dd)
    param2 = dyn[..., P:].reshape(N_c, B, Dd, d)

    # ---- block-diagonal packing of the per-box dynamic weights (item 1) ----
    eyeB = jnp.eye(B, dtype=jnp.float32)
    # bd1[i, b*d + c, k*Dd + m] = param1[i, b, c, m] * (b == k)
    bd1 = (param1[:, :, :, None, :] * eyeB[None, :, None, :, None]
           ).reshape(N_c, B * d, B * Dd)
    # bd2[i, b*Dd + m, k*d + c] = param2[i, b, m, c] * (b == k)
    bd2 = (param2[:, :, :, None, :] * eyeB[None, :, None, :, None]
           ).reshape(N_c, B * Dd, B * d)

    # Constant block-diagonal averaging matrices for the grouped LayerNorms
    # (XLA constant-folds these under jit).
    A1 = jnp.kron(eyeB, jnp.full((Dd, Dd), 1.0 / Dd, dtype=jnp.float32))  # (B*Dd, B*Dd)
    A2 = jnp.kron(eyeB, jnp.full((d, d), 1.0 / d, dtype=jnp.float32))     # (B*d, B*d)

    # Tiled LN affine rows; kept as (1, L) so the kernel sublane-broadcasts them.
    g1t = jnp.tile(params["g1"], B)[None, :]
    b1t = jnp.tile(params["b1"], B)[None, :]
    g2t = jnp.tile(params["g2"], B)[None, :]
    b2t = jnp.tile(params["b2"], B)[None, :]

    # Free contiguous view: (N_c, S, B, d) -> (N_c, S, B*d). No wrapper transpose.
    roi_flat = class_roi_features.reshape(N_c, S, B * d)

    feat = pl.pallas_call(
        _interact_kernel,
        out_shape=jax.ShapeDtypeStruct((N_c, S, B * d), jnp.float32),
        grid_spec=pltpu.PrefetchScalarGridSpec(
            num_scalar_prefetch=0,
            grid=(N_c,),
            in_specs=[
                pl.BlockSpec((None, S, B * d), lambda i: (i, 0, 0)),       # roi
                pl.BlockSpec((None, B * d, B * Dd), lambda i: (i, 0, 0)),  # bd1
                pl.BlockSpec((None, B * Dd, B * d), lambda i: (i, 0, 0)),  # bd2
                pl.BlockSpec((B * Dd, B * Dd), lambda i: (0, 0)),          # A1 (resident)
                pl.BlockSpec((B * d, B * d), lambda i: (0, 0)),            # A2 (resident)
                pl.BlockSpec((1, B * Dd), lambda i: (0, 0)),               # g1 tiled
                pl.BlockSpec((1, B * Dd), lambda i: (0, 0)),               # b1 tiled
                pl.BlockSpec((1, B * d), lambda i: (0, 0)),                # g2 tiled
                pl.BlockSpec((1, B * d), lambda i: (0, 0)),                # b2 tiled
            ],
            out_specs=pl.BlockSpec((None, S, B * d), lambda i: (i, 0, 0)), # lane-dense
        ),
        compiler_params=pltpu.CompilerParams(
            dimension_semantics=("parallel",),   # classes sharded across TCs (v7x)
        ),
    )(roi_flat, bd1, bd2, A1, A2, g1t, b1t, g2t, b2t)

    # ---- cheap XLA relayout between the two kernels (~2.4 MB) --------------
    # (N_c, S, B, d) -> (N_c, B, S, d) -> (N_c*B, S*d); row order = s*d + c,
    # matching Wo_T's row ordering exactly.
    flat = feat.reshape(N_c, S, B, d).transpose(0, 2, 1, 3).reshape(N_c * B, S * d)

    # ---- out_layer + norm3 + ReLU: single shot, everything in VMEM ---------
    vmem_specs = [pl.BlockSpec(memory_space=pltpu.MemorySpace.VMEM) for _ in range(5)]
    out = pl.pallas_call(
        _out_kernel,
        out_shape=jax.ShapeDtypeStruct((N_c * B, d), jnp.float32),
        in_specs=vmem_specs,
        out_specs=pl.BlockSpec(memory_space=pltpu.MemorySpace.VMEM),
    )(flat, params["Wo_T"], params["bo"][None, :],
      params["g3"][None, :], params["b3"][None, :])

    return out.reshape(N_c, B, d)


# ---------------------------------------------------------------------------
# Pure-JAX reference (mirrors the PyTorch forward exactly)
# ---------------------------------------------------------------------------
def reference(pro, roi, params, dim_dynamic):
    N_c, B, d = pro.shape
    S = roi.shape[1]
    Dd = dim_dynamic
    P = d * Dd
    dyn = pro @ params["Wd_T"] + params["bd"]
    param1 = dyn[..., :P].reshape(N_c, B, d, Dd)
    param2 = dyn[..., P:].reshape(N_c, B, Dd, d)
    f = jnp.einsum("ijkl,iklm->ijkm", roi, param1)
    f = jnp.maximum(_layer_norm(f, params["g1"], params["b1"]), 0.0)
    f = jnp.einsum("ijkl,iklm->ijkm", f, param2)
    f = jnp.maximum(_layer_norm(f, params["g2"], params["b2"]), 0.0)
    f = jnp.transpose(f, (0, 2, 1, 3)).reshape(N_c, B, S * d)
    f = f @ params["Wo_T"] + params["bo"]
    f = jnp.maximum(_layer_norm(f, params["g3"], params["b3"]), 0.0)
    return f


# ---------------------------------------------------------------------------
if __name__ == "__main__":
    # Small config consistent with the module:
    HIDDEN_DIM = 64          # hidden_dim / d_model
    DIM_DYNAMIC = 16         # dim_dynamic
    NUM_DYNAMIC = 2          # num_dynamic
    POOLER_RES = 7           # pooler_resolution -> S = 49
    N_CLASSES = 3
    BOXES = 8                # N * nr_boxes

    S = POOLER_RES ** 2
    P = HIDDEN_DIM * DIM_DYNAMIC
    NUM_OUTPUT = HIDDEN_DIM * S

    key = jax.random.PRNGKey(0)
    ks = jax.random.split(key, 12)

    # deterministic synthetic parameters (no checkpoint loading)
    params = {
        # dynamic_layer: Linear(hidden_dim, num_dynamic * num_params) — pass W^T
        "Wd_T": jax.random.normal(ks[0], (HIDDEN_DIM, NUM_DYNAMIC * P), jnp.float32) * 0.05,
        "bd": jax.random.normal(ks[1], (NUM_DYNAMIC * P,), jnp.float32) * 0.05,
        # norm1 (dim_dynamic)
        "g1": 1.0 + 0.1 * jax.random.normal(ks[2], (DIM_DYNAMIC,), jnp.float32),
        "b1": 0.1 * jax.random.normal(ks[3], (DIM_DYNAMIC,), jnp.float32),
        # norm2 (hidden_dim)
        "g2": 1.0 + 0.1 * jax.random.normal(ks[4], (HIDDEN_DIM,), jnp.float32),
        "b2": 0.1 * jax.random.normal(ks[5], (HIDDEN_DIM,), jnp.float32),
        # out_layer: Linear(num_output, hidden_dim) — pass W^T
        "Wo_T": jax.random.normal(ks[6], (NUM_OUTPUT, HIDDEN_DIM), jnp.float32) * 0.02,
        "bo": jax.random.normal(ks[7], (HIDDEN_DIM,), jnp.float32) * 0.05,
        # norm3 (hidden_dim)
        "g3": 1.0 + 0.1 * jax.random.normal(ks[8], (HIDDEN_DIM,), jnp.float32),
        "b3": 0.1 * jax.random.normal(ks[9], (HIDDEN_DIM,), jnp.float32),
    }

    pro_features = jax.random.normal(ks[10], (N_CLASSES, BOXES, HIDDEN_DIM), jnp.float32)
    class_roi_features = jax.random.normal(
        ks[11], (N_CLASSES, S, BOXES, HIDDEN_DIM), jnp.float32
    )

    out = class_dynamic_conv(
        pro_features, class_roi_features, params, dim_dynamic=DIM_DYNAMIC
    )
    out = jax.block_until_ready(out)

    ref = reference(pro_features, class_roi_features, params, DIM_DYNAMIC)
    np.testing.assert_allclose(np.asarray(out), np.asarray(ref), rtol=2e-3, atol=2e-3)

    print("KERNEL_OK")
</pallas_src>

<mosaic_0001>
module attributes {stable_mosaic.version = 11 : i64} {
  func.func @_interact_kernel(%arg0: i32, %arg1: memref<1x49x512xf32, #tpu.memory_space<vmem>>, %arg2: memref<1x512x128xf32, #tpu.memory_space<vmem>>, %arg3: memref<1x128x512xf32, #tpu.memory_space<vmem>>, %arg4: memref<128x128xf32, #tpu.memory_space<vmem>>, %arg5: memref<512x512xf32, #tpu.memory_space<vmem>>, %arg6: memref<1x128xf32, #tpu.memory_space<vmem>>, %arg7: memref<1x128xf32, #tpu.memory_space<vmem>>, %arg8: memref<1x512xf32, #tpu.memory_space<vmem>>, %arg9: memref<1x512xf32, #tpu.memory_space<vmem>>, %arg10: memref<1x49x512xf32, #tpu.memory_space<vmem>>) attributes {dimension_semantics = [#tpu.dimension_semantics<parallel>], iteration_bounds = array<i64: 3>, scalar_prefetch = 0 : i64, scratch_operands = 0 : i64, tpu.core_type = #tpu.core_type<tc>, window_params = [{transform_indices = @transform_0, window_bounds = array<i64: 1, 49, 512>}, {transform_indices = @transform_1, window_bounds = array<i64: 1, 512, 128>}, {transform_indices = @transform_2, window_bounds = array<i64: 1, 128, 512>}, {pipeline_mode = #tpu.pipeline_mode<synchronous>, transform_indices = @transform_3, window_bounds = array<i64: 128, 128>}, {pipeline_mode = #tpu.pipeline_mode<synchronous>, transform_indices = @transform_4, window_bounds = array<i64: 512, 512>}, {pipeline_mode = #tpu.pipeline_mode<synchronous>, transform_indices = @transform_5, window_bounds = array<i64: 1, 128>}, {pipeline_mode = #tpu.pipeline_mode<synchronous>, transform_indices = @transform_6, window_bounds = array<i64: 1, 128>}, {pipeline_mode = #tpu.pipeline_mode<synchronous>, transform_indices = @transform_7, window_bounds = array<i64: 1, 512>}, {pipeline_mode = #tpu.pipeline_mode<synchronous>, transform_indices = @transform_8, window_bounds = array<i64: 1, 512>}, {transform_indices = @transform_9, window_bounds = array<i64: 1, 49, 512>}]} {
    %c0 = arith.constant 0 : index
    %c0_0 = arith.constant 0 : index
    %c0_1 = arith.constant 0 : index
    %0 = vector.load %arg1[%c0, %c0_0, %c0_1] : memref<1x49x512xf32, #tpu.memory_space<vmem>>, vector<1x49x512xf32>
    %1 = vector.shape_cast %0 : vector<1x49x512xf32> to vector<49x512xf32>
    %c0_2 = arith.constant 0 : index
    %c0_3 = arith.constant 0 : index
    %c0_4 = arith.constant 0 : index
    %2 = vector.load %arg2[%c0_2, %c0_3, %c0_4] : memref<1x512x128xf32, #tpu.memory_space<vmem>>, vector<1x512x128xf32>
    %3 = vector.shape_cast %2 : vector<1x512x128xf32> to vector<512x128xf32>
    %cst = arith.constant dense<0.000000e+00> : vector<49x128xf32>
    %4 = tpu.matmul %1, %3, %cst {dimension_numbers = #tpu.dot_dimension_numbers<[1], [0], [0], [1], [0, 0, 1, 1], [], []>} : vector<49x512xf32>, vector<512x128xf32>, vector<49x128xf32> -> vector<49x128xf32>
    %c0_5 = arith.constant 0 : index
    %c0_6 = arith.constant 0 : index
    %5 = vector.load %arg4[%c0_5, %c0_6] : memref<128x128xf32, #tpu.memory_space<vmem>>, vector<128x128xf32>
    %c0_7 = arith.constant 0 : index
    %c0_8 = arith.constant 0 : index
    %6 = vector.load %arg6[%c0_7, %c0_8] : memref<1x128xf32, #tpu.memory_space<vmem>>, vector<1x128xf32>
    %c0_9 = arith.constant 0 : index
    %c0_10 = arith.constant 0 : index
    %7 = vector.load %arg7[%c0_9, %c0_10] : memref<1x128xf32, #tpu.memory_space<vmem>>, vector<1x128xf32>
    %cst_11 = arith.constant dense<0.000000e+00> : vector<49x128xf32>
    %8 = tpu.matmul %4, %5, %cst_11 {dimension_numbers = #tpu.dot_dimension_numbers<[1], [0], [0], [1], [0, 0, 1, 1], [], []>} : vector<49x128xf32>, vector<128x128xf32>, vector<49x128xf32> -> vector<49x128xf32>
    %9 = arith.mulf %4, %4 : vector<49x128xf32>
    %cst_12 = arith.constant dense<0.000000e+00> : vector<49x128xf32>
    %10 = tpu.matmul %9, %5, %cst_12 {dimension_numbers = #tpu.dot_dimension_numbers<[1], [0], [0], [1], [0, 0, 1, 1], [], []>} : vector<49x128xf32>, vector<128x128xf32>, vector<49x128xf32> -> vector<49x128xf32>
    %11 = arith.mulf %8, %8 : vector<49x128xf32>
    %12 = arith.subf %10, %11 : vector<49x128xf32>
    %13 = arith.subf %4, %8 : vector<49x128xf32>
    %cst_13 = arith.constant 9.99999974E-6 : f32
    %14 = vector.broadcast %cst_13 : f32 to vector<49x128xf32>
    %15 = arith.addf %12, %14 : vector<49x128xf32>
    %16 = math.rsqrt %15 : vector<49x128xf32>
    %17 = arith.mulf %13, %16 : vector<49x128xf32>
    %18 = vector.broadcast %6 : vector<1x128xf32> to vector<49x128xf32>
    %19 = arith.mulf %17, %18 : vector<49x128xf32>
    %20 = vector.broadcast %7 : vector<1x128xf32> to vector<49x128xf32>
    %21 = arith.addf %19, %20 : vector<49x128xf32>
    %cst_14 = arith.constant 0.000000e+00 : f32
    %22 = vector.broadcast %cst_14 : f32 to vector<49x128xf32>
    %23 = arith.maximumf %21, %22 : vector<49x128xf32>
    %c0_15 = arith.constant 0 : index
    %c0_16 = arith.constant 0 : index
    %c0_17 = arith.constant 0 : index
    %24 = vector.load %arg3[%c0_15, %c0_16, %c0_17] : memref<1x128x512xf32, #tpu.memory_space<vmem>>, vector<1x128x512xf32>
    %25 = vector.shape_cast %24 : vector<1x128x512xf32> to vector<128x512xf32>
    %cst_18 = arith.constant dense<0.000000e+00> : vector<49x512xf32>
    %26 = tpu.matmul %23, %25, %cst_18 {dimension_numbers = #tpu.dot_dimension_numbers<[1], [0], [0], [1], [0, 0, 1, 1], [], []>} : vector<49x128xf32>, vector<128x512xf32>, vector<49x512xf32> -> vector<49x512xf32>
    %c0_19 = arith.constant 0 : index
    %c0_20 = arith.constant 0 : index
    %27 = vector.load %arg5[%c0_19, %c0_20] : memref<512x512xf32, #tpu.memory_space<vmem>>, vector<512x512xf32>
    %c0_21 = arith.constant 0 : index
    %c0_22 = arith.constant 0 : index
    %28 = vector.load %arg8[%c0_21, %c0_22] : memref<1x512xf32, #tpu.memory_space<vmem>>, vector<1x512xf32>
    %c0_23 = arith.constant 0 : index
    %c0_24 = arith.constant 0 : index
    %29 = vector.load %arg9[%c0_23, %c0_24] : memref<1x512xf32, #tpu.memory_space<vmem>>, vector<1x512xf32>
    %cst_25 = arith.constant dense<0.000000e+00> : vector<49x512xf32>
    %30 = tpu.matmul %26, %27, %cst_25 {dimension_numbers = #tpu.dot_dimension_numbers<[1], [0], [0], [1], [0, 0, 1, 1], [], []>} : vector<49x512xf32>, vector<512x512xf32>, vector<49x512xf32> -> vector<49x512xf32>
    %31 = arith.mulf %26, %26 : vector<49x512xf32>
    %cst_26 = arith.constant dense<0.000000e+00> : vector<49x512xf32>
    %32 = tpu.matmul %31, %27, %cst_26 {dimension_numbers = #tpu.dot_dimension_numbers<[1], [0], [0], [1], [0, 0, 1, 1], [], []>} : vector<49x512xf32>, vector<512x512xf32>, vector<49x512xf32> -> vector<49x512xf32>
    %33 = arith.mulf %30, %30 : vector<49x512xf32>
    %34 = arith.subf %32, %33 : vector<49x512xf32>
    %35 = arith.subf %26, %30 : vector<49x512xf32>
    %cst_27 = arith.constant 9.99999974E-6 : f32
    %36 = vector.broadcast %cst_27 : f32 to vector<49x512xf32>
    %37 = arith.addf %34, %36 : vector<49x512xf32>
    %38 = math.rsqrt %37 : vector<49x512xf32>
    %39 = arith.mulf %35, %38 : vector<49x512xf32>
    %40 = vector.broadcast %28 : vector<1x512xf32> to vector<49x512xf32>
    %41 = arith.mulf %39, %40 : vector<49x512xf32>
    %42 = vector.broadcast %29 : vector<1x512xf32> to vector<49x512xf32>
    %43 = arith.addf %41, %42 : vector<49x512xf32>
    %cst_28 = arith.constant 0.000000e+00 : f32
    %44 = vector.broadcast %cst_28 : f32 to vector<49x512xf32>
    %45 = arith.maximumf %43, %44 : vector<49x512xf32>
    %c0_29 = arith.constant 0 : index
    %c0_30 = arith.constant 0 : index
    %c0_31 = arith.constant 0 : index
    %46 = vector.load %arg10[%c0_29, %c0_30, %c0_31] : memref<1x49x512xf32, #tpu.memory_space<vmem>>, vector<1x49x512xf32>
    %47 = vector.shape_cast %46 : vector<1x49x512xf32> to vector<49x512xf32>
    %48 = vector.shape_cast %45 : vector<49x512xf32> to vector<1x49x512xf32>
    tpu.vector_store %arg10[%c0_29, %c0_30, %c0_31], %48 {strides = array<i32>} : memref<1x49x512xf32, #tpu.memory_space<vmem>>, vector<1x49x512xf32>,
    return
  }
  func.func @transform_0(%arg0: i32) -> (i32, i32, i32) {
    %c0_i32 = arith.constant 0 : i32
    %c0_i32_0 = arith.constant 0 : i32
    %c0_i32_1 = arith.constant 0 : i32
    return %arg0, %c0_i32, %c0_i32_0 : i32, i32, i32
  }
  func.func @transform_1(%arg0: i32) -> (i32, i32, i32) {
    %c0_i32 = arith.constant 0 : i32
    %c0_i32_0 = arith.constant 0 : i32
    %c0_i32_1 = arith.constant 0 : i32
    return %arg0, %c0_i32, %c0_i32_0 : i32, i32, i32
  }
  func.func @transform_2(%arg0: i32) -> (i32, i32, i32) {
    %c0_i32 = arith.constant 0 : i32
    %c0_i32_0 = arith.constant 0 : i32
    %c0_i32_1 = arith.constant 0 : i32
    return %arg0, %c0_i32, %c0_i32_0 : i32, i32, i32
  }
  func.func @transform_3(%arg0: i32) -> (i32, i32) {
    %c0_i32 = arith.constant 0 : i32
    %c0_i32_0 = arith.constant 0 : i32
    %c0_i32_1 = arith.constant 0 : i32
    return %c0_i32, %c0_i32_0 : i32, i32
  }
  func.func @transform_4(%arg0: i32) -> (i32, i32) {
    %c0_i32 = arith.constant 0 : i32
    %c0_i32_0 = arith.constant 0 : i32
    %c0_i32_1 = arith.constant 0 : i32
    return %c0_i32, %c0_i32_0 : i32, i32
  }
  func.func @transform_5(%arg0: i32) -> (i32, i32) {
    %c0_i32 = arith.constant 0 : i32
    %c0_i32_0 = arith.constant 0 : i32
    %c0_i32_1 = arith.constant 0 : i32
    return %c0_i32, %c0_i32_0 : i32, i32
  }
  func.func @transform_6(%arg0: i32) -> (i32, i32) {
    %c0_i32 = arith.constant 0 : i32
    %c0_i32_0 = arith.constant 0 : i32
    %c0_i32_1 = arith.constant 0 : i32
    return %c0_i32, %c0_i32_0 : i32, i32
  }
  func.func @transform_7(%arg0: i32) -> (i32, i32) {
    %c0_i32 = arith.constant 0 : i32
    %c0_i32_0 = arith.constant 0 : i32
    %c0_i32_1 = arith.constant 0 : i32
    return %c0_i32, %c0_i32_0 : i32, i32
  }
  func.func @transform_8(%arg0: i32) -> (i32, i32) {
    %c0_i32 = arith.constant 0 : i32
    %c0_i32_0 = arith.constant 0 : i32
    %c0_i32_1 = arith.constant 0 : i32
    return %c0_i32, %c0_i32_0 : i32, i32
  }
  func.func @transform_9(%arg0: i32) -> (i32, i32, i32) {
    %c0_i32 = arith.constant 0 : i32
    %c0_i32_0 = arith.constant 0 : i32
    %c0_i32_1 = arith.constant 0 : i32
    return %arg0, %c0_i32, %c0_i32_0 : i32, i32, i32
  }
}

module attributes {stable_mosaic.version = 11 : i64} {
  func.func @_out_kernel(%arg0: memref<24x3136xf32, #tpu.memory_space<vmem>>, %arg1: memref<3136x64xf32, #tpu.memory_space<vmem>>, %arg2: memref<1x64xf32, #tpu.memory_space<vmem>>, %arg3: memref<1x64xf32, #tpu.memory_space<vmem>>, %arg4: memref<1x64xf32, #tpu.memory_space<vmem>>, %arg5: memref<24x64xf32, #tpu.memory_space<vmem>>) attributes {dimension_semantics = [], scalar_prefetch = 0 : i64, scratch_operands = 0 : i64, tpu.core_type = #tpu.core_type<tc>} {
    %c0 = arith.constant 0 : index
    %c0_0 = arith.constant 0 : index
    %0 = vector.load %arg0[%c0, %c0_0] : memref<24x3136xf32, #tpu.memory_space<vmem>>, vector<24x3136xf32>
    %c0_1 = arith.constant 0 : index
    %c0_2 = arith.constant 0 : index
    %1 = vector.load %arg1[%c0_1, %c0_2] : memref<3136x64xf32, #tpu.memory_space<vmem>>, vector<3136x64xf32>
    %cst = arith.constant dense<0.000000e+00> : vector<24x64xf32>
    %2 = tpu.matmul %0, %1, %cst {dimension_numbers = #tpu.dot_dimension_numbers<[1], [0], [0], [1], [0, 0, 1, 1], [], []>} : vector<24x3136xf32>, vector<3136x64xf32>, vector<24x64xf32> -> vector<24x64xf32>
    %c0_3 = arith.constant 0 : index
    %c0_4 = arith.constant 0 : index
    %3 = vector.load %arg2[%c0_3, %c0_4] : memref<1x64xf32, #tpu.memory_space<vmem>>, vector<1x64xf32>
    %4 = vector.broadcast %3 : vector<1x64xf32> to vector<24x64xf32>
    %5 = arith.addf %2, %4 : vector<24x64xf32>
    %c0_5 = arith.constant 0 : index
    %c0_6 = arith.constant 0 : index
    %6 = vector.load %arg3[%c0_5, %c0_6] : memref<1x64xf32, #tpu.memory_space<vmem>>, vector<1x64xf32>
    %c0_7 = arith.constant 0 : index
    %c0_8 = arith.constant 0 : index
    %7 = vector.load %arg4[%c0_7, %c0_8] : memref<1x64xf32, #tpu.memory_space<vmem>>, vector<1x64xf32>
    %cst_9 = arith.constant dense<0.000000e+00> : vector<24xf32>
    %8 = vector.multi_reduction <add>, %5, %cst_9 [1] : vector<24x64xf32> to vector<24xf32>
    %9 = vector.shape_cast %8 : vector<24xf32> to vector<24x1xf32>
    %cst_10 = arith.constant 6.400000e+01 : f32
    %10 = vector.broadcast %cst_10 : f32 to vector<24x1xf32>
    %11 = arith.divf %9, %10 : vector<24x1xf32>
    %12 = vector.broadcast %11 : vector<24x1xf32> to vector<24x64xf32>
    %13 = arith.subf %5, %12 : vector<24x64xf32>
    %14 = arith.mulf %13, %13 : vector<24x64xf32>
    %cst_11 = arith.constant dense<0.000000e+00> : vector<24xf32>
    %15 = vector.multi_reduction <add>, %14, %cst_11 [1] : vector<24x64xf32> to vector<24xf32>
    %16 = vector.shape_cast %15 : vector<24xf32> to vector<24x1xf32>
    %cst_12 = arith.constant 6.400000e+01 : f32
    %17 = vector.broadcast %cst_12 : f32 to vector<24x1xf32>
    %18 = arith.divf %16, %17 : vector<24x1xf32>
    %19 = vector.broadcast %11 : vector<24x1xf32> to vector<24x64xf32>
    %20 = arith.subf %5, %19 : vector<24x64xf32>
    %cst_13 = arith.constant 9.99999974E-6 : f32
    %21 = vector.broadcast %cst_13 : f32 to vector<24x1xf32>
    %22 = arith.addf %18, %21 : vector<24x1xf32>
    %23 = math.rsqrt %22 : vector<24x1xf32>
    %24 = vector.broadcast %23 : vector<24x1xf32> to vector<24x64xf32>
    %25 = arith.mulf %20, %24 : vector<24x64xf32>
    %26 = vector.broadcast %6 : vector<1x64xf32> to vector<24x64xf32>
    %27 = arith.mulf %25, %26 : vector<24x64xf32>
    %28 = vector.broadcast %7 : vector<1x64xf32> to vector<24x64xf32>
    %29 = arith.addf %27, %28 : vector<24x64xf32>
    %cst_14 = arith.constant 0.000000e+00 : f32
    %30 = vector.broadcast %cst_14 : f32 to vector<24x64xf32>
    %31 = arith.maximumf %29, %30 : vector<24x64xf32>
    %c0_15 = arith.constant 0 : index
    %c0_16 = arith.constant 0 : index
    %32 = vector.load %arg5[%c0_15, %c0_16] : memref<24x64xf32, #tpu.memory_space<vmem>>, vector<24x64xf32>
    tpu.vector_store %arg5[%c0_15, %c0_16], %31 {strides = array<i32>} : memref<24x64xf32, #tpu.memory_space<vmem>>, vector<24x64xf32>,
    return
  }
}

</mosaic_0001>

<bundles_post_ra>
// kernel: mul.43
= control target key start
LH: loop header
LB: loop body
LE: loop exit
PB: predicated region body
PF: predicated region fallthrough
CT: control target
= control target key end

     0   :  { %vm459_vm0 = vcmask 1047556   ;;  %s3519_s14 = smov 112   ;;  %s3520_s5 = smov 96   ;;  %vm3_vm1 = vcmask 130048   ;;  %s7097_s0 = inlined_call_operand.vmem [shape: f32[3,8,1024], index: 0, kind: input, shape index: {}]   ;;  %s7098_s1 = inlined_call_operand.vmem [shape: f32[3,8,64,16], index: 1, kind: output, shape index: {}]  }
   0x1   :  { %v2854_v0 = vld [vmem:[%s7097_s0 + $0x4] ss:$8 sm:$0xf]   ;;  %v2855_v1 = vld [vmem:[%s7097_s0 - $0x1b] ss:$8 sm:$0xf0]  }
   0x2   :  { %v486_v2 = vsel %vm459_vm0, %v2855_v1, %v2854_v0  ;;  %v456_v3 = vld [vmem:[%s7097_s0] ss:$8 sm:$0xf]   ;;  %v2847_v4 = vld [vmem:[%s7097_s0 - $0x1f] ss:$8 sm:$0xf0]  }
   0x3   :  { %487 = vrot.lane.b32.xlu1 %v486_v2, %s3519_s14  ;;  %v460_v5 = vsel %vm459_vm0, %v2847_v4, %v456_v3  ;;  %v2858_v6 = vld [vmem:[%s7097_s0 + $0x6] ss:$8 sm:$0xf]   ;;  %v2859_v7 = vld [vmem:[%s7097_s0 - $0x19] ss:$8 sm:$0xf0]  }
   0x4   :  { %461 = vrot.lane.b32.xlu0 %v460_v5, %s3519_s14  ;;  %v499_v8 = vsel %vm459_vm0, %v2859_v7, %v2858_v6  ;;  %v2850_v9 = vld [vmem:[%s7097_s0 + $0x2] ss:$8 sm:$0xf]   ;;  %v2851_v10 = vld [vmem:[%s7097_s0 - $0x1d] ss:$8 sm:$0xf0]  }
   0x5   :  { %v473_v11 = vsel %vm459_vm0, %v2851_v10, %v2850_v9  ;;  %v2866_v12 = vld [vmem:[%s7097_s0 + $0x22] ss:$8 sm:$0xf]   ;;  %v2867_v13 = vld [vmem:[%s7097_s0 + $0x3] ss:$8 sm:$0xf0]  }
   0x6   :  { %v2862_v14 = vld [vmem:[%s7097_s0 + $0x20] ss:$8 sm:$0xf]   ;;  %v2863_v15 = vld [vmem:[%s7097_s0 + $0x1] ss:$8 sm:$0xf0]   ;;  %v525_v16 = vsel %vm459_vm0, %v2867_v13, %v2866_v12 }
   0x7   :  { %500 = vrot.lane.b32.xlu1 %v499_v8, %s3519_s14  ;;  %v512_v17 = vsel %vm459_vm0, %v2863_v15, %v2862_v14  ;;  %v2874_v18 = vld [vmem:[%s7097_s0 + $0x26] ss:$8 sm:$0xf]   ;;  %v2875_v19 = vld [vmem:[%s7097_s0 + $0x7] ss:$8 sm:$0xf0]  }
   0x8   :  { %474 = vrot.lane.b32.xlu0 %v473_v11, %s3519_s14  ;;  %v2870_v20 = vld [vmem:[%s7097_s0 + $0x24] ss:$8 sm:$0xf]   ;;  %v2871_v21 = vld [vmem:[%s7097_s0 + $0x5] ss:$8 sm:$0xf0]   ;;  %v551_v22 = vsel %vm459_vm0, %v2875_v19, %v2874_v18 }
   0x9   :  { %v538_v23 = vsel %vm459_vm0, %v2871_v21, %v2870_v20  ;;  %v2882_v24 = vld [vmem:[%s7097_s0 + $0x42] ss:$8 sm:$0xf]   ;;  %v2883_v25 = vld [vmem:[%s7097_s0 + $0x23] ss:$8 sm:$0xf0]  }
   0xa   :  { %v2878_v26 = vld [vmem:[%s7097_s0 + $0x40] ss:$8 sm:$0xf]   ;;  %v2879_v27 = vld [vmem:[%s7097_s0 + $0x21] ss:$8 sm:$0xf0]   ;;  %v577_v28 = vsel %vm459_vm0, %v2883_v25, %v2882_v24 }
   0xb   :  { %526 = vrot.lane.b32.xlu1 %v525_v16, %s3519_s14  ;;  %v564_v29 = vsel %vm459_vm0, %v2879_v27, %v2878_v26  ;;  %v2890_v30 = vld [vmem:[%s7097_s0 + $0x46] ss:$8 sm:$0xf]   ;;  %v2891_v31 = vld [vmem:[%s7097_s0 + $0x27] ss:$8 sm:$0xf0]  }
   0xc   :  { %513 = vrot.lane.b32.xlu0 %v512_v17, %s3519_s14  ;;  %v2886_v32 = vld [vmem:[%s7097_s0 + $0x44] ss:$8 sm:$0xf]   ;;  %v2887_v33 = vld [vmem:[%s7097_s0 + $0x25] ss:$8 sm:$0xf0]   ;;  %v603_v34 = vsel %vm459_vm0, %v2891_v31, %v2890_v30 }
   0xd   :  { %v590_v35 = vsel %vm459_vm0, %v2887_v33, %v2886_v32  ;;  %v2898_v36 = vld [vmem:[%s7097_s0 + $0x62] ss:$8 sm:$0xf]   ;;  %v2899_v37 = vld [vmem:[%s7097_s0 + $0x43] ss:$8 sm:$0xf0]  }
   0xe   :  { %v2894_v38 = vld [vmem:[%s7097_s0 + $0x60] ss:$8 sm:$0xf]   ;;  %v2895_v39 = vld [vmem:[%s7097_s0 + $0x41] ss:$8 sm:$0xf0]   ;;  %v629_v40 = vsel %vm459_vm0, %v2899_v37, %v2898_v36 }
   0xf   :  { %552 = vrot.lane.b32.xlu1 %v551_v22, %s3519_s14  ;;  %v616_v41 = vsel %vm459_vm0, %v2895_v39, %v2894_v38  ;;  %v2906_v42 = vld [vmem:[%s7097_s0 + $0x66] ss:$8 sm:$0xf]   ;;  %v2907_v43 = vld [vmem:[%s7097_s0 + $0x47] ss:$8 sm:$0xf0]  }
  0x10   :  { %539 = vrot.lane.b32.xlu0 %v538_v23, %s3519_s14  ;;  %v2902_v44 = vld [vmem:[%s7097_s0 + $0x64] ss:$8 sm:$0xf]   ;;  %v2903_v45 = vld [vmem:[%s7097_s0 + $0x45] ss:$8 sm:$0xf0]   ;;  %v655_v46 = vsel %vm459_vm0, %v2907_v43, %v2906_v42 }
  0x11   :  { %v642_v47 = vsel %vm459_vm0, %v2903_v45, %v2902_v44  ;;  %v2914_v48 = vld [vmem:[%s7097_s0 + $0x82] ss:$8 sm:$0xf]   ;;  %v2915_v49 = vld [vmem:[%s7097_s0 + $0x63] ss:$8 sm:$0xf0]  }
  0x12   :  { %v2910_v50 = vld [vmem:[%s7097_s0 + $0x80] ss:$8 sm:$0xf]   ;;  %v2911_v51 = vld [vmem:[%s7097_s0 + $0x61] ss:$8 sm:$0xf0]   ;;  %v681_v52 = vsel %vm459_vm0, %v2915_v49, %v2914_v48 }
  0x13   :  { %578 = vrot.lane.b32.xlu1 %v577_v28, %s3519_s14  ;;  %v668_v53 = vsel %vm459_vm0, %v2911_v51, %v2910_v50  ;;  %v2922_v54 = vld [vmem:[%s7097_s0 + $0x86] ss:$8 sm:$0xf]   ;;  %v2923_v55 = vld [vmem:[%s7097_s0 + $0x67] ss:$8 sm:$0xf0]  }
  0x14   :  { %565 = vrot.lane.b32.xlu0 %v564_v29, %s3519_s14  ;;  %v2918_v56 = vld [vmem:[%s7097_s0 + $0x84] ss:$8 sm:$0xf]   ;;  %v2919_v57 = vld [vmem:[%s7097_s0 + $0x65] ss:$8 sm:$0xf0]   ;;  %v707_v58 = vsel %vm459_vm0, %v2923_v55, %v2922_v54 }
  0x15   :  { %v694_v59 = vsel %vm459_vm0, %v2919_v57, %v2918_v56  ;;  %v2930_v60 = vld [vmem:[%s7097_s0 + $0xa2] ss:$8 sm:$0xf]   ;;  %v2931_v61 = vld [vmem:[%s7097_s0 + $0x83] ss:$8 sm:$0xf0]  }
  0x16   :  { %v2926_v62 = vld [vmem:[%s7097_s0 + $0xa0] ss:$8 sm:$0xf]   ;;  %v2927_v63 = vld [vmem:[%s7097_s0 + $0x81] ss:$8 sm:$0xf0]   ;;  %v733_v0 = vsel %vm459_vm0, %v2931_v61, %v2930_v60 }
  0x17   :  { %604 = vrot.lane.b32.xlu1 %v603_v34, %s3519_s14  ;;  %v720_v1 = vsel %vm459_vm0, %v2927_v63, %v2926_v62  ;;  %v2938_v2 = vld [vmem:[%s7097_s0 + $0xa6] ss:$8 sm:$0xf]   ;;  %v2939_v3 = vld [vmem:[%s7097_s0 + $0x87] ss:$8 sm:$0xf0]  }
  0x18   :  { %591 = vrot.lane.b32.xlu0 %v590_v35, %s3519_s14  ;;  %v2934_v4 = vld [vmem:[%s7097_s0 + $0xa4] ss:$8 sm:$0xf]   ;;  %v2935_v5 = vld [vmem:[%s7097_s0 + $0x85] ss:$8 sm:$0xf0]   ;;  %v759_v6 = vsel %vm459_vm0, %v2939_v3, %v2938_v2 }
  0x19   :  { %v746_v7 = vsel %vm459_vm0, %v2935_v5, %v2934_v4  ;;  %v2945_v8 = vld [vmem:[%s7097_s0 + $0x2] ss:$8 sm:$0xf]   ;;  %v2946_v9 = vld [vmem:[%s7097_s0 - $0x1d] ss:$8 sm:$0xf0]  }
  0x1a   :  { %v767_v10 = vld [vmem:[%s7097_s0] ss:$8 sm:$0xf]   ;;  %v2942_v11 = vld [vmem:[%s7097_s0 - $0x1f] ss:$8 sm:$0xf0]   ;;  %v784_v12 = vsel %vm459_vm0, %v2946_v9, %v2945_v8 }
  0x1b   :  { %630 = vrot.lane.b32.xlu1 %v629_v40, %s3519_s14  ;;  %v771_v13 = vsel %vm459_vm0, %v2942_v11, %v767_v10  ;;  %v2953_v14 = vld [vmem:[%s7097_s0 + $0x6] ss:$8 sm:$0xf]   ;;  %v2954_v15 = vld [vmem:[%s7097_s0 - $0x19] ss:$8 sm:$0xf0]  }
  0x1c   :  { %617 = vrot.lane.b32.xlu0 %v616_v41, %s3519_s14  ;;  %v2949_v16 = vld [vmem:[%s7097_s0 + $0x4] ss:$8 sm:$0xf]   ;;  %v2950_v17 = vld [vmem:[%s7097_s0 - $0x1b] ss:$8 sm:$0xf0]   ;;  %v810_v18 = vsel %vm459_vm0, %v2954_v15, %v2953_v14 }
  0x1d   :  { %v797_v19 = vsel %vm459_vm0, %v2950_v17, %v2949_v16  ;;  %v2961_v20 = vld [vmem:[%s7097_s0 + $0x22] ss:$8 sm:$0xf]   ;;  %v2962_v21 = vld [vmem:[%s7097_s0 + $0x3] ss:$8 sm:$0xf0]  }
  0x1e   :  { %v2957_v22 = vld [vmem:[%s7097_s0 + $0x20] ss:$8 sm:$0xf]   ;;  %v2958_v23 = vld [vmem:[%s7097_s0 + $0x1] ss:$8 sm:$0xf0]   ;;  %v836_v24 = vsel %vm459_vm0, %v2962_v21, %v2961_v20 }
  0x1f   :  { %656 = vrot.lane.b32.xlu1 %v655_v46, %s3519_s14  ;;  %v823_v25 = vsel %vm459_vm0, %v2958_v23, %v2957_v22  ;;  %v2969_v26 = vld [vmem:[%s7097_s0 + $0x26] ss:$8 sm:$0xf]   ;;  %v2970_v27 = vld [vmem:[%s7097_s0 + $0x7] ss:$8 sm:$0xf0]  }
  0x20   :  { %643 = vrot.lane.b32.xlu0 %v642_v47, %s3519_s14  ;;  %v2965_v28 = vld [vmem:[%s7097_s0 + $0x24] ss:$8 sm:$0xf]   ;;  %v2966_v29 = vld [vmem:[%s7097_s0 + $0x5] ss:$8 sm:$0xf0]   ;;  %v862_v30 = vsel %vm459_vm0, %v2970_v27, %v2969_v26 }
  0x21   :  { %v849_v31 = vsel %vm459_vm0, %v2966_v29, %v2965_v28  ;;  %v2977_v32 = vld [vmem:[%s7097_s0 + $0x42] ss:$8 sm:$0xf]   ;;  %v2978_v33 = vld [vmem:[%s7097_s0 + $0x23] ss:$8 sm:$0xf0]  }
  0x22   :  { %v2973_v34 = vld [vmem:[%s7097_s0 + $0x40] ss:$8 sm:$0xf]   ;;  %v2974_v35 = vld [vmem:[%s7097_s0 + $0x21] ss:$8 sm:$0xf0]   ;;  %v888_v36 = vsel %vm459_vm0, %v2978_v33, %v2977_v32 }
  0x23   :  { %682 = vrot.lane.b32.xlu1 %v681_v52, %s3519_s14  ;;  %v875_v37 = vsel %vm459_vm0, %v2974_v35, %v2973_v34  ;;  %v2985_v38 = vld [vmem:[%s7097_s0 + $0x46] ss:$8 sm:$0xf]   ;;  %v2986_v39 = vld [vmem:[%s7097_s0 + $0x27] ss:$8 sm:$0xf0]  }
  0x24   :  { %669 = vrot.lane.b32.xlu0 %v668_v53, %s3519_s14  ;;  %v2981_v40 = vld [vmem:[%s7097_s0 + $0x44] ss:$8 sm:$0xf]   ;;  %v2982_v41 = vld [vmem:[%s7097_s0 + $0x25] ss:$8 sm:$0xf0]   ;;  %v914_v42 = vsel %vm459_vm0, %v2986_v39, %v2985_v38 }
  0x25   :  { %v901_v43 = vsel %vm459_vm0, %v2982_v41, %v2981_v40  ;;  %v2993_v44 = vld [vmem:[%s7097_s0 + $0x62] ss:$8 sm:$0xf]   ;;  %v2994_v45 = vld [vmem:[%s7097_s0 + $0x43] ss:$8 sm:$0xf0]  }
  0x26   :  { %v2989_v46 = vld [vmem:[%s7097_s0 + $0x60] ss:$8 sm:$0xf]   ;;  %v2990_v47 = vld [vmem:[%s7097_s0 + $0x41] ss:$8 sm:$0xf0]   ;;  %v940_v48 = vsel %vm459_vm0, %v2994_v45, %v2993_v44 }
  0x27   :  { %708 = vrot.lane.b32.xlu1 %v707_v58, %s3519_s14  ;;  %v927_v49 = vsel %vm459_vm0, %v2990_v47, %v2989_v46  ;;  %v3001_v50 = vld [vmem:[%s7097_s0 + $0x66] ss:$8 sm:$0xf]   ;;  %v3002_v51 = vld [vmem:[%s7097_s0 + $0x47] ss:$8 sm:$0xf0]  }
  0x28   :  { %695 = vrot.lane.b32.xlu0 %v694_v59, %s3519_s14  ;;  %v2997_v52 = vld [vmem:[%s7097_s0 + $0x64] ss:$8 sm:$0xf]   ;;  %v2998_v53 = vld [vmem:[%s7097_s0 + $0x45] ss:$8 sm:$0xf0]   ;;  %v966_v54 = vsel %vm459_vm0, %v3002_v51, %v3001_v50 }
  0x29   :  { %v953_v55 = vsel %vm459_vm0, %v2998_v53, %v2997_v52  ;;  %v3009_v56 = vld [vmem:[%s7097_s0 + $0x82] ss:$8 sm:$0xf]   ;;  %v3010_v57 = vld [vmem:[%s7097_s0 + $0x63] ss:$8 sm:$0xf0]  }
  0x2a   :  { %v3005_v58 = vld [vmem:[%s7097_s0 + $0x80] ss:$8 sm:$0xf]   ;;  %v3006_v59 = vld [vmem:[%s7097_s0 + $0x61] ss:$8 sm:$0xf0]   ;;  %v992_v60 = vsel %vm459_vm0, %v3010_v57, %v3009_v56 }
  0x2b   :  { %734 = vrot.lane.b32.xlu1 %v733_v0, %s3519_s14  ;;  %v979_v61 = vsel %vm459_vm0, %v3006_v59, %v3005_v58  ;;  %v3017_v62 = vld [vmem:[%s7097_s0 + $0x86] ss:$8 sm:$0xf]   ;;  %v3018_v63 = vld [vmem:[%s7097_s0 + $0x67] ss:$8 sm:$0xf0]  }
  0x2c   :  { %721 = vrot.lane.b32.xlu0 %v720_v1, %s3519_s14  ;;  %v3013_v0 = vld [vmem:[%s7097_s0 + $0x84] ss:$8 sm:$0xf]   ;;  %v3014_v1 = vld [vmem:[%s7097_s0 + $0x65] ss:$8 sm:$0xf0]   ;;  %v1018_v2 = vsel %vm459_vm0, %v3018_v63, %v3017_v62 }
  0x2d   :  { %v1005_v3 = vsel %vm459_vm0, %v3014_v1, %v3013_v0  ;;  %v3025_v4 = vld [vmem:[%s7097_s0 + $0xa2] ss:$8 sm:$0xf]   ;;  %v3026_v5 = vld [vmem:[%s7097_s0 + $0x83] ss:$8 sm:$0xf0]  }
  0x2e   :  { %v1044_v8 = vsel %vm459_vm0, %v3026_v5, %v3025_v4  ;;  %v3033_v10 = vld [vmem:[%s7097_s0 + $0xa6] ss:$8 sm:$0xf]   ;;  %v3034_v11 = vld [vmem:[%s7097_s0 + $0x87] ss:$8 sm:$0xf0]  }
  0x2f   :  { %760 = vrot.lane.b32.xlu1 %v759_v6, %s3519_s14  ;;  %v3021_v6 = vld [vmem:[%s7097_s0 + $0xa0] ss:$8 sm:$0xf]   ;;  %v1070_v14 = vsel %vm459_vm0, %v3034_v11, %v3033_v10  ;;  %v3040_v16 = vld [vmem:[%s7097_s0 + $0x2] ss:$8 sm:$0xf]  }
  0x30   :  { %747 = vrot.lane.b32.xlu0 %v746_v7, %s3519_s14  ;;  %v3022_v7 = vld [vmem:[%s7097_s0 + $0x81] ss:$8 sm:$0xf0]   ;;  %v3041_v17 = vld [vmem:[%s7097_s0 - $0x1d] ss:$8 sm:$0xf0]  }
  0x31   :  { %v1031_v9 = vsel %vm459_vm0, %v3022_v7, %v3021_v6  ;;  %v1095_v20 = vsel %vm459_vm0, %v3041_v17, %v3040_v16  ;;  %v3048_v22 = vld [vmem:[%s7097_s0 + $0x6] ss:$8 sm:$0xf]   ;;  %v3049_v23 = vld [vmem:[%s7097_s0 - $0x19] ss:$8 sm:$0xf0]  }
  0x32   :  { %s3521_s18 = smov 80   ;;  %v1121_v26 = vsel %vm459_vm0, %v3049_v23, %v3048_v22  ;;  %v3056_v28 = vld [vmem:[%s7097_s0 + $0x22] ss:$8 sm:$0xf]   ;;  %s3522_s9 = smov 64  }
  0x33   :  { %785 = vrot.lane.b32.xlu1 %v784_v12, %s3520_s5  ;;  %v3029_v12 = vld [vmem:[%s7097_s0 + $0xa4] ss:$8 sm:$0xf]   ;;  %v3057_v29 = vld [vmem:[%s7097_s0 + $0x3] ss:$8 sm:$0xf0]  }
  0x34   :  { %772 = vrot.lane.b32.xlu0 %v771_v13, %s3520_s5  ;;  %v3030_v13 = vld [vmem:[%s7097_s0 + $0x85] ss:$8 sm:$0xf0]   ;;  %v1147_v32 = vsel %vm459_vm0, %v3057_v29, %v3056_v28  ;;  %v3064_v34 = vld [vmem:[%s7097_s0 + $0x26] ss:$8 sm:$0xf]  }
  0x35   :  { %v1057_v15 = vsel %vm459_vm0, %v3030_v13, %v3029_v12  ;;  %v3065_v35 = vld [vmem:[%s7097_s0 + $0x7] ss:$8 sm:$0xf0]   ;;  %v3072_v40 = vld [vmem:[%s7097_s0 + $0x42] ss:$8 sm:$0xf]  }
  0x36   :  { %v1173_v38 = vsel %vm459_vm0, %v3065_v35, %v3064_v34  ;;  %v3073_v41 = vld [vmem:[%s7097_s0 + $0x23] ss:$8 sm:$0xf0]   ;;  %v3080_v46 = vld [vmem:[%s7097_s0 + $0x46] ss:$8 sm:$0xf]  }
  0x37   :  { %811 = vrot.lane.b32.xlu1 %v810_v18, %s3520_s5  ;;  %v1078_v18 = vld [vmem:[%s7097_s0] ss:$8 sm:$0xf]   ;;  %v1199_v44 = vsel %vm459_vm0, %v3073_v41, %v3072_v40  ;;  %v3081_v47 = vld [vmem:[%s7097_s0 + $0x27] ss:$8 sm:$0xf0]  }
  0x38   :  { %798 = vrot.lane.b32.xlu0 %v797_v19, %s3520_s5  ;;  %v3037_v19 = vld [vmem:[%s7097_s0 - $0x1f] ss:$8 sm:$0xf0]   ;;  %v1225_v50 = vsel %vm459_vm0, %v3081_v47, %v3080_v46  ;;  %v3088_v53 = vld [vmem:[%s7097_s0 + $0x62] ss:$8 sm:$0xf]  }
  0x39   :  { %v1082_v21 = vsel %vm459_vm0, %v3037_v19, %v1078_v18  ;;  %v3084_v56 = vld [vmem:[%s7097_s0 + $0x60] ss:$8 sm:$0xf]   ;;  %v3085_v57 = vld [vmem:[%s7097_s0 + $0x41] ss:$8 sm:$0xf0]  }
  0x3a   :  { %v3097_v62 = vld [vmem:[%s7097_s0 + $0x47] ss:$8 sm:$0xf0]   ;;  %v3092_v0 = vld [vmem:[%s7097_s0 + $0x64] ss:$8 sm:$0xf]  }
  0x3b   :  { %837 = vrot.lane.b32.xlu1 %v836_v24, %s3520_s5  ;;  %v3044_v24 = vld [vmem:[%s7097_s0 + $0x4] ss:$8 sm:$0xf]   ;;  %v3093_v1 = vld [vmem:[%s7097_s0 + $0x45] ss:$8 sm:$0xf0]  }
  0x3c   :  { %824 = vrot.lane.b32.xlu0 %v823_v25, %s3520_s5  ;;  %v3045_v25 = vld [vmem:[%s7097_s0 - $0x1b] ss:$8 sm:$0xf0]   ;;  %v1264_v4 = vsel %vm459_vm0, %v3093_v1, %v3092_v0  ;;  %v3104_v5 = vld [vmem:[%s7097_s0 + $0x82] ss:$8 sm:$0xf]  }
  0x3d   :  { %v1108_v27 = vsel %vm459_vm0, %v3045_v25, %v3044_v24  ;;  %v3105_v6 = vld [vmem:[%s7097_s0 + $0x63] ss:$8 sm:$0xf0]   ;;  %v3112_v13 = vld [vmem:[%s7097_s0 + $0x86] ss:$8 sm:$0xf]  }
  0x3e   :  { %v1303_v10 = vsel %vm459_vm0, %v3105_v6, %v3104_v5  ;;  %v3108_v16 = vld [vmem:[%s7097_s0 + $0x84] ss:$8 sm:$0xf]   ;;  %v3109_v17 = vld [vmem:[%s7097_s0 + $0x65] ss:$8 sm:$0xf0]  }
  0x3f   :  { %863 = vrot.lane.b32.xlu1 %v862_v30, %s3520_s5  ;;  %v3052_v30 = vld [vmem:[%s7097_s0 + $0x20] ss:$8 sm:$0xf]   ;;  %v3121_v22 = vld [vmem:[%s7097_s0 + $0x83] ss:$8 sm:$0xf0]  }
  0x40   :  { %850 = vrot.lane.b32.xlu0 %v849_v31, %s3520_s5  ;;  %v3053_v31 = vld [vmem:[%s7097_s0 + $0x1] ss:$8 sm:$0xf0]   ;;  %v3116_v24 = vld [vmem:[%s7097_s0 + $0xa0] ss:$8 sm:$0xf]  }
  0x41   :  { %v1134_v33 = vsel %vm459_vm0, %v3053_v31, %v3052_v30  ;;  %v3117_v25 = vld [vmem:[%s7097_s0 + $0x81] ss:$8 sm:$0xf0]   ;;  %v3128_v29 = vld [vmem:[%s7097_s0 + $0xa6] ss:$8 sm:$0xf]  }
  0x42   :  { %v1342_v28 = vsel %vm459_vm0, %v3117_v25, %v3116_v24  ;;  %v3129_v30 = vld [vmem:[%s7097_s0 + $0x87] ss:$8 sm:$0xf0]   ;;  %v1389_v40 = vld [vmem:[%s7097_s0] ss:$8 sm:$0xf]  }
  0x43   :  { %889 = vrot.lane.b32.xlu1 %v888_v36, %s3520_s5  ;;  %v3060_v36 = vld [vmem:[%s7097_s0 + $0x24] ss:$8 sm:$0xf]   ;;  %v1381_v34 = vsel %vm459_vm0, %v3129_v30, %v3128_v29  ;;  %v3132_v41 = vld [vmem:[%s7097_s0 - $0x1f] ss:$8 sm:$0xf0]  }
  0x44   :  { %876 = vrot.lane.b32.xlu0 %v875_v37, %s3520_s5  ;;  %v3061_v37 = vld [vmem:[%s7097_s0 + $0x5] ss:$8 sm:$0xf0]   ;;  %v3144_v46 = vld [vmem:[%s7097_s0 - $0x19] ss:$8 sm:$0xf0]  }
  0x45   :  { %v1160_v39 = vsel %vm459_vm0, %v3061_v37, %v3060_v36  ;;  %v3135_v37 = vld [vmem:[%s7097_s0 + $0x2] ss:$8 sm:$0xf]   ;;  %v3155_v0 = vld [vmem:[%s7097_s0 + $0x24] ss:$8 sm:$0xf]  }
  0x46   :  { %v3156_v1 = vld [vmem:[%s7097_s0 + $0x5] ss:$8 sm:$0xf0]   ;;  %v3167_v5 = vld [vmem:[%s7097_s0 + $0x42] ss:$8 sm:$0xf]  }
  0x47   :  { %915 = vrot.lane.b32.xlu1 %v914_v42, %s3520_s5  ;;  %v3068_v42 = vld [vmem:[%s7097_s0 + $0x40] ss:$8 sm:$0xf]   ;;  %v3168_v6 = vld [vmem:[%s7097_s0 + $0x23] ss:$8 sm:$0xf0]  }
  0x48   :  { %902 = vrot.lane.b32.xlu0 %v901_v43, %s3520_s5  ;;  %v3069_v43 = vld [vmem:[%s7097_s0 + $0x21] ss:$8 sm:$0xf0]   ;;  %v3179_v24 = vld [vmem:[%s7097_s0 + $0x60] ss:$8 sm:$0xf]  }
  0x49   :  { %v1186_v45 = vsel %vm459_vm0, %v3069_v43, %v3068_v42  ;;  %v3180_v25 = vld [vmem:[%s7097_s0 + $0x41] ss:$8 sm:$0xf0]   ;;  %v3191_v29 = vld [vmem:[%s7097_s0 + $0x66] ss:$8 sm:$0xf]  }
  0x4a   :  { %v3192_v30 = vld [vmem:[%s7097_s0 + $0x47] ss:$8 sm:$0xf0]   ;;  %s3523_s3 = smov 48   ;;  %s3524_s27 = smov 32  }
  0x4b   :  { %941 = vrot.lane.b32.xlu1 %v940_v48, %s3520_s5  ;;  %v3076_v48 = vld [vmem:[%s7097_s0 + $0x44] ss:$8 sm:$0xf]   ;;  %s3525_s23 = smov 16  }
  0x4c   :  { %928 = vrot.lane.b32.xlu0 %v927_v49, %s3520_s5  ;;  %v3077_v49 = vld [vmem:[%s7097_s0 + $0x25] ss:$8 sm:$0xf0]  }
  0x4d   :  { %v1212_v52 = vsel %vm459_vm0, %v3077_v49, %v3076_v48  ;;  %v3139_v48 = vld [vmem:[%s7097_s0 + $0x4] ss:$8 sm:$0xf]   ;;  %v3140_v49 = vld [vmem:[%s7097_s0 - $0x1b] ss:$8 sm:$0xf0]  }
  0x4f   :  { %967 = vrot.lane.b32.xlu1 %v966_v54, %s3520_s5  ;;  %v3089_v54 = vld [vmem:[%s7097_s0 + $0x43] ss:$8 sm:$0xf0]  }
  0x50   :  { %954 = vrot.lane.b32.xlu0 %v953_v55, %s3520_s5  ;;  %v1251_v58 = vsel %vm459_vm0, %v3089_v54, %v3088_v53  ;;  %v3151_v53 = vld [vmem:[%s7097_s0 + $0x22] ss:$8 sm:$0xf]   ;;  %v3152_v54 = vld [vmem:[%s7097_s0 + $0x3] ss:$8 sm:$0xf0]  }
  0x53   :  { %993 = vrot.lane.b32.xlu1 %v992_v60, %s3520_s5  ;;  %v1238_v60 = vsel %vm459_vm0, %v3085_v57, %v3084_v56  ;;  %v3147_v56 = vld [vmem:[%s7097_s0 + $0x20] ss:$8 sm:$0xf]   ;;  %v3148_v57 = vld [vmem:[%s7097_s0 + $0x1] ss:$8 sm:$0xf0]  }
  0x54   :  { %980 = vrot.lane.b32.xlu0 %v979_v61, %s3520_s5  ;;  %v3096_v61 = vld [vmem:[%s7097_s0 + $0x66] ss:$8 sm:$0xf]  }
  0x57   :  { %1019 = vrot.lane.b32.xlu1 %v1018_v2, %s3520_s5  ;;  %v1277_v2 = vsel %vm459_vm0, %v3097_v62, %v3096_v61  ;;  %v3159_v61 = vld [vmem:[%s7097_s0 + $0x26] ss:$8 sm:$0xf]   ;;  %v3160_v62 = vld [vmem:[%s7097_s0 + $0x7] ss:$8 sm:$0xf0]  }
  0x58   :  { %1006 = vrot.lane.b32.xlu0 %v1005_v3, %s3520_s5 }
  0x5b   :  { %1045 = vrot.lane.b32.xlu1 %v1044_v8, %s3520_s5  ;;  %v3100_v8 = vld [vmem:[%s7097_s0 + $0x80] ss:$8 sm:$0xf]  }
  0x5c   :  { %1032 = vrot.lane.b32.xlu0 %v1031_v9, %s3520_s5  ;;  %v3101_v9 = vld [vmem:[%s7097_s0 + $0x61] ss:$8 sm:$0xf0]  }
  0x5d   :  { %v1290_v12 = vsel %vm459_vm0, %v3101_v9, %v3100_v8  ;;  %v3163_v8 = vld [vmem:[%s7097_s0 + $0x40] ss:$8 sm:$0xf]   ;;  %v3164_v9 = vld [vmem:[%s7097_s0 + $0x21] ss:$8 sm:$0xf0]  }
  0x5f   :  { %1071 = vrot.lane.b32.xlu1 %v1070_v14, %s3520_s5  ;;  %v3113_v14 = vld [vmem:[%s7097_s0 + $0x67] ss:$8 sm:$0xf0]  }
  0x60   :  { %1058 = vrot.lane.b32.xlu0 %v1057_v15, %s3520_s5  ;;  %v1329_v18 = vsel %vm459_vm0, %v3113_v14, %v3112_v13  ;;  %v3175_v13 = vld [vmem:[%s7097_s0 + $0x46] ss:$8 sm:$0xf]   ;;  %v3176_v14 = vld [vmem:[%s7097_s0 + $0x27] ss:$8 sm:$0xf0]  }
  0x63   :  { %1096 = vrot.lane.b32.xlu1 %v1095_v20, %s3521_s18  ;;  %v1316_v20 = vsel %vm459_vm0, %v3109_v17, %v3108_v16  ;;  %v3171_v16 = vld [vmem:[%s7097_s0 + $0x44] ss:$8 sm:$0xf]   ;;  %v3172_v17 = vld [vmem:[%s7097_s0 + $0x25] ss:$8 sm:$0xf0]  }
  0x64   :  { %1083 = vrot.lane.b32.xlu0 %v1082_v21, %s3521_s18  ;;  %v3120_v21 = vld [vmem:[%s7097_s0 + $0xa2] ss:$8 sm:$0xf]  }
  0x67   :  { %1122 = vrot.lane.b32.xlu1 %v1121_v26, %s3521_s18  ;;  %v1355_v26 = vsel %vm459_vm0, %v3121_v22, %v3120_v21  ;;  %v3183_v21 = vld [vmem:[%s7097_s0 + $0x62] ss:$8 sm:$0xf]   ;;  %v3184_v22 = vld [vmem:[%s7097_s0 + $0x43] ss:$8 sm:$0xf0]  }
  0x68   :  { %1109 = vrot.lane.b32.xlu0 %v1108_v27, %s3521_s18 }
  0x6b   :  { %1148 = vrot.lane.b32.xlu1 %v1147_v32, %s3521_s18  ;;  %v3124_v32 = vld [vmem:[%s7097_s0 + $0xa4] ss:$8 sm:$0xf]  }
  0x6c   :  { %1135 = vrot.lane.b32.xlu0 %v1134_v33, %s3521_s18  ;;  %v3125_v33 = vld [vmem:[%s7097_s0 + $0x85] ss:$8 sm:$0xf0]  }
  0x6d   :  { %v1368_v36 = vsel %vm459_vm0, %v3125_v33, %v3124_v32  ;;  %v3187_v32 = vld [vmem:[%s7097_s0 + $0x64] ss:$8 sm:$0xf]   ;;  %v3188_v33 = vld [vmem:[%s7097_s0 + $0x45] ss:$8 sm:$0xf0]  }
  0x6f   :  { %1174 = vrot.lane.b32.xlu1 %v1173_v38, %s3521_s18  ;;  %v3136_v38 = vld [vmem:[%s7097_s0 - $0x1d] ss:$8 sm:$0xf0]  }
  0x70   :  { %1161 = vrot.lane.b32.xlu0 %v1160_v39, %s3521_s18  ;;  %v1406_v42 = vsel %vm459_vm0, %v3136_v38, %v3135_v37  ;;  %v3199_v37 = vld [vmem:[%s7097_s0 + $0x82] ss:$8 sm:$0xf]   ;;  %v3200_v38 = vld [vmem:[%s7097_s0 + $0x63] ss:$8 sm:$0xf0]  }
  0x73   :  { %1200 = vrot.lane.b32.xlu1 %v1199_v44, %s3521_s18  ;;  %v1393_v44 = vsel %vm459_vm0, %v3132_v41, %v1389_v40  ;;  %v3195_v40 = vld [vmem:[%s7097_s0 + $0x80] ss:$8 sm:$0xf]   ;;  %v3196_v41 = vld [vmem:[%s7097_s0 + $0x61] ss:$8 sm:$0xf0]  }
  0x74   :  { %1187 = vrot.lane.b32.xlu0 %v1186_v45, %s3521_s18  ;;  %v3143_v45 = vld [vmem:[%s7097_s0 + $0x6] ss:$8 sm:$0xf]  }
  0x75   :  { %v488_v51 = vpop.permute.xlu1 %487  }
  0x76   :  { %2856 = vst.msk [vmem:[%s7098_s1 + $0x101] ss:$8 sm:$0xf] %vm3_vm1, %v488_v51   ;;  %2857 = vst.msk [vmem:[%s7098_s1 + $0x121] ss:$8 sm:$0xf0] %vm3_vm1, %v488_v51   ;;  %v462_v55 = vpop.permute.xlu0 %461  }
  0x77   :  { %2848 = vst.msk [vmem:[%s7098_s1 + $0x1] ss:$8 sm:$0xf] %vm3_vm1, %v462_v55   ;;  %2849 = vst.msk [vmem:[%s7098_s1 + $0x21] ss:$8 sm:$0xf0] %vm3_vm1, %v462_v55   ;;  %1226 = vrot.lane.b32.xlu1 %v1225_v50, %s3521_s18  ;;  %v1432_v50 = vsel %vm459_vm0, %v3144_v46, %v3143_v45 }
  0x78   :  { %1213 = vrot.lane.b32.xlu0 %v1212_v52, %s3521_s18  ;;  %v1419_v52 = vsel %vm459_vm0, %v3140_v49, %v3139_v48  ;;  %v3207_v45 = vld [vmem:[%s7097_s0 + $0x86] ss:$8 sm:$0xf]   ;;  %v3208_v46 = vld [vmem:[%s7097_s0 + $0x67] ss:$8 sm:$0xf0]  }
  0x79   :  { %v501_v59 = vpop.permute.xlu1 %500   ;;  %v3203_v48 = vld [vmem:[%s7097_s0 + $0x84] ss:$8 sm:$0xf]   ;;  %v3204_v49 = vld [vmem:[%s7097_s0 + $0x65] ss:$8 sm:$0xf0]  }
  0x7a   :  { %2860 = vst.msk [vmem:[%s7098_s1 + $0x181] ss:$8 sm:$0xf] %vm3_vm1, %v501_v59   ;;  %2861 = vst.msk [vmem:[%s7098_s1 + $0x1a1] ss:$8 sm:$0xf0] %vm3_vm1, %v501_v59   ;;  %v475_v63 = vpop.permute.xlu0 %474  }
  0x7b   :  { %2852 = vst.msk [vmem:[%s7098_s1 + $0x81] ss:$8 sm:$0xf] %vm3_vm1, %v475_v63   ;;  %2853 = vst.msk [vmem:[%s7098_s1 + $0xa1] ss:$8 sm:$0xf0] %vm3_vm1, %v475_v63   ;;  %1252 = vrot.lane.b32.xlu1 %v1251_v58, %s3521_s18  ;;  %v1458_v58 = vsel %vm459_vm0, %v3152_v54, %v3151_v53 }
  0x7c   :  { %1239 = vrot.lane.b32.xlu0 %v1238_v60, %s3521_s18  ;;  %v1445_v60 = vsel %vm459_vm0, %v3148_v57, %v3147_v56  ;;  %v3215_v53 = vld [vmem:[%s7097_s0 + $0xa2] ss:$8 sm:$0xf]   ;;  %v3216_v54 = vld [vmem:[%s7097_s0 + $0x83] ss:$8 sm:$0xf0]  }
  0x7d   :  { %v527_v3 = vpop.permute.xlu1 %526   ;;  %v3211_v56 = vld [vmem:[%s7097_s0 + $0xa0] ss:$8 sm:$0xf]   ;;  %v3212_v57 = vld [vmem:[%s7097_s0 + $0x81] ss:$8 sm:$0xf0]  }
  0x7e   :  { %2868 = vst.msk [vmem:[%s7098_s1 + $0xa1] ss:$8 sm:$0xf] %vm3_vm1, %v527_v3   ;;  %2869 = vst.msk [vmem:[%s7098_s1 + $0xc1] ss:$8 sm:$0xf0] %vm3_vm1, %v527_v3   ;;  %v514_v7 = vpop.permute.xlu0 %513  }
  0x7f   :  { %2864 = vst.msk [vmem:[%s7098_s1 + $0x21] ss:$8 sm:$0xf] %vm3_vm1, %v514_v7   ;;  %2865 = vst.msk [vmem:[%s7098_s1 + $0x41] ss:$8 sm:$0xf0] %vm3_vm1, %v514_v7   ;;  %1278 = vrot.lane.b32.xlu1 %v1277_v2, %s3521_s18  ;;  %v1484_v2 = vsel %vm459_vm0, %v3160_v62, %v3159_v61 }
  0x80   :  { %1265 = vrot.lane.b32.xlu0 %v1264_v4, %s3521_s18  ;;  %v1471_v4 = vsel %vm459_vm0, %v3156_v1, %v3155_v0  ;;  %v3223_v61 = vld [vmem:[%s7097_s0 + $0xa6] ss:$8 sm:$0xf]   ;;  %v3224_v62 = vld [vmem:[%s7097_s0 + $0x87] ss:$8 sm:$0xf0]  }
  0x81   :  { %v553_v11 = vpop.permute.xlu1 %552   ;;  %v3219_v0 = vld [vmem:[%s7097_s0 + $0xa4] ss:$8 sm:$0xf]   ;;  %v3220_v1 = vld [vmem:[%s7097_s0 + $0x85] ss:$8 sm:$0xf0]  }
  0x82   :  { %2876 = vst.msk [vmem:[%s7098_s1 + $0x1a1] ss:$8 sm:$0xf] %vm3_vm1, %v553_v11   ;;  %2877 = vst.msk [vmem:[%s7098_s1 + $0x1c1] ss:$8 sm:$0xf0] %vm3_vm1, %v553_v11   ;;  %v540_v15 = vpop.permute.xlu0 %539  }
  0x83   :  { %2872 = vst.msk [vmem:[%s7098_s1 + $0x121] ss:$8 sm:$0xf] %vm3_vm1, %v540_v15   ;;  %2873 = vst.msk [vmem:[%s7098_s1 + $0x141] ss:$8 sm:$0xf0] %vm3_vm1, %v540_v15   ;;  %1304 = vrot.lane.b32.xlu1 %v1303_v10, %s3521_s18  ;;  %v1510_v10 = vsel %vm459_vm0, %v3168_v6, %v3167_v5 }
  0x84   :  { %1291 = vrot.lane.b32.xlu0 %v1290_v12, %s3521_s18  ;;  %v1497_v12 = vsel %vm459_vm0, %v3164_v9, %v3163_v8  ;;  %v3230_v5 = vld [vmem:[%s7097_s0 + $0x2] ss:$8 sm:$0xf]   ;;  %v3231_v6 = vld [vmem:[%s7097_s0 - $0x1d] ss:$8 sm:$0xf0]  }
  0x85   :  { %v579_v19 = vpop.permute.xlu1 %578   ;;  %v1700_v8 = vld [vmem:[%s7097_s0] ss:$8 sm:$0xf]   ;;  %v3227_v9 = vld [vmem:[%s7097_s0 - $0x1f] ss:$8 sm:$0xf0]  }
  0x86   :  { %2884 = vst.msk [vmem:[%s7098_s1 + $0x281] ss:$8 sm:$0xf] %vm3_vm1, %v579_v19   ;;  %2885 = vst.msk [vmem:[%s7098_s1 + $0x2a1] ss:$8 sm:$0xf0] %vm3_vm1, %v579_v19   ;;  %v566_v23 = vpop.permute.xlu0 %565  }
  0x87   :  { %2880 = vst.msk [vmem:[%s7098_s1 + $0x201] ss:$8 sm:$0xf] %vm3_vm1, %v566_v23   ;;  %2881 = vst.msk [vmem:[%s7098_s1 + $0x221] ss:$8 sm:$0xf0] %vm3_vm1, %v566_v23   ;;  %1330 = vrot.lane.b32.xlu1 %v1329_v18, %s3521_s18  ;;  %v1536_v18 = vsel %vm459_vm0, %v3176_v14, %v3175_v13 }
  0x88   :  { %1317 = vrot.lane.b32.xlu0 %v1316_v20, %s3521_s18  ;;  %v1523_v20 = vsel %vm459_vm0, %v3172_v17, %v3171_v16  ;;  %v3238_v13 = vld [vmem:[%s7097_s0 + $0x6] ss:$8 sm:$0xf]   ;;  %v3239_v14 = vld [vmem:[%s7097_s0 - $0x19] ss:$8 sm:$0xf0]  }
  0x89   :  { %v605_v27 = vpop.permute.xlu1 %604   ;;  %v3234_v16 = vld [vmem:[%s7097_s0 + $0x4] ss:$8 sm:$0xf]   ;;  %v3235_v17 = vld [vmem:[%s7097_s0 - $0x1b] ss:$8 sm:$0xf0]  }
  0x8a   :  { %2892 = vst.msk [vmem:[%s7098_s1 + $0x381] ss:$8 sm:$0xf] %vm3_vm1, %v605_v27   ;;  %2893 = vst.msk [vmem:[%s7098_s1 + $0x3a1] ss:$8 sm:$0xf0] %vm3_vm1, %v605_v27   ;;  %v592_v31 = vpop.permute.xlu0 %591  }
  0x8b   :  { %2888 = vst.msk [vmem:[%s7098_s1 + $0x301] ss:$8 sm:$0xf] %vm3_vm1, %v592_v31   ;;  %2889 = vst.msk [vmem:[%s7098_s1 + $0x321] ss:$8 sm:$0xf0] %vm3_vm1, %v592_v31   ;;  %1356 = vrot.lane.b32.xlu1 %v1355_v26, %s3521_s18  ;;  %v1562_v26 = vsel %vm459_vm0, %v3184_v22, %v3183_v21 }
  0x8c   :  { %1343 = vrot.lane.b32.xlu0 %v1342_v28, %s3521_s18  ;;  %v1549_v28 = vsel %vm459_vm0, %v3180_v25, %v3179_v24  ;;  %v3246_v21 = vld [vmem:[%s7097_s0 + $0x22] ss:$8 sm:$0xf]   ;;  %v3247_v22 = vld [vmem:[%s7097_s0 + $0x3] ss:$8 sm:$0xf0]  }
  0x8d   :  { %v631_v35 = vpop.permute.xlu1 %630   ;;  %v3242_v24 = vld [vmem:[%s7097_s0 + $0x20] ss:$8 sm:$0xf]   ;;  %v3243_v25 = vld [vmem:[%s7097_s0 + $0x1] ss:$8 sm:$0xf0]  }
  0x8e   :  { %2900 = vst.msk [vmem:[%s7098_s1 + $0x2a1] ss:$8 sm:$0xf] %vm3_vm1, %v631_v35   ;;  %2901 = vst.msk [vmem:[%s7098_s1 + $0x2c1] ss:$8 sm:$0xf0] %vm3_vm1, %v631_v35   ;;  %v618_v39 = vpop.permute.xlu0 %617  }
  0x8f   :  { %2896 = vst.msk [vmem:[%s7098_s1 + $0x221] ss:$8 sm:$0xf] %vm3_vm1, %v618_v39   ;;  %2897 = vst.msk [vmem:[%s7098_s1 + $0x241] ss:$8 sm:$0xf0] %vm3_vm1, %v618_v39   ;;  %1382 = vrot.lane.b32.xlu1 %v1381_v34, %s3521_s18  ;;  %v1588_v34 = vsel %vm459_vm0, %v3192_v30, %v3191_v29 }
  0x90   :  { %1369 = vrot.lane.b32.xlu0 %v1368_v36, %s3521_s18  ;;  %v1575_v36 = vsel %vm459_vm0, %v3188_v33, %v3187_v32  ;;  %v3254_v29 = vld [vmem:[%s7097_s0 + $0x26] ss:$8 sm:$0xf]   ;;  %v3255_v30 = vld [vmem:[%s7097_s0 + $0x7] ss:$8 sm:$0xf0]  }
  0x91   :  { %v657_v43 = vpop.permute.xlu1 %656   ;;  %v3250_v32 = vld [vmem:[%s7097_s0 + $0x24] ss:$8 sm:$0xf]   ;;  %v3251_v33 = vld [vmem:[%s7097_s0 + $0x5] ss:$8 sm:$0xf0]  }
  0x92   :  { %2908 = vst.msk [vmem:[%s7098_s1 + $0x3a1] ss:$8 sm:$0xf] %vm3_vm1, %v657_v43   ;;  %2909 = vst.msk [vmem:[%s7098_s1 + $0x3c1] ss:$8 sm:$0xf0] %vm3_vm1, %v657_v43   ;;  %v644_v47 = vpop.permute.xlu0 %643  }
  0x93   :  { %2904 = vst.msk [vmem:[%s7098_s1 + $0x321] ss:$8 sm:$0xf] %vm3_vm1, %v644_v47   ;;  %2905 = vst.msk [vmem:[%s7098_s1 + $0x341] ss:$8 sm:$0xf0] %vm3_vm1, %v644_v47   ;;  %1407 = vrot.lane.b32.xlu1 %v1406_v42, %s3522_s9  ;;  %v1614_v42 = vsel %vm459_vm0, %v3200_v38, %v3199_v37 }
  0x94   :  { %1394 = vrot.lane.b32.xlu0 %v1393_v44, %s3522_s9  ;;  %v1601_v44 = vsel %vm459_vm0, %v3196_v41, %v3195_v40  ;;  %v3262_v37 = vld [vmem:[%s7097_s0 + $0x42] ss:$8 sm:$0xf]   ;;  %v3263_v38 = vld [vmem:[%s7097_s0 + $0x23] ss:$8 sm:$0xf0]  }
  0x95   :  { %v683_v51 = vpop.permute.xlu1 %682   ;;  %v3258_v40 = vld [vmem:[%s7097_s0 + $0x40] ss:$8 sm:$0xf]   ;;  %v3259_v41 = vld [vmem:[%s7097_s0 + $0x21] ss:$8 sm:$0xf0]  }
  0x96   :  { %2916 = vst.msk [vmem:[%s7098_s1 + $0x481] ss:$8 sm:$0xf] %vm3_vm1, %v683_v51   ;;  %2917 = vst.msk [vmem:[%s7098_s1 + $0x4a1] ss:$8 sm:$0xf0] %vm3_vm1, %v683_v51   ;;  %v670_v55 = vpop.permute.xlu0 %669  }
  0x97   :  { %2912 = vst.msk [vmem:[%s7098_s1 + $0x401] ss:$8 sm:$0xf] %vm3_vm1, %v670_v55   ;;  %2913 = vst.msk [vmem:[%s7098_s1 + $0x421] ss:$8 sm:$0xf0] %vm3_vm1, %v670_v55   ;;  %1433 = vrot.lane.b32.xlu1 %v1432_v50, %s3522_s9  ;;  %v1640_v50 = vsel %vm459_vm0, %v3208_v46, %v3207_v45 }
  0x98   :  { %1420 = vrot.lane.b32.xlu0 %v1419_v52, %s3522_s9  ;;  %v1627_v52 = vsel %vm459_vm0, %v3204_v49, %v3203_v48  ;;  %v3270_v45 = vld [vmem:[%s7097_s0 + $0x46] ss:$8 sm:$0xf]   ;;  %v3271_v46 = vld [vmem:[%s7097_s0 + $0x27] ss:$8 sm:$0xf0]  }
  0x99   :  { %v709_v59 = vpop.permute.xlu1 %708   ;;  %v3266_v48 = vld [vmem:[%s7097_s0 + $0x44] ss:$8 sm:$0xf]   ;;  %v3267_v49 = vld [vmem:[%s7097_s0 + $0x25] ss:$8 sm:$0xf0]  }
  0x9a   :  { %2924 = vst.msk [vmem:[%s7098_s1 + $0x581] ss:$8 sm:$0xf] %vm3_vm1, %v709_v59   ;;  %2925 = vst.msk [vmem:[%s7098_s1 + $0x5a1] ss:$8 sm:$0xf0] %vm3_vm1, %v709_v59   ;;  %v696_v63 = vpop.permute.xlu0 %695  }
  0x9b   :  { %2920 = vst.msk [vmem:[%s7098_s1 + $0x501] ss:$8 sm:$0xf] %vm3_vm1, %v696_v63   ;;  %2921 = vst.msk [vmem:[%s7098_s1 + $0x521] ss:$8 sm:$0xf0] %vm3_vm1, %v696_v63   ;;  %1459 = vrot.lane.b32.xlu1 %v1458_v58, %s3522_s9  ;;  %v1666_v58 = vsel %vm459_vm0, %v3216_v54, %v3215_v53 }
  0x9c   :  { %1446 = vrot.lane.b32.xlu0 %v1445_v60, %s3522_s9  ;;  %v1653_v60 = vsel %vm459_vm0, %v3212_v57, %v3211_v56  ;;  %v3278_v53 = vld [vmem:[%s7097_s0 + $0x62] ss:$8 sm:$0xf]   ;;  %v3279_v54 = vld [vmem:[%s7097_s0 + $0x43] ss:$8 sm:$0xf0]  }
  0x9d   :  { %v735_v3 = vpop.permute.xlu1 %734   ;;  %v3274_v56 = vld [vmem:[%s7097_s0 + $0x60] ss:$8 sm:$0xf]   ;;  %v3275_v57 = vld [vmem:[%s7097_s0 + $0x41] ss:$8 sm:$0xf0]  }
  0x9e   :  { %2932 = vst.msk [vmem:[%s7098_s1 + $0x4a1] ss:$8 sm:$0xf] %vm3_vm1, %v735_v3   ;;  %2933 = vst.msk [vmem:[%s7098_s1 + $0x4c1] ss:$8 sm:$0xf0] %vm3_vm1, %v735_v3   ;;  %v722_v7 = vpop.permute.xlu0 %721  }
  0x9f   :  { %2928 = vst.msk [vmem:[%s7098_s1 + $0x421] ss:$8 sm:$0xf] %vm3_vm1, %v722_v7   ;;  %2929 = vst.msk [vmem:[%s7098_s1 + $0x441] ss:$8 sm:$0xf0] %vm3_vm1, %v722_v7   ;;  %1485 = vrot.lane.b32.xlu1 %v1484_v2, %s3522_s9  ;;  %v1692_v2 = vsel %vm459_vm0, %v3224_v62, %v3223_v61 }
  0xa0   :  { %1472 = vrot.lane.b32.xlu0 %v1471_v4, %s3522_s9  ;;  %v1679_v4 = vsel %vm459_vm0, %v3220_v1, %v3219_v0  ;;  %v3286_v61 = vld [vmem:[%s7097_s0 + $0x66] ss:$8 sm:$0xf]   ;;  %v3287_v62 = vld [vmem:[%s7097_s0 + $0x47] ss:$8 sm:$0xf0]  }
  0xa1   :  { %v761_v11 = vpop.permute.xlu1 %760   ;;  %v3282_v0 = vld [vmem:[%s7097_s0 + $0x64] ss:$8 sm:$0xf]   ;;  %v3283_v1 = vld [vmem:[%s7097_s0 + $0x45] ss:$8 sm:$0xf0]  }
  0xa2   :  { %2940 = vst.msk [vmem:[%s7098_s1 + $0x5a1] ss:$8 sm:$0xf] %vm3_vm1, %v761_v11   ;;  %2941 = vst.msk [vmem:[%s7098_s1 + $0x5c1] ss:$8 sm:$0xf0] %vm3_vm1, %v761_v11   ;;  %v748_v15 = vpop.permute.xlu0 %747  }
  0xa3   :  { %2936 = vst.msk [vmem:[%s7098_s1 + $0x521] ss:$8 sm:$0xf] %vm3_vm1, %v748_v15   ;;  %2937 = vst.msk [vmem:[%s7098_s1 + $0x541] ss:$8 sm:$0xf0] %vm3_vm1, %v748_v15   ;;  %1511 = vrot.lane.b32.xlu1 %v1510_v10, %s3522_s9  ;;  %v1717_v10 = vsel %vm459_vm0, %v3231_v6, %v3230_v5 }
  0xa4   :  { %1498 = vrot.lane.b32.xlu0 %v1497_v12, %s3522_s9  ;;  %v1704_v12 = vsel %vm459_vm0, %v3227_v9, %v1700_v8  ;;  %v3294_v5 = vld [vmem:[%s7097_s0 + $0x82] ss:$8 sm:$0xf]   ;;  %v3295_v6 = vld [vmem:[%s7097_s0 + $0x63] ss:$8 sm:$0xf0]  }
  0xa5   :  { %v786_v19 = vpop.permute.xlu1 %785   ;;  %v3290_v8 = vld [vmem:[%s7097_s0 + $0x80] ss:$8 sm:$0xf]   ;;  %v3291_v9 = vld [vmem:[%s7097_s0 + $0x61] ss:$8 sm:$0xf0]  }
  0xa6   :  { %2947 = vst.msk [vmem:[%s7098_s1 + $0x82] ss:$8 sm:$0xf] %vm3_vm1, %v786_v19   ;;  %2948 = vst.msk [vmem:[%s7098_s1 + $0xa2] ss:$8 sm:$0xf0] %vm3_vm1, %v786_v19   ;;  %v773_v23 = vpop.permute.xlu0 %772  }
  0xa7   :  { %2943 = vst.msk [vmem:[%s7098_s1 + $0x2] ss:$8 sm:$0xf] %vm3_vm1, %v773_v23   ;;  %2944 = vst.msk [vmem:[%s7098_s1 + $0x22] ss:$8 sm:$0xf0] %vm3_vm1, %v773_v23   ;;  %1537 = vrot.lane.b32.xlu1 %v1536_v18, %s3522_s9  ;;  %v1743_v18 = vsel %vm459_vm0, %v3239_v14, %v3238_v13 }
  0xa8   :  { %1524 = vrot.lane.b32.xlu0 %v1523_v20, %s3522_s9  ;;  %v1730_v20 = vsel %vm459_vm0, %v3235_v17, %v3234_v16  ;;  %v3302_v13 = vld [vmem:[%s7097_s0 + $0x86] ss:$8 sm:$0xf]   ;;  %v3303_v14 = vld [vmem:[%s7097_s0 + $0x67] ss:$8 sm:$0xf0]  }
  0xa9   :  { %v812_v27 = vpop.permute.xlu1 %811   ;;  %v3298_v16 = vld [vmem:[%s7097_s0 + $0x84] ss:$8 sm:$0xf]   ;;  %v3299_v17 = vld [vmem:[%s7097_s0 + $0x65] ss:$8 sm:$0xf0]  }
  0xaa   :  { %2955 = vst.msk [vmem:[%s7098_s1 + $0x182] ss:$8 sm:$0xf] %vm3_vm1, %v812_v27   ;;  %2956 = vst.msk [vmem:[%s7098_s1 + $0x1a2] ss:$8 sm:$0xf0] %vm3_vm1, %v812_v27   ;;  %v799_v31 = vpop.permute.xlu0 %798  }
  0xab   :  { %2951 = vst.msk [vmem:[%s7098_s1 + $0x102] ss:$8 sm:$0xf] %vm3_vm1, %v799_v31   ;;  %2952 = vst.msk [vmem:[%s7098_s1 + $0x122] ss:$8 sm:$0xf0] %vm3_vm1, %v799_v31   ;;  %1563 = vrot.lane.b32.xlu1 %v1562_v26, %s3522_s9  ;;  %v1769_v26 = vsel %vm459_vm0, %v3247_v22, %v3246_v21 }
  0xac   :  { %1550 = vrot.lane.b32.xlu0 %v1549_v28, %s3522_s9  ;;  %v1756_v28 = vsel %vm459_vm0, %v3243_v25, %v3242_v24  ;;  %v3310_v21 = vld [vmem:[%s7097_s0 + $0xa2] ss:$8 sm:$0xf]   ;;  %v3311_v22 = vld [vmem:[%s7097_s0 + $0x83] ss:$8 sm:$0xf0]  }
  0xad   :  { %v838_v35 = vpop.permute.xlu1 %837   ;;  %v3306_v24 = vld [vmem:[%s7097_s0 + $0xa0] ss:$8 sm:$0xf]   ;;  %v3307_v25 = vld [vmem:[%s7097_s0 + $0x81] ss:$8 sm:$0xf0]  }
  0xae   :  { %2963 = vst.msk [vmem:[%s7098_s1 + $0xa2] ss:$8 sm:$0xf] %vm3_vm1, %v838_v35   ;;  %2964 = vst.msk [vmem:[%s7098_s1 + $0xc2] ss:$8 sm:$0xf0] %vm3_vm1, %v838_v35   ;;  %v825_v39 = vpop.permute.xlu0 %824  }
  0xaf   :  { %2959 = vst.msk [vmem:[%s7098_s1 + $0x22] ss:$8 sm:$0xf] %vm3_vm1, %v825_v39   ;;  %2960 = vst.msk [vmem:[%s7098_s1 + $0x42] ss:$8 sm:$0xf0] %vm3_vm1, %v825_v39   ;;  %1589 = vrot.lane.b32.xlu1 %v1588_v34, %s3522_s9  ;;  %v1795_v34 = vsel %vm459_vm0, %v3255_v30, %v3254_v29 }
  0xb0   :  { %1576 = vrot.lane.b32.xlu0 %v1575_v36, %s3522_s9  ;;  %v1782_v36 = vsel %vm459_vm0, %v3251_v33, %v3250_v32  ;;  %v3318_v29 = vld [vmem:[%s7097_s0 + $0xa6] ss:$8 sm:$0xf]   ;;  %v3319_v30 = vld [vmem:[%s7097_s0 + $0x87] ss:$8 sm:$0xf0]  }
  0xb1   :  { %v864_v43 = vpop.permute.xlu1 %863   ;;  %v3314_v32 = vld [vmem:[%s7097_s0 + $0xa4] ss:$8 sm:$0xf]   ;;  %v3315_v33 = vld [vmem:[%s7097_s0 + $0x85] ss:$8 sm:$0xf0]  }
  0xb2   :  { %2971 = vst.msk [vmem:[%s7098_s1 + $0x1a2] ss:$8 sm:$0xf] %vm3_vm1, %v864_v43   ;;  %2972 = vst.msk [vmem:[%s7098_s1 + $0x1c2] ss:$8 sm:$0xf0] %vm3_vm1, %v864_v43   ;;  %v851_v47 = vpop.permute.xlu0 %850  }
  0xb3   :  { %2967 = vst.msk [vmem:[%s7098_s1 + $0x122] ss:$8 sm:$0xf] %vm3_vm1, %v851_v47   ;;  %2968 = vst.msk [vmem:[%s7098_s1 + $0x142] ss:$8 sm:$0xf0] %vm3_vm1, %v851_v47   ;;  %1615 = vrot.lane.b32.xlu1 %v1614_v42, %s3522_s9  ;;  %v1821_v42 = vsel %vm459_vm0, %v3263_v38, %v3262_v37 }
  0xb4   :  { %1602 = vrot.lane.b32.xlu0 %v1601_v44, %s3522_s9  ;;  %v1808_v44 = vsel %vm459_vm0, %v3259_v41, %v3258_v40  ;;  %v3325_v37 = vld [vmem:[%s7097_s0 + $0x2] ss:$8 sm:$0xf]   ;;  %v3326_v38 = vld [vmem:[%s7097_s0 - $0x1d] ss:$8 sm:$0xf0]  }
  0xb5   :  { %v890_v51 = vpop.permute.xlu1 %889   ;;  %v2011_v40 = vld [vmem:[%s7097_s0] ss:$8 sm:$0xf]   ;;  %v3322_v41 = vld [vmem:[%s7097_s0 - $0x1f] ss:$8 sm:$0xf0]  }
  0xb6   :  { %2979 = vst.msk [vmem:[%s7098_s1 + $0x282] ss:$8 sm:$0xf] %vm3_vm1, %v890_v51   ;;  %2980 = vst.msk [vmem:[%s7098_s1 + $0x2a2] ss:$8 sm:$0xf0] %vm3_vm1, %v890_v51   ;;  %v877_v55 = vpop.permute.xlu0 %876  }
  0xb7   :  { %2975 = vst.msk [vmem:[%s7098_s1 + $0x202] ss:$8 sm:$0xf] %vm3_vm1, %v877_v55   ;;  %2976 = vst.msk [vmem:[%s7098_s1 + $0x222] ss:$8 sm:$0xf0] %vm3_vm1, %v877_v55   ;;  %1641 = vrot.lane.b32.xlu1 %v1640_v50, %s3522_s9  ;;  %v1847_v50 = vsel %vm459_vm0, %v3271_v46, %v3270_v45 }
  0xb8   :  { %1628 = vrot.lane.b32.xlu0 %v1627_v52, %s3522_s9  ;;  %v1834_v52 = vsel %vm459_vm0, %v3267_v49, %v3266_v48  ;;  %v3333_v45 = vld [vmem:[%s7097_s0 + $0x6] ss:$8 sm:$0xf]   ;;  %v3334_v46 = vld [vmem:[%s7097_s0 - $0x19] ss:$8 sm:$0xf0]  }
  0xb9   :  { %v916_v59 = vpop.permute.xlu1 %915   ;;  %v3329_v48 = vld [vmem:[%s7097_s0 + $0x4] ss:$8 sm:$0xf]   ;;  %v3330_v49 = vld [vmem:[%s7097_s0 - $0x1b] ss:$8 sm:$0xf0]  }
  0xba   :  { %2987 = vst.msk [vmem:[%s7098_s1 + $0x382] ss:$8 sm:$0xf] %vm3_vm1, %v916_v59   ;;  %2988 = vst.msk [vmem:[%s7098_s1 + $0x3a2] ss:$8 sm:$0xf0] %vm3_vm1, %v916_v59   ;;  %v903_v63 = vpop.permute.xlu0 %902  }
  0xbb   :  { %2983 = vst.msk [vmem:[%s7098_s1 + $0x302] ss:$8 sm:$0xf] %vm3_vm1, %v903_v63   ;;  %2984 = vst.msk [vmem:[%s7098_s1 + $0x322] ss:$8 sm:$0xf0] %vm3_vm1, %v903_v63   ;;  %1667 = vrot.lane.b32.xlu1 %v1666_v58, %s3522_s9  ;;  %v1873_v58 = vsel %vm459_vm0, %v3279_v54, %v3278_v53 }
  0xbc   :  { %1654 = vrot.lane.b32.xlu0 %v1653_v60, %s3522_s9  ;;  %v1860_v60 = vsel %vm459_vm0, %v3275_v57, %v3274_v56  ;;  %v3341_v53 = vld [vmem:[%s7097_s0 + $0x22] ss:$8 sm:$0xf]   ;;  %v3342_v54 = vld [vmem:[%s7097_s0 + $0x3] ss:$8 sm:$0xf0]  }
  0xbd   :  { %v942_v3 = vpop.permute.xlu1 %941   ;;  %v3337_v56 = vld [vmem:[%s7097_s0 + $0x20] ss:$8 sm:$0xf]   ;;  %v3338_v57 = vld [vmem:[%s7097_s0 + $0x1] ss:$8 sm:$0xf0]  }
  0xbe   :  { %2995 = vst.msk [vmem:[%s7098_s1 + $0x2a2] ss:$8 sm:$0xf] %vm3_vm1, %v942_v3   ;;  %2996 = vst.msk [vmem:[%s7098_s1 + $0x2c2] ss:$8 sm:$0xf0] %vm3_vm1, %v942_v3   ;;  %v929_v7 = vpop.permute.xlu0 %928  }
  0xbf   :  { %2991 = vst.msk [vmem:[%s7098_s1 + $0x222] ss:$8 sm:$0xf] %vm3_vm1, %v929_v7   ;;  %2992 = vst.msk [vmem:[%s7098_s1 + $0x242] ss:$8 sm:$0xf0] %vm3_vm1, %v929_v7   ;;  %1693 = vrot.lane.b32.xlu1 %v1692_v2, %s3522_s9  ;;  %v1899_v2 = vsel %vm459_vm0, %v3287_v62, %v3286_v61 }
  0xc0   :  { %1680 = vrot.lane.b32.xlu0 %v1679_v4, %s3522_s9  ;;  %v1886_v4 = vsel %vm459_vm0, %v3283_v1, %v3282_v0  ;;  %v3349_v61 = vld [vmem:[%s7097_s0 + $0x26] ss:$8 sm:$0xf]   ;;  %v3350_v62 = vld [vmem:[%s7097_s0 + $0x7] ss:$8 sm:$0xf0]  }
  0xc1   :  { %v968_v11 = vpop.permute.xlu1 %967   ;;  %v3345_v0 = vld [vmem:[%s7097_s0 + $0x24] ss:$8 sm:$0xf]   ;;  %v3346_v1 = vld [vmem:[%s7097_s0 + $0x5] ss:$8 sm:$0xf0]  }
  0xc2   :  { %3003 = vst.msk [vmem:[%s7098_s1 + $0x3a2] ss:$8 sm:$0xf] %vm3_vm1, %v968_v11   ;;  %3004 = vst.msk [vmem:[%s7098_s1 + $0x3c2] ss:$8 sm:$0xf0] %vm3_vm1, %v968_v11   ;;  %v955_v15 = vpop.permute.xlu0 %954  }
  0xc3   :  { %2999 = vst.msk [vmem:[%s7098_s1 + $0x322] ss:$8 sm:$0xf] %vm3_vm1, %v955_v15   ;;  %3000 = vst.msk [vmem:[%s7098_s1 + $0x342] ss:$8 sm:$0xf0] %vm3_vm1, %v955_v15   ;;  %1718 = vrot.lane.b32.xlu1 %v1717_v10, %s3523_s3  ;;  %v1925_v10 = vsel %vm459_vm0, %v3295_v6, %v3294_v5 }
  0xc4   :  { %1705 = vrot.lane.b32.xlu0 %v1704_v12, %s3523_s3  ;;  %v1912_v12 = vsel %vm459_vm0, %v3291_v9, %v3290_v8  ;;  %v3357_v5 = vld [vmem:[%s7097_s0 + $0x42] ss:$8 sm:$0xf]   ;;  %v3358_v6 = vld [vmem:[%s7097_s0 + $0x23] ss:$8 sm:$0xf0]  }
  0xc5   :  { %v994_v19 = vpop.permute.xlu1 %993   ;;  %v3353_v8 = vld [vmem:[%s7097_s0 + $0x40] ss:$8 sm:$0xf]   ;;  %v3354_v9 = vld [vmem:[%s7097_s0 + $0x21] ss:$8 sm:$0xf0]  }
  0xc6   :  { %3011 = vst.msk [vmem:[%s7098_s1 + $0x482] ss:$8 sm:$0xf] %vm3_vm1, %v994_v19   ;;  %3012 = vst.msk [vmem:[%s7098_s1 + $0x4a2] ss:$8 sm:$0xf0] %vm3_vm1, %v994_v19   ;;  %v981_v23 = vpop.permute.xlu0 %980  }
  0xc7   :  { %3007 = vst.msk [vmem:[%s7098_s1 + $0x402] ss:$8 sm:$0xf] %vm3_vm1, %v981_v23   ;;  %3008 = vst.msk [vmem:[%s7098_s1 + $0x422] ss:$8 sm:$0xf0] %vm3_vm1, %v981_v23   ;;  %1744 = vrot.lane.b32.xlu1 %v1743_v18, %s3523_s3  ;;  %v1951_v18 = vsel %vm459_vm0, %v3303_v14, %v3302_v13 }
  0xc8   :  { %1731 = vrot.lane.b32.xlu0 %v1730_v20, %s3523_s3  ;;  %v1938_v20 = vsel %vm459_vm0, %v3299_v17, %v3298_v16  ;;  %v3365_v13 = vld [vmem:[%s7097_s0 + $0x46] ss:$8 sm:$0xf]   ;;  %v3366_v14 = vld [vmem:[%s7097_s0 + $0x27] ss:$8 sm:$0xf0]  }
  0xc9   :  { %v1020_v27 = vpop.permute.xlu1 %1019   ;;  %v3361_v16 = vld [vmem:[%s7097_s0 + $0x44] ss:$8 sm:$0xf]   ;;  %v3362_v17 = vld [vmem:[%s7097_s0 + $0x25] ss:$8 sm:$0xf0]  }
  0xca   :  { %3019 = vst.msk [vmem:[%s7098_s1 + $0x582] ss:$8 sm:$0xf] %vm3_vm1, %v1020_v27   ;;  %3020 = vst.msk [vmem:[%s7098_s1 + $0x5a2] ss:$8 sm:$0xf0] %vm3_vm1, %v1020_v27   ;;  %v1007_v31 = vpop.permute.xlu0 %1006  }
  0xcb   :  { %3015 = vst.msk [vmem:[%s7098_s1 + $0x502] ss:$8 sm:$0xf] %vm3_vm1, %v1007_v31   ;;  %3016 = vst.msk [vmem:[%s7098_s1 + $0x522] ss:$8 sm:$0xf0] %vm3_vm1, %v1007_v31   ;;  %1770 = vrot.lane.b32.xlu1 %v1769_v26, %s3523_s3  ;;  %v1977_v26 = vsel %vm459_vm0, %v3311_v22, %v3310_v21 }
  0xcc   :  { %1757 = vrot.lane.b32.xlu0 %v1756_v28, %s3523_s3  ;;  %v1964_v28 = vsel %vm459_vm0, %v3307_v25, %v3306_v24  ;;  %v3373_v21 = vld [vmem:[%s7097_s0 + $0x62] ss:$8 sm:$0xf]   ;;  %v3374_v22 = vld [vmem:[%s7097_s0 + $0x43] ss:$8 sm:$0xf0]  }
  0xcd   :  { %v1046_v35 = vpop.permute.xlu1 %1045   ;;  %v3369_v24 = vld [vmem:[%s7097_s0 + $0x60] ss:$8 sm:$0xf]   ;;  %v3370_v25 = vld [vmem:[%s7097_s0 + $0x41] ss:$8 sm:$0xf0]  }
  0xce   :  { %3027 = vst.msk [vmem:[%s7098_s1 + $0x4a2] ss:$8 sm:$0xf] %vm3_vm1, %v1046_v35   ;;  %3028 = vst.msk [vmem:[%s7098_s1 + $0x4c2] ss:$8 sm:$0xf0] %vm3_vm1, %v1046_v35   ;;  %v1033_v39 = vpop.permute.xlu0 %1032  }
  0xcf   :  { %3023 = vst.msk [vmem:[%s7098_s1 + $0x422] ss:$8 sm:$0xf] %vm3_vm1, %v1033_v39   ;;  %3024 = vst.msk [vmem:[%s7098_s1 + $0x442] ss:$8 sm:$0xf0] %vm3_vm1, %v1033_v39   ;;  %1796 = vrot.lane.b32.xlu1 %v1795_v34, %s3523_s3  ;;  %v2003_v34 = vsel %vm459_vm0, %v3319_v30, %v3318_v29 }
  0xd0   :  { %1783 = vrot.lane.b32.xlu0 %v1782_v36, %s3523_s3  ;;  %v1990_v36 = vsel %vm459_vm0, %v3315_v33, %v3314_v32  ;;  %v3381_v29 = vld [vmem:[%s7097_s0 + $0x66] ss:$8 sm:$0xf]   ;;  %v3382_v30 = vld [vmem:[%s7097_s0 + $0x47] ss:$8 sm:$0xf0]  }
  0xd1   :  { %v1072_v43 = vpop.permute.xlu1 %1071   ;;  %v3377_v32 = vld [vmem:[%s7097_s0 + $0x64] ss:$8 sm:$0xf]   ;;  %v3378_v33 = vld [vmem:[%s7097_s0 + $0x45] ss:$8 sm:$0xf0]  }
  0xd2   :  { %3035 = vst.msk [vmem:[%s7098_s1 + $0x5a2] ss:$8 sm:$0xf] %vm3_vm1, %v1072_v43   ;;  %3036 = vst.msk [vmem:[%s7098_s1 + $0x5c2] ss:$8 sm:$0xf0] %vm3_vm1, %v1072_v43   ;;  %v1059_v47 = vpop.permute.xlu0 %1058  }
  0xd3   :  { %3031 = vst.msk [vmem:[%s7098_s1 + $0x522] ss:$8 sm:$0xf] %vm3_vm1, %v1059_v47   ;;  %3032 = vst.msk [vmem:[%s7098_s1 + $0x542] ss:$8 sm:$0xf0] %vm3_vm1, %v1059_v47   ;;  %1822 = vrot.lane.b32.xlu1 %v1821_v42, %s3523_s3  ;;  %v2028_v42 = vsel %vm459_vm0, %v3326_v38, %v3325_v37 }
  0xd4   :  { %1809 = vrot.lane.b32.xlu0 %v1808_v44, %s3523_s3  ;;  %v2015_v44 = vsel %vm459_vm0, %v3322_v41, %v2011_v40  ;;  %v3389_v37 = vld [vmem:[%s7097_s0 + $0x82] ss:$8 sm:$0xf]   ;;  %v3390_v38 = vld [vmem:[%s7097_s0 + $0x63] ss:$8 sm:$0xf0]  }
  0xd5   :  { %v1097_v51 = vpop.permute.xlu1 %1096   ;;  %v3385_v40 = vld [vmem:[%s7097_s0 + $0x80] ss:$8 sm:$0xf]   ;;  %v3386_v41 = vld [vmem:[%s7097_s0 + $0x61] ss:$8 sm:$0xf0]  }
  0xd6   :  { %3042 = vst.msk [vmem:[%s7098_s1 + $0x83] ss:$8 sm:$0xf] %vm3_vm1, %v1097_v51   ;;  %3043 = vst.msk [vmem:[%s7098_s1 + $0xa3] ss:$8 sm:$0xf0] %vm3_vm1, %v1097_v51   ;;  %v1084_v55 = vpop.permute.xlu0 %1083  }
  0xd7   :  { %3038 = vst.msk [vmem:[%s7098_s1 + $0x3] ss:$8 sm:$0xf] %vm3_vm1, %v1084_v55   ;;  %3039 = vst.msk [vmem:[%s7098_s1 + $0x23] ss:$8 sm:$0xf0] %vm3_vm1, %v1084_v55   ;;  %1848 = vrot.lane.b32.xlu1 %v1847_v50, %s3523_s3  ;;  %v2054_v50 = vsel %vm459_vm0, %v3334_v46, %v3333_v45 }
  0xd8   :  { %1835 = vrot.lane.b32.xlu0 %v1834_v52, %s3523_s3  ;;  %v2041_v52 = vsel %vm459_vm0, %v3330_v49, %v3329_v48  ;;  %v3397_v45 = vld [vmem:[%s7097_s0 + $0x86] ss:$8 sm:$0xf]   ;;  %v3398_v46 = vld [vmem:[%s7097_s0 + $0x67] ss:$8 sm:$0xf0]  }
  0xd9   :  { %v1123_v59 = vpop.permute.xlu1 %1122   ;;  %v3393_v48 = vld [vmem:[%s7097_s0 + $0x84] ss:$8 sm:$0xf]   ;;  %v3394_v49 = vld [vmem:[%s7097_s0 + $0x65] ss:$8 sm:$0xf0]  }
  0xda   :  { %3050 = vst.msk [vmem:[%s7098_s1 + $0x183] ss:$8 sm:$0xf] %vm3_vm1, %v1123_v59   ;;  %3051 = vst.msk [vmem:[%s7098_s1 + $0x1a3] ss:$8 sm:$0xf0] %vm3_vm1, %v1123_v59   ;;  %v1110_v63 = vpop.permute.xlu0 %1109  }
  0xdb   :  { %3046 = vst.msk [vmem:[%s7098_s1 + $0x103] ss:$8 sm:$0xf] %vm3_vm1, %v1110_v63   ;;  %3047 = vst.msk [vmem:[%s7098_s1 + $0x123] ss:$8 sm:$0xf0] %vm3_vm1, %v1110_v63   ;;  %1874 = vrot.lane.b32.xlu1 %v1873_v58, %s3523_s3  ;;  %v2080_v58 = vsel %vm459_vm0, %v3342_v54, %v3341_v53 }
  0xdc   :  { %1861 = vrot.lane.b32.xlu0 %v1860_v60, %s3523_s3  ;;  %v2067_v60 = vsel %vm459_vm0, %v3338_v57, %v3337_v56  ;;  %v3405_v53 = vld [vmem:[%s7097_s0 + $0xa2] ss:$8 sm:$0xf]   ;;  %v3406_v54 = vld [vmem:[%s7097_s0 + $0x83] ss:$8 sm:$0xf0]  }
  0xdd   :  { %v1149_v3 = vpop.permute.xlu1 %1148   ;;  %v3401_v56 = vld [vmem:[%s7097_s0 + $0xa0] ss:$8 sm:$0xf]   ;;  %v3402_v57 = vld [vmem:[%s7097_s0 + $0x81] ss:$8 sm:$0xf0]  }
  0xde   :  { %3058 = vst.msk [vmem:[%s7098_s1 + $0xa3] ss:$8 sm:$0xf] %vm3_vm1, %v1149_v3   ;;  %3059 = vst.msk [vmem:[%s7098_s1 + $0xc3] ss:$8 sm:$0xf0] %vm3_vm1, %v1149_v3   ;;  %v1136_v7 = vpop.permute.xlu0 %1135  }
  0xdf   :  { %3054 = vst.msk [vmem:[%s7098_s1 + $0x23] ss:$8 sm:$0xf] %vm3_vm1, %v1136_v7   ;;  %3055 = vst.msk [vmem:[%s7098_s1 + $0x43] ss:$8 sm:$0xf0] %vm3_vm1, %v1136_v7   ;;  %1900 = vrot.lane.b32.xlu1 %v1899_v2, %s3523_s3  ;;  %v2106_v2 = vsel %vm459_vm0, %v3350_v62, %v3349_v61 }
  0xe0   :  { %1887 = vrot.lane.b32.xlu0 %v1886_v4, %s3523_s3  ;;  %v2093_v4 = vsel %vm459_vm0, %v3346_v1, %v3345_v0  ;;  %v3413_v61 = vld [vmem:[%s7097_s0 + $0xa6] ss:$8 sm:$0xf]   ;;  %v3414_v62 = vld [vmem:[%s7097_s0 + $0x87] ss:$8 sm:$0xf0]  }
  0xe1   :  { %v1175_v11 = vpop.permute.xlu1 %1174   ;;  %v3409_v0 = vld [vmem:[%s7097_s0 + $0xa4] ss:$8 sm:$0xf]   ;;  %v3410_v1 = vld [vmem:[%s7097_s0 + $0x85] ss:$8 sm:$0xf0]  }
  0xe2   :  { %3066 = vst.msk [vmem:[%s7098_s1 + $0x1a3] ss:$8 sm:$0xf] %vm3_vm1, %v1175_v11   ;;  %3067 = vst.msk [vmem:[%s7098_s1 + $0x1c3] ss:$8 sm:$0xf0] %vm3_vm1, %v1175_v11   ;;  %v1162_v15 = vpop.permute.xlu0 %1161  }
  0xe3   :  { %3062 = vst.msk [vmem:[%s7098_s1 + $0x123] ss:$8 sm:$0xf] %vm3_vm1, %v1162_v15   ;;  %3063 = vst.msk [vmem:[%s7098_s1 + $0x143] ss:$8 sm:$0xf0] %vm3_vm1, %v1162_v15   ;;  %1926 = vrot.lane.b32.xlu1 %v1925_v10, %s3523_s3  ;;  %v2132_v10 = vsel %vm459_vm0, %v3358_v6, %v3357_v5 }
  0xe4   :  { %1913 = vrot.lane.b32.xlu0 %v1912_v12, %s3523_s3  ;;  %v2119_v12 = vsel %vm459_vm0, %v3354_v9, %v3353_v8  ;;  %v3420_v5 = vld [vmem:[%s7097_s0 + $0x2] ss:$8 sm:$0xf]   ;;  %v3421_v6 = vld [vmem:[%s7097_s0 - $0x1d] ss:$8 sm:$0xf0]  }
  0xe5   :  { %v1201_v19 = vpop.permute.xlu1 %1200   ;;  %v2322_v8 = vld [vmem:[%s7097_s0] ss:$8 sm:$0xf]   ;;  %v3417_v9 = vld [vmem:[%s7097_s0 - $0x1f] ss:$8 sm:$0xf0]  }
  0xe6   :  { %3074 = vst.msk [vmem:[%s7098_s1 + $0x283] ss:$8 sm:$0xf] %vm3_vm1, %v1201_v19   ;;  %3075 = vst.msk [vmem:[%s7098_s1 + $0x2a3] ss:$8 sm:$0xf0] %vm3_vm1, %v1201_v19   ;;  %v1188_v23 = vpop.permute.xlu0 %1187  }
  0xe7   :  { %3070 = vst.msk [vmem:[%s7098_s1 + $0x203] ss:$8 sm:$0xf] %vm3_vm1, %v1188_v23   ;;  %3071 = vst.msk [vmem:[%s7098_s1 + $0x223] ss:$8 sm:$0xf0] %vm3_vm1, %v1188_v23   ;;  %1952 = vrot.lane.b32.xlu1 %v1951_v18, %s3523_s3  ;;  %v2158_v18 = vsel %vm459_vm0, %v3366_v14, %v3365_v13 }
  0xe8   :  { %1939 = vrot.lane.b32.xlu0 %v1938_v20, %s3523_s3  ;;  %v2145_v20 = vsel %vm459_vm0, %v3362_v17, %v3361_v16  ;;  %v3428_v13 = vld [vmem:[%s7097_s0 + $0x6] ss:$8 sm:$0xf]   ;;  %v3429_v14 = vld [vmem:[%s7097_s0 - $0x19] ss:$8 sm:$0xf0]  }
  0xe9   :  { %v1227_v27 = vpop.permute.xlu1 %1226   ;;  %v3424_v16 = vld [vmem:[%s7097_s0 + $0x4] ss:$8 sm:$0xf]   ;;  %v3425_v17 = vld [vmem:[%s7097_s0 - $0x1b] ss:$8 sm:$0xf0]  }
  0xea   :  { %3082 = vst.msk [vmem:[%s7098_s1 + $0x383] ss:$8 sm:$0xf] %vm3_vm1, %v1227_v27   ;;  %3083 = vst.msk [vmem:[%s7098_s1 + $0x3a3] ss:$8 sm:$0xf0] %vm3_vm1, %v1227_v27   ;;  %v1214_v31 = vpop.permute.xlu0 %1213  }
  0xeb   :  { %3078 = vst.msk [vmem:[%s7098_s1 + $0x303] ss:$8 sm:$0xf] %vm3_vm1, %v1214_v31   ;;  %3079 = vst.msk [vmem:[%s7098_s1 + $0x323] ss:$8 sm:$0xf0] %vm3_vm1, %v1214_v31   ;;  %1978 = vrot.lane.b32.xlu1 %v1977_v26, %s3523_s3  ;;  %v2184_v26 = vsel %vm459_vm0, %v3374_v22, %v3373_v21 }
  0xec   :  { %1965 = vrot.lane.b32.xlu0 %v1964_v28, %s3523_s3  ;;  %v2171_v28 = vsel %vm459_vm0, %v3370_v25, %v3369_v24  ;;  %v3436_v21 = vld [vmem:[%s7097_s0 + $0x22] ss:$8 sm:$0xf]   ;;  %v3437_v22 = vld [vmem:[%s7097_s0 + $0x3] ss:$8 sm:$0xf0]  }
  0xed   :  { %v1253_v35 = vpop.permute.xlu1 %1252   ;;  %v3432_v24 = vld [vmem:[%s7097_s0 + $0x20] ss:$8 sm:$0xf]   ;;  %v3433_v25 = vld [vmem:[%s7097_s0 + $0x1] ss:$8 sm:$0xf0]  }
  0xee   :  { %3090 = vst.msk [vmem:[%s7098_s1 + $0x2a3] ss:$8 sm:$0xf] %vm3_vm1, %v1253_v35   ;;  %3091 = vst.msk [vmem:[%s7098_s1 + $0x2c3] ss:$8 sm:$0xf0] %vm3_vm1, %v1253_v35   ;;  %v1240_v39 = vpop.permute.xlu0 %1239  }
  0xef   :  { %3086 = vst.msk [vmem:[%s7098_s1 + $0x223] ss:$8 sm:$0xf] %vm3_vm1, %v1240_v39   ;;  %3087 = vst.msk [vmem:[%s7098_s1 + $0x243] ss:$8 sm:$0xf0] %vm3_vm1, %v1240_v39   ;;  %2004 = vrot.lane.b32.xlu1 %v2003_v34, %s3523_s3  ;;  %v2210_v34 = vsel %vm459_vm0, %v3382_v30, %v3381_v29 }
  0xf0   :  { %1991 = vrot.lane.b32.xlu0 %v1990_v36, %s3523_s3  ;;  %v2197_v36 = vsel %vm459_vm0, %v3378_v33, %v3377_v32  ;;  %v3444_v29 = vld [vmem:[%s7097_s0 + $0x26] ss:$8 sm:$0xf]   ;;  %v3445_v30 = vld [vmem:[%s7097_s0 + $0x7] ss:$8 sm:$0xf0]  }
  0xf1   :  { %v1279_v43 = vpop.permute.xlu1 %1278   ;;  %v3440_v32 = vld [vmem:[%s7097_s0 + $0x24] ss:$8 sm:$0xf]   ;;  %v3441_v33 = vld [vmem:[%s7097_s0 + $0x5] ss:$8 sm:$0xf0]  }
  0xf2   :  { %3098 = vst.msk [vmem:[%s7098_s1 + $0x3a3] ss:$8 sm:$0xf] %vm3_vm1, %v1279_v43   ;;  %3099 = vst.msk [vmem:[%s7098_s1 + $0x3c3] ss:$8 sm:$0xf0] %vm3_vm1, %v1279_v43   ;;  %v1266_v47 = vpop.permute.xlu0 %1265  }
  0xf3   :  { %3094 = vst.msk [vmem:[%s7098_s1 + $0x323] ss:$8 sm:$0xf] %vm3_vm1, %v1266_v47   ;;  %3095 = vst.msk [vmem:[%s7098_s1 + $0x343] ss:$8 sm:$0xf0] %vm3_vm1, %v1266_v47   ;;  %2029 = vrot.lane.b32.xlu1 %v2028_v42, %s3524_s27  ;;  %v2236_v42 = vsel %vm459_vm0, %v3390_v38, %v3389_v37 }
  0xf4   :  { %2016 = vrot.lane.b32.xlu0 %v2015_v44, %s3524_s27  ;;  %v2223_v44 = vsel %vm459_vm0, %v3386_v41, %v3385_v40  ;;  %v3452_v37 = vld [vmem:[%s7097_s0 + $0x42] ss:$8 sm:$0xf]   ;;  %v3453_v38 = vld [vmem:[%s7097_s0 + $0x23] ss:$8 sm:$0xf0]  }
  0xf5   :  { %v1305_v51 = vpop.permute.xlu1 %1304   ;;  %v3448_v40 = vld [vmem:[%s7097_s0 + $0x40] ss:$8 sm:$0xf]   ;;  %v3449_v41 = vld [vmem:[%s7097_s0 + $0x21] ss:$8 sm:$0xf0]  }
  0xf6   :  { %3106 = vst.msk [vmem:[%s7098_s1 + $0x483] ss:$8 sm:$0xf] %vm3_vm1, %v1305_v51   ;;  %3107 = vst.msk [vmem:[%s7098_s1 + $0x4a3] ss:$8 sm:$0xf0] %vm3_vm1, %v1305_v51   ;;  %v1292_v55 = vpop.permute.xlu0 %1291  }
  0xf7   :  { %3102 = vst.msk [vmem:[%s7098_s1 + $0x403] ss:$8 sm:$0xf] %vm3_vm1, %v1292_v55   ;;  %3103 = vst.msk [vmem:[%s7098_s1 + $0x423] ss:$8 sm:$0xf0] %vm3_vm1, %v1292_v55   ;;  %2055 = vrot.lane.b32.xlu1 %v2054_v50, %s3524_s27  ;;  %v2262_v50 = vsel %vm459_vm0, %v3398_v46, %v3397_v45 }
  0xf8   :  { %2042 = vrot.lane.b32.xlu0 %v2041_v52, %s3524_s27  ;;  %v2249_v52 = vsel %vm459_vm0, %v3394_v49, %v3393_v48  ;;  %v3460_v45 = vld [vmem:[%s7097_s0 + $0x46] ss:$8 sm:$0xf]   ;;  %v3461_v46 = vld [vmem:[%s7097_s0 + $0x27] ss:$8 sm:$0xf0]  }
  0xf9   :  { %v1331_v59 = vpop.permute.xlu1 %1330   ;;  %v3456_v48 = vld [vmem:[%s7097_s0 + $0x44] ss:$8 sm:$0xf]   ;;  %v3457_v49 = vld [vmem:[%s7097_s0 + $0x25] ss:$8 sm:$0xf0]  }
  0xfa   :  { %3114 = vst.msk [vmem:[%s7098_s1 + $0x583] ss:$8 sm:$0xf] %vm3_vm1, %v1331_v59   ;;  %3115 = vst.msk [vmem:[%s7098_s1 + $0x5a3] ss:$8 sm:$0xf0] %vm3_vm1, %v1331_v59   ;;  %v1318_v63 = vpop.permute.xlu0 %1317  }
  0xfb   :  { %3110 = vst.msk [vmem:[%s7098_s1 + $0x503] ss:$8 sm:$0xf] %vm3_vm1, %v1318_v63   ;;  %3111 = vst.msk [vmem:[%s7098_s1 + $0x523] ss:$8 sm:$0xf0] %vm3_vm1, %v1318_v63   ;;  %2081 = vrot.lane.b32.xlu1 %v2080_v58, %s3524_s27  ;;  %v2288_v58 = vsel %vm459_vm0, %v3406_v54, %v3405_v53 }
  0xfc   :  { %2068 = vrot.lane.b32.xlu0 %v2067_v60, %s3524_s27  ;;  %v2275_v60 = vsel %vm459_vm0, %v3402_v57, %v3401_v56  ;;  %v3468_v53 = vld [vmem:[%s7097_s0 + $0x62] ss:$8 sm:$0xf]   ;;  %v3469_v54 = vld [vmem:[%s7097_s0 + $0x43] ss:$8 sm:$0xf0]  }
  0xfd   :  { %v1357_v3 = vpop.permute.xlu1 %1356   ;;  %v3464_v56 = vld [vmem:[%s7097_s0 + $0x60] ss:$8 sm:$0xf]   ;;  %v3465_v57 = vld [vmem:[%s7097_s0 + $0x41] ss:$8 sm:$0xf0]  }
  0xfe   :  { %3122 = vst.msk [vmem:[%s7098_s1 + $0x4a3] ss:$8 sm:$0xf] %vm3_vm1, %v1357_v3   ;;  %3123 = vst.msk [vmem:[%s7098_s1 + $0x4c3] ss:$8 sm:$0xf0] %vm3_vm1, %v1357_v3   ;;  %v1344_v7 = vpop.permute.xlu0 %1343  }
  0xff   :  { %3118 = vst.msk [vmem:[%s7098_s1 + $0x423] ss:$8 sm:$0xf] %vm3_vm1, %v1344_v7   ;;  %3119 = vst.msk [vmem:[%s7098_s1 + $0x443] ss:$8 sm:$0xf0] %vm3_vm1, %v1344_v7   ;;  %2107 = vrot.lane.b32.xlu1 %v2106_v2, %s3524_s27  ;;  %v2314_v2 = vsel %vm459_vm0, %v3414_v62, %v3413_v61 }
 0x100   :  { %2094 = vrot.lane.b32.xlu0 %v2093_v4, %s3524_s27  ;;  %v2301_v4 = vsel %vm459_vm0, %v3410_v1, %v3409_v0  ;;  %v3476_v61 = vld [vmem:[%s7097_s0 + $0x66] ss:$8 sm:$0xf]   ;;  %v3477_v62 = vld [vmem:[%s7097_s0 + $0x47] ss:$8 sm:$0xf0]  }
 0x101   :  { %v1383_v11 = vpop.permute.xlu1 %1382   ;;  %v3472_v0 = vld [vmem:[%s7097_s0 + $0x64] ss:$8 sm:$0xf]   ;;  %v3473_v1 = vld [vmem:[%s7097_s0 + $0x45] ss:$8 sm:$0xf0]  }
 0x102   :  { %3130 = vst.msk [vmem:[%s7098_s1 + $0x5a3] ss:$8 sm:$0xf] %vm3_vm1, %v1383_v11   ;;  %3131 = vst.msk [vmem:[%s7098_s1 + $0x5c3] ss:$8 sm:$0xf0] %vm3_vm1, %v1383_v11   ;;  %v1370_v15 = vpop.permute.xlu0 %1369  }
 0x103   :  { %3126 = vst.msk [vmem:[%s7098_s1 + $0x523] ss:$8 sm:$0xf] %vm3_vm1, %v1370_v15   ;;  %3127 = vst.msk [vmem:[%s7098_s1 + $0x543] ss:$8 sm:$0xf0] %vm3_vm1, %v1370_v15   ;;  %2133 = vrot.lane.b32.xlu1 %v2132_v10, %s3524_s27  ;;  %v2339_v10 = vsel %vm459_vm0, %v3421_v6, %v3420_v5 }
 0x104   :  { %2120 = vrot.lane.b32.xlu0 %v2119_v12, %s3524_s27  ;;  %v2326_v12 = vsel %vm459_vm0, %v3417_v9, %v2322_v8  ;;  %v3484_v5 = vld [vmem:[%s7097_s0 + $0x82] ss:$8 sm:$0xf]   ;;  %v3485_v6 = vld [vmem:[%s7097_s0 + $0x63] ss:$8 sm:$0xf0]  }
 0x105   :  { %v1408_v19 = vpop.permute.xlu1 %1407   ;;  %v3480_v8 = vld [vmem:[%s7097_s0 + $0x80] ss:$8 sm:$0xf]   ;;  %v3481_v9 = vld [vmem:[%s7097_s0 + $0x61] ss:$8 sm:$0xf0]  }
 0x106   :  { %3137 = vst.msk [vmem:[%s7098_s1 + $0x84] ss:$8 sm:$0xf] %vm3_vm1, %v1408_v19   ;;  %3138 = vst.msk [vmem:[%s7098_s1 + $0xa4] ss:$8 sm:$0xf0] %vm3_vm1, %v1408_v19   ;;  %v1395_v23 = vpop.permute.xlu0 %1394  }
 0x107   :  { %3133 = vst.msk [vmem:[%s7098_s1 + $0x4] ss:$8 sm:$0xf] %vm3_vm1, %v1395_v23   ;;  %3134 = vst.msk [vmem:[%s7098_s1 + $0x24] ss:$8 sm:$0xf0] %vm3_vm1, %v1395_v23   ;;  %2159 = vrot.lane.b32.xlu1 %v2158_v18, %s3524_s27  ;;  %v2365_v18 = vsel %vm459_vm0, %v3429_v14, %v3428_v13  ;;  %v2534_v14 = vsel %vm459_vm0, %v3481_v9, %v3480_v8 }
 0x108   :  { %2146 = vrot.lane.b32.xlu0 %v2145_v20, %s3524_s27  ;;  %v2352_v20 = vsel %vm459_vm0, %v3425_v17, %v3424_v16  ;;  %v5660_v16 = vld [vmem:[%s7097_s0 + $0x65] ss:$8 sm:$0xf0]  }
 0x109   :  { %v1434_v27 = vpop.permute.xlu1 %1433  }
 0x10a   :  { %3145 = vst.msk [vmem:[%s7098_s1 + $0x184] ss:$8 sm:$0xf] %vm3_vm1, %v1434_v27   ;;  %3146 = vst.msk [vmem:[%s7098_s1 + $0x1a4] ss:$8 sm:$0xf0] %vm3_vm1, %v1434_v27   ;;  %v1421_v31 = vpop.permute.xlu0 %1420  }
 0x10b   :  { %3141 = vst.msk [vmem:[%s7098_s1 + $0x104] ss:$8 sm:$0xf] %vm3_vm1, %v1421_v31   ;;  %3142 = vst.msk [vmem:[%s7098_s1 + $0x124] ss:$8 sm:$0xf0] %vm3_vm1, %v1421_v31   ;;  %2185 = vrot.lane.b32.xlu1 %v2184_v26, %s3524_s27  ;;  %v2391_v26 = vsel %vm459_vm0, %v3437_v22, %v3436_v21 }
 0x10c   :  { %2172 = vrot.lane.b32.xlu0 %v2171_v28, %s3524_s27  ;;  %v2378_v28 = vsel %vm459_vm0, %v3433_v25, %v3432_v24  ;;  %v5691_v21 = vld [vmem:[%s7097_s0 + $0xa2] ss:$8 sm:$0xf]   ;;  %v5696_v22 = vld [vmem:[%s7097_s0 + $0x83] ss:$8 sm:$0xf0]  }
 0x10d   :  { %v1460_v35 = vpop.permute.xlu1 %1459   ;;  %v2667_v24 = vld [vmem:[%s7097_s0 + $0x20] sm:$0xff]   ;;  %v2676_v25 = vld [vmem:[%s7097_s0 + $0x28] sm:$0xff]  }
 0x10e   :  { %3153 = vst.msk [vmem:[%s7098_s1 + $0xa4] ss:$8 sm:$0xf] %vm3_vm1, %v1460_v35   ;;  %3154 = vst.msk [vmem:[%s7098_s1 + $0xc4] ss:$8 sm:$0xf0] %vm3_vm1, %v1460_v35   ;;  %v1447_v39 = vpop.permute.xlu0 %1446  }
 0x10f   :  { %3149 = vst.msk [vmem:[%s7098_s1 + $0x24] ss:$8 sm:$0xf] %vm3_vm1, %v1447_v39   ;;  %3150 = vst.msk [vmem:[%s7098_s1 + $0x44] ss:$8 sm:$0xf0] %vm3_vm1, %v1447_v39   ;;  %2211 = vrot.lane.b32.xlu1 %v2210_v34, %s3524_s27  ;;  %v2417_v34 = vsel %vm459_vm0, %v3445_v30, %v3444_v29 }
 0x110   :  { %2198 = vrot.lane.b32.xlu0 %v2197_v36, %s3524_s27  ;;  %v2404_v36 = vsel %vm459_vm0, %v3441_v33, %v3440_v32  ;;  %2668 = vst.msk [vmem:[%s7098_s1 + $0x20] sm:$0x1] %vm3_vm1, %v2667_v24   ;;  %2669 = vst.msk [vmem:[%s7098_s1 + $0x5f] sm:$0x2] %vm3_vm1, %v2667_v24   ;;  %v2685_v29 = vld [vmem:[%s7097_s0 + $0x30] sm:$0xff]  }
 0x111   :  { %v1486_v43 = vpop.permute.xlu1 %1485   ;;  %2670 = vst.msk [vmem:[%s7098_s1 + $0x9e] sm:$0x4] %vm3_vm1, %v2667_v24   ;;  %2671 = vst.msk [vmem:[%s7098_s1 + $0xdd] sm:$0x8] %vm3_vm1, %v2667_v24   ;;  %v2694_v30 = vld [vmem:[%s7097_s0 + $0x38] sm:$0xff]  }
 0x112   :  { %3161 = vst.msk [vmem:[%s7098_s1 + $0x1a4] ss:$8 sm:$0xf] %vm3_vm1, %v1486_v43   ;;  %3162 = vst.msk [vmem:[%s7098_s1 + $0x1c4] ss:$8 sm:$0xf0] %vm3_vm1, %v1486_v43   ;;  %v1473_v47 = vpop.permute.xlu0 %1472  }
 0x113   :  { %3157 = vst.msk [vmem:[%s7098_s1 + $0x124] ss:$8 sm:$0xf] %vm3_vm1, %v1473_v47   ;;  %3158 = vst.msk [vmem:[%s7098_s1 + $0x144] ss:$8 sm:$0xf0] %vm3_vm1, %v1473_v47   ;;  %2237 = vrot.lane.b32.xlu1 %v2236_v42, %s3524_s27  ;;  %v2443_v42 = vsel %vm459_vm0, %v3453_v38, %v3452_v37 }
 0x114   :  { %2224 = vrot.lane.b32.xlu0 %v2223_v44, %s3524_s27  ;;  %v2430_v44 = vsel %vm459_vm0, %v3449_v41, %v3448_v40  ;;  %2672 = vst.msk [vmem:[%s7098_s1 + $0x11c] sm:$0x10] %vm3_vm1, %v2667_v24   ;;  %2673 = vst.msk [vmem:[%s7098_s1 + $0x15b] sm:$0x20] %vm3_vm1, %v2667_v24   ;;  %v2739_v38 = vld [vmem:[%s7097_s0 + $0x60] sm:$0xff]  }
 0x115   :  { %v1512_v51 = vpop.permute.xlu1 %1511   ;;  %2674 = vst.msk [vmem:[%s7098_s1 + $0x19a] sm:$0x40] %vm3_vm1, %v2667_v24   ;;  %2675 = vst.msk [vmem:[%s7098_s1 + $0x1d9] sm:$0x80] %vm3_vm1, %v2667_v24   ;;  %v2757_v40 = vld [vmem:[%s7097_s0 + $0x70] sm:$0xff]  }
 0x116   :  { %3169 = vst.msk [vmem:[%s7098_s1 + $0x284] ss:$8 sm:$0xf] %vm3_vm1, %v1512_v51   ;;  %3170 = vst.msk [vmem:[%s7098_s1 + $0x2a4] ss:$8 sm:$0xf0] %vm3_vm1, %v1512_v51   ;;  %v1499_v55 = vpop.permute.xlu0 %1498  }
 0x117   :  { %3165 = vst.msk [vmem:[%s7098_s1 + $0x204] ss:$8 sm:$0xf] %vm3_vm1, %v1499_v55   ;;  %3166 = vst.msk [vmem:[%s7098_s1 + $0x224] ss:$8 sm:$0xf0] %vm3_vm1, %v1499_v55   ;;  %2263 = vrot.lane.b32.xlu1 %v2262_v50, %s3524_s27  ;;  %v2469_v50 = vsel %vm459_vm0, %v3461_v46, %v3460_v45  ;;  %v6275_v46 = vsel %vm459_vm0, %v5696_v22, %v5691_v21 }
 0x118   :  { %2250 = vrot.lane.b32.xlu0 %v2249_v52, %s3524_s27  ;;  %v2456_v52 = vsel %vm459_vm0, %v3457_v49, %v3456_v48  ;;  %2677 = vst.msk [vmem:[%s7098_s1 + $0x28] sm:$0x1] %vm3_vm1, %v2676_v25   ;;  %2678 = vst.msk [vmem:[%s7098_s1 + $0x67] sm:$0x2] %vm3_vm1, %v2676_v25   ;;  %v2784_v45 = vld [vmem:[%s7097_s0 + $0x88] sm:$0xff]  }
 0x119   :  { %v1538_v59 = vpop.permute.xlu1 %1537   ;;  %2679 = vst.msk [vmem:[%s7098_s1 + $0xa6] sm:$0x4] %vm3_vm1, %v2676_v25   ;;  %2680 = vst.msk [vmem:[%s7098_s1 + $0xe5] sm:$0x8] %vm3_vm1, %v2676_v25   ;;  %v2802_v48 = vld [vmem:[%s7097_s0 + $0x98] sm:$0xff]   ;;  %v2811_v49 = vld [vmem:[%s7097_s0 + $0xa0] sm:$0xff]  }
 0x11a   :  { %3177 = vst.msk [vmem:[%s7098_s1 + $0x384] ss:$8 sm:$0xf] %vm3_vm1, %v1538_v59   ;;  %3178 = vst.msk [vmem:[%s7098_s1 + $0x3a4] ss:$8 sm:$0xf0] %vm3_vm1, %v1538_v59   ;;  %v1525_v63 = vpop.permute.xlu0 %1524  }
 0x11b   :  { %3173 = vst.msk [vmem:[%s7098_s1 + $0x304] ss:$8 sm:$0xf] %vm3_vm1, %v1525_v63   ;;  %3174 = vst.msk [vmem:[%s7098_s1 + $0x324] ss:$8 sm:$0xf0] %vm3_vm1, %v1525_v63   ;;  %2289 = vrot.lane.b32.xlu1 %v2288_v58, %s3524_s27  ;;  %v2495_v58 = vsel %vm459_vm0, %v3469_v54, %v3468_v53 }
 0x11c   :  { %2276 = vrot.lane.b32.xlu0 %v2275_v60, %s3524_s27  ;;  %v2482_v60 = vsel %vm459_vm0, %v3465_v57, %v3464_v56  ;;  %2681 = vst.msk [vmem:[%s7098_s1 + $0x124] sm:$0x10] %vm3_vm1, %v2676_v25   ;;  %2682 = vst.msk [vmem:[%s7098_s1 + $0x163] sm:$0x20] %vm3_vm1, %v2676_v25   ;;  %v2829_v53 = vld [vmem:[%s7097_s0 + $0xb0] sm:$0xff]  }
 0x11d   :  { %v1564_v3 = vpop.permute.xlu1 %1563   ;;  %2683 = vst.msk [vmem:[%s7098_s1 + $0x1a2] sm:$0x40] %vm3_vm1, %v2676_v25   ;;  %2684 = vst.msk [vmem:[%s7098_s1 + $0x1e1] sm:$0x80] %vm3_vm1, %v2676_v25   ;;  %v2838_v54 = vld [vmem:[%s7097_s0 + $0xb8] sm:$0xff]  }
 0x11e   :  { %3185 = vst.msk [vmem:[%s7098_s1 + $0x2a4] ss:$8 sm:$0xf] %vm3_vm1, %v1564_v3   ;;  %3186 = vst.msk [vmem:[%s7098_s1 + $0x2c4] ss:$8 sm:$0xf0] %vm3_vm1, %v1564_v3   ;;  %v1551_v7 = vpop.permute.xlu0 %1550  }
 0x11f   :  { %3181 = vst.msk [vmem:[%s7098_s1 + $0x224] ss:$8 sm:$0xf] %vm3_vm1, %v1551_v7   ;;  %3182 = vst.msk [vmem:[%s7098_s1 + $0x244] ss:$8 sm:$0xf0] %vm3_vm1, %v1551_v7   ;;  %2315 = vrot.lane.b32.xlu1 %v2314_v2, %s3524_s27  ;;  %v2521_v2 = vsel %vm459_vm0, %v3477_v62, %v3476_v61 }
 0x120   :  { %2302 = vrot.lane.b32.xlu0 %v2301_v4, %s3524_s27  ;;  %v2508_v4 = vsel %vm459_vm0, %v3473_v1, %v3472_v0  ;;  %2686 = vst.msk [vmem:[%s7098_s1 + $0x30] sm:$0x1] %vm3_vm1, %v2685_v29   ;;  %2687 = vst.msk [vmem:[%s7098_s1 + $0x6f] sm:$0x2] %vm3_vm1, %v2685_v29  }
 0x121   :  { %v1590_v11 = vpop.permute.xlu1 %1589   ;;  %2688 = vst.msk [vmem:[%s7098_s1 + $0xae] sm:$0x4] %vm3_vm1, %v2685_v29   ;;  %2689 = vst.msk [vmem:[%s7098_s1 + $0xed] sm:$0x8] %vm3_vm1, %v2685_v29  }
 0x122   :  { %3193 = vst.msk [vmem:[%s7098_s1 + $0x3a4] ss:$8 sm:$0xf] %vm3_vm1, %v1590_v11   ;;  %3194 = vst.msk [vmem:[%s7098_s1 + $0x3c4] ss:$8 sm:$0xf0] %vm3_vm1, %v1590_v11   ;;  %v1577_v15 = vpop.permute.xlu0 %1576  }
 0x123   :  { %3189 = vst.msk [vmem:[%s7098_s1 + $0x324] ss:$8 sm:$0xf] %vm3_vm1, %v1577_v15   ;;  %3190 = vst.msk [vmem:[%s7098_s1 + $0x344] ss:$8 sm:$0xf0] %vm3_vm1, %v1577_v15   ;;  %2340 = vrot.lane.b32.xlu1 %v2339_v10, %s3525_s23  ;;  %v2547_v10 = vsel %vm459_vm0, %v3485_v6, %v3484_v5 }
 0x124   :  { %2327 = vrot.lane.b32.xlu0 %v2326_v12, %s3525_s23  ;;  %v3492_v11 = vld [vmem:[%s7097_s0 + $0x86] ss:$8 sm:$0xf]   ;;  %v3493_v12 = vld [vmem:[%s7097_s0 + $0x67] ss:$8 sm:$0xf0]  }
 0x125   :  { %v1616_v19 = vpop.permute.xlu1 %1615   ;;  %v5655_v15 = vld [vmem:[%s7097_s0 + $0x84] ss:$8 sm:$0xf]   ;;  %2690 = vst.msk [vmem:[%s7098_s1 + $0x12c] sm:$0x10] %vm3_vm1, %v2685_v29  }
 0x126   :  { %3201 = vst.msk [vmem:[%s7098_s1 + $0x484] ss:$8 sm:$0xf] %vm3_vm1, %v1616_v19   ;;  %3202 = vst.msk [vmem:[%s7098_s1 + $0x4a4] ss:$8 sm:$0xf0] %vm3_vm1, %v1616_v19   ;;  %v1603_v23 = vpop.permute.xlu0 %1602   ;;  %v5925_v33 = vsel %vm459_vm0, %v5660_v16, %v5655_v15 }
 0x127   :  { %3197 = vst.msk [vmem:[%s7098_s1 + $0x404] ss:$8 sm:$0xf] %vm3_vm1, %v1603_v23   ;;  %3198 = vst.msk [vmem:[%s7098_s1 + $0x424] ss:$8 sm:$0xf0] %vm3_vm1, %v1603_v23   ;;  %2366 = vrot.lane.b32.xlu1 %v2365_v18, %s3525_s23 }
 0x128   :  { %2353 = vrot.lane.b32.xlu0 %v2352_v20, %s3525_s23  ;;  %v2_v18 = vld [vmem:[%s7097_s0] sm:$0xff]   ;;  %v2640_v19 = vld [vmem:[%s7097_s0 + $0x8] sm:$0xff]   ;;  %v2649_v20 = vld [vmem:[%s7097_s0 + $0x10] sm:$0xff]  }
 0x129   :  { %v1642_v27 = vpop.permute.xlu1 %1641   ;;  %4 = vst.msk [vmem:[%s7098_s1] sm:$0x1] %vm3_vm1, %v2_v18   ;;  %2633 = vst.msk [vmem:[%s7098_s1 + $0x3f] sm:$0x2] %vm3_vm1, %v2_v18   ;;  %v2658_v23 = vld [vmem:[%s7097_s0 + $0x18] sm:$0xff]  }
 0x12a   :  { %3209 = vst.msk [vmem:[%s7098_s1 + $0x584] ss:$8 sm:$0xf] %vm3_vm1, %v1642_v27   ;;  %3210 = vst.msk [vmem:[%s7098_s1 + $0x5a4] ss:$8 sm:$0xf0] %vm3_vm1, %v1642_v27   ;;  %v1629_v31 = vpop.permute.xlu0 %1628  }
 0x12b   :  { %3205 = vst.msk [vmem:[%s7098_s1 + $0x504] ss:$8 sm:$0xf] %vm3_vm1, %v1629_v31   ;;  %3206 = vst.msk [vmem:[%s7098_s1 + $0x524] ss:$8 sm:$0xf0] %vm3_vm1, %v1629_v31   ;;  %2392 = vrot.lane.b32.xlu1 %v2391_v26, %s3525_s23  ;;  %v5805_v26 = vsel %vm459_vm0, %v3493_v12, %v3492_v11 }
 0x12c   :  { %2379 = vrot.lane.b32.xlu0 %v2378_v28, %s3525_s23  ;;  %2634 = vst.msk [vmem:[%s7098_s1 + $0x7e] sm:$0x4] %vm3_vm1, %v2_v18   ;;  %2635 = vst.msk [vmem:[%s7098_s1 + $0xbd] sm:$0x8] %vm3_vm1, %v2_v18   ;;  %v2703_v31 = vld [vmem:[%s7097_s0 + $0x40] sm:$0xff]  }
 0x12d   :  { %v1668_v35 = vpop.permute.xlu1 %1667   ;;  %2636 = vst.msk [vmem:[%s7098_s1 + $0xfc] sm:$0x10] %vm3_vm1, %v2_v18   ;;  %2637 = vst.msk [vmem:[%s7098_s1 + $0x13b] sm:$0x20] %vm3_vm1, %v2_v18  }
 0x12e   :  { %3217 = vst.msk [vmem:[%s7098_s1 + $0x4a4] ss:$8 sm:$0xf] %vm3_vm1, %v1668_v35   ;;  %3218 = vst.msk [vmem:[%s7098_s1 + $0x4c4] ss:$8 sm:$0xf0] %vm3_vm1, %v1668_v35   ;;  %v1655_v39 = vpop.permute.xlu0 %1654  }
 0x12f   :  { %3213 = vst.msk [vmem:[%s7098_s1 + $0x424] ss:$8 sm:$0xf] %vm3_vm1, %v1655_v39   ;;  %3214 = vst.msk [vmem:[%s7098_s1 + $0x444] ss:$8 sm:$0xf0] %vm3_vm1, %v1655_v39   ;;  %2418 = vrot.lane.b32.xlu1 %v2417_v34, %s3525_s23 }
 0x130   :  { %2405 = vrot.lane.b32.xlu0 %v2404_v36, %s3525_s23  ;;  %2638 = vst.msk [vmem:[%s7098_s1 + $0x17a] sm:$0x40] %vm3_vm1, %v2_v18   ;;  %2639 = vst.msk [vmem:[%s7098_s1 + $0x1b9] sm:$0x80] %vm3_vm1, %v2_v18   ;;  %v2712_v34 = vld [vmem:[%s7097_s0 + $0x48] sm:$0xff]  }
 0x131   :  { %v1694_v43 = vpop.permute.xlu1 %1693   ;;  %2641 = vst.msk [vmem:[%s7098_s1 + $0x8] sm:$0x1] %vm3_vm1, %v2640_v19   ;;  %2642 = vst.msk [vmem:[%s7098_s1 + $0x47] sm:$0x2] %vm3_vm1, %v2640_v19   ;;  %v2721_v35 = vld [vmem:[%s7097_s0 + $0x50] sm:$0xff]   ;;  %v2730_v36 = vld [vmem:[%s7097_s0 + $0x58] sm:$0xff]  }
 0x132   :  { %3225 = vst.msk [vmem:[%s7098_s1 + $0x5a4] ss:$8 sm:$0xf] %vm3_vm1, %v1694_v43   ;;  %3226 = vst.msk [vmem:[%s7098_s1 + $0x5c4] ss:$8 sm:$0xf0] %vm3_vm1, %v1694_v43   ;;  %v1681_v47 = vpop.permute.xlu0 %1680  }
 0x133   :  { %3221 = vst.msk [vmem:[%s7098_s1 + $0x524] ss:$8 sm:$0xf] %vm3_vm1, %v1681_v47   ;;  %3222 = vst.msk [vmem:[%s7098_s1 + $0x544] ss:$8 sm:$0xf0] %vm3_vm1, %v1681_v47   ;;  %2444 = vrot.lane.b32.xlu1 %v2443_v42, %s3525_s23 }
 0x134   :  { %2431 = vrot.lane.b32.xlu0 %v2430_v44, %s3525_s23  ;;  %2643 = vst.msk [vmem:[%s7098_s1 + $0x86] sm:$0x4] %vm3_vm1, %v2640_v19   ;;  %2644 = vst.msk [vmem:[%s7098_s1 + $0xc5] sm:$0x8] %vm3_vm1, %v2640_v19   ;;  %v2748_v39 = vld [vmem:[%s7097_s0 + $0x68] sm:$0xff]  }
 0x135   :  { %v1719_v51 = vpop.permute.xlu1 %1718   ;;  %2645 = vst.msk [vmem:[%s7098_s1 + $0x104] sm:$0x10] %vm3_vm1, %v2640_v19   ;;  %2646 = vst.msk [vmem:[%s7098_s1 + $0x143] sm:$0x20] %vm3_vm1, %v2640_v19   ;;  %v2766_v43 = vld [vmem:[%s7097_s0 + $0x78] sm:$0xff]   ;;  %v2775_v44 = vld [vmem:[%s7097_s0 + $0x80] sm:$0xff]  }
 0x136   :  { %3232 = vst.msk [vmem:[%s7098_s1 + $0x85] ss:$8 sm:$0xf] %vm3_vm1, %v1719_v51   ;;  %3233 = vst.msk [vmem:[%s7098_s1 + $0xa5] ss:$8 sm:$0xf0] %vm3_vm1, %v1719_v51   ;;  %v1706_v55 = vpop.permute.xlu0 %1705  }
 0x137   :  { %3228 = vst.msk [vmem:[%s7098_s1 + $0x5] ss:$8 sm:$0xf] %vm3_vm1, %v1706_v55   ;;  %3229 = vst.msk [vmem:[%s7098_s1 + $0x25] ss:$8 sm:$0xf0] %vm3_vm1, %v1706_v55   ;;  %2470 = vrot.lane.b32.xlu1 %v2469_v50, %s3525_s23 }
 0x138   :  { %2457 = vrot.lane.b32.xlu0 %v2456_v52, %s3525_s23  ;;  %2647 = vst.msk [vmem:[%s7098_s1 + $0x182] sm:$0x40] %vm3_vm1, %v2640_v19   ;;  %2648 = vst.msk [vmem:[%s7098_s1 + $0x1c1] sm:$0x80] %vm3_vm1, %v2640_v19   ;;  %v2793_v47 = vld [vmem:[%s7097_s0 + $0x90] sm:$0xff]  }
 0x139   :  { %v1745_v59 = vpop.permute.xlu1 %1744   ;;  %2650 = vst.msk [vmem:[%s7098_s1 + $0x10] sm:$0x1] %vm3_vm1, %v2649_v20   ;;  %2651 = vst.msk [vmem:[%s7098_s1 + $0x4f] sm:$0x2] %vm3_vm1, %v2649_v20   ;;  %v2820_v52 = vld [vmem:[%s7097_s0 + $0xa8] sm:$0xff]  }
 0x13a   :  { %3240 = vst.msk [vmem:[%s7098_s1 + $0x185] ss:$8 sm:$0xf] %vm3_vm1, %v1745_v59   ;;  %3241 = vst.msk [vmem:[%s7098_s1 + $0x1a5] ss:$8 sm:$0xf0] %vm3_vm1, %v1745_v59   ;;  %v1732_v63 = vpop.permute.xlu0 %1731  }
 0x13b   :  { %3236 = vst.msk [vmem:[%s7098_s1 + $0x105] ss:$8 sm:$0xf] %vm3_vm1, %v1732_v63   ;;  %3237 = vst.msk [vmem:[%s7098_s1 + $0x125] ss:$8 sm:$0xf0] %vm3_vm1, %v1732_v63   ;;  %2496 = vrot.lane.b32.xlu1 %v2495_v58, %s3525_s23 }
 0x13c   :  { %2483 = vrot.lane.b32.xlu0 %v2482_v60, %s3525_s23  ;;  %2652 = vst.msk [vmem:[%s7098_s1 + $0x8e] sm:$0x4] %vm3_vm1, %v2649_v20   ;;  %2653 = vst.msk [vmem:[%s7098_s1 + $0xcd] sm:$0x8] %vm3_vm1, %v2649_v20  }
 0x13d   :  { %v1771_v3 = vpop.permute.xlu1 %1770   ;;  %2654 = vst.msk [vmem:[%s7098_s1 + $0x10c] sm:$0x10] %vm3_vm1, %v2649_v20   ;;  %2655 = vst.msk [vmem:[%s7098_s1 + $0x14b] sm:$0x20] %vm3_vm1, %v2649_v20  }
 0x13e   :  { %3248 = vst.msk [vmem:[%s7098_s1 + $0xa5] ss:$8 sm:$0xf] %vm3_vm1, %v1771_v3   ;;  %3249 = vst.msk [vmem:[%s7098_s1 + $0xc5] ss:$8 sm:$0xf0] %vm3_vm1, %v1771_v3   ;;  %v1758_v7 = vpop.permute.xlu0 %1757  }
 0x13f   :  { %3244 = vst.msk [vmem:[%s7098_s1 + $0x25] ss:$8 sm:$0xf] %vm3_vm1, %v1758_v7   ;;  %3245 = vst.msk [vmem:[%s7098_s1 + $0x45] ss:$8 sm:$0xf0] %vm3_vm1, %v1758_v7   ;;  %2522 = vrot.lane.b32.xlu1 %v2521_v2, %s3525_s23 }
 0x140   :  { %2509 = vrot.lane.b32.xlu0 %v2508_v4, %s3525_s23  ;;  %2656 = vst.msk [vmem:[%s7098_s1 + $0x18a] sm:$0x40] %vm3_vm1, %v2649_v20   ;;  %2657 = vst.msk [vmem:[%s7098_s1 + $0x1c9] sm:$0x80] %vm3_vm1, %v2649_v20  }
 0x141   :  { %v1797_v13 = vpop.permute.xlu1 %1796   ;;  %v5810_v27 = vld [vmem:[%s7097_s0 + $0xa0] ss:$8 sm:$0xf]   ;;  %v5815_v28 = vld [vmem:[%s7097_s0 + $0x81] ss:$8 sm:$0xf0]  }
 0x142   :  { %3256 = vst.msk [vmem:[%s7098_s1 + $0x1a5] ss:$8 sm:$0xf] %vm3_vm1, %v1797_v13   ;;  %3257 = vst.msk [vmem:[%s7098_s1 + $0x1c5] ss:$8 sm:$0xf0] %vm3_vm1, %v1797_v13   ;;  %v1784_v17 = vpop.permute.xlu0 %1783   ;;  %v2586_v51 = vsel %vm459_vm0, %v5815_v28, %v5810_v27 }
 0x143   :  { %3252 = vst.msk [vmem:[%s7098_s1 + $0x125] ss:$8 sm:$0xf] %vm3_vm1, %v1784_v17   ;;  %3253 = vst.msk [vmem:[%s7098_s1 + $0x145] ss:$8 sm:$0xf0] %vm3_vm1, %v1784_v17   ;;  %2548 = vrot.lane.b32.xlu1 %v2547_v10, %s3525_s23 }
 0x144   :  { %2535 = vrot.lane.b32.xlu0 %v2534_v14, %s3525_s23  ;;  %2659 = vst.msk [vmem:[%s7098_s1 + $0x18] sm:$0x1] %vm3_vm1, %v2658_v23   ;;  %2660 = vst.msk [vmem:[%s7098_s1 + $0x57] sm:$0x2] %vm3_vm1, %v2658_v23  }
 0x145   :  { %2661 = vst.msk [vmem:[%s7098_s1 + $0x96] sm:$0x4] %vm3_vm1, %v2658_v23   ;;  %2662 = vst.msk [vmem:[%s7098_s1 + $0xd5] sm:$0x8] %vm3_vm1, %v2658_v23   ;;  %v1823_v32 = vpop.permute.xlu1 %1822  }
 0x146   :  { %2663 = vst.msk [vmem:[%s7098_s1 + $0x114] sm:$0x10] %vm3_vm1, %v2658_v23   ;;  %2664 = vst.msk [vmem:[%s7098_s1 + $0x153] sm:$0x20] %vm3_vm1, %v2658_v23   ;;  %v1810_v37 = vpop.permute.xlu0 %1809  }
 0x147   :  { %2665 = vst.msk [vmem:[%s7098_s1 + $0x192] sm:$0x40] %vm3_vm1, %v2658_v23   ;;  %2666 = vst.msk [vmem:[%s7098_s1 + $0x1d1] sm:$0x80] %vm3_vm1, %v2658_v23   ;;  %2574 = vrot.lane.b32.xlu1 %v5805_v26, %s3525_s23 }
 0x148   :  { %2691 = vst.msk [vmem:[%s7098_s1 + $0x16b] sm:$0x20] %vm3_vm1, %v2685_v29   ;;  %2692 = vst.msk [vmem:[%s7098_s1 + $0x1aa] sm:$0x40] %vm3_vm1, %v2685_v29   ;;  %2561 = vrot.lane.b32.xlu0 %v5925_v33, %s3525_s23 }
 0x149   :  { %2693 = vst.msk [vmem:[%s7098_s1 + $0x1e9] sm:$0x80] %vm3_vm1, %v2685_v29   ;;  %2695 = vst.msk [vmem:[%s7098_s1 + $0x38] sm:$0x1] %vm3_vm1, %v2694_v30   ;;  %v1849_v50 = vpop.permute.xlu1 %1848  }
 0x14a   :  { %2696 = vst.msk [vmem:[%s7098_s1 + $0x77] sm:$0x2] %vm3_vm1, %v2694_v30   ;;  %2697 = vst.msk [vmem:[%s7098_s1 + $0xb6] sm:$0x4] %vm3_vm1, %v2694_v30   ;;  %v1836_v55 = vpop.permute.xlu0 %1835  }
 0x14b   :  { %2698 = vst.msk [vmem:[%s7098_s1 + $0xf5] sm:$0x8] %vm3_vm1, %v2694_v30   ;;  %2699 = vst.msk [vmem:[%s7098_s1 + $0x134] sm:$0x10] %vm3_vm1, %v2694_v30   ;;  %2600 = vrot.lane.b32.xlu1 %v6275_v46, %s3525_s23 }
 0x14c   :  { %2700 = vst.msk [vmem:[%s7098_s1 + $0x173] sm:$0x20] %vm3_vm1, %v2694_v30   ;;  %2701 = vst.msk [vmem:[%s7098_s1 + $0x1b2] sm:$0x40] %vm3_vm1, %v2694_v30   ;;  %2587 = vrot.lane.b32.xlu0 %v2586_v51, %s3525_s23 }
 0x14d   :  { %2702 = vst.msk [vmem:[%s7098_s1 + $0x1f1] sm:$0x80] %vm3_vm1, %v2694_v30   ;;  %2704 = vst.msk [vmem:[%s7098_s1 + $0x200] sm:$0x1] %vm3_vm1, %v2703_v31   ;;  %v1875_v59 = vpop.permute.xlu1 %1874  }
 0x14e   :  { %2705 = vst.msk [vmem:[%s7098_s1 + $0x23f] sm:$0x2] %vm3_vm1, %v2703_v31   ;;  %2706 = vst.msk [vmem:[%s7098_s1 + $0x27e] sm:$0x4] %vm3_vm1, %v2703_v31   ;;  %v1862_v61 = vpop.permute.xlu0 %1861  }
 0x14f   :  { %2707 = vst.msk [vmem:[%s7098_s1 + $0x2bd] sm:$0x8] %vm3_vm1, %v2703_v31   ;;  %2708 = vst.msk [vmem:[%s7098_s1 + $0x2fc] sm:$0x10] %vm3_vm1, %v2703_v31  }
 0x150   :  { %2709 = vst.msk [vmem:[%s7098_s1 + $0x33b] sm:$0x20] %vm3_vm1, %v2703_v31   ;;  %2710 = vst.msk [vmem:[%s7098_s1 + $0x37a] sm:$0x40] %vm3_vm1, %v2703_v31  }
 0x151   :  { %2711 = vst.msk [vmem:[%s7098_s1 + $0x3b9] sm:$0x80] %vm3_vm1, %v2703_v31   ;;  %3264 = vst.msk [vmem:[%s7098_s1 + $0x285] ss:$8 sm:$0xf] %vm3_vm1, %v1823_v32   ;;  %v1901_v62 = vpop.permute.xlu1 %1900  }
 0x152   :  { %3265 = vst.msk [vmem:[%s7098_s1 + $0x2a5] ss:$8 sm:$0xf0] %vm3_vm1, %v1823_v32   ;;  %2713 = vst.msk [vmem:[%s7098_s1 + $0x208] sm:$0x1] %vm3_vm1, %v2712_v34   ;;  %v1888_v63 = vpop.permute.xlu0 %1887  }
 0x153   :  { %2714 = vst.msk [vmem:[%s7098_s1 + $0x247] sm:$0x2] %vm3_vm1, %v2712_v34   ;;  %2715 = vst.msk [vmem:[%s7098_s1 + $0x286] sm:$0x4] %vm3_vm1, %v2712_v34  }
 0x154   :  { %2716 = vst.msk [vmem:[%s7098_s1 + $0x2c5] sm:$0x8] %vm3_vm1, %v2712_v34   ;;  %2717 = vst.msk [vmem:[%s7098_s1 + $0x304] sm:$0x10] %vm3_vm1, %v2712_v34  }
 0x155   :  { %2718 = vst.msk [vmem:[%s7098_s1 + $0x343] sm:$0x20] %vm3_vm1, %v2712_v34   ;;  %2719 = vst.msk [vmem:[%s7098_s1 + $0x382] sm:$0x40] %vm3_vm1, %v2712_v34   ;;  %v1927_v0 = vpop.permute.xlu1 %1926  }
 0x156   :  { %2720 = vst.msk [vmem:[%s7098_s1 + $0x3c1] sm:$0x80] %vm3_vm1, %v2712_v34   ;;  %2722 = vst.msk [vmem:[%s7098_s1 + $0x210] sm:$0x1] %vm3_vm1, %v2721_v35   ;;  %v1914_v1 = vpop.permute.xlu0 %1913  }
 0x157   :  { %2723 = vst.msk [vmem:[%s7098_s1 + $0x24f] sm:$0x2] %vm3_vm1, %v2721_v35   ;;  %2724 = vst.msk [vmem:[%s7098_s1 + $0x28e] sm:$0x4] %vm3_vm1, %v2721_v35  }
 0x158   :  { %2725 = vst.msk [vmem:[%s7098_s1 + $0x2cd] sm:$0x8] %vm3_vm1, %v2721_v35   ;;  %2726 = vst.msk [vmem:[%s7098_s1 + $0x30c] sm:$0x10] %vm3_vm1, %v2721_v35  }
 0x159   :  { %2727 = vst.msk [vmem:[%s7098_s1 + $0x34b] sm:$0x20] %vm3_vm1, %v2721_v35   ;;  %2728 = vst.msk [vmem:[%s7098_s1 + $0x38a] sm:$0x40] %vm3_vm1, %v2721_v35   ;;  %v1953_v2 = vpop.permute.xlu1 %1952  }
 0x15a   :  { %2729 = vst.msk [vmem:[%s7098_s1 + $0x3c9] sm:$0x80] %vm3_vm1, %v2721_v35   ;;  %2731 = vst.msk [vmem:[%s7098_s1 + $0x218] sm:$0x1] %vm3_vm1, %v2730_v36   ;;  %v1940_v3 = vpop.permute.xlu0 %1939  }
 0x15b   :  { %2732 = vst.msk [vmem:[%s7098_s1 + $0x257] sm:$0x2] %vm3_vm1, %v2730_v36   ;;  %2733 = vst.msk [vmem:[%s7098_s1 + $0x296] sm:$0x4] %vm3_vm1, %v2730_v36  }
 0x15c   :  { %2734 = vst.msk [vmem:[%s7098_s1 + $0x2d5] sm:$0x8] %vm3_vm1, %v2730_v36   ;;  %2735 = vst.msk [vmem:[%s7098_s1 + $0x314] sm:$0x10] %vm3_vm1, %v2730_v36  }
 0x15d   :  { %2736 = vst.msk [vmem:[%s7098_s1 + $0x353] sm:$0x20] %vm3_vm1, %v2730_v36   ;;  %2737 = vst.msk [vmem:[%s7098_s1 + $0x392] sm:$0x40] %vm3_vm1, %v2730_v36   ;;  %v1979_v4 = vpop.permute.xlu1 %1978  }
 0x15e   :  { %2738 = vst.msk [vmem:[%s7098_s1 + $0x3d1] sm:$0x80] %vm3_vm1, %v2730_v36   ;;  %3260 = vst.msk [vmem:[%s7098_s1 + $0x205] ss:$8 sm:$0xf] %vm3_vm1, %v1810_v37   ;;  %v1966_v5 = vpop.permute.xlu0 %1965  }
 0x15f   :  { %3261 = vst.msk [vmem:[%s7098_s1 + $0x225] ss:$8 sm:$0xf0] %vm3_vm1, %v1810_v37   ;;  %v6158_v41 = vld [vmem:[%s7097_s0 + $0xa6] ss:$8 sm:$0xf]  }
 0x160   :  { %v6163_v42 = vld [vmem:[%s7097_s0 + $0x87] ss:$8 sm:$0xf0]   ;;  %2740 = vst.msk [vmem:[%s7098_s1 + $0x220] sm:$0x1] %vm3_vm1, %v2739_v38  }
 0x161   :  { %2741 = vst.msk [vmem:[%s7098_s1 + $0x25f] sm:$0x2] %vm3_vm1, %v2739_v38   ;;  %2742 = vst.msk [vmem:[%s7098_s1 + $0x29e] sm:$0x4] %vm3_vm1, %v2739_v38   ;;  %v2625_v58 = vsel %vm459_vm0, %v6163_v42, %v6158_v41  ;;  %v2005_v6 = vpop.permute.xlu1 %2004  }
 0x162   :  { %2743 = vst.msk [vmem:[%s7098_s1 + $0x2dd] sm:$0x8] %vm3_vm1, %v2739_v38   ;;  %2744 = vst.msk [vmem:[%s7098_s1 + $0x31c] sm:$0x10] %vm3_vm1, %v2739_v38   ;;  %2626 = vrot.lane.b32.xlu1 %v2625_v58, %s3525_s23  ;;  %v1992_v7 = vpop.permute.xlu0 %1991  }
 0x163   :  { %2745 = vst.msk [vmem:[%s7098_s1 + $0x35b] sm:$0x20] %vm3_vm1, %v2739_v38   ;;  %2746 = vst.msk [vmem:[%s7098_s1 + $0x39a] sm:$0x40] %vm3_vm1, %v2739_v38  }
 0x164   :  { %2747 = vst.msk [vmem:[%s7098_s1 + $0x3d9] sm:$0x80] %vm3_vm1, %v2739_v38   ;;  %2749 = vst.msk [vmem:[%s7098_s1 + $0x228] sm:$0x1] %vm3_vm1, %v2748_v39  }
 0x165   :  { %2750 = vst.msk [vmem:[%s7098_s1 + $0x267] sm:$0x2] %vm3_vm1, %v2748_v39   ;;  %2751 = vst.msk [vmem:[%s7098_s1 + $0x2a6] sm:$0x4] %vm3_vm1, %v2748_v39   ;;  %v2030_v8 = vpop.permute.xlu1 %2029  }
 0x166   :  { %2752 = vst.msk [vmem:[%s7098_s1 + $0x2e5] sm:$0x8] %vm3_vm1, %v2748_v39   ;;  %2753 = vst.msk [vmem:[%s7098_s1 + $0x324] sm:$0x10] %vm3_vm1, %v2748_v39   ;;  %v2017_v9 = vpop.permute.xlu0 %2016  }
 0x167   :  { %2754 = vst.msk [vmem:[%s7098_s1 + $0x363] sm:$0x20] %vm3_vm1, %v2748_v39   ;;  %2755 = vst.msk [vmem:[%s7098_s1 + $0x3a2] sm:$0x40] %vm3_vm1, %v2748_v39  }
 0x168   :  { %2756 = vst.msk [vmem:[%s7098_s1 + $0x3e1] sm:$0x80] %vm3_vm1, %v2748_v39   ;;  %2758 = vst.msk [vmem:[%s7098_s1 + $0x230] sm:$0x1] %vm3_vm1, %v2757_v40  }
 0x169   :  { %2759 = vst.msk [vmem:[%s7098_s1 + $0x26f] sm:$0x2] %vm3_vm1, %v2757_v40   ;;  %2760 = vst.msk [vmem:[%s7098_s1 + $0x2ae] sm:$0x4] %vm3_vm1, %v2757_v40   ;;  %v2056_v10 = vpop.permute.xlu1 %2055  }
 0x16a   :  { %2761 = vst.msk [vmem:[%s7098_s1 + $0x2ed] sm:$0x8] %vm3_vm1, %v2757_v40   ;;  %2762 = vst.msk [vmem:[%s7098_s1 + $0x32c] sm:$0x10] %vm3_vm1, %v2757_v40   ;;  %v2043_v11 = vpop.permute.xlu0 %2042  }
 0x16b   :  { %2763 = vst.msk [vmem:[%s7098_s1 + $0x36b] sm:$0x20] %vm3_vm1, %v2757_v40   ;;  %2764 = vst.msk [vmem:[%s7098_s1 + $0x3aa] sm:$0x40] %vm3_vm1, %v2757_v40  }
 0x16c   :  { %2765 = vst.msk [vmem:[%s7098_s1 + $0x3e9] sm:$0x80] %vm3_vm1, %v2757_v40   ;;  %2767 = vst.msk [vmem:[%s7098_s1 + $0x238] sm:$0x1] %vm3_vm1, %v2766_v43  }
 0x16d   :  { %2768 = vst.msk [vmem:[%s7098_s1 + $0x277] sm:$0x2] %vm3_vm1, %v2766_v43   ;;  %2769 = vst.msk [vmem:[%s7098_s1 + $0x2b6] sm:$0x4] %vm3_vm1, %v2766_v43   ;;  %v2082_v12 = vpop.permute.xlu1 %2081  }
 0x16e   :  { %2770 = vst.msk [vmem:[%s7098_s1 + $0x2f5] sm:$0x8] %vm3_vm1, %v2766_v43   ;;  %2771 = vst.msk [vmem:[%s7098_s1 + $0x334] sm:$0x10] %vm3_vm1, %v2766_v43   ;;  %v2069_v13 = vpop.permute.xlu0 %2068  }
 0x16f   :  { %2772 = vst.msk [vmem:[%s7098_s1 + $0x373] sm:$0x20] %vm3_vm1, %v2766_v43   ;;  %2773 = vst.msk [vmem:[%s7098_s1 + $0x3b2] sm:$0x40] %vm3_vm1, %v2766_v43  }
 0x170   :  { %2774 = vst.msk [vmem:[%s7098_s1 + $0x3f1] sm:$0x80] %vm3_vm1, %v2766_v43   ;;  %2776 = vst.msk [vmem:[%s7098_s1 + $0x400] sm:$0x1] %vm3_vm1, %v2775_v44  }
 0x171   :  { %2777 = vst.msk [vmem:[%s7098_s1 + $0x43f] sm:$0x2] %vm3_vm1, %v2775_v44   ;;  %2778 = vst.msk [vmem:[%s7098_s1 + $0x47e] sm:$0x4] %vm3_vm1, %v2775_v44   ;;  %v2108_v14 = vpop.permute.xlu1 %2107  }
 0x172   :  { %2779 = vst.msk [vmem:[%s7098_s1 + $0x4bd] sm:$0x8] %vm3_vm1, %v2775_v44   ;;  %2780 = vst.msk [vmem:[%s7098_s1 + $0x4fc] sm:$0x10] %vm3_vm1, %v2775_v44   ;;  %v2095_v15 = vpop.permute.xlu0 %2094  }
 0x173   :  { %2781 = vst.msk [vmem:[%s7098_s1 + $0x53b] sm:$0x20] %vm3_vm1, %v2775_v44   ;;  %2782 = vst.msk [vmem:[%s7098_s1 + $0x57a] sm:$0x40] %vm3_vm1, %v2775_v44  }
 0x174   :  { %2783 = vst.msk [vmem:[%s7098_s1 + $0x5b9] sm:$0x80] %vm3_vm1, %v2775_v44   ;;  %2785 = vst.msk [vmem:[%s7098_s1 + $0x408] sm:$0x1] %vm3_vm1, %v2784_v45  }
 0x175   :  { %2786 = vst.msk [vmem:[%s7098_s1 + $0x447] sm:$0x2] %vm3_vm1, %v2784_v45   ;;  %2787 = vst.msk [vmem:[%s7098_s1 + $0x486] sm:$0x4] %vm3_vm1, %v2784_v45   ;;  %v2134_v16 = vpop.permute.xlu1 %2133  }
 0x176   :  { %2788 = vst.msk [vmem:[%s7098_s1 + $0x4c5] sm:$0x8] %vm3_vm1, %v2784_v45   ;;  %2789 = vst.msk [vmem:[%s7098_s1 + $0x504] sm:$0x10] %vm3_vm1, %v2784_v45   ;;  %v2121_v17 = vpop.permute.xlu0 %2120  }
 0x177   :  { %2790 = vst.msk [vmem:[%s7098_s1 + $0x543] sm:$0x20] %vm3_vm1, %v2784_v45   ;;  %2791 = vst.msk [vmem:[%s7098_s1 + $0x582] sm:$0x40] %vm3_vm1, %v2784_v45  }
 0x178   :  { %2792 = vst.msk [vmem:[%s7098_s1 + $0x5c1] sm:$0x80] %vm3_vm1, %v2784_v45   ;;  %2794 = vst.msk [vmem:[%s7098_s1 + $0x410] sm:$0x1] %vm3_vm1, %v2793_v47  }
 0x179   :  { %2795 = vst.msk [vmem:[%s7098_s1 + $0x44f] sm:$0x2] %vm3_vm1, %v2793_v47   ;;  %2796 = vst.msk [vmem:[%s7098_s1 + $0x48e] sm:$0x4] %vm3_vm1, %v2793_v47   ;;  %v2160_v18 = vpop.permute.xlu1 %2159  }
 0x17a   :  { %2797 = vst.msk [vmem:[%s7098_s1 + $0x4cd] sm:$0x8] %vm3_vm1, %v2793_v47   ;;  %2798 = vst.msk [vmem:[%s7098_s1 + $0x50c] sm:$0x10] %vm3_vm1, %v2793_v47   ;;  %v2147_v19 = vpop.permute.xlu0 %2146  }
 0x17b   :  { %2799 = vst.msk [vmem:[%s7098_s1 + $0x54b] sm:$0x20] %vm3_vm1, %v2793_v47   ;;  %2800 = vst.msk [vmem:[%s7098_s1 + $0x58a] sm:$0x40] %vm3_vm1, %v2793_v47  }
 0x17c   :  { %2801 = vst.msk [vmem:[%s7098_s1 + $0x5c9] sm:$0x80] %vm3_vm1, %v2793_v47   ;;  %2803 = vst.msk [vmem:[%s7098_s1 + $0x418] sm:$0x1] %vm3_vm1, %v2802_v48  }
 0x17d   :  { %2804 = vst.msk [vmem:[%s7098_s1 + $0x457] sm:$0x2] %vm3_vm1, %v2802_v48   ;;  %2805 = vst.msk [vmem:[%s7098_s1 + $0x496] sm:$0x4] %vm3_vm1, %v2802_v48   ;;  %v2186_v20 = vpop.permute.xlu1 %2185  }
 0x17e   :  { %2806 = vst.msk [vmem:[%s7098_s1 + $0x4d5] sm:$0x8] %vm3_vm1, %v2802_v48   ;;  %2807 = vst.msk [vmem:[%s7098_s1 + $0x514] sm:$0x10] %vm3_vm1, %v2802_v48   ;;  %v2173_v21 = vpop.permute.xlu0 %2172  }
 0x17f   :  { %2808 = vst.msk [vmem:[%s7098_s1 + $0x553] sm:$0x20] %vm3_vm1, %v2802_v48   ;;  %2809 = vst.msk [vmem:[%s7098_s1 + $0x592] sm:$0x40] %vm3_vm1, %v2802_v48  }
 0x180   :  { %2810 = vst.msk [vmem:[%s7098_s1 + $0x5d1] sm:$0x80] %vm3_vm1, %v2802_v48   ;;  %2812 = vst.msk [vmem:[%s7098_s1 + $0x420] sm:$0x1] %vm3_vm1, %v2811_v49  }
 0x181   :  { %2813 = vst.msk [vmem:[%s7098_s1 + $0x45f] sm:$0x2] %vm3_vm1, %v2811_v49   ;;  %2814 = vst.msk [vmem:[%s7098_s1 + $0x49e] sm:$0x4] %vm3_vm1, %v2811_v49   ;;  %v2212_v22 = vpop.permute.xlu1 %2211  }
 0x182   :  { %2815 = vst.msk [vmem:[%s7098_s1 + $0x4dd] sm:$0x8] %vm3_vm1, %v2811_v49   ;;  %2816 = vst.msk [vmem:[%s7098_s1 + $0x51c] sm:$0x10] %vm3_vm1, %v2811_v49   ;;  %v2199_v23 = vpop.permute.xlu0 %2198  }
 0x183   :  { %2817 = vst.msk [vmem:[%s7098_s1 + $0x55b] sm:$0x20] %vm3_vm1, %v2811_v49   ;;  %2818 = vst.msk [vmem:[%s7098_s1 + $0x59a] sm:$0x40] %vm3_vm1, %v2811_v49  }
 0x184   :  { %2819 = vst.msk [vmem:[%s7098_s1 + $0x5d9] sm:$0x80] %vm3_vm1, %v2811_v49   ;;  %3272 = vst.msk [vmem:[%s7098_s1 + $0x385] ss:$8 sm:$0xf] %vm3_vm1, %v1849_v50  }
 0x185   :  { %3273 = vst.msk [vmem:[%s7098_s1 + $0x3a5] ss:$8 sm:$0xf0] %vm3_vm1, %v1849_v50   ;;  %v3504_v56 = vld [vmem:[%s7097_s0 + $0xa4] ss:$8 sm:$0xf]   ;;  %v2238_v24 = vpop.permute.xlu1 %2237  }
 0x186   :  { %v3505_v57 = vld [vmem:[%s7097_s0 + $0x85] ss:$8 sm:$0xf0]   ;;  %2821 = vst.msk [vmem:[%s7098_s1 + $0x428] sm:$0x1] %vm3_vm1, %v2820_v52   ;;  %v2225_v25 = vpop.permute.xlu0 %2224  }
 0x187   :  { %2822 = vst.msk [vmem:[%s7098_s1 + $0x467] sm:$0x2] %vm3_vm1, %v2820_v52   ;;  %2823 = vst.msk [vmem:[%s7098_s1 + $0x4a6] sm:$0x4] %vm3_vm1, %v2820_v52   ;;  %v2612_v60 = vsel %vm459_vm0, %v3505_v57, %v3504_v56 }
 0x188   :  { %2824 = vst.msk [vmem:[%s7098_s1 + $0x4e5] sm:$0x8] %vm3_vm1, %v2820_v52   ;;  %2825 = vst.msk [vmem:[%s7098_s1 + $0x524] sm:$0x10] %vm3_vm1, %v2820_v52   ;;  %2613 = vrot.lane.b32.xlu0 %v2612_v60, %s3525_s23 }
 0x189   :  { %2826 = vst.msk [vmem:[%s7098_s1 + $0x563] sm:$0x20] %vm3_vm1, %v2820_v52   ;;  %2827 = vst.msk [vmem:[%s7098_s1 + $0x5a2] sm:$0x40] %vm3_vm1, %v2820_v52   ;;  %v2264_v26 = vpop.permute.xlu1 %2263  }
 0x18a   :  { %2828 = vst.msk [vmem:[%s7098_s1 + $0x5e1] sm:$0x80] %vm3_vm1, %v2820_v52   ;;  %2830 = vst.msk [vmem:[%s7098_s1 + $0x430] sm:$0x1] %vm3_vm1, %v2829_v53   ;;  %v2251_v27 = vpop.permute.xlu0 %2250  }
 0x18b   :  { %2831 = vst.msk [vmem:[%s7098_s1 + $0x46f] sm:$0x2] %vm3_vm1, %v2829_v53   ;;  %2832 = vst.msk [vmem:[%s7098_s1 + $0x4ae] sm:$0x4] %vm3_vm1, %v2829_v53  }
 0x18c   :  { %2833 = vst.msk [vmem:[%s7098_s1 + $0x4ed] sm:$0x8] %vm3_vm1, %v2829_v53   ;;  %2834 = vst.msk [vmem:[%s7098_s1 + $0x52c] sm:$0x10] %vm3_vm1, %v2829_v53  }
 0x18d   :  { %2835 = vst.msk [vmem:[%s7098_s1 + $0x56b] sm:$0x20] %vm3_vm1, %v2829_v53   ;;  %2836 = vst.msk [vmem:[%s7098_s1 + $0x5aa] sm:$0x40] %vm3_vm1, %v2829_v53   ;;  %v2290_v28 = vpop.permute.xlu1 %2289  }
 0x18e   :  { %2837 = vst.msk [vmem:[%s7098_s1 + $0x5e9] sm:$0x80] %vm3_vm1, %v2829_v53   ;;  %2839 = vst.msk [vmem:[%s7098_s1 + $0x438] sm:$0x1] %vm3_vm1, %v2838_v54   ;;  %v2277_v29 = vpop.permute.xlu0 %2276  }
 0x18f   :  { %2840 = vst.msk [vmem:[%s7098_s1 + $0x477] sm:$0x2] %vm3_vm1, %v2838_v54   ;;  %2841 = vst.msk [vmem:[%s7098_s1 + $0x4b6] sm:$0x4] %vm3_vm1, %v2838_v54  }
 0x190   :  { %2842 = vst.msk [vmem:[%s7098_s1 + $0x4f5] sm:$0x8] %vm3_vm1, %v2838_v54   ;;  %2843 = vst.msk [vmem:[%s7098_s1 + $0x534] sm:$0x10] %vm3_vm1, %v2838_v54  }
 0x191   :  { %2844 = vst.msk [vmem:[%s7098_s1 + $0x573] sm:$0x20] %vm3_vm1, %v2838_v54   ;;  %2845 = vst.msk [vmem:[%s7098_s1 + $0x5b2] sm:$0x40] %vm3_vm1, %v2838_v54   ;;  %v2316_v30 = vpop.permute.xlu1 %2315  }
 0x192   :  { %2846 = vst.msk [vmem:[%s7098_s1 + $0x5f1] sm:$0x80] %vm3_vm1, %v2838_v54   ;;  %3268 = vst.msk [vmem:[%s7098_s1 + $0x305] ss:$8 sm:$0xf] %vm3_vm1, %v1836_v55   ;;  %v2303_v31 = vpop.permute.xlu0 %2302  }
 0x193   :  { %3269 = vst.msk [vmem:[%s7098_s1 + $0x325] ss:$8 sm:$0xf0] %vm3_vm1, %v1836_v55   ;;  %3280 = vst.msk [vmem:[%s7098_s1 + $0x2a5] ss:$8 sm:$0xf] %vm3_vm1, %v1875_v59  }
 0x194   :  { %3281 = vst.msk [vmem:[%s7098_s1 + $0x2c5] ss:$8 sm:$0xf0] %vm3_vm1, %v1875_v59   ;;  %3276 = vst.msk [vmem:[%s7098_s1 + $0x225] ss:$8 sm:$0xf] %vm3_vm1, %v1862_v61  }
 0x195   :  { %3277 = vst.msk [vmem:[%s7098_s1 + $0x245] ss:$8 sm:$0xf0] %vm3_vm1, %v1862_v61   ;;  %3288 = vst.msk [vmem:[%s7098_s1 + $0x3a5] ss:$8 sm:$0xf] %vm3_vm1, %v1901_v62   ;;  %v2341_v32 = vpop.permute.xlu1 %2340  }
 0x196   :  { %3289 = vst.msk [vmem:[%s7098_s1 + $0x3c5] ss:$8 sm:$0xf0] %vm3_vm1, %v1901_v62   ;;  %3284 = vst.msk [vmem:[%s7098_s1 + $0x325] ss:$8 sm:$0xf] %vm3_vm1, %v1888_v63   ;;  %v2328_v33 = vpop.permute.xlu0 %2327  }
 0x197   :  { %3285 = vst.msk [vmem:[%s7098_s1 + $0x345] ss:$8 sm:$0xf0] %vm3_vm1, %v1888_v63   ;;  %3296 = vst.msk [vmem:[%s7098_s1 + $0x485] ss:$8 sm:$0xf] %vm3_vm1, %v1927_v0  }
 0x198   :  { %3297 = vst.msk [vmem:[%s7098_s1 + $0x4a5] ss:$8 sm:$0xf0] %vm3_vm1, %v1927_v0   ;;  %3292 = vst.msk [vmem:[%s7098_s1 + $0x405] ss:$8 sm:$0xf] %vm3_vm1, %v1914_v1  }
 0x199   :  { %3293 = vst.msk [vmem:[%s7098_s1 + $0x425] ss:$8 sm:$0xf0] %vm3_vm1, %v1914_v1   ;;  %3304 = vst.msk [vmem:[%s7098_s1 + $0x585] ss:$8 sm:$0xf] %vm3_vm1, %v1953_v2   ;;  %v2367_v34 = vpop.permute.xlu1 %2366  }
 0x19a   :  { %3305 = vst.msk [vmem:[%s7098_s1 + $0x5a5] ss:$8 sm:$0xf0] %vm3_vm1, %v1953_v2   ;;  %3300 = vst.msk [vmem:[%s7098_s1 + $0x505] ss:$8 sm:$0xf] %vm3_vm1, %v1940_v3   ;;  %v2354_v35 = vpop.permute.xlu0 %2353  }
 0x19b   :  { %3301 = vst.msk [vmem:[%s7098_s1 + $0x525] ss:$8 sm:$0xf0] %vm3_vm1, %v1940_v3   ;;  %3312 = vst.msk [vmem:[%s7098_s1 + $0x4a5] ss:$8 sm:$0xf] %vm3_vm1, %v1979_v4  }
 0x19c   :  { %3313 = vst.msk [vmem:[%s7098_s1 + $0x4c5] ss:$8 sm:$0xf0] %vm3_vm1, %v1979_v4   ;;  %3308 = vst.msk [vmem:[%s7098_s1 + $0x425] ss:$8 sm:$0xf] %vm3_vm1, %v1966_v5  }
 0x19d   :  { %3309 = vst.msk [vmem:[%s7098_s1 + $0x445] ss:$8 sm:$0xf0] %vm3_vm1, %v1966_v5   ;;  %3320 = vst.msk [vmem:[%s7098_s1 + $0x5a5] ss:$8 sm:$0xf] %vm3_vm1, %v2005_v6   ;;  %v2393_v36 = vpop.permute.xlu1 %2392  }
 0x19e   :  { %3321 = vst.msk [vmem:[%s7098_s1 + $0x5c5] ss:$8 sm:$0xf0] %vm3_vm1, %v2005_v6   ;;  %3316 = vst.msk [vmem:[%s7098_s1 + $0x525] ss:$8 sm:$0xf] %vm3_vm1, %v1992_v7   ;;  %v2380_v37 = vpop.permute.xlu0 %2379  }
 0x19f   :  { %3317 = vst.msk [vmem:[%s7098_s1 + $0x545] ss:$8 sm:$0xf0] %vm3_vm1, %v1992_v7   ;;  %3327 = vst.msk [vmem:[%s7098_s1 + $0x86] ss:$8 sm:$0xf] %vm3_vm1, %v2030_v8  }
 0x1a0   :  { %3328 = vst.msk [vmem:[%s7098_s1 + $0xa6] ss:$8 sm:$0xf0] %vm3_vm1, %v2030_v8   ;;  %3323 = vst.msk [vmem:[%s7098_s1 + $0x6] ss:$8 sm:$0xf] %vm3_vm1, %v2017_v9  }
 0x1a1   :  { %3324 = vst.msk [vmem:[%s7098_s1 + $0x26] ss:$8 sm:$0xf0] %vm3_vm1, %v2017_v9   ;;  %3335 = vst.msk [vmem:[%s7098_s1 + $0x186] ss:$8 sm:$0xf] %vm3_vm1, %v2056_v10   ;;  %v2419_v38 = vpop.permute.xlu1 %2418  }
 0x1a2   :  { %3336 = vst.msk [vmem:[%s7098_s1 + $0x1a6] ss:$8 sm:$0xf0] %vm3_vm1, %v2056_v10   ;;  %3331 = vst.msk [vmem:[%s7098_s1 + $0x106] ss:$8 sm:$0xf] %vm3_vm1, %v2043_v11   ;;  %v2406_v39 = vpop.permute.xlu0 %2405  }
 0x1a3   :  { %3332 = vst.msk [vmem:[%s7098_s1 + $0x126] ss:$8 sm:$0xf0] %vm3_vm1, %v2043_v11   ;;  %3343 = vst.msk [vmem:[%s7098_s1 + $0xa6] ss:$8 sm:$0xf] %vm3_vm1, %v2082_v12  }
 0x1a4   :  { %3344 = vst.msk [vmem:[%s7098_s1 + $0xc6] ss:$8 sm:$0xf0] %vm3_vm1, %v2082_v12   ;;  %3339 = vst.msk [vmem:[%s7098_s1 + $0x26] ss:$8 sm:$0xf] %vm3_vm1, %v2069_v13  }
 0x1a5   :  { %3340 = vst.msk [vmem:[%s7098_s1 + $0x46] ss:$8 sm:$0xf0] %vm3_vm1, %v2069_v13   ;;  %3351 = vst.msk [vmem:[%s7098_s1 + $0x1a6] ss:$8 sm:$0xf] %vm3_vm1, %v2108_v14   ;;  %v2445_v40 = vpop.permute.xlu1 %2444  }
 0x1a6   :  { %3352 = vst.msk [vmem:[%s7098_s1 + $0x1c6] ss:$8 sm:$0xf0] %vm3_vm1, %v2108_v14   ;;  %3347 = vst.msk [vmem:[%s7098_s1 + $0x126] ss:$8 sm:$0xf] %vm3_vm1, %v2095_v15   ;;  %v2432_v41 = vpop.permute.xlu0 %2431  }
 0x1a7   :  { %3348 = vst.msk [vmem:[%s7098_s1 + $0x146] ss:$8 sm:$0xf0] %vm3_vm1, %v2095_v15   ;;  %3359 = vst.msk [vmem:[%s7098_s1 + $0x286] ss:$8 sm:$0xf] %vm3_vm1, %v2134_v16  }
 0x1a8   :  { %3360 = vst.msk [vmem:[%s7098_s1 + $0x2a6] ss:$8 sm:$0xf0] %vm3_vm1, %v2134_v16   ;;  %3355 = vst.msk [vmem:[%s7098_s1 + $0x206] ss:$8 sm:$0xf] %vm3_vm1, %v2121_v17  }
 0x1a9   :  { %3356 = vst.msk [vmem:[%s7098_s1 + $0x226] ss:$8 sm:$0xf0] %vm3_vm1, %v2121_v17   ;;  %3367 = vst.msk [vmem:[%s7098_s1 + $0x386] ss:$8 sm:$0xf] %vm3_vm1, %v2160_v18   ;;  %v2471_v42 = vpop.permute.xlu1 %2470  }
 0x1aa   :  { %3368 = vst.msk [vmem:[%s7098_s1 + $0x3a6] ss:$8 sm:$0xf0] %vm3_vm1, %v2160_v18   ;;  %3363 = vst.msk [vmem:[%s7098_s1 + $0x306] ss:$8 sm:$0xf] %vm3_vm1, %v2147_v19   ;;  %v2458_v43 = vpop.permute.xlu0 %2457  }
 0x1ab   :  { %3364 = vst.msk [vmem:[%s7098_s1 + $0x326] ss:$8 sm:$0xf0] %vm3_vm1, %v2147_v19   ;;  %3375 = vst.msk [vmem:[%s7098_s1 + $0x2a6] ss:$8 sm:$0xf] %vm3_vm1, %v2186_v20  }
 0x1ac   :  { %3376 = vst.msk [vmem:[%s7098_s1 + $0x2c6] ss:$8 sm:$0xf0] %vm3_vm1, %v2186_v20   ;;  %3371 = vst.msk [vmem:[%s7098_s1 + $0x226] ss:$8 sm:$0xf] %vm3_vm1, %v2173_v21  }
 0x1ad   :  { %3372 = vst.msk [vmem:[%s7098_s1 + $0x246] ss:$8 sm:$0xf0] %vm3_vm1, %v2173_v21   ;;  %3383 = vst.msk [vmem:[%s7098_s1 + $0x3a6] ss:$8 sm:$0xf] %vm3_vm1, %v2212_v22   ;;  %v2497_v44 = vpop.permute.xlu1 %2496  }
 0x1ae   :  { %3384 = vst.msk [vmem:[%s7098_s1 + $0x3c6] ss:$8 sm:$0xf0] %vm3_vm1, %v2212_v22   ;;  %3379 = vst.msk [vmem:[%s7098_s1 + $0x326] ss:$8 sm:$0xf] %vm3_vm1, %v2199_v23   ;;  %v2484_v45 = vpop.permute.xlu0 %2483  }
 0x1af   :  { %3380 = vst.msk [vmem:[%s7098_s1 + $0x346] ss:$8 sm:$0xf0] %vm3_vm1, %v2199_v23   ;;  %3391 = vst.msk [vmem:[%s7098_s1 + $0x486] ss:$8 sm:$0xf] %vm3_vm1, %v2238_v24  }
 0x1b0   :  { %3392 = vst.msk [vmem:[%s7098_s1 + $0x4a6] ss:$8 sm:$0xf0] %vm3_vm1, %v2238_v24   ;;  %3387 = vst.msk [vmem:[%s7098_s1 + $0x406] ss:$8 sm:$0xf] %vm3_vm1, %v2225_v25  }
 0x1b1   :  { %3388 = vst.msk [vmem:[%s7098_s1 + $0x426] ss:$8 sm:$0xf0] %vm3_vm1, %v2225_v25   ;;  %3399 = vst.msk [vmem:[%s7098_s1 + $0x586] ss:$8 sm:$0xf] %vm3_vm1, %v2264_v26   ;;  %v2523_v46 = vpop.permute.xlu1 %2522  }
 0x1b2   :  { %3400 = vst.msk [vmem:[%s7098_s1 + $0x5a6] ss:$8 sm:$0xf0] %vm3_vm1, %v2264_v26   ;;  %3395 = vst.msk [vmem:[%s7098_s1 + $0x506] ss:$8 sm:$0xf] %vm3_vm1, %v2251_v27   ;;  %v2510_v47 = vpop.permute.xlu0 %2509  }
 0x1b3   :  { %3396 = vst.msk [vmem:[%s7098_s1 + $0x526] ss:$8 sm:$0xf0] %vm3_vm1, %v2251_v27   ;;  %3407 = vst.msk [vmem:[%s7098_s1 + $0x4a6] ss:$8 sm:$0xf] %vm3_vm1, %v2290_v28  }
 0x1b4   :  { %3408 = vst.msk [vmem:[%s7098_s1 + $0x4c6] ss:$8 sm:$0xf0] %vm3_vm1, %v2290_v28   ;;  %3403 = vst.msk [vmem:[%s7098_s1 + $0x426] ss:$8 sm:$0xf] %vm3_vm1, %v2277_v29  }
 0x1b5   :  { %3404 = vst.msk [vmem:[%s7098_s1 + $0x446] ss:$8 sm:$0xf0] %vm3_vm1, %v2277_v29   ;;  %3415 = vst.msk [vmem:[%s7098_s1 + $0x5a6] ss:$8 sm:$0xf] %vm3_vm1, %v2316_v30   ;;  %v2549_v48 = vpop.permute.xlu1 %2548  }
 0x1b6   :  { %3416 = vst.msk [vmem:[%s7098_s1 + $0x5c6] ss:$8 sm:$0xf0] %vm3_vm1, %v2316_v30   ;;  %3411 = vst.msk [vmem:[%s7098_s1 + $0x526] ss:$8 sm:$0xf] %vm3_vm1, %v2303_v31   ;;  %v2536_v49 = vpop.permute.xlu0 %2535  }
 0x1b7   :  { %3412 = vst.msk [vmem:[%s7098_s1 + $0x546] ss:$8 sm:$0xf0] %vm3_vm1, %v2303_v31   ;;  %3422 = vst.msk [vmem:[%s7098_s1 + $0x87] ss:$8 sm:$0xf] %vm3_vm1, %v2341_v32  }
 0x1b8   :  { %3423 = vst.msk [vmem:[%s7098_s1 + $0xa7] ss:$8 sm:$0xf0] %vm3_vm1, %v2341_v32   ;;  %3418 = vst.msk [vmem:[%s7098_s1 + $0x7] ss:$8 sm:$0xf] %vm3_vm1, %v2328_v33  }
 0x1b9   :  { %3419 = vst.msk [vmem:[%s7098_s1 + $0x27] ss:$8 sm:$0xf0] %vm3_vm1, %v2328_v33   ;;  %3430 = vst.msk [vmem:[%s7098_s1 + $0x187] ss:$8 sm:$0xf] %vm3_vm1, %v2367_v34   ;;  %v2575_v50 = vpop.permute.xlu1 %2574  }
 0x1ba   :  { %3431 = vst.msk [vmem:[%s7098_s1 + $0x1a7] ss:$8 sm:$0xf0] %vm3_vm1, %v2367_v34   ;;  %3426 = vst.msk [vmem:[%s7098_s1 + $0x107] ss:$8 sm:$0xf] %vm3_vm1, %v2354_v35   ;;  %v2562_v51 = vpop.permute.xlu0 %2561  }
 0x1bb   :  { %3427 = vst.msk [vmem:[%s7098_s1 + $0x127] ss:$8 sm:$0xf0] %vm3_vm1, %v2354_v35   ;;  %3438 = vst.msk [vmem:[%s7098_s1 + $0xa7] ss:$8 sm:$0xf] %vm3_vm1, %v2393_v36  }
 0x1bc   :  { %3439 = vst.msk [vmem:[%s7098_s1 + $0xc7] ss:$8 sm:$0xf0] %vm3_vm1, %v2393_v36   ;;  %3434 = vst.msk [vmem:[%s7098_s1 + $0x27] ss:$8 sm:$0xf] %vm3_vm1, %v2380_v37  }
 0x1bd   :  { %3435 = vst.msk [vmem:[%s7098_s1 + $0x47] ss:$8 sm:$0xf0] %vm3_vm1, %v2380_v37   ;;  %3446 = vst.msk [vmem:[%s7098_s1 + $0x1a7] ss:$8 sm:$0xf] %vm3_vm1, %v2419_v38   ;;  %v2601_v52 = vpop.permute.xlu1 %2600  }
 0x1be   :  { %3447 = vst.msk [vmem:[%s7098_s1 + $0x1c7] ss:$8 sm:$0xf0] %vm3_vm1, %v2419_v38   ;;  %3442 = vst.msk [vmem:[%s7098_s1 + $0x127] ss:$8 sm:$0xf] %vm3_vm1, %v2406_v39   ;;  %v2588_v53 = vpop.permute.xlu0 %2587  }
 0x1bf   :  { %3443 = vst.msk [vmem:[%s7098_s1 + $0x147] ss:$8 sm:$0xf0] %vm3_vm1, %v2406_v39   ;;  %3454 = vst.msk [vmem:[%s7098_s1 + $0x287] ss:$8 sm:$0xf] %vm3_vm1, %v2445_v40  }
 0x1c0   :  { %3455 = vst.msk [vmem:[%s7098_s1 + $0x2a7] ss:$8 sm:$0xf0] %vm3_vm1, %v2445_v40   ;;  %3450 = vst.msk [vmem:[%s7098_s1 + $0x207] ss:$8 sm:$0xf] %vm3_vm1, %v2432_v41  }
 0x1c1   :  { %3451 = vst.msk [vmem:[%s7098_s1 + $0x227] ss:$8 sm:$0xf0] %vm3_vm1, %v2432_v41   ;;  %3462 = vst.msk [vmem:[%s7098_s1 + $0x387] ss:$8 sm:$0xf] %vm3_vm1, %v2471_v42  }
 0x1c2   :  { %3463 = vst.msk [vmem:[%s7098_s1 + $0x3a7] ss:$8 sm:$0xf0] %vm3_vm1, %v2471_v42   ;;  %3458 = vst.msk [vmem:[%s7098_s1 + $0x307] ss:$8 sm:$0xf] %vm3_vm1, %v2458_v43  }
 0x1c3   :  { %3459 = vst.msk [vmem:[%s7098_s1 + $0x327] ss:$8 sm:$0xf0] %vm3_vm1, %v2458_v43   ;;  %3470 = vst.msk [vmem:[%s7098_s1 + $0x2a7] ss:$8 sm:$0xf] %vm3_vm1, %v2497_v44  }
 0x1c4   :  { %3471 = vst.msk [vmem:[%s7098_s1 + $0x2c7] ss:$8 sm:$0xf0] %vm3_vm1, %v2497_v44   ;;  %3466 = vst.msk [vmem:[%s7098_s1 + $0x227] ss:$8 sm:$0xf] %vm3_vm1, %v2484_v45  }
 0x1c5   :  { %3467 = vst.msk [vmem:[%s7098_s1 + $0x247] ss:$8 sm:$0xf0] %vm3_vm1, %v2484_v45   ;;  %3478 = vst.msk [vmem:[%s7098_s1 + $0x3a7] ss:$8 sm:$0xf] %vm3_vm1, %v2523_v46  }
 0x1c6   :  { %3479 = vst.msk [vmem:[%s7098_s1 + $0x3c7] ss:$8 sm:$0xf0] %vm3_vm1, %v2523_v46   ;;  %3474 = vst.msk [vmem:[%s7098_s1 + $0x327] ss:$8 sm:$0xf] %vm3_vm1, %v2510_v47  }
 0x1c7   :  { %3475 = vst.msk [vmem:[%s7098_s1 + $0x347] ss:$8 sm:$0xf0] %vm3_vm1, %v2510_v47   ;;  %3486 = vst.msk [vmem:[%s7098_s1 + $0x487] ss:$8 sm:$0xf] %vm3_vm1, %v2549_v48  }
 0x1c8   :  { %3487 = vst.msk [vmem:[%s7098_s1 + $0x4a7] ss:$8 sm:$0xf0] %vm3_vm1, %v2549_v48   ;;  %3482 = vst.msk [vmem:[%s7098_s1 + $0x407] ss:$8 sm:$0xf] %vm3_vm1, %v2536_v49  }
 0x1c9   :  { %3483 = vst.msk [vmem:[%s7098_s1 + $0x427] ss:$8 sm:$0xf0] %vm3_vm1, %v2536_v49   ;;  %3494 = vst.msk [vmem:[%s7098_s1 + $0x587] ss:$8 sm:$0xf] %vm3_vm1, %v2575_v50  }
 0x1ca   :  { %3495 = vst.msk [vmem:[%s7098_s1 + $0x5a7] ss:$8 sm:$0xf0] %vm3_vm1, %v2575_v50   ;;  %3490 = vst.msk [vmem:[%s7098_s1 + $0x507] ss:$8 sm:$0xf] %vm3_vm1, %v2562_v51  }
 0x1cb   :  { %3491 = vst.msk [vmem:[%s7098_s1 + $0x527] ss:$8 sm:$0xf0] %vm3_vm1, %v2562_v51   ;;  %3502 = vst.msk [vmem:[%s7098_s1 + $0x4a7] ss:$8 sm:$0xf] %vm3_vm1, %v2601_v52  }
 0x1cc   :  { %3503 = vst.msk [vmem:[%s7098_s1 + $0x4c7] ss:$8 sm:$0xf0] %vm3_vm1, %v2601_v52   ;;  %3498 = vst.msk [vmem:[%s7098_s1 + $0x427] ss:$8 sm:$0xf] %vm3_vm1, %v2588_v53  }
 0x1cd   :  { %3499 = vst.msk [vmem:[%s7098_s1 + $0x447] ss:$8 sm:$0xf0] %vm3_vm1, %v2588_v53  }
 0x1d4   :  { %v2627_v54 = vpop.permute.xlu1 %2626  }
 0x1d5   :  { %3510 = vst.msk [vmem:[%s7098_s1 + $0x5a7] ss:$8 sm:$0xf] %vm3_vm1, %v2627_v54   ;;  %3511 = vst.msk [vmem:[%s7098_s1 + $0x5c7] ss:$8 sm:$0xf0] %vm3_vm1, %v2627_v54  }
 0x1fa   :  { %v2614_v55 = vpop.permute.xlu0 %2613  }
 0x1fb   :  { %3506 = vst.msk [vmem:[%s7098_s1 + $0x527] ss:$8 sm:$0xf] %vm3_vm1, %v2614_v55   ;;  %3507 = vst.msk [vmem:[%s7098_s1 + $0x547] ss:$8 sm:$0xf0] %vm3_vm1, %v2614_v55  }

// kernel: mul.50
= control target key start
LH: loop header
LB: loop body
LE: loop exit
PB: predicated region body
PF: predicated region fallthrough
CT: control target
= control target key end

     0   :  { %vm263_vm0 = vcmask 1047556   ;;  %s709_s14 = smov 64   ;;  %vm3_vm1 = vcmask 523264   ;;  %s1482_s0 = inlined_call_operand.vmem [shape: f32[3,8,1024], index: 0, kind: input, shape index: {}]   ;;  %s1483_s1 = inlined_call_operand.vmem [shape: f32[3,8,16,64], index: 1, kind: output, shape index: {}]  }
   0x1   :  { %v642_v0 = vld [vmem:[%s1482_s0 + $0x4] ss:$8 sm:$0xf]   ;;  %v261_v3 = vld [vmem:[%s1482_s0] ss:$8 sm:$0xf]  }
   0x2   :  { %v643_v1 = vld [vmem:[%s1482_s0 + $0x4] ss:$8 sm:$0xf0]   ;;  %v262_v4 = vld [vmem:[%s1482_s0] ss:$8 sm:$0xf0]  }
   0x3   :  { %v286_v2 = vsel %vm263_vm0, %v643_v1, %v642_v0  ;;  %v264_v5 = vsel %vm263_vm0, %v262_v4, %v261_v3  ;;  %v645_v6 = vld [vmem:[%s1482_s0 + $0x6] ss:$8 sm:$0xf]   ;;  %v639_v9 = vld [vmem:[%s1482_s0 + $0x2] ss:$8 sm:$0xf]  }
   0x4   :  { %287 = vrot.lane.b32.xlu1 %v286_v2, %s709_s14  ;;  %v646_v7 = vld [vmem:[%s1482_s0 + $0x6] ss:$8 sm:$0xf0]   ;;  %265 = vrot.lane.b32.xlu0 %v264_v5, %s709_s14  ;;  %v640_v10 = vld [vmem:[%s1482_s0 + $0x2] ss:$8 sm:$0xf0]  }
   0x5   :  { %v297_v8 = vsel %vm263_vm0, %v646_v7, %v645_v6  ;;  %v275_v11 = vsel %vm263_vm0, %v640_v10, %v639_v9  ;;  %v651_v12 = vld [vmem:[%s1482_s0 + $0x42] ss:$8 sm:$0xf]   ;;  %v648_v14 = vld [vmem:[%s1482_s0 + $0x40] ss:$8 sm:$0xf]  }
   0x6   :  { %v652_v13 = vld [vmem:[%s1482_s0 + $0x42] ss:$8 sm:$0xf0]   ;;  %v649_v15 = vld [vmem:[%s1482_s0 + $0x40] ss:$8 sm:$0xf0]  }
   0x7   :  { %v319_v16 = vsel %vm263_vm0, %v652_v13, %v651_v12  ;;  %v308_v17 = vsel %vm263_vm0, %v649_v15, %v648_v14  ;;  %v657_v18 = vld [vmem:[%s1482_s0 + $0x46] ss:$8 sm:$0xf]   ;;  %v654_v20 = vld [vmem:[%s1482_s0 + $0x44] ss:$8 sm:$0xf]  }
   0x8   :  { %298 = vrot.lane.b32.xlu1 %v297_v8, %s709_s14  ;;  %276 = vrot.lane.b32.xlu0 %v275_v11, %s709_s14  ;;  %v658_v19 = vld [vmem:[%s1482_s0 + $0x46] ss:$8 sm:$0xf0]   ;;  %v655_v21 = vld [vmem:[%s1482_s0 + $0x44] ss:$8 sm:$0xf0]  }
   0x9   :  { %v341_v22 = vsel %vm263_vm0, %v658_v19, %v657_v18  ;;  %v330_v23 = vsel %vm263_vm0, %v655_v21, %v654_v20  ;;  %v663_v24 = vld [vmem:[%s1482_s0 + $0x82] ss:$8 sm:$0xf]   ;;  %v660_v26 = vld [vmem:[%s1482_s0 + $0x80] ss:$8 sm:$0xf]  }
   0xa   :  { %v664_v25 = vld [vmem:[%s1482_s0 + $0x82] ss:$8 sm:$0xf0]   ;;  %v661_v27 = vld [vmem:[%s1482_s0 + $0x80] ss:$8 sm:$0xf0]  }
   0xb   :  { %v363_v28 = vsel %vm263_vm0, %v664_v25, %v663_v24  ;;  %v352_v29 = vsel %vm263_vm0, %v661_v27, %v660_v26  ;;  %v669_v30 = vld [vmem:[%s1482_s0 + $0x86] ss:$8 sm:$0xf]   ;;  %v666_v32 = vld [vmem:[%s1482_s0 + $0x84] ss:$8 sm:$0xf]  }
   0xc   :  { %320 = vrot.lane.b32.xlu1 %v319_v16, %s709_s14  ;;  %309 = vrot.lane.b32.xlu0 %v308_v17, %s709_s14  ;;  %v670_v31 = vld [vmem:[%s1482_s0 + $0x86] ss:$8 sm:$0xf0]   ;;  %v667_v33 = vld [vmem:[%s1482_s0 + $0x84] ss:$8 sm:$0xf0]  }
   0xd   :  { %v385_v34 = vsel %vm263_vm0, %v670_v31, %v669_v30  ;;  %v374_v35 = vsel %vm263_vm0, %v667_v33, %v666_v32  ;;  %v675_v36 = vld [vmem:[%s1482_s0 + $0x3] ss:$8 sm:$0xf]   ;;  %v672_v38 = vld [vmem:[%s1482_s0 + $0x1] ss:$8 sm:$0xf]  }
   0xe   :  { %v676_v37 = vld [vmem:[%s1482_s0 + $0x3] ss:$8 sm:$0xf0]   ;;  %v673_v39 = vld [vmem:[%s1482_s0 + $0x1] ss:$8 sm:$0xf0]  }
   0xf   :  { %v407_v40 = vsel %vm263_vm0, %v676_v37, %v675_v36  ;;  %v396_v41 = vsel %vm263_vm0, %v673_v39, %v672_v38  ;;  %v681_v42 = vld [vmem:[%s1482_s0 + $0x7] ss:$8 sm:$0xf]   ;;  %v678_v44 = vld [vmem:[%s1482_s0 + $0x5] ss:$8 sm:$0xf]  }
  0x10   :  { %342 = vrot.lane.b32.xlu1 %v341_v22, %s709_s14  ;;  %331 = vrot.lane.b32.xlu0 %v330_v23, %s709_s14  ;;  %v682_v43 = vld [vmem:[%s1482_s0 + $0x7] ss:$8 sm:$0xf0]   ;;  %v679_v45 = vld [vmem:[%s1482_s0 + $0x5] ss:$8 sm:$0xf0]  }
  0x11   :  { %v429_v46 = vsel %vm263_vm0, %v682_v43, %v681_v42  ;;  %v418_v47 = vsel %vm263_vm0, %v679_v45, %v678_v44  ;;  %v687_v48 = vld [vmem:[%s1482_s0 + $0x43] ss:$8 sm:$0xf]   ;;  %v684_v50 = vld [vmem:[%s1482_s0 + $0x41] ss:$8 sm:$0xf]  }
  0x12   :  { %v688_v49 = vld [vmem:[%s1482_s0 + $0x43] ss:$8 sm:$0xf0]   ;;  %v685_v51 = vld [vmem:[%s1482_s0 + $0x41] ss:$8 sm:$0xf0]  }
  0x13   :  { %v451_v52 = vsel %vm263_vm0, %v688_v49, %v687_v48  ;;  %v693_v53 = vld [vmem:[%s1482_s0 + $0x47] ss:$8 sm:$0xf]   ;;  %v440_v55 = vsel %vm263_vm0, %v685_v51, %v684_v50  ;;  %v690_v56 = vld [vmem:[%s1482_s0 + $0x45] ss:$8 sm:$0xf]  }
  0x14   :  { %364 = vrot.lane.b32.xlu1 %v363_v28, %s709_s14  ;;  %353 = vrot.lane.b32.xlu0 %v352_v29, %s709_s14  ;;  %v694_v54 = vld [vmem:[%s1482_s0 + $0x47] ss:$8 sm:$0xf0]   ;;  %v691_v57 = vld [vmem:[%s1482_s0 + $0x45] ss:$8 sm:$0xf0]  }
  0x15   :  { %v2_v58 = vld [vmem:[%s1482_s0] sm:$0xff]   ;;  %v523_v59 = vld [vmem:[%s1482_s0 + $0x8] sm:$0xff]   ;;  %v528_v60 = vld [vmem:[%s1482_s0 + $0x10] sm:$0xff]   ;;  %v473_v2 = vsel %vm263_vm0, %v694_v54, %v693_v53  ;;  %v462_v8 = vsel %vm263_vm0, %v691_v57, %v690_v56 }
  0x16   :  { %v887_v61 = vld [vmem:[%s1482_s0 + $0x83] ss:$8 sm:$0xf]   ;;  %4 = vst.msk [vmem:[%s1483_s1] ss:$16 sm:$0x3] %vm3_vm1, %v2_v58  }
  0x17   :  { %v892_v62 = vld [vmem:[%s1482_s0 + $0x83] ss:$8 sm:$0xf0]   ;;  %5 = vst.msk [vmem:[%s1483_s1] ss:$16 sm:$0xc] %vm3_vm1, %v2_v58  }
  0x18   :  { %386 = vrot.lane.b32.xlu1 %v385_v34, %s709_s14  ;;  %375 = vrot.lane.b32.xlu0 %v374_v35, %s709_s14  ;;  %6 = vst.msk [vmem:[%s1483_s1] ss:$16 sm:$0x30] %vm3_vm1, %v2_v58   ;;  %7 = vst.msk [vmem:[%s1483_s1] ss:$16 sm:$0xc0] %vm3_vm1, %v2_v58   ;;  %v495_v20 = vsel %vm263_vm0, %v892_v62, %v887_v61 }
  0x19   :  { %524 = vst.msk [vmem:[%s1483_s1 + $0x2] ss:$16 sm:$0x3] %vm3_vm1, %v523_v59   ;;  %525 = vst.msk [vmem:[%s1483_s1 + $0x2] ss:$16 sm:$0xc] %vm3_vm1, %v523_v59  }
  0x1a   :  { %526 = vst.msk [vmem:[%s1483_s1 + $0x2] ss:$16 sm:$0x30] %vm3_vm1, %v523_v59   ;;  %527 = vst.msk [vmem:[%s1483_s1 + $0x2] ss:$16 sm:$0xc0] %vm3_vm1, %v523_v59  }
  0x1b   :  { %529 = vst.msk [vmem:[%s1483_s1 + $0x4] ss:$16 sm:$0x3] %vm3_vm1, %v528_v60   ;;  %530 = vst.msk [vmem:[%s1483_s1 + $0x4] ss:$16 sm:$0xc] %vm3_vm1, %v528_v60  }
  0x1c   :  { %408 = vrot.lane.b32.xlu1 %v407_v40, %s709_s14  ;;  %397 = vrot.lane.b32.xlu0 %v396_v41, %s709_s14  ;;  %531 = vst.msk [vmem:[%s1483_s1 + $0x4] ss:$16 sm:$0x30] %vm3_vm1, %v528_v60   ;;  %532 = vst.msk [vmem:[%s1483_s1 + $0x4] ss:$16 sm:$0xc0] %vm3_vm1, %v528_v60  }
  0x1d   :  { %v533_v63 = vld [vmem:[%s1482_s0 + $0x18] sm:$0xff]   ;;  %v538_v0 = vld [vmem:[%s1482_s0 + $0x20] sm:$0xff]   ;;  %v543_v1 = vld [vmem:[%s1482_s0 + $0x28] sm:$0xff]  }
  0x1e   :  { %v956_v3 = vld [vmem:[%s1482_s0 + $0x81] ss:$8 sm:$0xf]   ;;  %534 = vst.msk [vmem:[%s1483_s1 + $0x6] ss:$16 sm:$0x3] %vm3_vm1, %v533_v63  }
  0x1f   :  { %v961_v4 = vld [vmem:[%s1482_s0 + $0x81] ss:$8 sm:$0xf0]   ;;  %535 = vst.msk [vmem:[%s1483_s1 + $0x6] ss:$16 sm:$0xc] %vm3_vm1, %v533_v63  }
  0x20   :  { %430 = vrot.lane.b32.xlu1 %v429_v46, %s709_s14  ;;  %419 = vrot.lane.b32.xlu0 %v418_v47, %s709_s14  ;;  %536 = vst.msk [vmem:[%s1483_s1 + $0x6] ss:$16 sm:$0x30] %vm3_vm1, %v533_v63   ;;  %537 = vst.msk [vmem:[%s1483_s1 + $0x6] ss:$16 sm:$0xc0] %vm3_vm1, %v533_v63   ;;  %v484_v24 = vsel %vm263_vm0, %v961_v4, %v956_v3 }
  0x21   :  { %539 = vst.msk [vmem:[%s1483_s1 + $0x8] ss:$16 sm:$0x3] %vm3_vm1, %v538_v0   ;;  %540 = vst.msk [vmem:[%s1483_s1 + $0x8] ss:$16 sm:$0xc] %vm3_vm1, %v538_v0  }
  0x22   :  { %541 = vst.msk [vmem:[%s1483_s1 + $0x8] ss:$16 sm:$0x30] %vm3_vm1, %v538_v0   ;;  %542 = vst.msk [vmem:[%s1483_s1 + $0x8] ss:$16 sm:$0xc0] %vm3_vm1, %v538_v0  }
  0x23   :  { %544 = vst.msk [vmem:[%s1483_s1 + $0xa] ss:$16 sm:$0x3] %vm3_vm1, %v543_v1   ;;  %545 = vst.msk [vmem:[%s1483_s1 + $0xa] ss:$16 sm:$0xc] %vm3_vm1, %v543_v1  }
  0x24   :  { %452 = vrot.lane.b32.xlu1 %v451_v52, %s709_s14  ;;  %441 = vrot.lane.b32.xlu0 %v440_v55, %s709_s14  ;;  %546 = vst.msk [vmem:[%s1483_s1 + $0xa] ss:$16 sm:$0x30] %vm3_vm1, %v543_v1   ;;  %547 = vst.msk [vmem:[%s1483_s1 + $0xa] ss:$16 sm:$0xc0] %vm3_vm1, %v543_v1  }
  0x25   :  { %v548_v5 = vld [vmem:[%s1482_s0 + $0x30] sm:$0xff]   ;;  %v553_v6 = vld [vmem:[%s1482_s0 + $0x38] sm:$0xff]   ;;  %v558_v7 = vld [vmem:[%s1482_s0 + $0x40] sm:$0xff]  }
  0x26   :  { %549 = vst.msk [vmem:[%s1483_s1 + $0xc] ss:$16 sm:$0x3] %vm3_vm1, %v548_v5   ;;  %550 = vst.msk [vmem:[%s1483_s1 + $0xc] ss:$16 sm:$0xc] %vm3_vm1, %v548_v5  }
  0x27   :  { %551 = vst.msk [vmem:[%s1483_s1 + $0xc] ss:$16 sm:$0x30] %vm3_vm1, %v548_v5   ;;  %552 = vst.msk [vmem:[%s1483_s1 + $0xc] ss:$16 sm:$0xc0] %vm3_vm1, %v548_v5  }
  0x28   :  { %554 = vst.msk [vmem:[%s1483_s1 + $0xe] ss:$16 sm:$0x3] %vm3_vm1, %v553_v6   ;;  %555 = vst.msk [vmem:[%s1483_s1 + $0xe] ss:$16 sm:$0xc] %vm3_vm1, %v553_v6   ;;  %474 = vrot.lane.b32.xlu1 %v473_v2, %s709_s14  ;;  %463 = vrot.lane.b32.xlu0 %v462_v8, %s709_s14 }
  0x29   :  { %556 = vst.msk [vmem:[%s1483_s1 + $0xe] ss:$16 sm:$0x30] %vm3_vm1, %v553_v6   ;;  %557 = vst.msk [vmem:[%s1483_s1 + $0xe] ss:$16 sm:$0xc0] %vm3_vm1, %v553_v6  }
  0x2a   :  { %559 = vst.msk [vmem:[%s1483_s1 + $0x80] ss:$16 sm:$0x3] %vm3_vm1, %v558_v7   ;;  %560 = vst.msk [vmem:[%s1483_s1 + $0x80] ss:$16 sm:$0xc] %vm3_vm1, %v558_v7  }
  0x2b   :  { %561 = vst.msk [vmem:[%s1483_s1 + $0x80] ss:$16 sm:$0x30] %vm3_vm1, %v558_v7   ;;  %562 = vst.msk [vmem:[%s1483_s1 + $0x80] ss:$16 sm:$0xc0] %vm3_vm1, %v558_v7  }
  0x2c   :  { %v563_v9 = vld [vmem:[%s1482_s0 + $0x48] sm:$0xff]   ;;  %v568_v10 = vld [vmem:[%s1482_s0 + $0x50] sm:$0xff]   ;;  %v573_v11 = vld [vmem:[%s1482_s0 + $0x58] sm:$0xff]   ;;  %496 = vrot.lane.b32.xlu1 %v495_v20, %s709_s14 }
  0x2d   :  { %564 = vst.msk [vmem:[%s1483_s1 + $0x82] ss:$16 sm:$0x3] %vm3_vm1, %v563_v9   ;;  %565 = vst.msk [vmem:[%s1483_s1 + $0x82] ss:$16 sm:$0xc] %vm3_vm1, %v563_v9   ;;  %485 = vrot.lane.b32.xlu0 %v484_v24, %s709_s14 }
  0x2e   :  { %566 = vst.msk [vmem:[%s1483_s1 + $0x82] ss:$16 sm:$0x30] %vm3_vm1, %v563_v9   ;;  %567 = vst.msk [vmem:[%s1483_s1 + $0x82] ss:$16 sm:$0xc0] %vm3_vm1, %v563_v9  }
  0x2f   :  { %569 = vst.msk [vmem:[%s1483_s1 + $0x84] ss:$16 sm:$0x3] %vm3_vm1, %v568_v10   ;;  %570 = vst.msk [vmem:[%s1483_s1 + $0x84] ss:$16 sm:$0xc] %vm3_vm1, %v568_v10  }
  0x30   :  { %571 = vst.msk [vmem:[%s1483_s1 + $0x84] ss:$16 sm:$0x30] %vm3_vm1, %v568_v10   ;;  %572 = vst.msk [vmem:[%s1483_s1 + $0x84] ss:$16 sm:$0xc0] %vm3_vm1, %v568_v10  }
  0x31   :  { %574 = vst.msk [vmem:[%s1483_s1 + $0x86] ss:$16 sm:$0x3] %vm3_vm1, %v573_v11   ;;  %575 = vst.msk [vmem:[%s1483_s1 + $0x86] ss:$16 sm:$0xc] %vm3_vm1, %v573_v11  }
  0x32   :  { %576 = vst.msk [vmem:[%s1483_s1 + $0x86] ss:$16 sm:$0x30] %vm3_vm1, %v573_v11   ;;  %577 = vst.msk [vmem:[%s1483_s1 + $0x86] ss:$16 sm:$0xc0] %vm3_vm1, %v573_v11  }
  0x33   :  { %v578_v12 = vld [vmem:[%s1482_s0 + $0x60] sm:$0xff]   ;;  %v583_v13 = vld [vmem:[%s1482_s0 + $0x68] sm:$0xff]   ;;  %v588_v14 = vld [vmem:[%s1482_s0 + $0x70] sm:$0xff]  }
  0x34   :  { %v1139_v15 = vld [vmem:[%s1482_s0 + $0x87] ss:$8 sm:$0xf]   ;;  %579 = vst.msk [vmem:[%s1483_s1 + $0x88] ss:$16 sm:$0x3] %vm3_vm1, %v578_v12  }
  0x35   :  { %v1144_v16 = vld [vmem:[%s1482_s0 + $0x87] ss:$8 sm:$0xf0]   ;;  %580 = vst.msk [vmem:[%s1483_s1 + $0x88] ss:$16 sm:$0xc] %vm3_vm1, %v578_v12  }
  0x36   :  { %581 = vst.msk [vmem:[%s1483_s1 + $0x88] ss:$16 sm:$0x30] %vm3_vm1, %v578_v12   ;;  %582 = vst.msk [vmem:[%s1483_s1 + $0x88] ss:$16 sm:$0xc0] %vm3_vm1, %v578_v12   ;;  %v517_v30 = vsel %vm263_vm0, %v1144_v16, %v1139_v15 }
  0x37   :  { %584 = vst.msk [vmem:[%s1483_s1 + $0x8a] ss:$16 sm:$0x3] %vm3_vm1, %v583_v13   ;;  %585 = vst.msk [vmem:[%s1483_s1 + $0x8a] ss:$16 sm:$0xc] %vm3_vm1, %v583_v13   ;;  %518 = vrot.lane.b32.xlu1 %v517_v30, %s709_s14 }
  0x38   :  { %586 = vst.msk [vmem:[%s1483_s1 + $0x8a] ss:$16 sm:$0x30] %vm3_vm1, %v583_v13   ;;  %587 = vst.msk [vmem:[%s1483_s1 + $0x8a] ss:$16 sm:$0xc0] %vm3_vm1, %v583_v13  }
  0x39   :  { %589 = vst.msk [vmem:[%s1483_s1 + $0x8c] ss:$16 sm:$0x3] %vm3_vm1, %v588_v14   ;;  %590 = vst.msk [vmem:[%s1483_s1 + $0x8c] ss:$16 sm:$0xc] %vm3_vm1, %v588_v14  }
  0x3a   :  { %591 = vst.msk [vmem:[%s1483_s1 + $0x8c] ss:$16 sm:$0x30] %vm3_vm1, %v588_v14   ;;  %592 = vst.msk [vmem:[%s1483_s1 + $0x8c] ss:$16 sm:$0xc0] %vm3_vm1, %v588_v14  }
  0x3b   :  { %v593_v17 = vld [vmem:[%s1482_s0 + $0x78] sm:$0xff]   ;;  %v598_v18 = vld [vmem:[%s1482_s0 + $0x80] sm:$0xff]   ;;  %v603_v19 = vld [vmem:[%s1482_s0 + $0x88] sm:$0xff]  }
  0x3c   :  { %594 = vst.msk [vmem:[%s1483_s1 + $0x8e] ss:$16 sm:$0x3] %vm3_vm1, %v593_v17   ;;  %595 = vst.msk [vmem:[%s1483_s1 + $0x8e] ss:$16 sm:$0xc] %vm3_vm1, %v593_v17  }
  0x3d   :  { %596 = vst.msk [vmem:[%s1483_s1 + $0x8e] ss:$16 sm:$0x30] %vm3_vm1, %v593_v17   ;;  %597 = vst.msk [vmem:[%s1483_s1 + $0x8e] ss:$16 sm:$0xc0] %vm3_vm1, %v593_v17  }
  0x3e   :  { %599 = vst.msk [vmem:[%s1483_s1 + $0x100] ss:$16 sm:$0x3] %vm3_vm1, %v598_v18   ;;  %600 = vst.msk [vmem:[%s1483_s1 + $0x100] ss:$16 sm:$0xc] %vm3_vm1, %v598_v18  }
  0x3f   :  { %601 = vst.msk [vmem:[%s1483_s1 + $0x100] ss:$16 sm:$0x30] %vm3_vm1, %v598_v18   ;;  %602 = vst.msk [vmem:[%s1483_s1 + $0x100] ss:$16 sm:$0xc0] %vm3_vm1, %v598_v18  }
  0x40   :  { %604 = vst.msk [vmem:[%s1483_s1 + $0x102] ss:$16 sm:$0x3] %vm3_vm1, %v603_v19   ;;  %605 = vst.msk [vmem:[%s1483_s1 + $0x102] ss:$16 sm:$0xc] %vm3_vm1, %v603_v19  }
  0x41   :  { %606 = vst.msk [vmem:[%s1483_s1 + $0x102] ss:$16 sm:$0x30] %vm3_vm1, %v603_v19   ;;  %607 = vst.msk [vmem:[%s1483_s1 + $0x102] ss:$16 sm:$0xc0] %vm3_vm1, %v603_v19  }
  0x42   :  { %v608_v21 = vld [vmem:[%s1482_s0 + $0x90] sm:$0xff]   ;;  %v613_v22 = vld [vmem:[%s1482_s0 + $0x98] sm:$0xff]   ;;  %v618_v23 = vld [vmem:[%s1482_s0 + $0xa0] sm:$0xff]  }
  0x43   :  { %609 = vst.msk [vmem:[%s1483_s1 + $0x104] ss:$16 sm:$0x3] %vm3_vm1, %v608_v21   ;;  %610 = vst.msk [vmem:[%s1483_s1 + $0x104] ss:$16 sm:$0xc] %vm3_vm1, %v608_v21  }
  0x44   :  { %611 = vst.msk [vmem:[%s1483_s1 + $0x104] ss:$16 sm:$0x30] %vm3_vm1, %v608_v21   ;;  %612 = vst.msk [vmem:[%s1483_s1 + $0x104] ss:$16 sm:$0xc0] %vm3_vm1, %v608_v21  }
  0x45   :  { %614 = vst.msk [vmem:[%s1483_s1 + $0x106] ss:$16 sm:$0x3] %vm3_vm1, %v613_v22   ;;  %615 = vst.msk [vmem:[%s1483_s1 + $0x106] ss:$16 sm:$0xc] %vm3_vm1, %v613_v22  }
  0x46   :  { %616 = vst.msk [vmem:[%s1483_s1 + $0x106] ss:$16 sm:$0x30] %vm3_vm1, %v613_v22   ;;  %617 = vst.msk [vmem:[%s1483_s1 + $0x106] ss:$16 sm:$0xc0] %vm3_vm1, %v613_v22  }
  0x47   :  { %619 = vst.msk [vmem:[%s1483_s1 + $0x108] ss:$16 sm:$0x3] %vm3_vm1, %v618_v23   ;;  %620 = vst.msk [vmem:[%s1483_s1 + $0x108] ss:$16 sm:$0xc] %vm3_vm1, %v618_v23  }
  0x48   :  { %621 = vst.msk [vmem:[%s1483_s1 + $0x108] ss:$16 sm:$0x30] %vm3_vm1, %v618_v23   ;;  %622 = vst.msk [vmem:[%s1483_s1 + $0x108] ss:$16 sm:$0xc0] %vm3_vm1, %v618_v23  }
  0x49   :  { %v623_v25 = vld [vmem:[%s1482_s0 + $0xa8] sm:$0xff]   ;;  %v628_v26 = vld [vmem:[%s1482_s0 + $0xb0] sm:$0xff]   ;;  %v633_v27 = vld [vmem:[%s1482_s0 + $0xb8] sm:$0xff]  }
  0x4a   :  { %v702_v28 = vld [vmem:[%s1482_s0 + $0x85] ss:$8 sm:$0xf]   ;;  %624 = vst.msk [vmem:[%s1483_s1 + $0x10a] ss:$16 sm:$0x3] %vm3_vm1, %v623_v25  }
  0x4b   :  { %v703_v29 = vld [vmem:[%s1482_s0 + $0x85] ss:$8 sm:$0xf0]   ;;  %625 = vst.msk [vmem:[%s1483_s1 + $0x10a] ss:$16 sm:$0xc] %vm3_vm1, %v623_v25  }
  0x4c   :  { %626 = vst.msk [vmem:[%s1483_s1 + $0x10a] ss:$16 sm:$0x30] %vm3_vm1, %v623_v25   ;;  %627 = vst.msk [vmem:[%s1483_s1 + $0x10a] ss:$16 sm:$0xc0] %vm3_vm1, %v623_v25   ;;  %v506_v31 = vsel %vm263_vm0, %v703_v29, %v702_v28 }
  0x4d   :  { %629 = vst.msk [vmem:[%s1483_s1 + $0x10c] ss:$16 sm:$0x3] %vm3_vm1, %v628_v26   ;;  %630 = vst.msk [vmem:[%s1483_s1 + $0x10c] ss:$16 sm:$0xc] %vm3_vm1, %v628_v26   ;;  %507 = vrot.lane.b32.xlu0 %v506_v31, %s709_s14 }
  0x4e   :  { %631 = vst.msk [vmem:[%s1483_s1 + $0x10c] ss:$16 sm:$0x30] %vm3_vm1, %v628_v26   ;;  %632 = vst.msk [vmem:[%s1483_s1 + $0x10c] ss:$16 sm:$0xc0] %vm3_vm1, %v628_v26  }
  0x4f   :  { %634 = vst.msk [vmem:[%s1483_s1 + $0x10e] ss:$16 sm:$0x3] %vm3_vm1, %v633_v27   ;;  %635 = vst.msk [vmem:[%s1483_s1 + $0x10e] ss:$16 sm:$0xc] %vm3_vm1, %v633_v27  }
  0x50   :  { %636 = vst.msk [vmem:[%s1483_s1 + $0x10e] ss:$16 sm:$0x30] %vm3_vm1, %v633_v27   ;;  %637 = vst.msk [vmem:[%s1483_s1 + $0x10e] ss:$16 sm:$0xc0] %vm3_vm1, %v633_v27  }
  0x76   :  { %v288_v32 = vpop.permute.xlu1 %287   ;;  %v266_v33 = vpop.permute.xlu0 %265  }
  0x77   :  { %644 = vst.msk [vmem:[%s1483_s1 + $0x41] ss:$2 sm:$0xff] %vm3_vm1, %v288_v32   ;;  %638 = vst.msk [vmem:[%s1483_s1 + $0x1] ss:$2 sm:$0xff] %vm3_vm1, %v266_v33  }
  0x7a   :  { %v299_v34 = vpop.permute.xlu1 %298   ;;  %v277_v35 = vpop.permute.xlu0 %276  }
  0x7b   :  { %647 = vst.msk [vmem:[%s1483_s1 + $0x61] ss:$2 sm:$0xff] %vm3_vm1, %v299_v34   ;;  %641 = vst.msk [vmem:[%s1483_s1 + $0x21] ss:$2 sm:$0xff] %vm3_vm1, %v277_v35  }
  0x7e   :  { %v321_v36 = vpop.permute.xlu1 %320   ;;  %v310_v37 = vpop.permute.xlu0 %309  }
  0x7f   :  { %653 = vst.msk [vmem:[%s1483_s1 + $0xa1] ss:$2 sm:$0xff] %vm3_vm1, %v321_v36   ;;  %650 = vst.msk [vmem:[%s1483_s1 + $0x81] ss:$2 sm:$0xff] %vm3_vm1, %v310_v37  }
  0x82   :  { %v343_v38 = vpop.permute.xlu1 %342   ;;  %v332_v39 = vpop.permute.xlu0 %331  }
  0x83   :  { %659 = vst.msk [vmem:[%s1483_s1 + $0xe1] ss:$2 sm:$0xff] %vm3_vm1, %v343_v38   ;;  %656 = vst.msk [vmem:[%s1483_s1 + $0xc1] ss:$2 sm:$0xff] %vm3_vm1, %v332_v39  }
  0x86   :  { %v365_v40 = vpop.permute.xlu1 %364   ;;  %v354_v41 = vpop.permute.xlu0 %353  }
  0x87   :  { %665 = vst.msk [vmem:[%s1483_s1 + $0x121] ss:$2 sm:$0xff] %vm3_vm1, %v365_v40   ;;  %662 = vst.msk [vmem:[%s1483_s1 + $0x101] ss:$2 sm:$0xff] %vm3_vm1, %v354_v41  }
  0x8a   :  { %v387_v42 = vpop.permute.xlu1 %386   ;;  %v376_v43 = vpop.permute.xlu0 %375  }
  0x8b   :  { %671 = vst.msk [vmem:[%s1483_s1 + $0x161] ss:$2 sm:$0xff] %vm3_vm1, %v387_v42   ;;  %668 = vst.msk [vmem:[%s1483_s1 + $0x141] ss:$2 sm:$0xff] %vm3_vm1, %v376_v43  }
  0x8e   :  { %v409_v44 = vpop.permute.xlu1 %408   ;;  %v398_v45 = vpop.permute.xlu0 %397  }
  0x8f   :  { %677 = vst.msk [vmem:[%s1483_s1 + $0x31] ss:$2 sm:$0xff] %vm3_vm1, %v409_v44   ;;  %674 = vst.msk [vmem:[%s1483_s1 + $0x11] ss:$2 sm:$0xff] %vm3_vm1, %v398_v45  }
  0x92   :  { %v431_v46 = vpop.permute.xlu1 %430   ;;  %v420_v47 = vpop.permute.xlu0 %419  }
  0x93   :  { %683 = vst.msk [vmem:[%s1483_s1 + $0x71] ss:$2 sm:$0xff] %vm3_vm1, %v431_v46   ;;  %680 = vst.msk [vmem:[%s1483_s1 + $0x51] ss:$2 sm:$0xff] %vm3_vm1, %v420_v47  }
  0x96   :  { %v453_v48 = vpop.permute.xlu1 %452   ;;  %v442_v49 = vpop.permute.xlu0 %441  }
  0x97   :  { %689 = vst.msk [vmem:[%s1483_s1 + $0xb1] ss:$2 sm:$0xff] %vm3_vm1, %v453_v48   ;;  %686 = vst.msk [vmem:[%s1483_s1 + $0x91] ss:$2 sm:$0xff] %vm3_vm1, %v442_v49  }
  0x9a   :  { %v475_v50 = vpop.permute.xlu1 %474   ;;  %v464_v51 = vpop.permute.xlu0 %463  }
  0x9b   :  { %695 = vst.msk [vmem:[%s1483_s1 + $0xf1] ss:$2 sm:$0xff] %vm3_vm1, %v475_v50   ;;  %692 = vst.msk [vmem:[%s1483_s1 + $0xd1] ss:$2 sm:$0xff] %vm3_vm1, %v464_v51  }
  0x9e   :  { %v497_v52 = vpop.permute.xlu1 %496  }
  0x9f   :  { %701 = vst.msk [vmem:[%s1483_s1 + $0x131] ss:$2 sm:$0xff] %vm3_vm1, %v497_v52   ;;  %v486_v53 = vpop.permute.xlu0 %485  }
  0xa0   :  { %698 = vst.msk [vmem:[%s1483_s1 + $0x111] ss:$2 sm:$0xff] %vm3_vm1, %v486_v53  }
  0xa9   :  { %v519_v54 = vpop.permute.xlu1 %518  }
  0xaa   :  { %707 = vst.msk [vmem:[%s1483_s1 + $0x171] ss:$2 sm:$0xff] %vm3_vm1, %v519_v54  }
  0xbf   :  { %v508_v55 = vpop.permute.xlu0 %507  }
  0xc0   :  { %704 = vst.msk [vmem:[%s1483_s1 + $0x151] ss:$2 sm:$0xff] %vm3_vm1, %v508_v55  }

// kernel: tile.33
= control target key start
LH: loop header
LB: loop body
LE: loop exit
PB: predicated region body
PF: predicated region fallthrough
CT: control target
= control target key end

     0   :  { %s22_s0 = inlined_call_operand.vmem [shape: f32[64], index: 0, kind: input, shape index: {}]   ;;  %s23_s1 = inlined_call_operand.vmem [shape: f32[8,64], index: 1, kind: output, shape index: {}]  }
   0x1   :  { %v4_v0 = vld [vmem:[%s22_s0] ss:$0 sm:$0xff] }
   0x2   :  { %5 = vst [vmem:[%s23_s1] sm:$0xff] %v4_v0 }

// kernel: tile.34
= control target key start
LH: loop header
LB: loop body
LE: loop exit
PB: predicated region body
PF: predicated region fallthrough
CT: control target
= control target key end

     0   :  { %vm3_vm0 = vcmask 523264   ;;  %s41_s8 = smov 64   ;;  %vm9_vm1 = vcmask 1048064   ;;  %s70_s0 = inlined_call_operand.vmem [shape: f32[8,64], index: 0, kind: input, shape index: {}]   ;;  %s71_s1 = inlined_call_operand.vmem [shape: f32[1,512], index: 1, kind: output, shape index: {}]  }
   0x1   :  { %v36_v0 = vld [vmem:[%s70_s0 + $0x1] ss:$2 sm:$0xf]   ;;  %v2_v1 = vld [vmem:[%s70_s0] ss:$2 sm:$0xf]  }
   0x2   :  { %7 = vrot.lane.b32.xlu0 %v36_v0, %s41_s8  ;;  %4 = vst.msk [vmem:[#allocation0] ss:$8 sm:$0xf] %vm3_vm0, %v2_v1  }
  0x74   :  { %v8_v2 = vpop.permute.xlu0 %7  }
  0x75   :  { %10 = vst.msk [vmem:[#allocation0] ss:$8 sm:$0xf] %vm9_vm1, %v8_v2  }
  0x7c   :  { %v14_v3 = vld [vmem:[#allocation0] sm:$0x1]  ;;  %v18_v4 = vld [vmem:[#allocation0 + $0x8] sm:$0x1]  ;;  %v23_v5 = vld [vmem:[#allocation0 + $0x10] sm:$0x1] }
  0x7d   :  { %16 = vst [vmem:[%s71_s1] sm:$0x1] %v14_v3  ;;  %37 = vst [vmem:[%s71_s1 + $0x1] sm:$0x1] %v18_v4  ;;  %v29_v6 = vld [vmem:[#allocation0 + $0x18] sm:$0x1] }
  0x7e   :  { %38 = vst [vmem:[%s71_s1 + $0x2] sm:$0x1] %v23_v5  ;;  %39 = vst [vmem:[%s71_s1 + $0x3] sm:$0x1] %v29_v6 }

// kernel: tile.23
= control target key start
LH: loop header
LB: loop body
LE: loop exit
PB: predicated region body
PF: predicated region fallthrough
CT: control target
= control target key end

     0   :  { %s22_s0 = inlined_call_operand.vmem [shape: f32[16], index: 0, kind: input, shape index: {}]   ;;  %s23_s1 = inlined_call_operand.vmem [shape: f32[8,16], index: 1, kind: output, shape index: {}]  }
   0x1   :  { %v4_v0 = vld [vmem:[%s22_s0] ss:$0 sm:$0xff] }
   0x2   :  { %5 = vst [vmem:[%s23_s1] sm:$0xff] %v4_v0 }

// kernel: tile.24
= control target key start
LH: loop header
LB: loop body
LE: loop exit
PB: predicated region body
PF: predicated region fallthrough
CT: control target
= control target key end

     0   :  { %s67_s10 = smov 112   ;;  %s68_s11 = smov 80   ;;  %vm3_vm0 = vcmask 130048   ;;  %vm9_vm1 = vcmask 1048448   ;;  %vm15_vm2 = vcmask 917248   ;;  %vm21_vm3 = vcmask 786048   ;;  %s111_s0 = inlined_call_operand.vmem [shape: f32[8,16], index: 0, kind: input, shape index: {}]   ;;  %s112_s1 = inlined_call_operand.vmem [shape: f32[1,128], index: 1, kind: output, shape index: {}]  }
   0x1   :  { %v53_v0 = vld [vmem:[%s111_s0 + $0x7] sm:$0x1]   ;;  %v55_v1 = vld [vmem:[%s111_s0 + $0x5] sm:$0x1]   ;;  %v54_v2 = vld [vmem:[%s111_s0 + $0x6] sm:$0x1]  }
   0x2   :  { %7 = vrot.lane.b32.xlu0 %v53_v0, %s67_s10  ;;  %19 = vrot.lane.b32.xlu1 %v55_v1, %s68_s11  ;;  %v56_v3 = vld [vmem:[%s111_s0 + $0x4] sm:$0x1]   ;;  %v2_v4 = vld [vmem:[%s111_s0] sm:$0x1]   ;;  %s69_s18 = smov 96   ;;  %s70_s19 = smov 64  }
   0x3   :  { %4 = vst.msk [vmem:[#allocation0] sm:$0x1] %vm3_vm0, %v2_v4   ;;  %v57_v5 = vld [vmem:[%s111_s0 + $0x3] sm:$0x1]   ;;  %v58_v6 = vld [vmem:[%s111_s0 + $0x2] sm:$0x1]  }
   0x4   :  { %s71_s24 = smov 48   ;;  %s72_s25 = smov 32   ;;  %v59_v7 = vld [vmem:[%s111_s0 + $0x1] sm:$0x1]   ;;  %vm27_vm4 = vcmask 654848   ;;  %vm33_vm5 = vcmask 523648  }
   0x5   :  { %s73_s0 = smov 16   ;;  %vm39_vm6 = vcmask 392448   ;;  %vm45_vm7 = vcmask 261248  }
   0x6   :  { %13 = vrot.lane.b32.xlu0 %v54_v2, %s69_s18  ;;  %25 = vrot.lane.b32.xlu1 %v56_v3, %s70_s19 }
   0xa   :  { %31 = vrot.lane.b32.xlu0 %v57_v5, %s71_s24  ;;  %37 = vrot.lane.b32.xlu1 %v58_v6, %s72_s25 }
   0xe   :  { %43 = vrot.lane.b32.xlu0 %v59_v7, %s73_s0 }
  0x74   :  { %v8_v8 = vpop.permute.xlu0 %7   ;;  %v20_v9 = vpop.permute.xlu1 %19  }
  0x75   :  { %10 = vst.msk [vmem:[#allocation0] sm:$0x1] %vm9_vm1, %v8_v8  }
  0x78   :  { %v14_v10 = vpop.permute.xlu0 %13   ;;  %v26_v11 = vpop.permute.xlu1 %25  }
  0x79   :  { %16 = vst.msk [vmem:[#allocation0] sm:$0x1] %vm15_vm2, %v14_v10  }
  0x7a   :  { %22 = vst.msk [vmem:[#allocation0] sm:$0x1] %vm21_vm3, %v20_v9  }
  0x7b   :  { %28 = vst.msk [vmem:[#allocation0] sm:$0x1] %vm27_vm4, %v26_v11  }
  0x7c   :  { %v32_v12 = vpop.permute.xlu0 %31   ;;  %v38_v13 = vpop.permute.xlu1 %37  }
  0x7d   :  { %34 = vst.msk [vmem:[#allocation0] sm:$0x1] %vm33_vm5, %v32_v12  }
  0x7e   :  { %40 = vst.msk [vmem:[#allocation0] sm:$0x1] %vm39_vm6, %v38_v13  }
  0x80   :  { %v44_v14 = vpop.permute.xlu0 %43  }
  0x81   :  { %46 = vst.msk [vmem:[#allocation0] sm:$0x1] %vm45_vm7, %v44_v14  }
  0x88   :  { %v50_v15 = vld [vmem:[#allocation0] sm:$0x1] }
  0x89   :  { %52 = vst [vmem:[%s112_s1] sm:$0x1] %v50_v15 }

// kernel: class_dynamic_conv.2
= control target key start
LH: loop header
LB: loop body
LE: loop exit
PB: predicated region body
PF: predicated region fallthrough
CT: control target
= control target key end

     0   :  { %s3948_s30 = smov 0   ;;  %s6252_s0 = inlined_call_operand.vmem [shape: f32[3,49,512], index: 0, kind: input, shape index: {}]   ;;  %s6253_s1 = inlined_call_operand.vmem [shape: f32[3,512,128], index: 1, kind: input, shape index: {}]   ;;  %s6254_s2 = inlined_call_operand.vmem [shape: f32[3,128,512], index: 2, kind: input, shape index: {}]   ;;  %s6255_s3 = inlined_call_operand.vmem [shape: f32[128,128], index: 3, kind: input, shape index: {}]   ;;  %s6256_s4 = inlined_call_operand.vmem [shape: f32[512,512], index: 4, kind: input, shape index: {}]   ;;  %s6257_s5 = inlined_call_operand.vmem [shape: f32[1,128], index: 5, kind: input, shape index: {}]   ;;  %s6258_s6 = inlined_call_operand.vmem [shape: f32[1,128], index: 6, kind: input, shape index: {}]   ;;  %s6259_s7 = inlined_call_operand.vmem [shape: f32[1,512], index: 7, kind: input, shape index: {}]   ;;  %s6260_s8 = inlined_call_operand.vmem [shape: f32[1,512], index: 8, kind: input, shape index: {}]   ;;  %s6261_s9 = inlined_call_operand.vmem [shape: f32[3,49,512], index: 9, kind: output, shape index: {}]  }
   0x1 LB: > { %s2786_s10 = sadd.s32 4294967295, %s3893_s30   ;;  %p2790_p0 = scmp.ge.s32.totalorder %s3893_s30, 1  ;;  %s3893_s30 = sphi %s3948_s30, %s19_s30  }
   0x2   : > { %p307_p1 = scmp.lt.s32.totalorder %s3893_s30, 4 }
   0x4   : > { %p308_p2 = pnand %p2790_p0, %p307_p1 }
   0x6   : > { %311 = sbr.rel (%p308_p2) target bundleno = 1197 (0x4ad), region = 56 }
   0xd   : > { %p353_p3 = scmp.lt.s32.totalorder %s2786_s10, 2  ;;  %vm3896_vm0 = vmmov 0  }
   0xf   : > { %s6701_s10 = smov (!%p353_p3, %s2786_s10), 2 }
  0x10   : > { %s2801_s11 = sshll.u32 %s6701_s10, 9  ;;  %s3805_s15 = smul.u32 224, %s6701_s10 }
  0x11   : > { %s3964_s14 = scalar_lea.vmem %s6253_s1, %s2801_s11  ;;  %s4139_s20 = scalar_lea.vmem %s6254_s2, %s2801_s11 }
  0x12   : > { %v417_v0 = vld [vmem:[%s3964_s14 + $0x80] sm:$0xff]  ;;  %v418_v1 = vld [vmem:[%s3964_s14 + $0x88] sm:$0xff]  ;;  %v419_v11 = vld [vmem:[%s3964_s14 + $0x90] sm:$0xff]  ;;  %s4022_s18 = scalar_lea.vmem %s6252_s0, %s3805_s15  ;;  %s6061_s11 = scalar_lea.vmem %s6261_s9, %s3805_s15 }
  0x13   : > { %v449_v2 = vld [vmem:[%s3964_s14 + $0x180] sm:$0xff]  ;;  %v3061_v3 = vpack.c.bf16 %v418_v1, %v417_v0  ;;  %v450_v4 = vld [vmem:[%s3964_s14 + $0x188] sm:$0xff]  ;;  %v420_v13 = vld [vmem:[%s3964_s14 + $0x98] sm:$0xff] }
  0x14   : > { %v401_v5 = vld [vmem:[%s3964_s14] sm:$0xff]  ;;  %v402_v6 = vld [vmem:[%s3964_s14 + $0x8] sm:$0xff]  ;;  %v3093_v7 = vpack.c.bf16 %v450_v4, %v449_v2  ;;  %v451_v14 = vld [vmem:[%s3964_s14 + $0x190] sm:$0xff]  ;;  %v3065_v16 = vpack.c.bf16 %v420_v13, %v419_v11 }
  0x15   : > { %v3063_v8 = vpack.c.bf16 %v402_v6, %v401_v5  ;;  %v433_v9 = vld [vmem:[%s3964_s14 + $0x100] sm:$0xff]  ;;  %v434_v10 = vld [vmem:[%s3964_s14 + $0x108] sm:$0xff]  ;;  %3062 = vmatprep.subr.bf16.mxu0 %v3061_v3  ;;  %v452_v15 = vld [vmem:[%s3964_s14 + $0x198] sm:$0xff] }
  0x16   : > { %v3095_v12 = vpack.c.bf16 %v434_v10, %v433_v9  ;;  %3094 = vmatprep.subr.bf16.mxu1 %v3093_v7  ;;  %v3097_v17 = vpack.c.bf16 %v452_v15, %v451_v14  ;;  %v403_v18 = vld [vmem:[%s3964_s14 + $0x10] sm:$0xff]  ;;  %v404_v19 = vld [vmem:[%s3964_s14 + $0x18] sm:$0xff]  ;;  %v421_v23 = vld [vmem:[%s3964_s14 + $0xa0] sm:$0xff] }
  0x17   : > { %3064 = vmatpush3.bf16.msra.mxu0 %v3063_v8  ;;  %v435_v20 = vld [vmem:[%s3964_s14 + $0x110] sm:$0xff]  ;;  %v3067_v21 = vpack.c.bf16 %v404_v19, %v403_v18  ;;  %v436_v22 = vld [vmem:[%s3964_s14 + $0x118] sm:$0xff]  ;;  %v422_v24 = vld [vmem:[%s3964_s14 + $0xa8] sm:$0xff] }
  0x18   : > { %3096 = vmatpush3.bf16.msra.mxu1 %v3095_v12  ;;  %3066 = vmatprep.subr.bf16.mxu0 %v3065_v16  ;;  %v3099_v25 = vpack.c.bf16 %v436_v22, %v435_v20  ;;  %v3069_v26 = vpack.c.bf16 %v422_v24, %v421_v23  ;;  %v453_v27 = vld [vmem:[%s3964_s14 + $0x1a0] sm:$0xff]  ;;  %v454_v28 = vld [vmem:[%s3964_s14 + $0x1a8] sm:$0xff]  ;;  %v423_v35 = vld [vmem:[%s3964_s14 + $0xb0] sm:$0xff] }
  0x19   : > { %3098 = vmatprep.subr.bf16.mxu1 %v3097_v17  ;;  %v405_v29 = vld [vmem:[%s3964_s14 + $0x20] sm:$0xff]  ;;  %v3101_v30 = vpack.c.bf16 %v454_v28, %v453_v27  ;;  %v406_v31 = vld [vmem:[%s3964_s14 + $0x28] sm:$0xff]  ;;  %v424_v36 = vld [vmem:[%s3964_s14 + $0xb8] sm:$0xff] }
  0x1a   : > { %v437_v32 = vld [vmem:[%s3964_s14 + $0x120] sm:$0xff]  ;;  %v438_v33 = vld [vmem:[%s3964_s14 + $0x128] sm:$0xff]  ;;  %v3071_v34 = vpack.c.bf16 %v406_v31, %v405_v29  ;;  %v455_v37 = vld [vmem:[%s3964_s14 + $0x1b0] sm:$0xff]  ;;  %v3073_v39 = vpack.c.bf16 %v424_v36, %v423_v35 }
  0x1b   : > { %3068 = vmatpush3.bf16.msra.mxu0 %v3067_v21  ;;  %v3103_v38 = vpack.c.bf16 %v438_v33, %v437_v32  ;;  %v456_v40 = vld [vmem:[%s3964_s14 + $0x1b8] sm:$0xff]  ;;  %v407_v41 = vld [vmem:[%s3964_s14 + $0x30] sm:$0xff]  ;;  %v425_v46 = vld [vmem:[%s3964_s14 + $0xc0] sm:$0xff] }
  0x1c   : > { %3100 = vmatpush3.bf16.msra.mxu1 %v3099_v25  ;;  %3070 = vmatprep.subr.bf16.mxu0 %v3069_v26  ;;  %v408_v42 = vld [vmem:[%s3964_s14 + $0x38] sm:$0xff]  ;;  %v3105_v43 = vpack.c.bf16 %v456_v40, %v455_v37  ;;  %v439_v44 = vld [vmem:[%s3964_s14 + $0x130] sm:$0xff]  ;;  %v426_v47 = vld [vmem:[%s3964_s14 + $0xc8] sm:$0xff] }
  0x1d   : > { %3102 = vmatprep.subr.bf16.mxu1 %v3101_v30  ;;  %v440_v45 = vld [vmem:[%s3964_s14 + $0x138] sm:$0xff]  ;;  %v457_v48 = vld [vmem:[%s3964_s14 + $0x1c0] sm:$0xff]  ;;  %v458_v49 = vld [vmem:[%s3964_s14 + $0x1c8] sm:$0xff]  ;;  %v3075_v50 = vpack.c.bf16 %v408_v42, %v407_v41  ;;  %v3077_v52 = vpack.c.bf16 %v426_v47, %v425_v46 }
  0x1e   : > { %v3107_v51 = vpack.c.bf16 %v440_v45, %v439_v44  ;;  %v409_v53 = vld [vmem:[%s3964_s14 + $0x40] sm:$0xff]  ;;  %v410_v54 = vld [vmem:[%s3964_s14 + $0x48] sm:$0xff]  ;;  %v3109_v56 = vpack.c.bf16 %v458_v49, %v457_v48  ;;  %v427_v58 = vld [vmem:[%s3964_s14 + $0xd0] sm:$0xff] }
  0x1f   : > { %3072 = vmatpush3.bf16.msra.mxu0 %v3071_v34  ;;  %v441_v55 = vld [vmem:[%s3964_s14 + $0x140] sm:$0xff]  ;;  %v442_v57 = vld [vmem:[%s3964_s14 + $0x148] sm:$0xff]  ;;  %v428_v59 = vld [vmem:[%s3964_s14 + $0xd8] sm:$0xff]  ;;  %v3079_v62 = vpack.c.bf16 %v410_v54, %v409_v53 }
  0x20   : > { %3104 = vmatpush3.bf16.msra.mxu1 %v3103_v38  ;;  %3074 = vmatprep.subr.bf16.mxu0 %v3073_v39  ;;  %v459_v60 = vld [vmem:[%s3964_s14 + $0x1d0] sm:$0xff]  ;;  %v460_v61 = vld [vmem:[%s3964_s14 + $0x1d8] sm:$0xff]  ;;  %v3111_v63 = vpack.c.bf16 %v442_v57, %v441_v55  ;;  %v3081_v0 = vpack.c.bf16 %v428_v59, %v427_v58  ;;  %v429_v6 = vld [vmem:[%s3964_s14 + $0xe0] sm:$0xff]  ;;  %v3895_v39 = vmov 0.0|0.0  }
  0x21   : > { %3106 = vmatprep.subr.bf16.mxu1 %v3105_v43  ;;  %v411_v1 = vld [vmem:[%s3964_s14 + $0x50] sm:$0xff]  ;;  %v412_v2 = vld [vmem:[%s3964_s14 + $0x58] sm:$0xff]  ;;  %v3113_v4 = vpack.c.bf16 %v460_v61, %v459_v60  ;;  %v430_v7 = vld [vmem:[%s3964_s14 + $0xe8] sm:$0xff] }
  0x22   : > { %v443_v3 = vld [vmem:[%s3964_s14 + $0x150] sm:$0xff]  ;;  %v444_v5 = vld [vmem:[%s3964_s14 + $0x158] sm:$0xff]  ;;  %v461_v8 = vld [vmem:[%s3964_s14 + $0x1e0] sm:$0xff]  ;;  %v3083_v10 = vpack.c.bf16 %v412_v2, %v411_v1  ;;  %v3085_v14 = vpack.c.bf16 %v430_v7, %v429_v6 }
  0x23   : > { %3076 = vmatpush3.bf16.msra.mxu0 %v3075_v50  ;;  %v462_v9 = vld [vmem:[%s3964_s14 + $0x1e8] sm:$0xff]  ;;  %v413_v11 = vld [vmem:[%s3964_s14 + $0x60] sm:$0xff]  ;;  %v3115_v13 = vpack.c.bf16 %v444_v5, %v443_v3  ;;  %v376_v17 = vld [vmem:[%s4022_s18 + $0x18] sm:$0xff] }
  0x24   : > { %3108 = vmatpush3.bf16.msra.mxu1 %v3107_v51  ;;  %3078 = vmatprep.subr.bf16.mxu0 %v3077_v52  ;;  %v414_v12 = vld [vmem:[%s3964_s14 + $0x68] sm:$0xff]  ;;  %v445_v15 = vld [vmem:[%s3964_s14 + $0x160] sm:$0xff]  ;;  %v3117_v18 = vpack.c.bf16 %v462_v9, %v461_v8  ;;  %v431_v20 = vld [vmem:[%s3964_s14 + $0xf0] sm:$0xff] }
  0x25   : > { %3110 = vmatprep.subr.bf16.mxu1 %v3109_v56  ;;  %v374_v16 = vld [vmem:[%s4022_s18 + $0x8] sm:$0xff]  ;;  %v432_v21 = vld [vmem:[%s3964_s14 + $0xf8] sm:$0xff]  ;;  %v463_v22 = vld [vmem:[%s3964_s14 + $0x1f0] sm:$0xff]  ;;  %629 = vmatprep.mubr.f32.mxu1 %v376_v17  ;;  %v3087_v24 = vpack.c.bf16 %v414_v12, %v413_v11 }
  0x26   : > { %v446_v19 = vld [vmem:[%s3964_s14 + $0x168] sm:$0xff]  ;;  %529 = vmatprep.mubr.f32.mxu0 %v374_v16  ;;  %v464_v23 = vld [vmem:[%s3964_s14 + $0x1f8] sm:$0xff]  ;;  %v3089_v26 = vpack.c.bf16 %v432_v21, %v431_v20  ;;  %v415_v27 = vld [vmem:[%s3964_s14 + $0x70] sm:$0xff]  ;;  %v3897_v21 = vmov 0.0  }
  0x27   : > { %3080 = vmatpush3.bf16.msra.mxu0 %v3079_v62  ;;  %v3119_v25 = vpack.c.bf16 %v446_v19, %v445_v15  ;;  %v416_v28 = vld [vmem:[%s3964_s14 + $0x78] sm:$0xff]  ;;  %v3121_v29 = vpack.c.bf16 %v464_v23, %v463_v22  ;;  %v447_v30 = vld [vmem:[%s3964_s14 + $0x170] sm:$0xff]  ;;  %v665_v34 = vld [vmem:[%s6255_s3] sm:$0xff] }
  0x28   : > { %3112 = vmatpush3.bf16.msra.mxu1 %v3111_v63  ;;  %3082 = vmatprep.subr.bf16.mxu0 %v3081_v0  ;;  %v448_v31 = vld [vmem:[%s3964_s14 + $0x178] sm:$0xff]  ;;  %v3091_v32 = vpack.c.bf16 %v416_v28, %v415_v27  ;;  %v666_v35 = vld [vmem:[%s6255_s3 + $0x8] sm:$0xff]  ;;  %v373_v36 = vld [vmem:[%s4022_s18] sm:$0xff] }
  0x29   : > { %3114 = vmatprep.subr.bf16.mxu1 %v3113_v4  ;;  %v3123_v33 = vpack.c.bf16 %v448_v31, %v447_v30  ;;  %v375_v37 = vld [vmem:[%s4022_s18 + $0x10] sm:$0xff]  ;;  %v378_v38 = vld [vmem:[%s4022_s18 + $0x28] sm:$0xff]  ;;  %v3126_v40 = vpack.c.bf16 %v666_v35, %v665_v34  ;;  %v380_v41 = vld [vmem:[%s4022_s18 + $0x38] sm:$0xff] }
  0x2a   : > { %v667_v42 = vld [vmem:[%s6255_s3 + $0x10] sm:$0xff]  ;;  %v668_v43 = vld [vmem:[%s6255_s3 + $0x18] sm:$0xff]  ;;  %v377_v44 = vld [vmem:[%s4022_s18 + $0x20] sm:$0xff] }
  0x2b   : > { %3084 = vmatpush3.bf16.msra.mxu0 %v3083_v10  ;;  %v379_v45 = vld [vmem:[%s4022_s18 + $0x30] sm:$0xff]  ;;  %v382_v46 = vld [vmem:[%s4022_s18 + $0x48] sm:$0xff]  ;;  %v3129_v47 = vpack.c.bf16 %v668_v43, %v667_v42  ;;  %v384_v48 = vld [vmem:[%s4022_s18 + $0x58] sm:$0xff] }
  0x2c   : > { %3116 = vmatpush3.bf16.msra.mxu1 %v3115_v13  ;;  %3086 = vmatprep.subr.bf16.mxu0 %v3085_v14  ;;  %v669_v49 = vld [vmem:[%s6255_s3 + $0x20] sm:$0xff]  ;;  %v670_v50 = vld [vmem:[%s6255_s3 + $0x28] sm:$0xff]  ;;  %v383_v52 = vld [vmem:[%s4022_s18 + $0x50] sm:$0xff] }
  0x2d   : > { %3118 = vmatprep.subr.bf16.mxu1 %v3117_v18  ;;  %v381_v51 = vld [vmem:[%s4022_s18 + $0x40] sm:$0xff]  ;;  %v386_v53 = vld [vmem:[%s4022_s18 + $0x68] sm:$0xff]  ;;  %v3132_v54 = vpack.c.bf16 %v670_v50, %v669_v49  ;;  %v388_v55 = vld [vmem:[%s4022_s18 + $0x78] sm:$0xff] }
  0x2e   : > { %v671_v56 = vld [vmem:[%s6255_s3 + $0x30] sm:$0xff]  ;;  %v672_v57 = vld [vmem:[%s6255_s3 + $0x38] sm:$0xff]  ;;  %v385_v58 = vld [vmem:[%s4022_s18 + $0x60] sm:$0xff] }
  0x2f   : > { %3088 = vmatpush3.bf16.msra.mxu0 %v3087_v24  ;;  %v387_v59 = vld [vmem:[%s4022_s18 + $0x70] sm:$0xff]  ;;  %v390_v60 = vld [vmem:[%s4022_s18 + $0x88] sm:$0xff]  ;;  %v3135_v61 = vpack.c.bf16 %v672_v57, %v671_v56  ;;  %v392_v62 = vld [vmem:[%s4022_s18 + $0x98] sm:$0xff] }
  0x30   : > { %3120 = vmatpush3.bf16.msra.mxu1 %v3119_v25  ;;  %3090 = vmatprep.subr.bf16.mxu0 %v3089_v26  ;;  %v673_v63 = vld [vmem:[%s6255_s3 + $0x40] sm:$0xff]  ;;  %v674_v0 = vld [vmem:[%s6255_s3 + $0x48] sm:$0xff]  ;;  %v391_v2 = vld [vmem:[%s4022_s18 + $0x90] sm:$0xff] }
  0x31   : > { %3122 = vmatprep.subr.bf16.mxu1 %v3121_v29  ;;  %v389_v1 = vld [vmem:[%s4022_s18 + $0x80] sm:$0xff]  ;;  %v394_v3 = vld [vmem:[%s4022_s18 + $0xa8] sm:$0xff]  ;;  %v3138_v4 = vpack.c.bf16 %v674_v0, %v673_v63  ;;  %v396_v5 = vld [vmem:[%s4022_s18 + $0xb8] sm:$0xff] }
  0x32   : > { %v675_v6 = vld [vmem:[%s6255_s3 + $0x50] sm:$0xff]  ;;  %v676_v7 = vld [vmem:[%s6255_s3 + $0x58] sm:$0xff]  ;;  %v393_v8 = vld [vmem:[%s4022_s18 + $0xa0] sm:$0xff] }
  0x33   : > { %3092 = vmatpush3.bf16.msra.mxu0 %v3091_v32  ;;  %v395_v9 = vld [vmem:[%s4022_s18 + $0xb0] sm:$0xff]  ;;  %v398_v10 = vld [vmem:[%s4022_s18 + $0xc8] sm:$0x1]  ;;  %v3141_v11 = vpack.c.bf16 %v676_v7, %v675_v6  ;;  %v400_v12 = vld [vmem:[%s4022_s18 + $0xd8] sm:$0x1] }
  0x34   : > { %3124 = vmatpush3.bf16.msra.mxu1 %v3123_v33  ;;  %3125 = vmatprep.subr.bf16.mxu0 %v3895_v39  ;;  %v677_v13 = vld [vmem:[%s6255_s3 + $0x60] sm:$0xff]  ;;  %v678_v14 = vld [vmem:[%s6255_s3 + $0x68] sm:$0xff]  ;;  %v399_v16 = vld [vmem:[%s4022_s18 + $0xd0] sm:$0x1] }
  0x35   : > { %3149 = vmatprep.subr.bf16.mxu1 %v3895_v39  ;;  %v397_v15 = vld [vmem:[%s4022_s18 + $0xc0] sm:$0x1]  ;;  %v3144_v17 = vpack.c.bf16 %v678_v14, %v677_v13  ;;  %v679_v18 = vld [vmem:[%s6255_s3 + $0x70] sm:$0xff]  ;;  %v680_v19 = vld [vmem:[%s6255_s3 + $0x78] sm:$0xff] }
  0x36   : > { %530 = vmatmul.mubr.f32.vlgmr.msra.gmra.mrb[0].mxu0 %v373_v36  ;;  %v3147_v20 = vpack.c.bf16 %v680_v19, %v679_v18  ;;  %v966_v22 = vld [vmem:[%s4139_s20 + $0x8] sm:$0xff]  ;;  %v968_v24 = vld [vmem:[%s4139_s20 + $0x18] sm:$0xff]  ;;  %v965_v31 = vld [vmem:[%s4139_s20] sm:$0xff] }
  0x37   : > { %630 = vmatmul.mubr.f32.vlgmr.msra.gmra.mrb[0].mxu1 %v375_v37  ;;  %534 = vmatprep.mubr.f32.mxu0 %v378_v38  ;;  %v970_v23 = vld [vmem:[%s4139_s20 + $0x28] sm:$0xff]  ;;  %v972_v26 = vld [vmem:[%s4139_s20 + $0x38] sm:$0xff]  ;;  %v969_v32 = vld [vmem:[%s4139_s20 + $0x20] sm:$0xff] }
  0x38   : > { %634 = vmatprep.mubr.f32.mxu1 %v380_v41  ;;  %3127 = vmatpush3.bf16.msra.mxu0 %v3126_v40  ;;  %v3173_v25 = vpack.c.bf16 %v970_v23, %v966_v22  ;;  %v3205_v27 = vpack.c.bf16 %v972_v26, %v968_v24  ;;  %v974_v35 = vld [vmem:[%s4139_s20 + $0x48] sm:$0xff]  ;;  %v967_v38 = vld [vmem:[%s4139_s20 + $0x10] sm:$0xff]  ;;  %v3175_v41 = vpack.c.bf16 %v969_v32, %v965_v31  ;;  %v976_v42 = vld [vmem:[%s4139_s20 + $0x58] sm:$0xff] }
  0x39   : > { %3151 = vmatpush3.bf16.msra.mxu1 %v3126_v40  ;;  %3128 = vmatprep.subr.bf16.mxu0 %v3895_v39  ;;  %v978_v36 = vld [vmem:[%s4139_s20 + $0x68] sm:$0xff]  ;;  %v980_v43 = vld [vmem:[%s4139_s20 + $0x78] sm:$0xff]  ;;  %v977_v49 = vld [vmem:[%s4139_s20 + $0x60] sm:$0xff] }
  0x3a   : > { %535 = vmatmul.mubr.f32.gmra.mrb[2].mxu0 %v377_v44  ;;  %3152 = vmatprep.subr.bf16.mxu1 %v3895_v39  ;;  %v975_v56 = vld [vmem:[%s4139_s20 + $0x50] sm:$0xff] }
  0x3b   : > { %635 = vmatmul.mubr.f32.gmra.mrb[2].mxu1 %v379_v45  ;;  %539 = vmatprep.mubr.f32.mxu0 %v382_v46  ;;  %v979_v57 = vld [vmem:[%s4139_s20 + $0x70] sm:$0xff] }
  0x3c   : > { %639 = vmatprep.mubr.f32.mxu1 %v384_v48  ;;  %3130 = vmatpush3.bf16.msra.mxu0 %v3129_v47  ;;  %v973_v48 = vld [vmem:[%s4139_s20 + $0x40] sm:$0xff] }
  0x3d   : > { %3154 = vmatpush3.bf16.msra.mxu1 %v3129_v47  ;;  %3131 = vmatprep.subr.bf16.mxu0 %v3895_v39  ;;  %v3177_v47 = vpack.c.bf16 %v978_v36, %v974_v35 }
  0x3e   : > { %540 = vmatmul.mubr.f32.gmra.mrb[4].mxu0 %v381_v51  ;;  %3155 = vmatprep.subr.bf16.mxu1 %v3895_v39 }
  0x3f   : > { %640 = vmatmul.mubr.f32.gmra.mrb[4].mxu1 %v383_v52  ;;  %544 = vmatprep.mubr.f32.mxu0 %v386_v53 }
  0x40   : > { %644 = vmatprep.mubr.f32.mxu1 %v388_v55  ;;  %3133 = vmatpush3.bf16.msra.mxu0 %v3132_v54  ;;  %v3209_v55 = vpack.c.bf16 %v980_v43, %v976_v42  ;;  %v988_v43 = vld [vmem:[%s4139_s20 + $0xb8] sm:$0xff] }
  0x41   : > { %3157 = vmatpush3.bf16.msra.mxu1 %v3132_v54  ;;  %3134 = vmatprep.subr.bf16.mxu0 %v3895_v39 }
  0x42   : > { %545 = vmatmul.mubr.f32.gmra.mrb[6].mxu0 %v385_v58  ;;  %3158 = vmatprep.subr.bf16.mxu1 %v3895_v39 }
  0x43   : > { %645 = vmatmul.mubr.f32.gmra.mrb[6].mxu1 %v387_v59  ;;  %549 = vmatprep.mubr.f32.mxu0 %v390_v60  ;;  %v3179_v59 = vpack.c.bf16 %v977_v49, %v973_v48  ;;  %v983_v49 = vld [vmem:[%s4139_s20 + $0x90] sm:$0xff] }
  0x44   : > { %649 = vmatprep.mubr.f32.mxu1 %v392_v62  ;;  %3136 = vmatpush3.bf16.msra.mxu0 %v3135_v61 }
  0x45   : > { %3160 = vmatpush3.bf16.msra.mxu1 %v3135_v61  ;;  %3137 = vmatprep.subr.bf16.mxu0 %v3895_v39 }
  0x46   : > { %550 = vmatmul.mubr.f32.gmra.mrb[8].mxu0 %v389_v1  ;;  %3161 = vmatprep.subr.bf16.mxu1 %v3895_v39  ;;  %v3211_v1 = vpack.c.bf16 %v979_v57, %v975_v56  ;;  %v996_v56 = vld [vmem:[%s4139_s20 + $0xf8] sm:$0xff]  ;;  %v989_v57 = vld [vmem:[%s4139_s20 + $0xc0] sm:$0xff] }
  0x47   : > { %650 = vmatmul.mubr.f32.gmra.mrb[8].mxu1 %v391_v2  ;;  %554 = vmatprep.mubr.f32.mxu0 %v394_v3 }
  0x48   : > { %654 = vmatprep.mubr.f32.mxu1 %v396_v5  ;;  %3139 = vmatpush3.bf16.msra.mxu0 %v3138_v4 }
  0x49   : > { %3163 = vmatpush3.bf16.msra.mxu1 %v3138_v4  ;;  %3140 = vmatprep.subr.bf16.mxu0 %v3895_v39 }
  0x4a   : > { %555 = vmatmul.mubr.f32.gmra.mrb[10].mxu0 %v393_v8  ;;  %3164 = vmatprep.subr.bf16.mxu1 %v3895_v39 }
  0x4b   : > { %655 = vmatmul.mubr.f32.gmra.mrb[10].mxu1 %v395_v9  ;;  %559 = vmatprep.mubr.f32.mxu0 %v398_v10 }
  0x4c   : > { %659 = vmatprep.mubr.f32.mxu1 %v400_v12  ;;  %3142 = vmatpush3.bf16.msra.mxu0 %v3141_v11 }
  0x4d   : > { %3166 = vmatpush3.bf16.msra.mxu1 %v3141_v11  ;;  %3143 = vmatprep.subr.bf16.mxu0 %v3895_v39 }
  0x4e   : > { %560 = vmatmul.mubr.f32.gmra.mrb[12].mxu0 %v397_v15  ;;  %3167 = vmatprep.subr.bf16.mxu1 %v3895_v39 }
  0x4f   : > { %660 = vmatmul.mubr.f32.gmra.mrb[12].mxu1 %v399_v16  ;;  %2987 = vmatprep.mubr.msk.f32.mxu0 %vm3896_vm0, %v3897_v21 }
  0x50   : > { %3145 = vmatpush3.bf16.msra.mxu0 %v3144_v17  ;;  %3040 = vmatprep.mubr.msk.f32.mxu1 %vm3896_vm0, %v3897_v21 }
  0x51   : > { %3169 = vmatpush3.bf16.msra.mxu1 %v3144_v17  ;;  %3146 = vmatprep.subr.bf16.mxu0 %v3895_v39 }
  0x52   : > { %3170 = vmatprep.subr.bf16.mxu1 %v3895_v39  ;;  %v971_v39 = vld [vmem:[%s4139_s20 + $0x30] sm:$0xff] }
  0x53   : > { %v3207_v52 = vpack.c.bf16 %v971_v39, %v967_v38  ;;  %v982_v39 = vld [vmem:[%s4139_s20 + $0x88] sm:$0xff] }
  0x54   : > { %3148 = vmatpush3.bf16.msra.mxu0 %v3147_v20 }
  0x55   : > { %3172 = vmatpush3.bf16.msra.mxu1 %v3147_v20  ;;  %3174 = vmatprep.subr.bf16.mxu0 %v3173_v25 }
  0x56   : > { %3206 = vmatprep.subr.bf16.mxu1 %v3205_v27 }
 0x109   : > { %v2835_v28 = vpop.f32.mrb[0].mxu0 }
 0x10a   : > { %v2888_v29 = vpop.f32.mrb[0].mxu1  ;;  %v2836_v30 = vpop.f32.mrb[1].mxu0 }
 0x10b   : > { %v2837_v33 = vadd.f32 %v2836_v30, %v2835_v28  ;;  %v2889_v34 = vpop.f32.mrb[1].mxu1 }
 0x10c   : > { %v2890_v37 = vadd.f32 %v2889_v34, %v2888_v29 }
 0x10d   : > { %v2838_v40 = vpop.f32.mrb[2].mxu0 }
 0x10e   : > { %v4153_v44 = vadd.f32 %v2890_v37, %v2837_v33  ;;  %v2891_v45 = vpop.f32.mrb[2].mxu1  ;;  %v2839_v46 = vpop.f32.mrb[3].mxu0 }
 0x10f   : > { %v2840_v50 = vadd.f32 %v2839_v46, %v2838_v40  ;;  %v2892_v51 = vpop.f32.mrb[3].mxu1  ;;  %v986_v40 = vld [vmem:[%s4139_s20 + $0xa8] sm:$0xff]  ;;  %v985_v46 = vld [vmem:[%s4139_s20 + $0xa0] sm:$0xff] }
 0x110   : > { %v783_v53 = vmul.f32 %v4153_v44, %v4153_v44  ;;  %v2893_v54 = vadd.f32 %v2892_v51, %v2891_v45  ;;  %2988 = vmatmul.mubr.f32.vlgmr.msra.gmra.mrb[14].mxu0 %v4153_v44  ;;  %v3181_v42 = vpack.c.bf16 %v986_v40, %v982_v39  ;;  %v981_v45 = vld [vmem:[%s4139_s20 + $0x80] sm:$0xff]  ;;  %v1015_v40 = vld [vmem:[%s4139_s20 + $0x190] sm:$0xff] }
 0x111   : > { %v2841_v58 = vpop.f32.mrb[4].mxu0  ;;  %2990 = vmatprep.mubr.msk.f32.mxu0 %vm3896_vm0, %v3897_v21  ;;  %3176 = vmatpush1.bf16.msra.mxu0 %v3175_v41  ;;  %v984_v41 = vld [vmem:[%s4139_s20 + $0x98] sm:$0xff]  ;;  %v3183_v48 = vpack.c.bf16 %v985_v46, %v981_v45  ;;  %v1026_v45 = vld [vmem:[%s4139_s20 + $0x1e8] sm:$0xff] }
 0x112   : > { %v4164_v60 = vadd.f32 %v2893_v54, %v2840_v50  ;;  %v2894_v61 = vpop.f32.mrb[4].mxu1  ;;  %3041 = vmatmul.mubr.f32.vlgmr.msra.gmra.mrb[14].mxu1 %v783_v53  ;;  %v2842_v62 = vpop.f32.mrb[5].mxu0  ;;  %3178 = vmatprep.subr.bf16.mxu0 %v3177_v47  ;;  %v3213_v47 = vpack.c.bf16 %v988_v43, %v984_v41  ;;  %v987_v50 = vld [vmem:[%s4139_s20 + $0xb0] sm:$0xff]  ;;  %v994_v53 = vld [vmem:[%s4139_s20 + $0xe8] sm:$0xff]  ;;  %v992_v54 = vld [vmem:[%s4139_s20 + $0xd8] sm:$0xff] }
 0x113   : > { %v2843_v63 = vadd.f32 %v2842_v62, %v2841_v58  ;;  %v2895_v0 = vpop.f32.mrb[5].mxu1  ;;  %3043 = vmatprep.mubr.msk.f32.mxu1 %vm3896_vm0, %v3897_v21  ;;  %3208 = vmatpush1.bf16.msra.mxu1 %v3207_v52  ;;  %v3215_v51 = vpack.c.bf16 %v987_v50, %v983_v49  ;;  %v990_v52 = vld [vmem:[%s4139_s20 + $0xc8] sm:$0xff]  ;;  %v993_v58 = vld [vmem:[%s4139_s20 + $0xe0] sm:$0xff]  ;;  %v991_v62 = vld [vmem:[%s4139_s20 + $0xd0] sm:$0xff] }
 0x114   : > { %v2896_v2 = vadd.f32 %v2895_v0, %v2894_v61  ;;  %2991 = vmatmul.mubr.f32.gmra.mrb[16].mxu0 %v4164_v60  ;;  %v784_v3 = vmul.f32 %v4164_v60, %v4164_v60  ;;  %3210 = vmatprep.subr.bf16.mxu1 %v3209_v55  ;;  %v3185_v55 = vpack.c.bf16 %v994_v53, %v990_v52  ;;  %v1019_v41 = vld [vmem:[%s4139_s20 + $0x1b0] sm:$0xff]  ;;  %v1022_v43 = vld [vmem:[%s4139_s20 + $0x1c8] sm:$0xff]  ;;  %v1024_v46 = vld [vmem:[%s4139_s20 + $0x1d8] sm:$0xff] }
 0x115   : > { %v2844_v4 = vpop.f32.mrb[6].mxu0  ;;  %2993 = vmatprep.mubr.msk.f32.mxu0 %vm3896_vm0, %v3897_v21  ;;  %3180 = vmatpush1.bf16.msra.mxu0 %v3179_v59  ;;  %v3217_v59 = vpack.c.bf16 %v996_v56, %v992_v54  ;;  %v3187_v61 = vpack.c.bf16 %v993_v58, %v989_v57  ;;  %v1021_v49 = vld [vmem:[%s4139_s20 + $0x1c0] sm:$0xff]  ;;  %v1023_v53 = vld [vmem:[%s4139_s20 + $0x1d0] sm:$0xff]  ;;  %v1244_v56 = vld [vmem:[%s6256_s4 + $0x8] sm:$0xff] }
 0x116   : > { %v4173_v5 = vadd.f32 %v2896_v2, %v2843_v63  ;;  %v2897_v6 = vpop.f32.mrb[6].mxu1  ;;  %3044 = vmatmul.mubr.f32.gmra.mrb[16].mxu1 %v784_v3  ;;  %v2845_v7 = vpop.f32.mrb[7].mxu0  ;;  %3182 = vmatprep.subr.bf16.mxu0 %v3181_v42  ;;  %v995_v63 = vld [vmem:[%s4139_s20 + $0xf0] sm:$0xff]  ;;  %v1002_v2 = vld [vmem:[%s4139_s20 + $0x128] sm:$0xff]  ;;  %v1000_v3 = vld [vmem:[%s4139_s20 + $0x118] sm:$0xff]  ;;  %v3231_v42 = vpack.c.bf16 %v1019_v41, %v1015_v40 }
 0x117   : > { %v2846_v8 = vadd.f32 %v2845_v7, %v2844_v4  ;;  %v2898_v9 = vpop.f32.mrb[7].mxu1  ;;  %3046 = vmatprep.mubr.msk.f32.mxu1 %vm3896_vm0, %v3897_v21  ;;  %3212 = vmatpush1.bf16.msra.mxu1 %v3211_v1  ;;  %v3219_v0 = vpack.c.bf16 %v995_v63, %v991_v62  ;;  %v998_v1 = vld [vmem:[%s4139_s20 + $0x108] sm:$0xff]  ;;  %v997_v7 = vld [vmem:[%s4139_s20 + $0x100] sm:$0xff]  ;;  %v1027_v54 = vld [vmem:[%s4139_s20 + $0x1f0] sm:$0xff] }
 0x118   : > { %v2899_v10 = vadd.f32 %v2898_v9, %v2897_v6  ;;  %2994 = vmatmul.mubr.f32.gmra.mrb[18].mxu0 %v4173_v5  ;;  %v785_v11 = vmul.f32 %v4173_v5, %v4173_v5  ;;  %3214 = vmatprep.subr.bf16.mxu1 %v3213_v47  ;;  %v3189_v4 = vpack.c.bf16 %v1002_v2, %v998_v1  ;;  %v1004_v6 = vld [vmem:[%s4139_s20 + $0x138] sm:$0xff]  ;;  %v1025_v50 = vld [vmem:[%s4139_s20 + $0x1e0] sm:$0xff]  ;;  %v1248_v57 = vld [vmem:[%s6256_s4 + $0x28] sm:$0xff] }
 0x119   : > { %v2847_v12 = vpop.f32.mrb[8].mxu0  ;;  %2996 = vmatprep.mubr.msk.f32.mxu0 %vm3896_vm0, %v3897_v21  ;;  %3184 = vmatpush1.bf16.msra.mxu0 %v3183_v48  ;;  %v3221_v9 = vpack.c.bf16 %v1004_v6, %v1000_v3  ;;  %v3201_v47 = vpack.c.bf16 %v1026_v45, %v1022_v43  ;;  %v1028_v48 = vld [vmem:[%s4139_s20 + $0x1f8] sm:$0xff]  ;;  %v3203_v52 = vpack.c.bf16 %v1025_v50, %v1021_v49 }
 0x11a   : > { %v4182_v13 = vadd.f32 %v2899_v10, %v2846_v8  ;;  %v2900_v14 = vpop.f32.mrb[8].mxu1  ;;  %3047 = vmatmul.mubr.f32.gmra.mrb[18].mxu1 %v785_v11  ;;  %v2848_v15 = vpop.f32.mrb[9].mxu0  ;;  %3186 = vmatprep.subr.bf16.mxu0 %v3185_v55  ;;  %v1001_v8 = vld [vmem:[%s4139_s20 + $0x120] sm:$0xff]  ;;  %v999_v11 = vld [vmem:[%s4139_s20 + $0x110] sm:$0xff]  ;;  %v3235_v55 = vpack.c.bf16 %v1027_v54, %v1023_v53  ;;  %v1246_v58 = vld [vmem:[%s6256_s4 + $0x18] sm:$0xff] }
 0x11b   : > { %v2849_v16 = vadd.f32 %v2848_v15, %v2847_v12  ;;  %v2901_v17 = vpop.f32.mrb[9].mxu1  ;;  %3049 = vmatprep.mubr.msk.f32.mxu1 %vm3896_vm0, %v3897_v21  ;;  %3216 = vmatpush1.bf16.msra.mxu1 %v3215_v51  ;;  %v3191_v10 = vpack.c.bf16 %v1001_v8, %v997_v7  ;;  %v1003_v12 = vld [vmem:[%s4139_s20 + $0x130] sm:$0xff]  ;;  %v1006_v15 = vld [vmem:[%s4139_s20 + $0x148] sm:$0xff]  ;;  %v3233_v51 = vpack.c.bf16 %v1028_v48, %v1024_v46  ;;  %v1247_v48 = vld [vmem:[%s6256_s4 + $0x20] sm:$0xff] }
 0x11c   : > { %v2902_v18 = vadd.f32 %v2901_v17, %v2900_v14  ;;  %2997 = vmatmul.mubr.f32.gmra.mrb[20].mxu0 %v4182_v13  ;;  %v786_v19 = vmul.f32 %v4182_v13, %v4182_v13  ;;  %3218 = vmatprep.subr.bf16.mxu1 %v3217_v59  ;;  %v3223_v14 = vpack.c.bf16 %v1003_v12, %v999_v11  ;;  %v1008_v17 = vld [vmem:[%s4139_s20 + $0x158] sm:$0xff]  ;;  %v1249_v53 = vld [vmem:[%s6256_s4 + $0x30] sm:$0xff]  ;;  %v1252_v54 = vld [vmem:[%s6256_s4 + $0x48] sm:$0xff] }
 0x11d   : > { %v2850_v20 = vpop.f32.mrb[10].mxu0  ;;  %2999 = vmatprep.mubr.msk.f32.mxu0 %vm3896_vm0, %v3897_v21  ;;  %3188 = vmatpush1.bf16.msra.mxu0 %v3187_v61  ;;  %v4275_v59 = vpack.c.bf16 %v1248_v57, %v1244_v56  ;;  %v1250_v61 = vld [vmem:[%s6256_s4 + $0x38] sm:$0xff] }
 0x11e   : > { %v4191_v22 = vadd.f32 %v2902_v18, %v2849_v16  ;;  %v2903_v23 = vpop.f32.mrb[10].mxu1  ;;  %3050 = vmatmul.mubr.f32.gmra.mrb[20].mxu1 %v786_v19  ;;  %v2851_v24 = vpop.f32.mrb[11].mxu0  ;;  %3190 = vmatprep.subr.bf16.mxu0 %v3189_v4  ;;  %v1010_v16 = vld [vmem:[%s4139_s20 + $0x168] sm:$0xff]  ;;  %v1012_v19 = vld [vmem:[%s4139_s20 + $0x178] sm:$0xff]  ;;  %v4280_v62 = vpack.c.bf16 %v1250_v61, %v1246_v58 }
 0x11f   : > { %v2852_v25 = vadd.f32 %v2851_v24, %v2850_v20  ;;  %v2904_v26 = vpop.f32.mrb[11].mxu1  ;;  %3052 = vmatprep.mubr.msk.f32.mxu1 %vm3896_vm0, %v3897_v21  ;;  %3220 = vmatpush1.bf16.msra.mxu1 %v3219_v0  ;;  %v3193_v18 = vpack.c.bf16 %v1010_v16, %v1006_v15  ;;  %v1005_v20 = vld [vmem:[%s4139_s20 + $0x140] sm:$0xff]  ;;  %v3225_v24 = vpack.c.bf16 %v1012_v19, %v1008_v17  ;;  %v1256_v58 = vld [vmem:[%s6256_s4 + $0x68] sm:$0xff]  ;;  %v1254_v61 = vld [vmem:[%s6256_s4 + $0x58] sm:$0xff] }
 0x120   : > { %v2905_v27 = vadd.f32 %v2904_v26, %v2903_v23  ;;  %3000 = vmatmul.mubr.f32.gmra.mrb[22].mxu0 %v4191_v22  ;;  %v787_v28 = vmul.f32 %v4191_v22, %v4191_v22  ;;  %3222 = vmatprep.subr.bf16.mxu1 %v3221_v9  ;;  %v1009_v23 = vld [vmem:[%s4139_s20 + $0x160] sm:$0xff]  ;;  %v1007_v26 = vld [vmem:[%s4139_s20 + $0x150] sm:$0xff] }
 0x121   : > { %v2853_v29 = vpop.f32.mrb[12].mxu0  ;;  %3002 = vmatprep.mubr.msk.f32.mxu0 %vm3896_vm0, %v3897_v21  ;;  %3192 = vmatpush1.bf16.msra.mxu0 %v3191_v10 }
 0x122   : > { %v4200_v30 = vadd.f32 %v2905_v27, %v2852_v25  ;;  %v2906_v31 = vpop.f32.mrb[12].mxu1  ;;  %3053 = vmatmul.mubr.f32.gmra.mrb[22].mxu1 %v787_v28  ;;  %v2854_v32 = vpop.f32.mrb[13].mxu0  ;;  %v3195_v25 = vpack.c.bf16 %v1009_v23, %v1005_v20  ;;  %v1011_v27 = vld [vmem:[%s4139_s20 + $0x170] sm:$0xff]  ;;  %3194 = vmatprep.subr.bf16.mxu0 %v3193_v18 }
 0x123   : > { %v2855_v33 = vadd.f32 %v2854_v32, %v2853_v29  ;;  %v2907_v34 = vpop.f32.mrb[13].mxu1  ;;  %3055 = vmatprep.mubr.msk.f32.mxu1 %vm3896_vm0, %v3897_v21  ;;  %3224 = vmatpush1.bf16.msra.mxu1 %v3223_v14  ;;  %v3227_v28 = vpack.c.bf16 %v1011_v27, %v1007_v26  ;;  %v1014_v29 = vld [vmem:[%s4139_s20 + $0x188] sm:$0xff]  ;;  %v1016_v32 = vld [vmem:[%s4139_s20 + $0x198] sm:$0xff] }
 0x124   : > { %v2908_v35 = vadd.f32 %v2907_v34, %v2906_v31  ;;  %3003 = vmatmul.mubr.f32.gmra.mrb[24].mxu0 %v4200_v30  ;;  %v788_v36 = vmul.f32 %v4200_v30, %v4200_v30  ;;  %3226 = vmatprep.subr.bf16.mxu1 %v3225_v24  ;;  %v1018_v31 = vld [vmem:[%s4139_s20 + $0x1a8] sm:$0xff]  ;;  %v1020_v34 = vld [vmem:[%s4139_s20 + $0x1b8] sm:$0xff] }
 0x125   : > { %3005 = vmatprep.mubr.msk.f32.mxu0 %vm3896_vm0, %v3897_v21  ;;  %3196 = vmatpush1.bf16.msra.mxu0 %v3195_v25 }
 0x126   : > { %v4209_v37 = vadd.f32 %v2908_v35, %v2855_v33  ;;  %3056 = vmatmul.mubr.f32.gmra.mrb[24].mxu1 %v788_v36  ;;  %v3197_v33 = vpack.c.bf16 %v1018_v31, %v1014_v29  ;;  %v1013_v35 = vld [vmem:[%s4139_s20 + $0x180] sm:$0xff] }
 0x127   : > { %3058 = vmatprep.mubr.msk.f32.mxu1 %vm3896_vm0, %v3897_v21  ;;  %3228 = vmatpush1.bf16.msra.mxu1 %v3227_v28  ;;  %v1017_v36 = vld [vmem:[%s4139_s20 + $0x1a0] sm:$0xff] }
 0x128   : > { %3006 = vmatmul.mubr.f32.gmra.mrb[26].mxu0 %v4209_v37  ;;  %v789_v38 = vmul.f32 %v4209_v37, %v4209_v37  ;;  %v3199_v39 = vpack.c.bf16 %v1017_v36, %v1013_v35  ;;  %3198 = vmatprep.subr.bf16.mxu0 %v3197_v33 }
 0x129   : > { %1093 = vmatprep.mubr.f32.mxu0 %v3897_v21 }
 0x12a   : > { %3059 = vmatmul.mubr.f32.gmra.mrb[26].mxu1 %v789_v38  ;;  %v3229_v38 = vpack.c.bf16 %v1020_v34, %v1016_v32  ;;  %3200 = vmatpush1.bf16.msra.mxu0 %v3199_v39 }
 0x12b   : > { %1200 = vmatprep.mubr.f32.mxu1 %v3897_v21  ;;  %3202 = vmatprep.subr.bf16.mxu0 %v3201_v47  ;;  %v1243_v47 = vld [vmem:[%s6256_s4] sm:$0xff] }
 0x12c   : > { %3230 = vmatprep.subr.bf16.mxu1 %v3229_v38  ;;  %v4300_v38 = vld [vmem:[%s6257_s5] ss:$0 sm:$0xff] }
 0x12d   : > { %3232 = vmatpush1.bf16.msra.mxu1 %v3231_v42 }
 0x12e   : > { %3234 = vmatprep.subr.bf16.mxu1 %v3233_v51  ;;  %3204 = vmatpush1.bf16.msra.mxu0 %v3203_v52 }
 0x12f   : > { %3238 = vmatprep.subr.bf16.mxu0 %v4275_v59 }
 0x131   : > { %3236 = vmatpush1.bf16.msra.mxu1 %v3235_v55 }
 0x132   : > { %3366 = vmatprep.subr.bf16.mxu1 %v4280_v62 }
 0x1e3   : > { %v749_v63 = vpop.f32.mrb[14].mxu0 }
 0x1e4   : > { %v890_v0 = vmul.f32 %v749_v63, %v749_v63  ;;  %v2989_v1 = vpop.f32.mrb[15].mxu0  ;;  %v904_v31 = vsub.f32 %v4153_v44, %v749_v63  ;;  %v4305_v44 = vld [vmem:[%s6258_s6] ss:$0 sm:$0xff]  ;;  %v1258_v63 = vld [vmem:[%s6256_s4 + $0x78] sm:$0xff] }
 0x1e5   : > { %v856_v2 = vpop.f32.mrb[14].mxu1 }
 0x1e6   : > { %v897_v3 = vsub.f32 %v856_v2, %v890_v0  ;;  %v3042_v4 = vpop.f32.mrb[15].mxu1  ;;  %v4338_v2 = vpack.c.bf16 %v1247_v48, %v1243_v47  ;;  %v1265_v47 = vld [vmem:[%s6256_s4 + $0xb0] sm:$0xff]  ;;  %v1268_v48 = vld [vmem:[%s6256_s4 + $0xc8] sm:$0xff] }
 0x1e7   : > { %v754_v6 = vpop.f32.mrb[16].mxu0 }
 0x1e8   : > { %v911_v7 = vadd.f32 1e-05, %v897_v3  ;;  %v891_v8 = vmul.f32 %v754_v6, %v754_v6  ;;  %v2992_v9 = vpop.f32.mrb[17].mxu0  ;;  %v905_v43 = vsub.f32 %v4164_v60, %v754_v6  ;;  %v1245_v60 = vld [vmem:[%s6256_s4 + $0x10] sm:$0xff] }
 0x1e9   : > { %v861_v10 = vpop.f32.mrb[16].mxu1  ;;  %v1251_v9 = vld [vmem:[%s6256_s4 + $0x40] sm:$0xff] }
 0x1ea   : > { %3817 = vrsqrt.f32 %v911_v7  ;;  %v898_v11 = vsub.f32 %v861_v10, %v891_v8  ;;  %v3045_v12 = vpop.f32.mrb[17].mxu1  ;;  %v4345_v8 = vpack.c.bf16 %v1249_v53, %v1245_v60  ;;  %v1255_v10 = vld [vmem:[%s6256_s4 + $0x60] sm:$0xff]  ;;  %v1274_v60 = vld [vmem:[%s6256_s4 + $0xf8] sm:$0xff] }
 0x1eb   : > { %v4284_v14 = vpop.f32.mrb[18].mxu0 }
 0x1ec   : > { %v912_v15 = vadd.f32 1e-05, %v898_v11  ;;  %v892_v16 = vmul.f32 %v4284_v14, %v4284_v14  ;;  %v2995_v17 = vpop.f32.mrb[19].mxu0  ;;  %v906_v3 = vsub.f32 %v4173_v5, %v4284_v14 }
 0x1ed   : > { %v866_v18 = vpop.f32.mrb[18].mxu1  ;;  %v1253_v17 = vld [vmem:[%s6256_s4 + $0x50] sm:$0xff] }
 0x1ee   : > { %3819 = vrsqrt.f32 %v912_v15  ;;  %v899_v19 = vsub.f32 %v866_v18, %v892_v16  ;;  %v3048_v20 = vpop.f32.mrb[19].mxu1  ;;  %v4355_v15 = vpack.c.bf16 %v1256_v58, %v1252_v54  ;;  %v4357_v16 = vpack.c.bf16 %v1258_v63, %v1254_v61  ;;  %v1257_v18 = vld [vmem:[%s6256_s4 + $0x70] sm:$0xff]  ;;  %v1267_v58 = vld [vmem:[%s6256_s4 + $0xc0] sm:$0xff] }
 0x1ef   : > { %v4288_v23 = vpop.f32.mrb[20].mxu0  ;;  %v1271_v61 = vld [vmem:[%s6256_s4 + $0xe0] sm:$0xff] }
 0x1f0   : > { %v913_v24 = vadd.f32 1e-05, %v899_v19  ;;  %v893_v25 = vmul.f32 %v4288_v23, %v4288_v23  ;;  %v2998_v26 = vpop.f32.mrb[21].mxu0  ;;  %v1260_v19 = vld [vmem:[%s6256_s4 + $0x88] sm:$0xff] }
 0x1f1   : > { %v871_v27 = vpop.f32.mrb[20].mxu1  ;;  %v1264_v26 = vld [vmem:[%s6256_s4 + $0xa8] sm:$0xff] }
 0x1f2   : > { %3821 = vrsqrt.f32 %v913_v24  ;;  %v900_v28 = vsub.f32 %v871_v27, %v893_v25  ;;  %v3051_v29 = vpop.f32.mrb[21].mxu1  ;;  %v1262_v27 = vld [vmem:[%s6256_s4 + $0x98] sm:$0xff] }
 0x1f3   : > { %v4293_v32 = vpop.f32.mrb[22].mxu0 }
 0x1f4   : > { %v3818_v33 = vpop.eup %3817  ;;  %v914_v34 = vadd.f32 1e-05, %v900_v28  ;;  %v894_v35 = vmul.f32 %v4293_v32, %v4293_v32  ;;  %v3001_v36 = vpop.f32.mrb[23].mxu0  ;;  %v1266_v28 = vld [vmem:[%s6256_s4 + $0xb8] sm:$0xff]  ;;  %v908_v54 = vsub.f32 %v4191_v22, %v4293_v32 }
 0x1f5   : > { %v925_v39 = vmul.f32 %v3818_v33, %v904_v31  ;;  %v876_v40 = vpop.f32.mrb[22].mxu1  ;;  %v4380_v33 = vpack.c.bf16 %v1255_v10, %v1251_v9  ;;  %v1280_v9 = vld [vmem:[%s6256_s4 + $0x128] sm:$0xff]  ;;  %v1278_v10 = vld [vmem:[%s6256_s4 + $0x118] sm:$0xff] }
 0x1f6   : > { %3823 = vrsqrt.f32 %v914_v34  ;;  %v901_v41 = vsub.f32 %v876_v40, %v894_v35  ;;  %v3054_v42 = vpop.f32.mrb[23].mxu1  ;;  %v907_v34 = vsub.f32 %v4182_v13, %v4288_v23  ;;  %v1259_v40 = vld [vmem:[%s6256_s4 + $0x80] sm:$0xff]  ;;  %v4397_v13 = vpack.c.bf16 %v1264_v26, %v1260_v19  ;;  %v1281_v26 = vld [vmem:[%s6256_s4 + $0x130] sm:$0xff] }
 0x1f7   : > { %v4308_v45 = vpop.f32.mrb[24].mxu0  ;;  %v938_v46 = vmul.f32 %v4300_v38, %v925_v39  ;;  %v4387_v39 = vpack.c.bf16 %v1257_v18, %v1253_v17  ;;  %v4399_v23 = vpack.c.bf16 %v1266_v28, %v1262_v27  ;;  %v1275_v19 = vld [vmem:[%s6256_s4 + $0x100] sm:$0xff]  ;;  %v1284_v27 = vld [vmem:[%s6256_s4 + $0x148] sm:$0xff] }
 0x1f8   : > { %v3820_v49 = vpop.eup %3819  ;;  %v915_v50 = vadd.f32 1e-05, %v901_v41  ;;  %v895_v51 = vmul.f32 %v4308_v45, %v4308_v45  ;;  %v3004_v52 = vpop.f32.mrb[25].mxu0  ;;  %v1263_v41 = vld [vmem:[%s6256_s4 + $0xa0] sm:$0xff] }
 0x1f9   : > { %v881_v55 = vpop.f32.mrb[24].mxu1  ;;  %v951_v56 = vadd.f32 %v4305_v44, %v938_v46  ;;  %v926_v57 = vmul.f32 %v3820_v49, %v905_v43  ;;  %v1261_v46 = vld [vmem:[%s6256_s4 + $0x90] sm:$0xff]  ;;  %v1270_v52 = vld [vmem:[%s6256_s4 + $0xd8] sm:$0xff]  ;;  %v4422_v53 = vpack.c.bf16 %v1263_v41, %v1259_v40 }
 0x1fa   : > { %3825 = vrsqrt.f32 %v915_v50  ;;  %v902_v0 = vsub.f32 %v881_v55, %v895_v51  ;;  %v3057_v1 = vpop.f32.mrb[25].mxu1  ;;  %v1272_v51 = vld [vmem:[%s6256_s4 + $0xe8] sm:$0xff]  ;;  %v4441_v32 = vpack.c.bf16 %v1274_v60, %v1270_v52 }
 0x1fb   : > { %v4342_v4 = vpop.f32.mrb[26].mxu0  ;;  %v958_v6 = vmax.f32 %v951_v56, 0.0  ;;  %v939_v7 = vmul.f32 %v4300_v38, %v926_v57  ;;  %v4429_v57 = vpack.c.bf16 %v1265_v47, %v1261_v46  ;;  %v4439_v22 = vpack.c.bf16 %v1272_v51, %v1268_v48  ;;  %v1273_v1 = vld [vmem:[%s6256_s4 + $0xf0] sm:$0xff]  ;;  %v1283_v46 = vld [vmem:[%s6256_s4 + $0x140] sm:$0xff]  ;;  %v1292_v51 = vld [vmem:[%s6256_s4 + $0x188] sm:$0xff] }
 0x1fc   : > { %v3822_v11 = vpop.eup %3821  ;;  %v916_v12 = vadd.f32 1e-05, %v902_v0  ;;  %v896_v5 = vmul.f32 %v4342_v4, %v4342_v4  ;;  %v3007_v14 = vpop.f32.mrb[27].mxu0  ;;  %v1269_v0 = vld [vmem:[%s6256_s4 + $0xd0] sm:$0xff]  ;;  %v910_v40 = vsub.f32 %v4209_v37, %v4342_v4  ;;  %v1287_v47 = vld [vmem:[%s6256_s4 + $0x160] sm:$0xff] }
 0x1fd   : > { %v886_v20 = vpop.f32.mrb[26].mxu1  ;;  %1094 = vmatmul.mubr.f32.vlgmr.msra.gmra.mrb[28].mxu0 %v958_v6  ;;  %1201 = vmatmul.mubr.f32.vlgmr.msra.gmra.mrb[28].mxu1 %v958_v6  ;;  %v952_v24 = vadd.f32 %v4305_v44, %v939_v7  ;;  %v927_v25 = vmul.f32 %v3822_v11, %v906_v3  ;;  %v1276_v3 = vld [vmem:[%s6256_s4 + $0x108] sm:$0xff]  ;;  %v1282_v11 = vld [vmem:[%s6256_s4 + $0x138] sm:$0xff]  ;;  %v4471_v18 = vpack.c.bf16 %v1273_v1, %v1269_v0  ;;  %v1291_v1 = vld [vmem:[%s6256_s4 + $0x180] sm:$0xff] }
 0x1fe   : > { %3827 = vrsqrt.f32 %v916_v12  ;;  %v903_v29 = vsub.f32 %v886_v20, %v896_v5  ;;  %1099 = vmatprep.mubr.f32.mxu0 %v3897_v21  ;;  %1206 = vmatprep.mubr.f32.mxu1 %v3897_v21  ;;  %v3060_v31 = vpop.f32.mrb[27].mxu1  ;;  %v4464_v12 = vpack.c.bf16 %v1271_v61, %v1267_v58  ;;  %v909_v5 = vsub.f32 %v4200_v30, %v4308_v45  ;;  %v1279_v20 = vld [vmem:[%s6256_s4 + $0x120] sm:$0xff] }
 0x1ff   : > { %v959_v35 = vmax.f32 %v952_v24, 0.0  ;;  %v940_v36 = vmul.f32 %v4300_v38, %v927_v25  ;;  %3240 = vmatpush1.bf16.msra.mxu0 %v4338_v2  ;;  %3368 = vmatpush1.bf16.msra.mxu1 %v4345_v8  ;;  %v4481_v30 = vpack.c.bf16 %v1280_v9, %v1276_v3  ;;  %v4483_v45 = vpack.c.bf16 %v1282_v11, %v1278_v10  ;;  %v1277_v25 = vld [vmem:[%s6256_s4 + $0x110] sm:$0xff]  ;;  %v1288_v31 = vld [vmem:[%s6256_s4 + $0x168] sm:$0xff]  ;;  %v1295_v3 = vld [vmem:[%s6256_s4 + $0x1a0] sm:$0xff] }
 0x200   : > { %v3824_v42 = vpop.eup %3823  ;;  %v917_v43 = vadd.f32 1e-05, %v903_v29  ;;  %3242 = vmatprep.subr.bf16.mxu0 %v4355_v15  ;;  %3370 = vmatprep.subr.bf16.mxu1 %v4357_v16  ;;  %v4523_v37 = vpack.c.bf16 %v1288_v31, %v1284_v27  ;;  %v1297_v9 = vld [vmem:[%s6256_s4 + $0x1b0] sm:$0xff]  ;;  %v1300_v10 = vld [vmem:[%s6256_s4 + $0x1c8] sm:$0xff] }
 0x201   : > { %1100 = vmatmul.mubr.f32.gmra.mrb[30].mxu0 %v959_v35  ;;  %1207 = vmatmul.mubr.f32.gmra.mrb[30].mxu1 %v959_v35  ;;  %v953_v49 = vadd.f32 %v4305_v44, %v940_v36  ;;  %v928_v50 = vmul.f32 %v3824_v42, %v907_v34  ;;  %v1286_v34 = vld [vmem:[%s6256_s4 + $0x158] sm:$0xff]  ;;  %v4506_v36 = vpack.c.bf16 %v1279_v20, %v1275_v19  ;;  %v1301_v27 = vld [vmem:[%s6256_s4 + $0x1d0] sm:$0xff]  ;;  %v1312_v31 = vld [vmem:[%s6256_s4 + $0x228] sm:$0xff] }
 0x202   : > { %3829 = vrsqrt.f32 %v917_v43  ;;  %1105 = vmatprep.mubr.f32.mxu0 %v3897_v21  ;;  %1212 = vmatprep.mubr.f32.mxu1 %v3897_v21  ;;  %v1290_v35 = vld [vmem:[%s6256_s4 + $0x178] sm:$0xff]  ;;  %v4513_v43 = vpack.c.bf16 %v1281_v26, %v1277_v25  ;;  %v1303_v25 = vld [vmem:[%s6256_s4 + $0x1e0] sm:$0xff] }
 0x203   : > { %v960_v55 = vmax.f32 %v953_v49, 0.0  ;;  %v941_v56 = vmul.f32 %v4300_v38, %v928_v50  ;;  %3244 = vmatpush1.bf16.msra.mxu0 %v4380_v33  ;;  %3372 = vmatpush1.bf16.msra.mxu1 %v4387_v39  ;;  %v4525_v4 = vpack.c.bf16 %v1290_v35, %v1286_v34  ;;  %v1285_v49 = vld [vmem:[%s6256_s4 + $0x150] sm:$0xff]  ;;  %v1310_v34 = vld [vmem:[%s6256_s4 + $0x218] sm:$0xff] }
 0x204   : > { %v3826_v63 = vpop.eup %3825  ;;  %3246 = vmatprep.subr.bf16.mxu0 %v4397_v13  ;;  %3374 = vmatprep.subr.bf16.mxu1 %v4399_v23  ;;  %v1289_v50 = vld [vmem:[%s6256_s4 + $0x170] sm:$0xff]  ;;  %v1314_v35 = vld [vmem:[%s6256_s4 + $0x238] sm:$0xff] }
 0x205   : > { %1106 = vmatmul.mubr.f32.gmra.mrb[32].mxu0 %v960_v55  ;;  %1213 = vmatmul.mubr.f32.gmra.mrb[32].mxu1 %v960_v55  ;;  %v954_v6 = vadd.f32 %v4305_v44, %v941_v56  ;;  %v929_v7 = vmul.f32 %v3826_v63, %v908_v54  ;;  %v1296_v54 = vld [vmem:[%s6256_s4 + $0x1a8] sm:$0xff]  ;;  %v1294_v55 = vld [vmem:[%s6256_s4 + $0x198] sm:$0xff]  ;;  %v4551_v63 = vpack.c.bf16 %v1287_v47, %v1283_v46  ;;  %v1311_v46 = vld [vmem:[%s6256_s4 + $0x220] sm:$0xff] }
 0x206   : > { %1111 = vmatprep.mubr.f32.mxu0 %v3897_v21  ;;  %1218 = vmatprep.mubr.f32.mxu1 %v3897_v21  ;;  %v1298_v56 = vld [vmem:[%s6256_s4 + $0x1b8] sm:$0xff]  ;;  %v4553_v0 = vpack.c.bf16 %v1289_v50, %v1285_v49  ;;  %v1309_v49 = vld [vmem:[%s6256_s4 + $0x210] sm:$0xff] }
 0x207   : > { %v961_v14 = vmax.f32 %v954_v6, 0.0  ;;  %v942_v17 = vmul.f32 %v4300_v38, %v929_v7  ;;  %3248 = vmatpush1.bf16.msra.mxu0 %v4422_v53  ;;  %3376 = vmatpush1.bf16.msra.mxu1 %v4429_v57  ;;  %v4565_v6 = vpack.c.bf16 %v1298_v56, %v1294_v55  ;;  %v1293_v7 = vld [vmem:[%s6256_s4 + $0x190] sm:$0xff] }
 0x208   : > { %v3828_v24 = vpop.eup %3827  ;;  %3250 = vmatprep.subr.bf16.mxu0 %v4439_v22  ;;  %3378 = vmatprep.subr.bf16.mxu1 %v4441_v32  ;;  %v4592_v20 = vpack.c.bf16 %v1297_v9, %v1293_v7  ;;  %v1313_v50 = vld [vmem:[%s6256_s4 + $0x230] sm:$0xff] }
 0x209   : > { %1112 = vmatmul.mubr.f32.gmra.mrb[34].mxu0 %v961_v14  ;;  %1219 = vmatmul.mubr.f32.gmra.mrb[34].mxu1 %v961_v14  ;;  %v955_v28 = vadd.f32 %v4305_v44, %v942_v17  ;;  %v930_v29 = vmul.f32 %v3828_v24, %v909_v5  ;;  %v1304_v5 = vld [vmem:[%s6256_s4 + $0x1e8] sm:$0xff]  ;;  %v1302_v14 = vld [vmem:[%s6256_s4 + $0x1d8] sm:$0xff]  ;;  %v1299_v24 = vld [vmem:[%s6256_s4 + $0x1c0] sm:$0xff]  ;;  %v4664_v56 = vpack.c.bf16 %v1313_v50, %v1309_v49 }
 0x20a   : > { %1117 = vmatprep.mubr.f32.mxu0 %v3897_v21  ;;  %1224 = vmatprep.mubr.f32.mxu1 %v3897_v21  ;;  %v1306_v17 = vld [vmem:[%s6256_s4 + $0x1f8] sm:$0xff]  ;;  %v1317_v7 = vld [vmem:[%s6256_s4 + $0x250] sm:$0xff] }
 0x20b   : > { %v962_v41 = vmax.f32 %v955_v28, 0.0  ;;  %v943_v42 = vmul.f32 %v4300_v38, %v930_v29  ;;  %3252 = vmatpush1.bf16.msra.mxu0 %v4464_v12  ;;  %3380 = vmatpush1.bf16.msra.mxu1 %v4471_v18  ;;  %v4604_v26 = vpack.c.bf16 %v1306_v17, %v1302_v14  ;;  %v1305_v28 = vld [vmem:[%s6256_s4 + $0x1f0] sm:$0xff]  ;;  %v1308_v29 = vld [vmem:[%s6256_s4 + $0x208] sm:$0xff]  ;;  %6410 = vst [vmem:[#allocation6_spill] sm:$0xff] %v4664_v56  ;;  %v1330_v14 = vld [vmem:[%s6256_s4 + $0x2b8] sm:$0xff] }
 0x20c   : > { %v3830_v48 = vpop.eup %3829  ;;  %3254 = vmatprep.subr.bf16.mxu0 %v4481_v30  ;;  %3382 = vmatprep.subr.bf16.mxu1 %v4483_v45  ;;  %v4638_v47 = vpack.c.bf16 %v1312_v31, %v1308_v29  ;;  %v1321_v9 = vld [vmem:[%s6256_s4 + $0x270] sm:$0xff] }
 0x20d   : > { %1118 = vmatmul.mubr.f32.gmra.mrb[36].mxu0 %v962_v41  ;;  %1225 = vmatmul.mubr.f32.gmra.mrb[36].mxu1 %v962_v41  ;;  %v956_v52 = vadd.f32 %v4305_v44, %v943_v42  ;;  %v931_v60 = vmul.f32 %v3830_v48, %v910_v40  ;;  %v4626_v40 = vpack.c.bf16 %v1303_v25, %v1299_v24  ;;  %v1307_v42 = vld [vmem:[%s6256_s4 + $0x200] sm:$0xff]  ;;  %v1325_v29 = vld [vmem:[%s6256_s4 + $0x290] sm:$0xff] }
 0x20e   : > { %1123 = vmatprep.mubr.f32.mxu0 %v3897_v21  ;;  %1230 = vmatprep.mubr.f32.mxu1 %v3897_v21  ;;  %v4628_v41 = vpack.c.bf16 %v1305_v28, %v1301_v27  ;;  %6407 = vst [vmem:[#allocation3_spill] sm:$0xff] %v4638_v47  ;;  %v4640_v48 = vpack.c.bf16 %v1314_v35, %v1310_v34  ;;  %v1323_v24 = vld [vmem:[%s6256_s4 + $0x280] sm:$0xff]  ;;  %v1329_v31 = vld [vmem:[%s6256_s4 + $0x2b0] sm:$0xff]  ;;  %v1332_v34 = vld [vmem:[%s6256_s4 + $0x2c8] sm:$0xff] }
 0x20f   : > { %v963_v58 = vmax.f32 %v956_v52, 0.0  ;;  %v944_v61 = vmul.f32 %v4300_v38, %v931_v60  ;;  %3256 = vmatpush1.bf16.msra.mxu0 %v4506_v36  ;;  %3384 = vmatpush1.bf16.msra.mxu1 %v4513_v43  ;;  %v4563_v38 = vpack.c.bf16 %v1296_v54, %v1292_v51  ;;  %v1316_v51 = vld [vmem:[%s6256_s4 + $0x248] sm:$0xff]  ;;  %v1318_v60 = vld [vmem:[%s6256_s4 + $0x258] sm:$0xff]  ;;  %v4662_v55 = vpack.c.bf16 %v1311_v46, %v1307_v42  ;;  %v1327_v25 = vld [vmem:[%s6256_s4 + $0x2a0] sm:$0xff] }
 0x210   : > { %3258 = vmatprep.subr.bf16.mxu0 %v4523_v37  ;;  %3386 = vmatprep.subr.bf16.mxu1 %v4525_v4  ;;  %6406 = vst [vmem:[#allocation2_spill] sm:$0xff] %v4628_v41  ;;  %6408 = vst [vmem:[#allocation4_spill] sm:$0xff] %v4640_v48  ;;  %v1320_v52 = vld [vmem:[%s6256_s4 + $0x268] sm:$0xff]  ;;  %v1322_v54 = vld [vmem:[%s6256_s4 + $0x278] sm:$0xff]  ;;  %v4734_v49 = vpack.c.bf16 %v1327_v25, %v1323_v24  ;;  %v4736_v50 = vpack.c.bf16 %v1329_v31, %v1325_v29 }
 0x211   : > { %1124 = vmatmul.mubr.f32.gmra.mrb[38].mxu0 %v963_v58  ;;  %1231 = vmatmul.mubr.f32.gmra.mrb[38].mxu1 %v963_v58  ;;  %v957_v11 = vadd.f32 %v4305_v44, %v944_v61  ;;  %v4590_v44 = vpack.c.bf16 %v1295_v3, %v1291_v1  ;;  %6409 = vst [vmem:[#allocation5_spill] sm:$0xff] %v4662_v55  ;;  %v1315_v58 = vld [vmem:[%s6256_s4 + $0x240] sm:$0xff]  ;;  %v1336_v35 = vld [vmem:[%s6256_s4 + $0x2e8] sm:$0xff]  ;;  %v1334_v42 = vld [vmem:[%s6256_s4 + $0x2d8] sm:$0xff] }
 0x212   : > { %1129 = vmatprep.mubr.f32.mxu0 %v3897_v21  ;;  %1236 = vmatprep.mubr.f32.mxu1 %v3897_v21  ;;  %v4602_v21 = vpack.c.bf16 %v1304_v5, %v1300_v10  ;;  %v1319_v61 = vld [vmem:[%s6256_s4 + $0x260] sm:$0xff]  ;;  %v4674_v1 = vpack.c.bf16 %v1320_v52, %v1316_v51  ;;  %v4676_v3 = vpack.c.bf16 %v1322_v54, %v1318_v60  ;;  %v1324_v10 = vld [vmem:[%s6256_s4 + $0x288] sm:$0xff]  ;;  %v1326_v5 = vld [vmem:[%s6256_s4 + $0x298] sm:$0xff] }
 0x213   : > { %v964_v19 = vmax.f32 %v957_v11, 0.0  ;;  %3260 = vmatpush1.bf16.msra.mxu0 %v4551_v63  ;;  %3388 = vmatpush1.bf16.msra.mxu1 %v4553_v0  ;;  %v1328_v11 = vld [vmem:[%s6256_s4 + $0x2a8] sm:$0xff]  ;;  %v4698_v17 = vpack.c.bf16 %v1319_v61, %v1315_v58  ;;  %v4712_v28 = vpack.c.bf16 %v1330_v14, %v1326_v5  ;;  %v1338_v46 = vld [vmem:[%s6256_s4 + $0x2f8] sm:$0xff]  ;;  %6417 = vst [vmem:[#allocation13_spill] sm:$0xff] %v4734_v49  ;;  %6418 = vst [vmem:[#allocation14_spill] sm:$0xff] %v4736_v50 }
 0x214   : > { %3262 = vmatprep.subr.bf16.mxu0 %v4563_v38  ;;  %3390 = vmatprep.subr.bf16.mxu1 %v4565_v6  ;;  %6411 = vst [vmem:[#allocation7_spill] sm:$0xff] %v4674_v1  ;;  %6412 = vst [vmem:[#allocation8_spill] sm:$0xff] %v4676_v3  ;;  %v4710_v27 = vpack.c.bf16 %v1328_v11, %v1324_v10  ;;  %v1331_v51 = vld [vmem:[%s6256_s4 + $0x2c0] sm:$0xff]  ;;  %v4746_v60 = vpack.c.bf16 %v1336_v35, %v1332_v34  ;;  %v1333_v58 = vld [vmem:[%s6256_s4 + $0x2d0] sm:$0xff] }
 0x215   : > { %1130 = vmatmul.mubr.f32.gmra.mrb[40].mxu0 %v964_v19  ;;  %1237 = vmatmul.mubr.f32.gmra.mrb[40].mxu1 %v964_v19  ;;  %6413 = vst [vmem:[#allocation9_spill] sm:$0xff] %v4698_v17  ;;  %v4700_v19 = vpack.c.bf16 %v1321_v9, %v1317_v7  ;;  %6416 = vst [vmem:[#allocation12_spill] sm:$0xff] %v4712_v28  ;;  %v1335_v52 = vld [vmem:[%s6256_s4 + $0x2e0] sm:$0xff]  ;;  %v4748_v54 = vpack.c.bf16 %v1338_v46, %v1334_v42  ;;  %v1337_v61 = vld [vmem:[%s6256_s4 + $0x2f0] sm:$0xff] }
 0x216   : > { %6415 = vst [vmem:[#allocation11_spill] sm:$0xff] %v4710_v27  ;;  %6419 = vst [vmem:[#allocation15_spill] sm:$0xff] %v4746_v60  ;;  %v1340_v7 = vld [vmem:[%s6256_s4 + $0x308] sm:$0xff]  ;;  %v1342_v10 = vld [vmem:[%s6256_s4 + $0x318] sm:$0xff]  ;;  %v4770_v5 = vpack.c.bf16 %v1335_v52, %v1331_v51  ;;  %v4772_v14 = vpack.c.bf16 %v1337_v61, %v1333_v58 }
 0x217   : > { %3264 = vmatpush1.bf16.msra.mxu0 %v4590_v44  ;;  %3392 = vmatpush1.bf16.msra.mxu1 %v4592_v20  ;;  %6414 = vst [vmem:[#allocation10_spill] sm:$0xff] %v4700_v19  ;;  %6420 = vst [vmem:[#allocation16_spill] sm:$0xff] %v4748_v54  ;;  %v1344_v9 = vld [vmem:[%s6256_s4 + $0x328] sm:$0xff]  ;;  %v1346_v11 = vld [vmem:[%s6256_s4 + $0x338] sm:$0xff] }
 0x218   : > { %3266 = vmatprep.subr.bf16.mxu0 %v4602_v21  ;;  %3394 = vmatprep.subr.bf16.mxu1 %v4604_v26  ;;  %6421 = vst [vmem:[#allocation17_spill] sm:$0xff] %v4770_v5  ;;  %6422 = vst [vmem:[#allocation18_spill] sm:$0xff] %v4772_v14  ;;  %v1339_v24 = vld [vmem:[%s6256_s4 + $0x300] sm:$0xff]  ;;  %v4782_v29 = vpack.c.bf16 %v1344_v9, %v1340_v7  ;;  %v4784_v31 = vpack.c.bf16 %v1346_v11, %v1342_v10  ;;  %v1341_v34 = vld [vmem:[%s6256_s4 + $0x310] sm:$0xff] }
 0x219   : > { %v1343_v25 = vld [vmem:[%s6256_s4 + $0x320] sm:$0xff]  ;;  %v1345_v35 = vld [vmem:[%s6256_s4 + $0x330] sm:$0xff]  ;;  %v1348_v42 = vld [vmem:[%s6256_s4 + $0x348] sm:$0xff] }
 0x21a   : > { %6423 = vst [vmem:[#allocation19_spill] sm:$0xff] %v4782_v29  ;;  %6424 = vst [vmem:[#allocation20_spill] sm:$0xff] %v4784_v31  ;;  %v1352_v46 = vld [vmem:[%s6256_s4 + $0x368] sm:$0xff]  ;;  %v1350_v51 = vld [vmem:[%s6256_s4 + $0x358] sm:$0xff]  ;;  %v4806_v58 = vpack.c.bf16 %v1343_v25, %v1339_v24  ;;  %v4808_v61 = vpack.c.bf16 %v1345_v35, %v1341_v34 }
 0x21b   : > { %3268 = vmatpush1.bf16.msra.mxu0 %v4626_v40  ;;  %3396 = vmatpush1.bf16.msra.mxu1 %v4628_v41  ;;  %v1354_v52 = vld [vmem:[%s6256_s4 + $0x378] sm:$0xff]  ;;  %v1347_v7 = vld [vmem:[%s6256_s4 + $0x340] sm:$0xff]  ;;  %v4818_v10 = vpack.c.bf16 %v1352_v46, %v1348_v42  ;;  %v1349_v24 = vld [vmem:[%s6256_s4 + $0x350] sm:$0xff] }
 0x21c   : > { %3270 = vmatprep.subr.bf16.mxu0 %v4638_v47  ;;  %3398 = vmatprep.subr.bf16.mxu1 %v4640_v48  ;;  %6425 = vst [vmem:[#allocation21_spill] sm:$0xff] %v4806_v58  ;;  %6426 = vst [vmem:[#allocation22_spill] sm:$0xff] %v4808_v61  ;;  %v1351_v9 = vld [vmem:[%s6256_s4 + $0x360] sm:$0xff]  ;;  %v4820_v11 = vpack.c.bf16 %v1354_v52, %v1350_v51  ;;  %v1353_v25 = vld [vmem:[%s6256_s4 + $0x370] sm:$0xff] }
 0x21d   : > { %6427 = vst [vmem:[#allocation23_spill] sm:$0xff] %v4818_v10  ;;  %v1356_v34 = vld [vmem:[%s6256_s4 + $0x388] sm:$0xff]  ;;  %v1358_v42 = vld [vmem:[%s6256_s4 + $0x398] sm:$0xff]  ;;  %v4842_v51 = vpack.c.bf16 %v1351_v9, %v1347_v7  ;;  %v4844_v52 = vpack.c.bf16 %v1353_v25, %v1349_v24  ;;  %v1357_v7 = vld [vmem:[%s6256_s4 + $0x390] sm:$0xff] }
 0x21e   : > { %6428 = vst [vmem:[#allocation24_spill] sm:$0xff] %v4820_v11  ;;  %v1360_v35 = vld [vmem:[%s6256_s4 + $0x3a8] sm:$0xff]  ;;  %v1362_v46 = vld [vmem:[%s6256_s4 + $0x3b8] sm:$0xff]  ;;  %v1361_v9 = vld [vmem:[%s6256_s4 + $0x3b0] sm:$0xff] }
 0x21f   : > { %3272 = vmatpush1.bf16.msra.mxu0 %v4662_v55  ;;  %3400 = vmatpush1.bf16.msra.mxu1 %v4664_v56  ;;  %6429 = vst [vmem:[#allocation25_spill] sm:$0xff] %v4842_v51  ;;  %6430 = vst [vmem:[#allocation26_spill] sm:$0xff] %v4844_v52  ;;  %v1364_v24 = vld [vmem:[%s6256_s4 + $0x3c8] sm:$0xff]  ;;  %v1419_v56 = vld [vmem:[%s6256_s4 + $0x580] sm:$0xff] }
 0x220   : > { %3274 = vmatprep.subr.bf16.mxu0 %v4674_v1  ;;  %3402 = vmatprep.subr.bf16.mxu1 %v4676_v3  ;;  %v1368_v25 = vld [vmem:[%s6256_s4 + $0x3e8] sm:$0xff]  ;;  %v1411_v3 = vld [vmem:[%s6256_s4 + $0x540] sm:$0xff]  ;;  %v1442_v41 = vld [vmem:[%s6256_s4 + $0x638] sm:$0xff] }
 0x223   : > { %3276 = vmatpush1.bf16.msra.mxu0 %v4698_v17  ;;  %3404 = vmatpush1.bf16.msra.mxu1 %v4700_v19  ;;  %v1403_v19 = vld [vmem:[%s6256_s4 + $0x500] sm:$0xff] }
 0x224   : > { %3278 = vmatprep.subr.bf16.mxu0 %v4710_v27  ;;  %3406 = vmatprep.subr.bf16.mxu1 %v4712_v28  ;;  %v1395_v28 = vld [vmem:[%s6256_s4 + $0x4c0] sm:$0xff] }
 0x227   : > { %3280 = vmatpush1.bf16.msra.mxu0 %v4734_v49  ;;  %3408 = vmatpush1.bf16.msra.mxu1 %v4736_v50  ;;  %v1387_v50 = vld [vmem:[%s6256_s4 + $0x480] sm:$0xff] }
 0x228   : > { %3282 = vmatprep.subr.bf16.mxu0 %v4746_v60  ;;  %3410 = vmatprep.subr.bf16.mxu1 %v4748_v54 }
 0x22b   : > { %3284 = vmatpush1.bf16.msra.mxu0 %v4770_v5  ;;  %3412 = vmatpush1.bf16.msra.mxu1 %v4772_v14  ;;  %v4854_v14 = vpack.c.bf16 %v1360_v35, %v1356_v34  ;;  %v1366_v34 = vld [vmem:[%s6256_s4 + $0x3d8] sm:$0xff] }
 0x22c   : > { %3286 = vmatprep.subr.bf16.mxu0 %v4782_v29  ;;  %3414 = vmatprep.subr.bf16.mxu1 %v4784_v31  ;;  %v1355_v31 = vld [vmem:[%s6256_s4 + $0x380] sm:$0xff]  ;;  %v1370_v35 = vld [vmem:[%s6256_s4 + $0x3f8] sm:$0xff] }
 0x22d   : > { %v1359_v29 = vld [vmem:[%s6256_s4 + $0x3a0] sm:$0xff]  ;;  %6431 = vst [vmem:[#allocation27_spill] sm:$0xff] %v4854_v14 }
 0x22f   : > { %3288 = vmatpush1.bf16.msra.mxu0 %v4806_v58  ;;  %3416 = vmatpush1.bf16.msra.mxu1 %v4808_v61  ;;  %v4856_v58 = vpack.c.bf16 %v1362_v46, %v1358_v42  ;;  %v4878_v42 = vpack.c.bf16 %v1359_v29, %v1355_v31  ;;  %v4880_v46 = vpack.c.bf16 %v1361_v9, %v1357_v7  ;;  %v1365_v29 = vld [vmem:[%s6256_s4 + $0x3d0] sm:$0xff] }
 0x230   : > { %3290 = vmatprep.subr.bf16.mxu0 %v4818_v10  ;;  %3418 = vmatprep.subr.bf16.mxu1 %v4820_v11  ;;  %v1363_v11 = vld [vmem:[%s6256_s4 + $0x3c0] sm:$0xff]  ;;  %v4887_v10 = vpack.c.bf16 %v1368_v25, %v1364_v24  ;;  %v4889_v61 = vpack.c.bf16 %v1370_v35, %v1366_v34  ;;  %v1369_v31 = vld [vmem:[%s6256_s4 + $0x3f0] sm:$0xff]  ;;  %v1372_v24 = vld [vmem:[%s6256_s4 + $0x408] sm:$0xff] }
 0x231   : > { %6432 = vst [vmem:[#allocation28_spill] sm:$0xff] %v4856_v58  ;;  %6433 = vst [vmem:[#allocation29_spill] sm:$0xff] %v4878_v42  ;;  %v4904_v9 = vpack.c.bf16 %v1369_v31, %v1365_v29  ;;  %v1376_v25 = vld [vmem:[%s6256_s4 + $0x428] sm:$0xff]  ;;  %v1378_v34 = vld [vmem:[%s6256_s4 + $0x438] sm:$0xff] }
 0x232   : > { %6434 = vst [vmem:[#allocation30_spill] sm:$0xff] %v4880_v46  ;;  %6435 = vst [vmem:[#allocation31_spill] sm:$0xff] %v4887_v10  ;;  %v1371_v29 = vld [vmem:[%s6256_s4 + $0x400] sm:$0xff] }
 0x233   : > { %3292 = vmatpush1.bf16.msra.mxu0 %v4842_v51  ;;  %3420 = vmatpush1.bf16.msra.mxu1 %v4844_v52  ;;  %6436 = vst [vmem:[#allocation32_spill] sm:$0xff] %v4889_v61  ;;  %v1367_v52 = vld [vmem:[%s6256_s4 + $0x3e0] sm:$0xff]  ;;  %6438 = vst [vmem:[#allocation34_spill] sm:$0xff] %v4904_v9 }
 0x234   : > { %3294 = vmatprep.subr.bf16.mxu0 %v4854_v14  ;;  %3422 = vmatprep.subr.bf16.mxu1 %v4856_v58  ;;  %v4902_v7 = vpack.c.bf16 %v1367_v52, %v1363_v11  ;;  %v1374_v11 = vld [vmem:[%s6256_s4 + $0x418] sm:$0xff]  ;;  %v4919_v52 = vpack.c.bf16 %v1376_v25, %v1372_v24  ;;  %v1375_v31 = vld [vmem:[%s6256_s4 + $0x420] sm:$0xff]  ;;  %v1373_v24 = vld [vmem:[%s6256_s4 + $0x410] sm:$0xff] }
 0x235   : > { %v4924_v35 = vpack.c.bf16 %v1378_v34, %v1374_v11  ;;  %v1377_v25 = vld [vmem:[%s6256_s4 + $0x430] sm:$0xff]  ;;  %v1380_v11 = vld [vmem:[%s6256_s4 + $0x448] sm:$0xff] }
 0x236   : > { %6437 = vst [vmem:[#allocation33_spill] sm:$0xff] %v4902_v7  ;;  %6439 = vst [vmem:[#allocation35_spill] sm:$0xff] %v4919_v52  ;;  %v1384_v34 = vld [vmem:[%s6256_s4 + $0x468] sm:$0xff] }
 0x237   : > { %3296 = vmatpush1.bf16.msra.mxu0 %v4878_v42  ;;  %3424 = vmatpush1.bf16.msra.mxu1 %v4880_v46  ;;  %6440 = vst [vmem:[#allocation36_spill] sm:$0xff] %v4924_v35  ;;  %v1379_v46 = vld [vmem:[%s6256_s4 + $0x440] sm:$0xff]  ;;  %v4970_v51 = vpack.c.bf16 %v1384_v34, %v1380_v11 }
 0x238   : > { %3298 = vmatprep.subr.bf16.mxu0 %v4887_v10  ;;  %3426 = vmatprep.subr.bf16.mxu1 %v4889_v61  ;;  %v4956_v61 = vpack.c.bf16 %v1375_v31, %v1371_v29  ;;  %v4958_v10 = vpack.c.bf16 %v1377_v25, %v1373_v24  ;;  %v1383_v42 = vld [vmem:[%s6256_s4 + $0x460] sm:$0xff]  ;;  %v1381_v29 = vld [vmem:[%s6256_s4 + $0x450] sm:$0xff]  ;;  %v1388_v24 = vld [vmem:[%s6256_s4 + $0x488] sm:$0xff] }
 0x239   : > { %6444 = vst [vmem:[#allocation40_spill] sm:$0xff] %v4970_v51  ;;  %v1385_v31 = vld [vmem:[%s6256_s4 + $0x470] sm:$0xff]  ;;  %v1394_v25 = vld [vmem:[%s6256_s4 + $0x4b8] sm:$0xff]  ;;  %v5002_v54 = vpack.c.bf16 %v1383_v42, %v1379_v46 }
 0x23a   : > { %6442 = vst [vmem:[#allocation38_spill] sm:$0xff] %v4956_v61  ;;  %6443 = vst [vmem:[#allocation39_spill] sm:$0xff] %v4958_v10  ;;  %v5004_v60 = vpack.c.bf16 %v1385_v31, %v1381_v29  ;;  %v1389_v29 = vld [vmem:[%s6256_s4 + $0x490] sm:$0xff] }
 0x23b   : > { %3300 = vmatpush1.bf16.msra.mxu0 %v4902_v7  ;;  %3428 = vmatpush1.bf16.msra.mxu1 %v4904_v9  ;;  %6447 = vst [vmem:[#allocation43_spill] sm:$0xff] %v5002_v54  ;;  %v1393_v31 = vld [vmem:[%s6256_s4 + $0x4b0] sm:$0xff] }
 0x23c   : > { %3302 = vmatprep.subr.bf16.mxu0 %v4919_v52  ;;  %3430 = vmatprep.subr.bf16.mxu1 %v4924_v35  ;;  %v1382_v35 = vld [vmem:[%s6256_s4 + $0x458] sm:$0xff]  ;;  %6448 = vst [vmem:[#allocation44_spill] sm:$0xff] %v5004_v60 }
 0x23d   : > { %v1386_v52 = vld [vmem:[%s6256_s4 + $0x478] sm:$0xff] }
 0x23e   : > { %v4972_v5 = vpack.c.bf16 %v1386_v52, %v1382_v35  ;;  %v1392_v52 = vld [vmem:[%s6256_s4 + $0x4a8] sm:$0xff]  ;;  %v1390_v35 = vld [vmem:[%s6256_s4 + $0x498] sm:$0xff] }
 0x23f   : > { %v5018_v42 = vpack.c.bf16 %v1392_v52, %v1388_v24  ;;  %v5020_v46 = vpack.c.bf16 %v1394_v25, %v1390_v35  ;;  %v1400_v24 = vld [vmem:[%s6256_s4 + $0x4e8] sm:$0xff]  ;;  %v1398_v52 = vld [vmem:[%s6256_s4 + $0x4d8] sm:$0xff] }
 0x240   : > { %6445 = vst [vmem:[#allocation41_spill] sm:$0xff] %v4972_v5  ;;  %v1402_v35 = vld [vmem:[%s6256_s4 + $0x4f8] sm:$0xff] }
 0x241   : > { %6450 = vst [vmem:[#allocation46_spill] sm:$0xff] %v5018_v42  ;;  %6451 = vst [vmem:[#allocation47_spill] sm:$0xff] %v5020_v46 }
 0x2d0   : > { %v4952_v9 = vpop.f32.mrb[28].mxu0  ;;  %v4954_v7 = vpop.f32.mrb[28].mxu1 }
 0x2d1   : > { %6441 = vst [vmem:[#allocation37_spill] sm:$0xff] %v4952_v9  ;;  %v4966_v58 = vpop.f32.mrb[29].mxu0  ;;  %v4968_v14 = vpop.f32.mrb[29].mxu1 }
 0x2d2   : > { %1565 = vmatprep.mubr.f32.mxu0 %v4966_v58  ;;  %1779 = vmatprep.mubr.f32.mxu1 %v4966_v58 }
 0x2d3   : > { %1566 = vmatmul.mubr.f32.vlgmr.msra.gmra.mrb[42].mxu0 %v4952_v9  ;;  %1780 = vmatmul.mubr.f32.vlgmr.msra.gmra.mrb[42].mxu1 %v4952_v9  ;;  %v1391_v9 = vld [vmem:[%s6256_s4 + $0x4a0] sm:$0xff] }
 0x2d4   : > { %3304 = vmatpush1.bf16.msra.mxu0 %v4956_v61  ;;  %3432 = vmatpush1.bf16.msra.mxu1 %v4958_v10  ;;  %v4998_v11 = vpop.f32.mrb[30].mxu0  ;;  %v5000_v34 = vpop.f32.mrb[30].mxu1  ;;  %v1396_v10 = vld [vmem:[%s6256_s4 + $0x4c8] sm:$0xff] }
 0x2d5   : > { %6446 = vst [vmem:[#allocation42_spill] sm:$0xff] %v4998_v11  ;;  %v5012_v49 = vpop.f32.mrb[31].mxu0  ;;  %v5014_v61 = vpop.f32.mrb[31].mxu1  ;;  %3306 = vmatprep.subr.bf16.mxu0 %v4970_v51  ;;  %3434 = vmatprep.subr.bf16.mxu1 %v4972_v5  ;;  %v5050_v51 = vpack.c.bf16 %v1391_v9, %v1387_v50  ;;  %v5066_v50 = vpack.c.bf16 %v1400_v24, %v1396_v10  ;;  %v1408_v10 = vld [vmem:[%s6256_s4 + $0x528] sm:$0xff]  ;;  %v1406_v24 = vld [vmem:[%s6256_s4 + $0x518] sm:$0xff] }
 0x2d6   : > { %6449 = vst [vmem:[#allocation45_spill] sm:$0xff] %v5012_v49  ;;  %1571 = vmatprep.mubr.f32.mxu0 %v5012_v49  ;;  %1785 = vmatprep.mubr.f32.mxu1 %v5012_v49  ;;  %v5052_v49 = vpack.c.bf16 %v1393_v31, %v1389_v29  ;;  %v5068_v9 = vpack.c.bf16 %v1402_v35, %v1398_v52  ;;  %v1397_v29 = vld [vmem:[%s6256_s4 + $0x4d0] sm:$0xff]  ;;  %v1410_v52 = vld [vmem:[%s6256_s4 + $0x538] sm:$0xff] }
 0x2d7   : > { %1572 = vmatmul.mubr.f32.gmra.mrb[44].mxu0 %v4998_v11  ;;  %1786 = vmatmul.mubr.f32.gmra.mrb[44].mxu1 %v4998_v11  ;;  %6453 = vst [vmem:[#allocation49_spill] sm:$0xff] %v5050_v51  ;;  %v1399_v11 = vld [vmem:[%s6256_s4 + $0x4e0] sm:$0xff]  ;;  %6457 = vst [vmem:[#allocation53_spill] sm:$0xff] %v5066_v50  ;;  %v1401_v31 = vld [vmem:[%s6256_s4 + $0x4f0] sm:$0xff] }
 0x2d8   : > { %3308 = vmatpush1.bf16.msra.mxu0 %v5002_v54  ;;  %3436 = vmatpush1.bf16.msra.mxu1 %v5004_v60  ;;  %v5046_v25 = vpop.f32.mrb[32].mxu0  ;;  %v5048_v5 = vpop.f32.mrb[32].mxu1  ;;  %6454 = vst [vmem:[#allocation50_spill] sm:$0xff] %v5052_v49  ;;  %6458 = vst [vmem:[#allocation54_spill] sm:$0xff] %v5068_v9  ;;  %v1404_v60 = vld [vmem:[%s6256_s4 + $0x508] sm:$0xff] }
 0x2d9   : > { %6452 = vst [vmem:[#allocation48_spill] sm:$0xff] %v5046_v25  ;;  %v5060_v27 = vpop.f32.mrb[33].mxu0  ;;  %v5062_v54 = vpop.f32.mrb[33].mxu1  ;;  %3310 = vmatprep.subr.bf16.mxu0 %v5018_v42  ;;  %3438 = vmatprep.subr.bf16.mxu1 %v5020_v46  ;;  %v5098_v42 = vpack.c.bf16 %v1399_v11, %v1395_v28  ;;  %v5114_v28 = vpack.c.bf16 %v1408_v10, %v1404_v60  ;;  %v1416_v60 = vld [vmem:[%s6256_s4 + $0x568] sm:$0xff]  ;;  %v1414_v10 = vld [vmem:[%s6256_s4 + $0x558] sm:$0xff] }
 0x2da   : > { %6455 = vst [vmem:[#allocation51_spill] sm:$0xff] %v5060_v27  ;;  %6456 = vst [vmem:[#allocation52_spill] sm:$0xff] %v5062_v54  ;;  %1577 = vmatprep.mubr.f32.mxu0 %v5060_v27  ;;  %1791 = vmatprep.mubr.f32.mxu1 %v5060_v27  ;;  %v5100_v27 = vpack.c.bf16 %v1401_v31, %v1397_v29  ;;  %v5116_v11 = vpack.c.bf16 %v1410_v52, %v1406_v24  ;;  %v1405_v29 = vld [vmem:[%s6256_s4 + $0x510] sm:$0xff]  ;;  %v1418_v24 = vld [vmem:[%s6256_s4 + $0x578] sm:$0xff] }
 0x2db   : > { %1578 = vmatmul.mubr.f32.gmra.mrb[46].mxu0 %v5046_v25  ;;  %1792 = vmatmul.mubr.f32.gmra.mrb[46].mxu1 %v5046_v25  ;;  %6461 = vst [vmem:[#allocation57_spill] sm:$0xff] %v5098_v42  ;;  %v1407_v25 = vld [vmem:[%s6256_s4 + $0x520] sm:$0xff]  ;;  %6465 = vst [vmem:[#allocation61_spill] sm:$0xff] %v5114_v28  ;;  %v1409_v31 = vld [vmem:[%s6256_s4 + $0x530] sm:$0xff] }
 0x2dc   : > { %3312 = vmatpush1.bf16.msra.mxu0 %v5050_v51  ;;  %3440 = vmatpush1.bf16.msra.mxu1 %v5052_v49  ;;  %v5094_v35 = vpop.f32.mrb[34].mxu0  ;;  %v5096_v46 = vpop.f32.mrb[34].mxu1  ;;  %6462 = vst [vmem:[#allocation58_spill] sm:$0xff] %v5100_v27  ;;  %6466 = vst [vmem:[#allocation62_spill] sm:$0xff] %v5116_v11  ;;  %v1412_v49 = vld [vmem:[%s6256_s4 + $0x548] sm:$0xff] }
 0x2dd   : > { %6459 = vst [vmem:[#allocation55_spill] sm:$0xff] %v5094_v35  ;;  %6460 = vst [vmem:[#allocation56_spill] sm:$0xff] %v5096_v46  ;;  %v5108_v17 = vpop.f32.mrb[35].mxu0  ;;  %v5110_v51 = vpop.f32.mrb[35].mxu1  ;;  %3314 = vmatprep.subr.bf16.mxu0 %v5066_v50  ;;  %3442 = vmatprep.subr.bf16.mxu1 %v5068_v9  ;;  %v5146_v50 = vpack.c.bf16 %v1407_v25, %v1403_v19  ;;  %v5162_v19 = vpack.c.bf16 %v1416_v60, %v1412_v49  ;;  %v1424_v49 = vld [vmem:[%s6256_s4 + $0x5a8] sm:$0xff]  ;;  %v1422_v60 = vld [vmem:[%s6256_s4 + $0x598] sm:$0xff] }
 0x2de   : > { %6463 = vst [vmem:[#allocation59_spill] sm:$0xff] %v5108_v17  ;;  %6464 = vst [vmem:[#allocation60_spill] sm:$0xff] %v5110_v51  ;;  %1583 = vmatprep.mubr.f32.mxu0 %v5108_v17  ;;  %1797 = vmatprep.mubr.f32.mxu1 %v5108_v17  ;;  %v5148_v17 = vpack.c.bf16 %v1409_v31, %v1405_v29  ;;  %v5164_v25 = vpack.c.bf16 %v1418_v24, %v1414_v10  ;;  %v1413_v29 = vld [vmem:[%s6256_s4 + $0x550] sm:$0xff]  ;;  %v1426_v10 = vld [vmem:[%s6256_s4 + $0x5b8] sm:$0xff] }
 0x2df   : > { %1584 = vmatmul.mubr.f32.gmra.mrb[48].mxu0 %v5094_v35  ;;  %1798 = vmatmul.mubr.f32.gmra.mrb[48].mxu1 %v5094_v35  ;;  %6469 = vst [vmem:[#allocation65_spill] sm:$0xff] %v5146_v50  ;;  %v1415_v35 = vld [vmem:[%s6256_s4 + $0x560] sm:$0xff]  ;;  %6473 = vst [vmem:[#allocation69_spill] sm:$0xff] %v5162_v19  ;;  %v1417_v31 = vld [vmem:[%s6256_s4 + $0x570] sm:$0xff] }
 0x2e0   : > { %3316 = vmatpush1.bf16.msra.mxu0 %v5098_v42  ;;  %3444 = vmatpush1.bf16.msra.mxu1 %v5100_v27  ;;  %v5142_v52 = vpop.f32.mrb[36].mxu0  ;;  %v5144_v9 = vpop.f32.mrb[36].mxu1  ;;  %6470 = vst [vmem:[#allocation66_spill] sm:$0xff] %v5148_v17  ;;  %6474 = vst [vmem:[#allocation70_spill] sm:$0xff] %v5164_v25  ;;  %v1420_v27 = vld [vmem:[%s6256_s4 + $0x588] sm:$0xff] }
 0x2e1   : > { %6467 = vst [vmem:[#allocation63_spill] sm:$0xff] %v5142_v52  ;;  %6468 = vst [vmem:[#allocation64_spill] sm:$0xff] %v5144_v9  ;;  %v5156_v1 = vpop.f32.mrb[37].mxu0  ;;  %v5158_v42 = vpop.f32.mrb[37].mxu1  ;;  %3318 = vmatprep.subr.bf16.mxu0 %v5114_v28  ;;  %3446 = vmatprep.subr.bf16.mxu1 %v5116_v11  ;;  %v5194_v28 = vpack.c.bf16 %v1415_v35, %v1411_v3  ;;  %v1423_v3 = vld [vmem:[%s6256_s4 + $0x5a0] sm:$0xff]  ;;  %v1421_v35 = vld [vmem:[%s6256_s4 + $0x590] sm:$0xff] }
 0x2e2   : > { %6471 = vst [vmem:[#allocation67_spill] sm:$0xff] %v5156_v1  ;;  %6472 = vst [vmem:[#allocation68_spill] sm:$0xff] %v5158_v42  ;;  %1589 = vmatprep.mubr.f32.mxu0 %v5156_v1  ;;  %1803 = vmatprep.mubr.f32.mxu1 %v5156_v1  ;;  %v5196_v1 = vpack.c.bf16 %v1417_v31, %v1413_v29  ;;  %v1425_v29 = vld [vmem:[%s6256_s4 + $0x5b0] sm:$0xff]  ;;  %v1432_v31 = vld [vmem:[%s6256_s4 + $0x5e8] sm:$0xff] }
 0x2e3   : > { %1590 = vmatmul.mubr.f32.gmra.mrb[50].mxu0 %v5142_v52  ;;  %1804 = vmatmul.mubr.f32.gmra.mrb[50].mxu1 %v5142_v52  ;;  %6477 = vst [vmem:[#allocation73_spill] sm:$0xff] %v5194_v28  ;;  %v1431_v52 = vld [vmem:[%s6256_s4 + $0x5e0] sm:$0xff] }
 0x2e4   : > { %3320 = vmatpush1.bf16.msra.mxu0 %v5146_v50  ;;  %3448 = vmatpush1.bf16.msra.mxu1 %v5148_v17  ;;  %v5190_v24 = vpop.f32.mrb[38].mxu0  ;;  %v5192_v11 = vpop.f32.mrb[38].mxu1  ;;  %6478 = vst [vmem:[#allocation74_spill] sm:$0xff] %v5196_v1  ;;  %v5207_v17 = vpack.c.bf16 %v1424_v49, %v1420_v27  ;;  %v5209_v50 = vpack.c.bf16 %v1426_v10, %v1422_v60  ;;  %v1428_v27 = vld [vmem:[%s6256_s4 + $0x5c8] sm:$0xff]  ;;  %v1430_v49 = vld [vmem:[%s6256_s4 + $0x5d8] sm:$0xff] }
 0x2e5   : > { %6475 = vst [vmem:[#allocation71_spill] sm:$0xff] %v5190_v24  ;;  %6476 = vst [vmem:[#allocation72_spill] sm:$0xff] %v5192_v11  ;;  %v5201_v55 = vpop.f32.mrb[39].mxu0  ;;  %v5203_v48 = vpop.f32.mrb[39].mxu1  ;;  %3322 = vmatprep.subr.bf16.mxu0 %v5162_v19  ;;  %3450 = vmatprep.subr.bf16.mxu1 %v5164_v25  ;;  %v1434_v60 = vld [vmem:[%s6256_s4 + $0x5f8] sm:$0xff]  ;;  %v5242_v19 = vpack.c.bf16 %v1423_v3, %v1419_v56  ;;  %v1429_v56 = vld [vmem:[%s6256_s4 + $0x5d0] sm:$0xff] }
 0x2e6   : > { %6479 = vst [vmem:[#allocation75_spill] sm:$0xff] %v5201_v55  ;;  %6480 = vst [vmem:[#allocation76_spill] sm:$0xff] %v5203_v48  ;;  %1595 = vmatprep.mubr.f32.mxu0 %v5201_v55  ;;  %1809 = vmatprep.mubr.f32.mxu1 %v5201_v55  ;;  %v1427_v55 = vld [vmem:[%s6256_s4 + $0x5c0] sm:$0xff]  ;;  %v1433_v3 = vld [vmem:[%s6256_s4 + $0x5f0] sm:$0xff] }
 0x2e7   : > { %6481 = vst [vmem:[#allocation77_spill] sm:$0xff] %v5207_v17  ;;  %6482 = vst [vmem:[#allocation78_spill] sm:$0xff] %v5209_v50  ;;  %1596 = vmatmul.mubr.f32.gmra.mrb[52].mxu0 %v5190_v24  ;;  %1810 = vmatmul.mubr.f32.gmra.mrb[52].mxu1 %v5190_v24  ;;  %v5244_v24 = vpack.c.bf16 %v1425_v29, %v1421_v35  ;;  %v1436_v35 = vld [vmem:[%s6256_s4 + $0x608] sm:$0xff]  ;;  %v5269_v29 = vpack.c.bf16 %v1432_v31, %v1428_v27 }
 0x2e8   : > { %3324 = vmatpush1.bf16.msra.mxu0 %v5194_v28  ;;  %3452 = vmatpush1.bf16.msra.mxu1 %v5196_v1  ;;  %v5238_v10 = vpop.f32.mrb[40].mxu0  ;;  %v5240_v25 = vpop.f32.mrb[40].mxu1  ;;  %6485 = vst [vmem:[#allocation81_spill] sm:$0xff] %v5242_v19  ;;  %v1438_v1 = vld [vmem:[%s6256_s4 + $0x618] sm:$0xff]  ;;  %v5286_v27 = vpack.c.bf16 %v1431_v52, %v1427_v55  ;;  %v5288_v31 = vpack.c.bf16 %v1433_v3, %v1429_v56  ;;  %v1437_v55 = vld [vmem:[%s6256_s4 + $0x610] sm:$0xff]  ;;  %v1444_v56 = vld [vmem:[%s6256_s4 + $0x648] sm:$0xff] }
 0x2e9   : > { %6483 = vst [vmem:[#allocation79_spill] sm:$0xff] %v5238_v10  ;;  %6484 = vst [vmem:[#allocation80_spill] sm:$0xff] %v5240_v25  ;;  %v5252_v47 = vpop.f32.mrb[41].mxu0  ;;  %v5254_v28 = vpop.f32.mrb[41].mxu1  ;;  %3326 = vmatprep.subr.bf16.mxu0 %v5207_v17  ;;  %3454 = vmatprep.subr.bf16.mxu1 %v5209_v50  ;;  %v5271_v17 = vpack.c.bf16 %v1434_v60, %v1430_v49  ;;  %v1440_v50 = vld [vmem:[%s6256_s4 + $0x628] sm:$0xff]  ;;  %v1435_v49 = vld [vmem:[%s6256_s4 + $0x600] sm:$0xff] }
 0x2ea   : > { %6486 = vst [vmem:[#allocation82_spill] sm:$0xff] %v5244_v24  ;;  %6487 = vst [vmem:[#allocation83_spill] sm:$0xff] %v5252_v47  ;;  %1601 = vmatprep.mubr.f32.mxu0 %v5252_v47  ;;  %1815 = vmatprep.mubr.f32.mxu1 %v5252_v47  ;;  %v1439_v60 = vld [vmem:[%s6256_s4 + $0x620] sm:$0xff]  ;;  %v1441_v52 = vld [vmem:[%s6256_s4 + $0x630] sm:$0xff] }
 0x2eb   : > { %6488 = vst [vmem:[#allocation84_spill] sm:$0xff] %v5254_v28  ;;  %6489 = vst [vmem:[#allocation85_spill] sm:$0xff] %v5269_v29  ;;  %1602 = vmatmul.mubr.f32.gmra.mrb[54].mxu0 %v5238_v10  ;;  %1816 = vmatmul.mubr.f32.gmra.mrb[54].mxu1 %v5238_v10  ;;  %v5298_v10 = vpack.c.bf16 %v1440_v50, %v1436_v35  ;;  %v1450_v50 = vld [vmem:[%s6256_s4 + $0x678] sm:$0xff]  ;;  %v5324_v3 = vpack.c.bf16 %v1439_v60, %v1435_v49  ;;  %v1445_v49 = vld [vmem:[%s6256_s4 + $0x650] sm:$0xff] }
 0x2ec   : > { %6490 = vst [vmem:[#allocation86_spill] sm:$0xff] %v5271_v17  ;;  %3328 = vmatpush1.bf16.msra.mxu0 %v5242_v19  ;;  %3456 = vmatpush1.bf16.msra.mxu1 %v5244_v24  ;;  %6491 = vst [vmem:[#allocation87_spill] sm:$0xff] %v5286_v27  ;;  %v5300_v19 = vpack.c.bf16 %v1442_v41, %v1438_v1  ;;  %v1448_v41 = vld [vmem:[%s6256_s4 + $0x668] sm:$0xff]  ;;  %v1446_v1 = vld [vmem:[%s6256_s4 + $0x658] sm:$0xff]  ;;  %v5326_v35 = vpack.c.bf16 %v1441_v52, %v1437_v55 }
 0x2ed   : > { %6492 = vst [vmem:[#allocation88_spill] sm:$0xff] %v5288_v31  ;;  %1672 = vmatprep.mubr.f32.mxu0 %v4968_v14  ;;  %1886 = vmatprep.mubr.f32.mxu1 %v4968_v14  ;;  %6493 = vst [vmem:[#allocation89_spill] sm:$0xff] %v5298_v10  ;;  %v5336_v24 = vpack.c.bf16 %v1448_v41, %v1444_v56  ;;  %v1449_v60 = vld [vmem:[%s6256_s4 + $0x670] sm:$0xff]  ;;  %v1452_v55 = vld [vmem:[%s6256_s4 + $0x688] sm:$0xff] }
 0x2ee   : > { %6494 = vst [vmem:[#allocation90_spill] sm:$0xff] %v5300_v19  ;;  %3330 = vmatprep.subr.bf16.mxu0 %v5269_v29  ;;  %3458 = vmatprep.subr.bf16.mxu1 %v5271_v17  ;;  %6495 = vst [vmem:[#allocation91_spill] sm:$0xff] %v5324_v3  ;;  %v1443_v17 = vld [vmem:[%s6256_s4 + $0x640] sm:$0xff]  ;;  %v1456_v52 = vld [vmem:[%s6256_s4 + $0x6a8] sm:$0xff] }
 0x2ef   : > { %6496 = vst [vmem:[#allocation92_spill] sm:$0xff] %v5326_v35  ;;  %v1447_v29 = vld [vmem:[%s6256_s4 + $0x660] sm:$0xff]  ;;  %6497 = vst [vmem:[#allocation93_spill] sm:$0xff] %v5336_v24  ;;  %v1454_v56 = vld [vmem:[%s6256_s4 + $0x698] sm:$0xff] }
 0x2f0   : > { %3332 = vmatpush1.bf16.msra.mxu0 %v5286_v27  ;;  %3460 = vmatpush1.bf16.msra.mxu1 %v5288_v31  ;;  %v5338_v27 = vpack.c.bf16 %v1450_v50, %v1446_v1  ;;  %v1458_v41 = vld [vmem:[%s6256_s4 + $0x6b8] sm:$0xff]  ;;  %v5360_v1 = vpack.c.bf16 %v1447_v29, %v1443_v17  ;;  %v5362_v50 = vpack.c.bf16 %v1449_v60, %v1445_v49  ;;  %v1453_v17 = vld [vmem:[%s6256_s4 + $0x690] sm:$0xff]  ;;  %v1460_v49 = vld [vmem:[%s6256_s4 + $0x6c8] sm:$0xff] }
 0x2f1   : > { %3334 = vmatprep.subr.bf16.mxu0 %v5298_v10  ;;  %3462 = vmatprep.subr.bf16.mxu1 %v5300_v19  ;;  %v1451_v19 = vld [vmem:[%s6256_s4 + $0x680] sm:$0xff]  ;;  %v5372_v31 = vpack.c.bf16 %v1456_v52, %v1452_v55  ;;  %v1457_v29 = vld [vmem:[%s6256_s4 + $0x6b0] sm:$0xff]  ;;  %v1464_v60 = vld [vmem:[%s6256_s4 + $0x6e8] sm:$0xff] }
 0x2f2   : > { %6498 = vst [vmem:[#allocation94_spill] sm:$0xff] %v5338_v27  ;;  %6499 = vst [vmem:[#allocation95_spill] sm:$0xff] %v5360_v1  ;;  %v1455_v10 = vld [vmem:[%s6256_s4 + $0x6a0] sm:$0xff]  ;;  %v1462_v55 = vld [vmem:[%s6256_s4 + $0x6d8] sm:$0xff] }
 0x2f3   : > { %6500 = vst [vmem:[#allocation96_spill] sm:$0xff] %v5362_v50  ;;  %6501 = vst [vmem:[#allocation97_spill] sm:$0xff] %v5372_v31  ;;  %v1466_v52 = vld [vmem:[%s6256_s4 + $0x6f8] sm:$0xff] }
 0x2f4   : > { %3336 = vmatpush1.bf16.msra.mxu0 %v5324_v3  ;;  %3464 = vmatpush1.bf16.msra.mxu1 %v5326_v35  ;;  %v5374_v3 = vpack.c.bf16 %v1458_v41, %v1454_v56  ;;  %v5396_v56 = vpack.c.bf16 %v1455_v10, %v1451_v19  ;;  %v5398_v41 = vpack.c.bf16 %v1457_v29, %v1453_v17  ;;  %v1461_v19 = vld [vmem:[%s6256_s4 + $0x6d0] sm:$0xff]  ;;  %v1468_v17 = vld [vmem:[%s6256_s4 + $0x708] sm:$0xff] }
 0x2f5   : > { %3338 = vmatprep.subr.bf16.mxu0 %v5336_v24  ;;  %3466 = vmatprep.subr.bf16.mxu1 %v5338_v27  ;;  %v1459_v27 = vld [vmem:[%s6256_s4 + $0x6c0] sm:$0xff]  ;;  %v5408_v35 = vpack.c.bf16 %v1464_v60, %v1460_v49  ;;  %v1465_v10 = vld [vmem:[%s6256_s4 + $0x6f0] sm:$0xff]  ;;  %v1472_v29 = vld [vmem:[%s6256_s4 + $0x728] sm:$0xff] }
 0x2f6   : > { %6502 = vst [vmem:[#allocation98_spill] sm:$0xff] %v5374_v3  ;;  %6503 = vst [vmem:[#allocation99_spill] sm:$0xff] %v5396_v56  ;;  %v1463_v24 = vld [vmem:[%s6256_s4 + $0x6e0] sm:$0xff]  ;;  %v1470_v49 = vld [vmem:[%s6256_s4 + $0x718] sm:$0xff] }
 0x2f7   : > { %6504 = vst [vmem:[#allocation100_spill] sm:$0xff] %v5398_v41  ;;  %6505 = vst [vmem:[#allocation101_spill] sm:$0xff] %v5408_v35  ;;  %v1474_v60 = vld [vmem:[%s6256_s4 + $0x738] sm:$0xff] }
 0x2f8   : > { %3340 = vmatpush1.bf16.msra.mxu0 %v5360_v1  ;;  %3468 = vmatpush1.bf16.msra.mxu1 %v5362_v50  ;;  %v5410_v1 = vpack.c.bf16 %v1466_v52, %v1462_v55  ;;  %v5432_v55 = vpack.c.bf16 %v1463_v24, %v1459_v27  ;;  %v5434_v52 = vpack.c.bf16 %v1465_v10, %v1461_v19  ;;  %v1469_v24 = vld [vmem:[%s6256_s4 + $0x710] sm:$0xff]  ;;  %v1476_v19 = vld [vmem:[%s6256_s4 + $0x748] sm:$0xff] }
 0x2f9   : > { %3342 = vmatprep.subr.bf16.mxu0 %v5372_v31  ;;  %3470 = vmatprep.subr.bf16.mxu1 %v5374_v3  ;;  %v1467_v3 = vld [vmem:[%s6256_s4 + $0x700] sm:$0xff]  ;;  %v5444_v50 = vpack.c.bf16 %v1472_v29, %v1468_v17  ;;  %v1473_v27 = vld [vmem:[%s6256_s4 + $0x730] sm:$0xff]  ;;  %v1480_v10 = vld [vmem:[%s6256_s4 + $0x768] sm:$0xff] }
 0x2fa   : > { %6506 = vst [vmem:[#allocation102_spill] sm:$0xff] %v5410_v1  ;;  %6507 = vst [vmem:[#allocation103_spill] sm:$0xff] %v5432_v55  ;;  %v1471_v31 = vld [vmem:[%s6256_s4 + $0x720] sm:$0xff]  ;;  %v1478_v17 = vld [vmem:[%s6256_s4 + $0x758] sm:$0xff] }
 0x2fb   : > { %6508 = vst [vmem:[#allocation104_spill] sm:$0xff] %v5434_v52  ;;  %6509 = vst [vmem:[#allocation105_spill] sm:$0xff] %v5444_v50  ;;  %v1482_v29 = vld [vmem:[%s6256_s4 + $0x778] sm:$0xff] }
 0x2fc   : > { %3344 = vmatpush1.bf16.msra.mxu0 %v5396_v56  ;;  %3472 = vmatpush1.bf16.msra.mxu1 %v5398_v41  ;;  %v5446_v56 = vpack.c.bf16 %v1474_v60, %v1470_v49  ;;  %v5468_v49 = vpack.c.bf16 %v1471_v31, %v1467_v3  ;;  %v5470_v60 = vpack.c.bf16 %v1473_v27, %v1469_v24  ;;  %v1477_v31 = vld [vmem:[%s6256_s4 + $0x750] sm:$0xff]  ;;  %v1484_v24 = vld [vmem:[%s6256_s4 + $0x788] sm:$0xff] }
 0x2fd   : > { %3346 = vmatprep.subr.bf16.mxu0 %v5408_v35  ;;  %3474 = vmatprep.subr.bf16.mxu1 %v5410_v1  ;;  %v1475_v1 = vld [vmem:[%s6256_s4 + $0x740] sm:$0xff]  ;;  %v5480_v41 = vpack.c.bf16 %v1480_v10, %v1476_v19  ;;  %v1481_v3 = vld [vmem:[%s6256_s4 + $0x770] sm:$0xff]  ;;  %v1488_v27 = vld [vmem:[%s6256_s4 + $0x7a8] sm:$0xff] }
 0x2fe   : > { %6510 = vst [vmem:[#allocation106_spill] sm:$0xff] %v5446_v56  ;;  %6511 = vst [vmem:[#allocation107_spill] sm:$0xff] %v5468_v49  ;;  %v1479_v35 = vld [vmem:[%s6256_s4 + $0x760] sm:$0xff]  ;;  %v1486_v19 = vld [vmem:[%s6256_s4 + $0x798] sm:$0xff] }
 0x2ff   : > { %6512 = vst [vmem:[#allocation108_spill] sm:$0xff] %v5470_v60  ;;  %6513 = vst [vmem:[#allocation109_spill] sm:$0xff] %v5480_v41  ;;  %v1490_v10 = vld [vmem:[%s6256_s4 + $0x7b8] sm:$0xff] }
 0x300   : > { %3348 = vmatpush1.bf16.msra.mxu0 %v5432_v55  ;;  %3476 = vmatpush1.bf16.msra.mxu1 %v5434_v52  ;;  %v5482_v55 = vpack.c.bf16 %v1482_v29, %v1478_v17  ;;  %v5504_v17 = vpack.c.bf16 %v1479_v35, %v1475_v1  ;;  %v5506_v29 = vpack.c.bf16 %v1481_v3, %v1477_v31  ;;  %v1485_v35 = vld [vmem:[%s6256_s4 + $0x790] sm:$0xff]  ;;  %v1492_v31 = vld [vmem:[%s6256_s4 + $0x7c8] sm:$0xff] }
 0x301   : > { %3350 = vmatprep.subr.bf16.mxu0 %v5444_v50  ;;  %3478 = vmatprep.subr.bf16.mxu1 %v5446_v56  ;;  %v1483_v56 = vld [vmem:[%s6256_s4 + $0x780] sm:$0xff]  ;;  %v5516_v52 = vpack.c.bf16 %v1488_v27, %v1484_v24  ;;  %v1489_v1 = vld [vmem:[%s6256_s4 + $0x7b0] sm:$0xff]  ;;  %v1496_v3 = vld [vmem:[%s6256_s4 + $0x7e8] sm:$0xff] }
 0x302   : > { %6514 = vst [vmem:[#allocation110_spill] sm:$0xff] %v5482_v55  ;;  %6515 = vst [vmem:[#allocation111_spill] sm:$0xff] %v5506_v29  ;;  %v1487_v50 = vld [vmem:[%s6256_s4 + $0x7a0] sm:$0xff]  ;;  %v1494_v24 = vld [vmem:[%s6256_s4 + $0x7d8] sm:$0xff] }
 0x303   : > { %v1498_v27 = vld [vmem:[%s6256_s4 + $0x7f8] sm:$0xff] }
 0x304   : > { %3352 = vmatpush1.bf16.msra.mxu0 %v5468_v49  ;;  %3480 = vmatpush1.bf16.msra.mxu1 %v5470_v60  ;;  %v5518_v49 = vpack.c.bf16 %v1490_v10, %v1486_v19  ;;  %v5540_v19 = vpack.c.bf16 %v1487_v50, %v1483_v56  ;;  %v5542_v10 = vpack.c.bf16 %v1489_v1, %v1485_v35  ;;  %v1493_v50 = vld [vmem:[%s6256_s4 + $0x7d0] sm:$0xff] }
 0x305   : > { %3354 = vmatprep.subr.bf16.mxu0 %v5480_v41  ;;  %3482 = vmatprep.subr.bf16.mxu1 %v5482_v55  ;;  %v1491_v55 = vld [vmem:[%s6256_s4 + $0x7c0] sm:$0xff]  ;;  %v5549_v41 = vpack.c.bf16 %v1496_v3, %v1492_v31  ;;  %v5551_v60 = vpack.c.bf16 %v1498_v27, %v1494_v24  ;;  %v1497_v56 = vld [vmem:[%s6256_s4 + $0x7f0] sm:$0xff]  ;;  %v6549_v3 = vld [vmem:[#allocation37_spill] sm:$0xff] }
 0x306   : > { %v5566_v1 = vpack.c.bf16 %v1497_v56, %v1493_v50  ;;  %v6548_v31 = vld [vmem:[#allocation34_spill] sm:$0xff]  ;;  %v1929_v24 = vmul.f32 %v6549_v3, %v6549_v3  ;;  %v6550_v27 = vld [vmem:[#allocation35_spill] sm:$0xff]  ;;  %v6551_v50 = vld [vmem:[#allocation36_spill] sm:$0xff] }
 0x307   : > { %v6552_v56 = vld [vmem:[#allocation45_spill] sm:$0xff] }
 0x308   : > { %3356 = vmatpush1.bf16.msra.mxu0 %v5504_v17  ;;  %3484 = vmatpush1.bf16.msra.mxu1 %v5506_v29  ;;  %v1495_v29 = vld [vmem:[%s6256_s4 + $0x7e0] sm:$0xff] }
 0x309   : > { %3358 = vmatprep.subr.bf16.mxu0 %v5516_v52  ;;  %3486 = vmatprep.subr.bf16.mxu1 %v5518_v49  ;;  %v5564_v35 = vpack.c.bf16 %v1495_v29, %v1491_v55  ;;  %v6546_v55 = vld [vmem:[#allocation32_spill] sm:$0xff]  ;;  %v6547_v29 = vld [vmem:[#allocation33_spill] sm:$0xff] }
 0x30c   : > { %3360 = vmatpush1.bf16.msra.mxu0 %v5540_v19  ;;  %3488 = vmatpush1.bf16.msra.mxu1 %v5542_v10 }
 0x30d   : > { %3362 = vmatprep.subr.bf16.mxu0 %v5549_v41  ;;  %3490 = vmatprep.subr.bf16.mxu1 %v5551_v60 }
 0x310   : > { %3364 = vmatpush1.bf16.msra.mxu0 %v5564_v35  ;;  %3492 = vmatpush1.bf16.msra.mxu1 %v5566_v1 }
 0x311   : > { %3494 = vmatprep.subr.bf16.mxu0 %v4275_v59  ;;  %3622 = vmatprep.subr.bf16.mxu1 %v4280_v62  ;;  %v1930_v59 = vmul.f32 %v4966_v58, %v4966_v58  ;;  %v6516_v62 = vld [vmem:[#allocation2_spill] sm:$0xff] }
 0x313   : > { %1673 = vmatmul.mubr.f32.vlgmr.msra.gmra.mrb[42].mxu0 %v4954_v7  ;;  %1887 = vmatmul.mubr.f32.vlgmr.msra.gmra.mrb[42].mxu1 %v4954_v7 }
 0x314   : > { %1678 = vmatprep.mubr.f32.mxu0 %v5014_v61  ;;  %1892 = vmatprep.mubr.f32.mxu1 %v5014_v61 }
 0x315   : > { %3496 = vmatpush1.bf16.msra.mxu0 %v4338_v2  ;;  %3624 = vmatpush1.bf16.msra.mxu1 %v4345_v8  ;;  %v6517_v2 = vld [vmem:[#allocation3_spill] sm:$0xff]  ;;  %v6518_v8 = vld [vmem:[#allocation4_spill] sm:$0xff] }
 0x316   : > { %3498 = vmatprep.subr.bf16.mxu0 %v4355_v15  ;;  %3626 = vmatprep.subr.bf16.mxu1 %v4357_v16  ;;  %v6519_v15 = vld [vmem:[#allocation5_spill] sm:$0xff]  ;;  %v6520_v16 = vld [vmem:[#allocation6_spill] sm:$0xff] }
 0x317   : > { %1679 = vmatmul.mubr.f32.gmra.mrb[44].mxu0 %v5000_v34  ;;  %1893 = vmatmul.mubr.f32.gmra.mrb[44].mxu1 %v5000_v34 }
 0x318   : > { %1684 = vmatprep.mubr.f32.mxu0 %v5062_v54  ;;  %1898 = vmatprep.mubr.f32.mxu1 %v5062_v54 }
 0x319   : > { %3500 = vmatpush1.bf16.msra.mxu0 %v4380_v33  ;;  %3628 = vmatpush1.bf16.msra.mxu1 %v4387_v39  ;;  %v6521_v33 = vld [vmem:[#allocation7_spill] sm:$0xff]  ;;  %v6522_v39 = vld [vmem:[#allocation8_spill] sm:$0xff] }
 0x31a   : > { %3502 = vmatprep.subr.bf16.mxu0 %v4397_v13  ;;  %3630 = vmatprep.subr.bf16.mxu1 %v4399_v23  ;;  %v6523_v13 = vld [vmem:[#allocation9_spill] sm:$0xff]  ;;  %v6524_v23 = vld [vmem:[#allocation10_spill] sm:$0xff] }
 0x31b   : > { %1685 = vmatmul.mubr.f32.gmra.mrb[46].mxu0 %v5048_v5  ;;  %1899 = vmatmul.mubr.f32.gmra.mrb[46].mxu1 %v5048_v5 }
 0x31c   : > { %1690 = vmatprep.mubr.f32.mxu0 %v5110_v51  ;;  %1904 = vmatprep.mubr.f32.mxu1 %v5110_v51 }
 0x31d   : > { %3504 = vmatpush1.bf16.msra.mxu0 %v4422_v53  ;;  %3632 = vmatpush1.bf16.msra.mxu1 %v4429_v57  ;;  %v6525_v53 = vld [vmem:[#allocation11_spill] sm:$0xff]  ;;  %v6526_v57 = vld [vmem:[#allocation12_spill] sm:$0xff] }
 0x31e   : > { %3506 = vmatprep.subr.bf16.mxu0 %v4439_v22  ;;  %3634 = vmatprep.subr.bf16.mxu1 %v4441_v32  ;;  %v6527_v22 = vld [vmem:[#allocation13_spill] sm:$0xff]  ;;  %v6528_v32 = vld [vmem:[#allocation14_spill] sm:$0xff] }
 0x31f   : > { %1691 = vmatmul.mubr.f32.gmra.mrb[48].mxu0 %v5096_v46  ;;  %1905 = vmatmul.mubr.f32.gmra.mrb[48].mxu1 %v5096_v46 }
 0x320   : > { %1696 = vmatprep.mubr.f32.mxu0 %v5158_v42  ;;  %1910 = vmatprep.mubr.f32.mxu1 %v5158_v42 }
 0x321   : > { %3508 = vmatpush1.bf16.msra.mxu0 %v4464_v12  ;;  %3636 = vmatpush1.bf16.msra.mxu1 %v4471_v18  ;;  %v6529_v12 = vld [vmem:[#allocation15_spill] sm:$0xff]  ;;  %v6530_v18 = vld [vmem:[#allocation16_spill] sm:$0xff] }
 0x322   : > { %3510 = vmatprep.subr.bf16.mxu0 %v4481_v30  ;;  %3638 = vmatprep.subr.bf16.mxu1 %v4483_v45  ;;  %v6531_v30 = vld [vmem:[#allocation17_spill] sm:$0xff]  ;;  %v6532_v45 = vld [vmem:[#allocation18_spill] sm:$0xff] }
 0x323   : > { %1697 = vmatmul.mubr.f32.gmra.mrb[50].mxu0 %v5144_v9  ;;  %1911 = vmatmul.mubr.f32.gmra.mrb[50].mxu1 %v5144_v9 }
 0x324   : > { %1702 = vmatprep.mubr.f32.mxu0 %v5203_v48  ;;  %1916 = vmatprep.mubr.f32.mxu1 %v5203_v48 }
 0x325   : > { %3512 = vmatpush1.bf16.msra.mxu0 %v4506_v36  ;;  %3640 = vmatpush1.bf16.msra.mxu1 %v4513_v43  ;;  %v6533_v36 = vld [vmem:[#allocation19_spill] sm:$0xff]  ;;  %v6534_v43 = vld [vmem:[#allocation20_spill] sm:$0xff] }
 0x326   : > { %3514 = vmatprep.subr.bf16.mxu0 %v4523_v37  ;;  %3642 = vmatprep.subr.bf16.mxu1 %v4525_v4  ;;  %v6535_v37 = vld [vmem:[#allocation21_spill] sm:$0xff]  ;;  %v6536_v4 = vld [vmem:[#allocation22_spill] sm:$0xff] }
 0x327   : > { %1703 = vmatmul.mubr.f32.gmra.mrb[52].mxu0 %v5192_v11  ;;  %1917 = vmatmul.mubr.f32.gmra.mrb[52].mxu1 %v5192_v11 }
 0x328   : > { %1708 = vmatprep.mubr.f32.mxu0 %v5254_v28  ;;  %1922 = vmatprep.mubr.f32.mxu1 %v5254_v28 }
 0x329   : > { %3516 = vmatpush1.bf16.msra.mxu0 %v4551_v63  ;;  %3644 = vmatpush1.bf16.msra.mxu1 %v4553_v0  ;;  %v6537_v63 = vld [vmem:[#allocation23_spill] sm:$0xff]  ;;  %v6538_v0 = vld [vmem:[#allocation24_spill] sm:$0xff] }
 0x32a   : > { %3518 = vmatprep.subr.bf16.mxu0 %v4563_v38  ;;  %3646 = vmatprep.subr.bf16.mxu1 %v4565_v6  ;;  %v6539_v38 = vld [vmem:[#allocation25_spill] sm:$0xff]  ;;  %v6540_v6 = vld [vmem:[#allocation26_spill] sm:$0xff] }
 0x32b   : > { %1709 = vmatmul.mubr.f32.gmra.mrb[54].mxu0 %v5240_v25  ;;  %1923 = vmatmul.mubr.f32.gmra.mrb[54].mxu1 %v5240_v25 }
 0x32c   : > { %2021 = vmatprep.mubr.f32.mxu0 %v1930_v59  ;;  %2235 = vmatprep.mubr.f32.mxu1 %v1930_v59  ;;  %v1934_v59 = vmul.f32 %v6552_v56, %v6552_v56 }
 0x32d   : > { %3520 = vmatpush1.bf16.msra.mxu0 %v4590_v44  ;;  %3648 = vmatpush1.bf16.msra.mxu1 %v4592_v20  ;;  %v6541_v44 = vld [vmem:[#allocation27_spill] sm:$0xff]  ;;  %v6542_v20 = vld [vmem:[#allocation28_spill] sm:$0xff] }
 0x32e   : > { %3522 = vmatprep.subr.bf16.mxu0 %v4602_v21  ;;  %3650 = vmatprep.subr.bf16.mxu1 %v4604_v26  ;;  %v6543_v21 = vld [vmem:[#allocation29_spill] sm:$0xff]  ;;  %v6544_v26 = vld [vmem:[#allocation30_spill] sm:$0xff] }
 0x331   : > { %3524 = vmatpush1.bf16.msra.mxu0 %v4626_v40  ;;  %3652 = vmatpush1.bf16.msra.mxu1 %v6516_v62  ;;  %v6545_v40 = vld [vmem:[#allocation31_spill] sm:$0xff]  ;;  %v6553_v62 = vld [vmem:[#allocation38_spill] sm:$0xff] }
 0x332   : > { %3526 = vmatprep.subr.bf16.mxu0 %v6517_v2  ;;  %3654 = vmatprep.subr.bf16.mxu1 %v6518_v8  ;;  %v6554_v2 = vld [vmem:[#allocation39_spill] sm:$0xff]  ;;  %v6555_v8 = vld [vmem:[#allocation42_spill] sm:$0xff] }
 0x335   : > { %3528 = vmatpush1.bf16.msra.mxu0 %v6519_v15  ;;  %3656 = vmatpush1.bf16.msra.mxu1 %v6520_v16  ;;  %v1933_v15 = vmul.f32 %v6555_v8, %v6555_v8  ;;  %v6556_v16 = vld [vmem:[#allocation40_spill] sm:$0xff] }
 0x336   : > { %3530 = vmatprep.subr.bf16.mxu0 %v6521_v33  ;;  %3658 = vmatprep.subr.bf16.mxu1 %v6522_v39  ;;  %v6557_v33 = vld [vmem:[#allocation41_spill] sm:$0xff]  ;;  %v6558_v39 = vld [vmem:[#allocation51_spill] sm:$0xff] }
 0x339   : > { %3532 = vmatpush1.bf16.msra.mxu0 %v6523_v13  ;;  %3660 = vmatpush1.bf16.msra.mxu1 %v6524_v23  ;;  %v1938_v13 = vmul.f32 %v6558_v39, %v6558_v39  ;;  %v6559_v23 = vld [vmem:[#allocation43_spill] sm:$0xff] }
 0x33a   : > { %3534 = vmatprep.subr.bf16.mxu0 %v6525_v53  ;;  %3662 = vmatprep.subr.bf16.mxu1 %v6526_v57  ;;  %v6560_v53 = vld [vmem:[#allocation44_spill] sm:$0xff] }
 0x33b   : > { %v6561_v57 = vld [vmem:[#allocation48_spill] sm:$0xff] }
 0x33d   : > { %3536 = vmatpush1.bf16.msra.mxu0 %v6527_v22  ;;  %3664 = vmatpush1.bf16.msra.mxu1 %v6528_v32  ;;  %v1937_v22 = vmul.f32 %v6561_v57, %v6561_v57  ;;  %v6562_v32 = vld [vmem:[#allocation46_spill] sm:$0xff] }
 0x33e   : > { %3538 = vmatprep.subr.bf16.mxu0 %v6529_v12  ;;  %3666 = vmatprep.subr.bf16.mxu1 %v6530_v18  ;;  %v6563_v12 = vld [vmem:[#allocation47_spill] sm:$0xff] }
 0x33f   : > { %v6564_v18 = vld [vmem:[#allocation59_spill] sm:$0xff] }
 0x341   : > { %3540 = vmatpush1.bf16.msra.mxu0 %v6531_v30  ;;  %3668 = vmatpush1.bf16.msra.mxu1 %v6532_v45  ;;  %v1942_v30 = vmul.f32 %v6564_v18, %v6564_v18  ;;  %v6565_v45 = vld [vmem:[#allocation49_spill] sm:$0xff] }
 0x342   : > { %3542 = vmatprep.subr.bf16.mxu0 %v6533_v36  ;;  %3670 = vmatprep.subr.bf16.mxu1 %v6534_v43  ;;  %v6566_v36 = vld [vmem:[#allocation50_spill] sm:$0xff]  ;;  %v6567_v43 = vld [vmem:[#allocation55_spill] sm:$0xff] }
 0x345   : > { %3544 = vmatpush1.bf16.msra.mxu0 %v6535_v37  ;;  %3672 = vmatpush1.bf16.msra.mxu1 %v6536_v4  ;;  %v1941_v37 = vmul.f32 %v6567_v43, %v6567_v43  ;;  %v6568_v4 = vld [vmem:[#allocation53_spill] sm:$0xff] }
 0x346   : > { %3546 = vmatprep.subr.bf16.mxu0 %v6537_v63  ;;  %3674 = vmatprep.subr.bf16.mxu1 %v6538_v0  ;;  %v6569_v63 = vld [vmem:[#allocation54_spill] sm:$0xff]  ;;  %v6570_v0 = vld [vmem:[#allocation67_spill] sm:$0xff] }
 0x349   : > { %3548 = vmatpush1.bf16.msra.mxu0 %v6539_v38  ;;  %3676 = vmatpush1.bf16.msra.mxu1 %v6540_v6  ;;  %v1946_v38 = vmul.f32 %v6570_v0, %v6570_v0  ;;  %v6571_v6 = vld [vmem:[#allocation57_spill] sm:$0xff] }
 0x34a   : > { %3550 = vmatprep.subr.bf16.mxu0 %v6541_v44  ;;  %3678 = vmatprep.subr.bf16.mxu1 %v6542_v20  ;;  %v6572_v44 = vld [vmem:[#allocation58_spill] sm:$0xff]  ;;  %v6573_v20 = vld [vmem:[#allocation63_spill] sm:$0xff] }
 0x34d   : > { %3552 = vmatpush1.bf16.msra.mxu0 %v6543_v21  ;;  %3680 = vmatpush1.bf16.msra.mxu1 %v6544_v26  ;;  %v1945_v21 = vmul.f32 %v6573_v20, %v6573_v20  ;;  %v6574_v26 = vld [vmem:[#allocation61_spill] sm:$0xff] }
 0x34e   : > { %3554 = vmatprep.subr.bf16.mxu0 %v6545_v40  ;;  %3682 = vmatprep.subr.bf16.mxu1 %v6546_v55  ;;  %v6575_v40 = vld [vmem:[#allocation62_spill] sm:$0xff]  ;;  %v6576_v55 = vld [vmem:[#allocation75_spill] sm:$0xff] }
 0x351   : > { %3556 = vmatpush1.bf16.msra.mxu0 %v6547_v29  ;;  %3684 = vmatpush1.bf16.msra.mxu1 %v6548_v31  ;;  %v1950_v29 = vmul.f32 %v6576_v55, %v6576_v55  ;;  %v6577_v31 = vld [vmem:[#allocation65_spill] sm:$0xff] }
 0x352   : > { %3558 = vmatprep.subr.bf16.mxu0 %v6550_v27  ;;  %3686 = vmatprep.subr.bf16.mxu1 %v6551_v50  ;;  %v6579_v27 = vld [vmem:[#allocation71_spill] sm:$0xff] }
 0x353   : > { %v1949_v50 = vmul.f32 %v6579_v27, %v6579_v27 }
 0x354   : > { %2022 = vmatmul.mubr.f32.vlgmr.msra.gmra.mrb[56].mxu0 %v1929_v24  ;;  %2236 = vmatmul.mubr.f32.vlgmr.msra.gmra.mrb[56].mxu1 %v1929_v24  ;;  %v6578_v24 = vld [vmem:[#allocation66_spill] sm:$0xff] }
 0x355   : > { %2027 = vmatprep.mubr.f32.mxu0 %v1934_v59  ;;  %3560 = vmatpush1.bf16.msra.mxu0 %v6553_v62  ;;  %v6581_v62 = vld [vmem:[#allocation70_spill] sm:$0xff] }
 0x356   : > { %2241 = vmatprep.mubr.f32.mxu1 %v1934_v59  ;;  %3688 = vmatpush1.bf16.msra.mxu1 %v6554_v2  ;;  %v6580_v59 = vld [vmem:[#allocation69_spill] sm:$0xff]  ;;  %v1954_v2 = vmul.f32 %v5252_v47, %v5252_v47 }
 0x357   : > { %3562 = vmatprep.subr.bf16.mxu0 %v6556_v16  ;;  %3690 = vmatprep.subr.bf16.mxu1 %v6557_v33  ;;  %v6583_v16 = vld [vmem:[#allocation74_spill] sm:$0xff]  ;;  %v6584_v33 = vld [vmem:[#allocation79_spill] sm:$0xff] }
 0x358   : > { %2028 = vmatmul.mubr.f32.gmra.mrb[58].mxu0 %v1933_v15  ;;  %2242 = vmatmul.mubr.f32.gmra.mrb[58].mxu1 %v1933_v15  ;;  %v6582_v15 = vld [vmem:[#allocation73_spill] sm:$0xff] }
 0x359   : > { %2033 = vmatprep.mubr.f32.mxu0 %v1938_v13  ;;  %3564 = vmatpush1.bf16.msra.mxu0 %v6559_v23  ;;  %v6585_v23 = vld [vmem:[#allocation77_spill] sm:$0xff] }
 0x35a   : > { %2247 = vmatprep.mubr.f32.mxu1 %v1938_v13  ;;  %3692 = vmatpush1.bf16.msra.mxu1 %v6560_v53  ;;  %v1953_v13 = vmul.f32 %v6584_v33, %v6584_v33  ;;  %v6586_v53 = vld [vmem:[#allocation78_spill] sm:$0xff] }
 0x35b   : > { %3566 = vmatprep.subr.bf16.mxu0 %v6562_v32  ;;  %3694 = vmatprep.subr.bf16.mxu1 %v6563_v12  ;;  %v6587_v32 = vld [vmem:[#allocation81_spill] sm:$0xff]  ;;  %v6588_v12 = vld [vmem:[#allocation82_spill] sm:$0xff] }
 0x35c   : > { %2034 = vmatmul.mubr.f32.gmra.mrb[60].mxu0 %v1937_v22  ;;  %2248 = vmatmul.mubr.f32.gmra.mrb[60].mxu1 %v1937_v22  ;;  %v1932_v22 = vmul.f32 %v4968_v14, %v4968_v14 }
 0x35d   : > { %2039 = vmatprep.mubr.f32.mxu0 %v1942_v30  ;;  %3568 = vmatpush1.bf16.msra.mxu0 %v6565_v45  ;;  %v6590_v45 = vld [vmem:[#allocation86_spill] sm:$0xff] }
 0x35e   : > { %2253 = vmatprep.mubr.f32.mxu1 %v1942_v30  ;;  %3696 = vmatpush1.bf16.msra.mxu1 %v6566_v36  ;;  %v6589_v30 = vld [vmem:[#allocation85_spill] sm:$0xff]  ;;  %v6591_v36 = vld [vmem:[#allocation87_spill] sm:$0xff] }
 0x35f   : > { %3570 = vmatprep.subr.bf16.mxu0 %v6568_v4  ;;  %3698 = vmatprep.subr.bf16.mxu1 %v6569_v63  ;;  %v6593_v4 = vld [vmem:[#allocation89_spill] sm:$0xff]  ;;  %v6594_v63 = vld [vmem:[#allocation90_spill] sm:$0xff] }
 0x360   : > { %2040 = vmatmul.mubr.f32.gmra.mrb[62].mxu0 %v1941_v37  ;;  %2254 = vmatmul.mubr.f32.gmra.mrb[62].mxu1 %v1941_v37  ;;  %v6592_v37 = vld [vmem:[#allocation88_spill] sm:$0xff] }
 0x361   : > { %2045 = vmatprep.mubr.f32.mxu0 %v1946_v38  ;;  %3572 = vmatpush1.bf16.msra.mxu0 %v6571_v6  ;;  %v6596_v6 = vld [vmem:[#allocation92_spill] sm:$0xff] }
 0x362   : > { %2259 = vmatprep.mubr.f32.mxu1 %v1946_v38  ;;  %3700 = vmatpush1.bf16.msra.mxu1 %v6572_v44  ;;  %v6595_v38 = vld [vmem:[#allocation91_spill] sm:$0xff]  ;;  %v6597_v44 = vld [vmem:[#allocation93_spill] sm:$0xff] }
 0x363   : > { %3574 = vmatprep.subr.bf16.mxu0 %v6574_v26  ;;  %3702 = vmatprep.subr.bf16.mxu1 %v6575_v40  ;;  %v6599_v26 = vld [vmem:[#allocation95_spill] sm:$0xff]  ;;  %v6600_v40 = vld [vmem:[#allocation96_spill] sm:$0xff] }
 0x364   : > { %2046 = vmatmul.mubr.f32.gmra.mrb[64].mxu0 %v1945_v21  ;;  %2260 = vmatmul.mubr.f32.gmra.mrb[64].mxu1 %v1945_v21  ;;  %v6598_v21 = vld [vmem:[#allocation94_spill] sm:$0xff] }
 0x365   : > { %2051 = vmatprep.mubr.f32.mxu0 %v1950_v29  ;;  %3576 = vmatpush1.bf16.msra.mxu0 %v6577_v31  ;;  %v6602_v31 = vld [vmem:[#allocation98_spill] sm:$0xff] }
 0x366   : > { %2265 = vmatprep.mubr.f32.mxu1 %v1950_v29  ;;  %3704 = vmatpush1.bf16.msra.mxu1 %v6578_v24  ;;  %v6601_v29 = vld [vmem:[#allocation97_spill] sm:$0xff]  ;;  %v6603_v24 = vld [vmem:[#allocation99_spill] sm:$0xff] }
 0x367   : > { %3578 = vmatprep.subr.bf16.mxu0 %v6580_v59  ;;  %3706 = vmatprep.subr.bf16.mxu1 %v6581_v62  ;;  %v6605_v59 = vld [vmem:[#allocation101_spill] sm:$0xff]  ;;  %v6606_v62 = vld [vmem:[#allocation102_spill] sm:$0xff] }
 0x368   : > { %2052 = vmatmul.mubr.f32.gmra.mrb[66].mxu0 %v1949_v50  ;;  %2266 = vmatmul.mubr.f32.gmra.mrb[66].mxu1 %v1949_v50  ;;  %v6604_v50 = vld [vmem:[#allocation100_spill] sm:$0xff] }
 0x369   : > { %2057 = vmatprep.mubr.f32.mxu0 %v1954_v2  ;;  %3580 = vmatpush1.bf16.msra.mxu0 %v6582_v15  ;;  %v6608_v15 = vld [vmem:[#allocation104_spill] sm:$0xff] }
 0x36a   : > { %2271 = vmatprep.mubr.f32.mxu1 %v1954_v2  ;;  %3708 = vmatpush1.bf16.msra.mxu1 %v6583_v16  ;;  %v6607_v2 = vld [vmem:[#allocation103_spill] sm:$0xff]  ;;  %v6609_v16 = vld [vmem:[#allocation105_spill] sm:$0xff] }
 0x36b   : > { %3582 = vmatprep.subr.bf16.mxu0 %v6585_v23  ;;  %3710 = vmatprep.subr.bf16.mxu1 %v6586_v53  ;;  %v6611_v23 = vld [vmem:[#allocation107_spill] sm:$0xff]  ;;  %v6612_v53 = vld [vmem:[#allocation108_spill] sm:$0xff] }
 0x36c   : > { %2058 = vmatmul.mubr.f32.gmra.mrb[68].mxu0 %v1953_v13  ;;  %2272 = vmatmul.mubr.f32.gmra.mrb[68].mxu1 %v1953_v13  ;;  %v6610_v13 = vld [vmem:[#allocation106_spill] sm:$0xff] }
 0x36d   : > { %3584 = vmatpush1.bf16.msra.mxu0 %v6587_v32  ;;  %2128 = vmatprep.mubr.f32.mxu0 %v1932_v22  ;;  %v6614_v32 = vld [vmem:[#allocation110_spill] sm:$0xff] }
 0x36e   : > { %3712 = vmatpush1.bf16.msra.mxu1 %v6588_v12  ;;  %2342 = vmatprep.mubr.f32.mxu1 %v1932_v22  ;;  %v6613_v22 = vld [vmem:[#allocation109_spill] sm:$0xff]  ;;  %v6615_v12 = vld [vmem:[#allocation111_spill] sm:$0xff] }
 0x36f   : > { %3586 = vmatprep.subr.bf16.mxu0 %v6589_v30  ;;  %3714 = vmatprep.subr.bf16.mxu1 %v6590_v45  ;;  %v1931_v30 = vmul.f32 %v4954_v7, %v4954_v7  ;;  %v1951_v45 = vmul.f32 %v5192_v11, %v5192_v11 }
 0x371   : > { %3588 = vmatpush1.bf16.msra.mxu0 %v6591_v36  ;;  %v1956_v36 = vmul.f32 %v5254_v28, %v5254_v28 }
 0x372   : > { %3716 = vmatpush1.bf16.msra.mxu1 %v6592_v37  ;;  %3590 = vmatprep.subr.bf16.mxu0 %v6593_v4  ;;  %v1955_v37 = vmul.f32 %v5240_v25, %v5240_v25 }
 0x373   : > { %3718 = vmatprep.subr.bf16.mxu1 %v6594_v63 }
 0x375   : > { %3592 = vmatpush1.bf16.msra.mxu0 %v6595_v38 }
 0x376   : > { %3720 = vmatpush1.bf16.msra.mxu1 %v6596_v6  ;;  %3594 = vmatprep.subr.bf16.mxu0 %v6597_v44 }
 0x377   : > { %3722 = vmatprep.subr.bf16.mxu1 %v6598_v21 }
 0x379   : > { %3596 = vmatpush1.bf16.msra.mxu0 %v6599_v26 }
 0x37a   : > { %3724 = vmatpush1.bf16.msra.mxu1 %v6600_v40  ;;  %3598 = vmatprep.subr.bf16.mxu0 %v6601_v29  ;;  %v2554_v40 = vlaneseq }
 0x37b   : > { %3726 = vmatprep.subr.bf16.mxu1 %v6602_v31 }
 0x37c   : > { %v5902_v38 = vshrl.u32 %v2554_v40, 7 }
 0x37d   : > { %3600 = vmatpush1.bf16.msra.mxu0 %v6603_v24 }
 0x37e   : > { %3728 = vmatpush1.bf16.msra.mxu1 %v6604_v50  ;;  %3602 = vmatprep.subr.bf16.mxu0 %v6605_v59 }
 0x37f   : > { %3730 = vmatprep.subr.bf16.mxu1 %v6606_v62 }
 0x381   : > { %3604 = vmatpush1.bf16.msra.mxu0 %v6607_v2 }
 0x382   : > { %3732 = vmatpush1.bf16.msra.mxu1 %v6608_v15  ;;  %3606 = vmatprep.subr.bf16.mxu0 %v6609_v16 }
 0x383   : > { %3734 = vmatprep.subr.bf16.mxu1 %v6610_v13 }
 0x385   : > { %3608 = vmatpush1.bf16.msra.mxu0 %v6611_v23 }
 0x386   : > { %3736 = vmatpush1.bf16.msra.mxu1 %v6612_v53  ;;  %3610 = vmatprep.subr.bf16.mxu0 %v6613_v22 }
 0x387   : > { %3738 = vmatprep.subr.bf16.mxu1 %v6614_v32 }
 0x389   : > { %3612 = vmatpush1.bf16.msra.mxu0 %v5504_v17  ;;  %v1944_v17 = vmul.f32 %v5110_v51, %v5110_v51 }
 0x38a   : > { %3740 = vmatpush1.bf16.msra.mxu1 %v6615_v12  ;;  %3614 = vmatprep.subr.bf16.mxu0 %v5516_v52  ;;  %v1936_v52 = vmul.f32 %v5014_v61, %v5014_v61 }
 0x38b   : > { %3742 = vmatprep.subr.bf16.mxu1 %v5518_v49  ;;  %v1935_v49 = vmul.f32 %v5000_v34, %v5000_v34 }
 0x38d   : > { %3616 = vmatpush1.bf16.msra.mxu0 %v5540_v19  ;;  %v1943_v19 = vmul.f32 %v5096_v46, %v5096_v46 }
 0x38e   : > { %3744 = vmatpush1.bf16.msra.mxu1 %v5542_v10  ;;  %3618 = vmatprep.subr.bf16.mxu0 %v5549_v41  ;;  %v1940_v41 = vmul.f32 %v5062_v54, %v5062_v54  ;;  %v1948_v10 = vmul.f32 %v5158_v42, %v5158_v42 }
 0x38f   : > { %3746 = vmatprep.subr.bf16.mxu1 %v5551_v60  ;;  %v1939_v60 = vmul.f32 %v5048_v5, %v5048_v5 }
 0x391   : > { %3620 = vmatpush1.bf16.msra.mxu0 %v5564_v35  ;;  %v1947_v35 = vmul.f32 %v5144_v9, %v5144_v9 }
 0x392   : > { %3748 = vmatpush1.bf16.msra.mxu1 %v5566_v1  ;;  %v1952_v1 = vmul.f32 %v5203_v48, %v5203_v48 }
 0x394   : > { %2129 = vmatmul.mubr.f32.vlgmr.msra.gmra.mrb[56].mxu0 %v1931_v30 }
 0x395   : > { %2343 = vmatmul.mubr.f32.vlgmr.msra.gmra.mrb[56].mxu1 %v1931_v30  ;;  %2134 = vmatprep.mubr.f32.mxu0 %v1936_v52 }
 0x396   : > { %2348 = vmatprep.mubr.f32.mxu1 %v1936_v52 }
 0x398   : > { %2135 = vmatmul.mubr.f32.gmra.mrb[58].mxu0 %v1935_v49 }
 0x399   : > { %2349 = vmatmul.mubr.f32.gmra.mrb[58].mxu1 %v1935_v49  ;;  %2140 = vmatprep.mubr.f32.mxu0 %v1940_v41 }
 0x39a   : > { %2354 = vmatprep.mubr.f32.mxu1 %v1940_v41 }
 0x39c   : > { %2141 = vmatmul.mubr.f32.gmra.mrb[60].mxu0 %v1939_v60 }
 0x39d   : > { %2355 = vmatmul.mubr.f32.gmra.mrb[60].mxu1 %v1939_v60  ;;  %2146 = vmatprep.mubr.f32.mxu0 %v1944_v17 }
 0x39e   : > { %2360 = vmatprep.mubr.f32.mxu1 %v1944_v17 }
 0x3a0   : > { %2147 = vmatmul.mubr.f32.gmra.mrb[62].mxu0 %v1943_v19 }
 0x3a1   : > { %2361 = vmatmul.mubr.f32.gmra.mrb[62].mxu1 %v1943_v19  ;;  %2152 = vmatprep.mubr.f32.mxu0 %v1948_v10 }
 0x3a2   : > { %2366 = vmatprep.mubr.f32.mxu1 %v1948_v10 }
 0x3a4   : > { %2153 = vmatmul.mubr.f32.gmra.mrb[64].mxu0 %v1947_v35 }
 0x3a5   : > { %2367 = vmatmul.mubr.f32.gmra.mrb[64].mxu1 %v1947_v35  ;;  %2158 = vmatprep.mubr.f32.mxu0 %v1952_v1 }
 0x3a6   : > { %2372 = vmatprep.mubr.f32.mxu1 %v1952_v1 }
 0x3a8   : > { %2159 = vmatmul.mubr.f32.gmra.mrb[66].mxu0 %v1951_v45 }
 0x3a9   : > { %2373 = vmatmul.mubr.f32.gmra.mrb[66].mxu1 %v1951_v45  ;;  %2164 = vmatprep.mubr.f32.mxu0 %v1956_v36 }
 0x3aa   : > { %2378 = vmatprep.mubr.f32.mxu1 %v1956_v36 }
 0x3ac   : > { %2165 = vmatmul.mubr.f32.gmra.mrb[68].mxu0 %v1955_v37 }
 0x3ad   : > { %2379 = vmatmul.mubr.f32.gmra.mrb[68].mxu1 %v1955_v37 }
 0x3e6   : > { %v5782_v4 = vpop.f32.mrb[42].mxu0  ;;  %v5784_v63 = vpop.f32.mrb[42].mxu1 }
 0x3e7   : > { %v5790_v44 = vpop.f32.mrb[43].mxu0  ;;  %v5792_v21 = vpop.f32.mrb[43].mxu1  ;;  %v2385_v26 = vmul.f32 %v5782_v4, %v5782_v4  ;;  %v2387_v36 = vmul.f32 %v5784_v63, %v5784_v63 }
 0x3e8   : > { %v2386_v37 = vmul.f32 %v5790_v44, %v5790_v44  ;;  %v2388_v6 = vmul.f32 %v5792_v21, %v5792_v21 }
 0x3ea   : > { %v5798_v29 = vpop.f32.mrb[44].mxu0  ;;  %v5800_v31 = vpop.f32.mrb[44].mxu1 }
 0x3eb   : > { %v5806_v59 = vpop.f32.mrb[45].mxu0  ;;  %v5808_v62 = vpop.f32.mrb[45].mxu1  ;;  %v2389_v10 = vmul.f32 %v5798_v29, %v5798_v29  ;;  %v2391_v35 = vmul.f32 %v5800_v31, %v5800_v31 }
 0x3ec   : > { %v2390_v28 = vmul.f32 %v5806_v59, %v5806_v59  ;;  %v2392_v47 = vmul.f32 %v5808_v62, %v5808_v62 }
 0x3ee   : > { %v5814_v16 = vpop.f32.mrb[46].mxu0  ;;  %v5816_v13 = vpop.f32.mrb[46].mxu1 }
 0x3ef   : > { %v5822_v22 = vpop.f32.mrb[47].mxu0  ;;  %v5824_v32 = vpop.f32.mrb[47].mxu1  ;;  %v5914_v25 = vmul.f32 %v5814_v16, %v5814_v16  ;;  %v5918_v40 = vmul.f32 %v5816_v13, %v5816_v13 }
 0x3f0   : > { %6616 = vst [vmem:[#allocation2_spill] sm:$0xff] %v5822_v22  ;;  %6617 = vst [vmem:[#allocation3_spill] sm:$0xff] %v5824_v32  ;;  %v5922_v33 = vmul.f32 %v5822_v22, %v5822_v22  ;;  %v5926_v48 = vmul.f32 %v5824_v32, %v5824_v32  ;;  %v2568_v32 = vsub.s32 3, %v5902_v38 }
 0x3f2   : > { %v5830_v52 = vpop.f32.mrb[48].mxu0  ;;  %v5832_v49 = vpop.f32.mrb[48].mxu1 }
 0x3f3   : > { %6618 = vst [vmem:[#allocation4_spill] sm:$0xff] %v5830_v52  ;;  %6619 = vst [vmem:[#allocation5_spill] sm:$0xff] %v5832_v49  ;;  %v5838_v17 = vpop.f32.mrb[49].mxu0  ;;  %v5840_v19 = vpop.f32.mrb[49].mxu1  ;;  %v5930_v55 = vmul.f32 %v5830_v52, %v5830_v52  ;;  %v5934_v11 = vmul.f32 %v5832_v49, %v5832_v49  ;;  %v2560_v52 = vsub.s32 1, %v5902_v38 }
 0x3f4   : > { %6620 = vst [vmem:[#allocation6_spill] sm:$0xff] %v5838_v17  ;;  %6621 = vst [vmem:[#allocation7_spill] sm:$0xff] %v5840_v19  ;;  %v5938_v27 = vmul.f32 %v5838_v17, %v5838_v17  ;;  %v5942_v42 = vmul.f32 %v5840_v19, %v5840_v19  ;;  %v2556_v17 = vsub.s32 0, %v5902_v38 }
 0x3f6   : > { %v5846_v1 = vpop.f32.mrb[50].mxu0  ;;  %v5848_v45 = vpop.f32.mrb[50].mxu1 }
 0x3f7   : > { %6622 = vst [vmem:[#allocation8_spill] sm:$0xff] %v5846_v1  ;;  %6623 = vst [vmem:[#allocation9_spill] sm:$0xff] %v5848_v45  ;;  %v5854_v60 = vpop.f32.mrb[51].mxu0  ;;  %v5856_v41 = vpop.f32.mrb[51].mxu1  ;;  %v5946_v0 = vmul.f32 %v5846_v1, %v5846_v1  ;;  %v5950_v9 = vmul.f32 %v5848_v45, %v5848_v45  ;;  %v1499_v1 = vld [vmem:[%s6259_s7] sm:$0xf] }
 0x3f8   : > { %6624 = vst [vmem:[#allocation10_spill] sm:$0xff] %v5854_v60  ;;  %6625 = vst [vmem:[#allocation11_spill] sm:$0xff] %v5856_v41  ;;  %v5954_v20 = vmul.f32 %v5854_v60, %v5854_v60  ;;  %v5959_v18 = vmul.f32 %v5856_v41, %v5856_v41  ;;  %v2564_v45 = vsub.s32 2, %v5902_v38  ;;  %v1500_v41 = vld [vmem:[%s6260_s8] sm:$0xf]  ;;  %v5986_v22 = vrot.slane %v1499_v1, %v2556_v17 }
 0x3f9   : > { %v5988_v38 = vrot.slane %v1500_v41, %v2556_v17 }
 0x3fa   : > { %v5862_v30 = vpop.f32.mrb[52].mxu0  ;;  %v5864_v12 = vpop.f32.mrb[52].mxu1  ;;  %6630 = vst [vmem:[#allocation16_spill] sm:$0xff] %v5954_v20  ;;  %6631 = vst [vmem:[#allocation17_spill] sm:$0xff] %v5959_v18 }
 0x3fb   : > { %6626 = vst [vmem:[#allocation12_spill] sm:$0xff] %v5862_v30  ;;  %6627 = vst [vmem:[#allocation13_spill] sm:$0xff] %v5864_v12  ;;  %v5870_v53 = vpop.f32.mrb[53].mxu0  ;;  %v5872_v23 = vpop.f32.mrb[53].mxu1  ;;  %v5968_v60 = vmul.f32 %v5862_v30, %v5862_v30 }
 0x3fc   : > { %6628 = vst [vmem:[#allocation14_spill] sm:$0xff] %v5870_v53  ;;  %6629 = vst [vmem:[#allocation15_spill] sm:$0xff] %v5872_v23 }
 0x3fd   : > { %6632 = vst [vmem:[#allocation18_spill] sm:$0xff] %v5968_v60  ;;  %v5984_v60 = vmul.f32 %v5872_v23, %v5872_v23  ;;  %v5992_v23 = vrot.slane %v1500_v41, %v2564_v45 }
 0x3fe   : > { %v5878_v15 = vpop.f32.mrb[54].mxu0  ;;  %v5880_v2 = vpop.f32.mrb[54].mxu1 }
 0x3ff   : > { %v5886_v50 = vpop.f32.mrb[55].mxu0  ;;  %v5888_v24 = vpop.f32.mrb[55].mxu1  ;;  %6634 = vst [vmem:[#allocation20_spill] sm:$0xff] %v5984_v60 }
 0x467   : > { %v2130_v51 = vpop.f32.mrb[56].mxu0 }
 0x468   : > { %v2413_v19 = vsub.f32 %v2130_v51, %v2385_v26  ;;  %v2344_v49 = vpop.f32.mrb[56].mxu1  ;;  %v2132_v46 = vpop.f32.mrb[57].mxu0  ;;  %v5976_v51 = vmul.f32 %v5864_v12, %v5864_v12  ;;  %v5980_v26 = vmul.f32 %v5870_v53, %v5870_v53  ;;  %v5990_v53 = vrot.slane %v1499_v1, %v2564_v45 }
 0x469   : > { %v2415_v18 = vsub.f32 %v2344_v49, %v2387_v36  ;;  %v2414_v20 = vsub.f32 %v2132_v46, %v2386_v37  ;;  %v2346_v43 = vpop.f32.mrb[57].mxu1 }
 0x46a   : > { %6633 = vst [vmem:[#allocation19_spill] sm:$0xff] %v5976_v51  ;;  %v2469_v54 = vadd.f32 1e-05, %v2413_v19  ;;  %v2416_v30 = vsub.f32 %v2346_v43, %v2388_v6 }
 0x46b   : > { %v2471_v46 = vadd.f32 1e-05, %v2415_v18  ;;  %v2470_v49 = vadd.f32 1e-05, %v2414_v20  ;;  %v2136_v36 = vpop.f32.mrb[58].mxu0  ;;  %v5994_v20 = vrot.slane %v1499_v1, %v2560_v52 }
 0x46c   : > { %3831 = vrsqrt.f32 %v2469_v54  ;;  %v2472_v37 = vadd.f32 1e-05, %v2416_v30  ;;  %v2417_v12 = vsub.f32 %v2136_v36, %v2389_v10  ;;  %v2350_v51 = vpop.f32.mrb[58].mxu1  ;;  %v2138_v39 = vpop.f32.mrb[59].mxu0  ;;  %v5996_v10 = vrot.slane %v1500_v41, %v2560_v52 }
 0x46d   : > { %3833 = vrsqrt.f32 %v2471_v46  ;;  %v2419_v43 = vsub.f32 %v2350_v51, %v2391_v35  ;;  %v2418_v6 = vsub.f32 %v2138_v39, %v2390_v28  ;;  %v2352_v19 = vpop.f32.mrb[59].mxu1  ;;  %v5999_v39 = vrot.slane %v1499_v1, %v2568_v32 }
 0x46e   : > { %3835 = vrsqrt.f32 %v2470_v49  ;;  %v2473_v60 = vadd.f32 1e-05, %v2417_v12  ;;  %v2420_v18 = vsub.f32 %v2352_v19, %v2392_v47  ;;  %v6003_v51 = vrot.slane %v1500_v41, %v2568_v32 }
 0x46f   : > { %3837 = vrsqrt.f32 %v2472_v37  ;;  %v2475_v54 = vadd.f32 1e-05, %v2419_v43  ;;  %v2474_v17 = vadd.f32 1e-05, %v2418_v6  ;;  %v2142_v30 = vpop.f32.mrb[60].mxu0 }
 0x470   : > { %3839 = vrsqrt.f32 %v2473_v60  ;;  %v2476_v46 = vadd.f32 1e-05, %v2420_v18  ;;  %v2421_v36 = vsub.f32 %v2142_v30, %v5914_v25  ;;  %v2356_v35 = vpop.f32.mrb[60].mxu1  ;;  %v2144_v28 = vpop.f32.mrb[61].mxu0  ;;  %v6008_v60 = vmul.f32 %v5878_v15, %v5878_v15 }
 0x471   : > { %3841 = vrsqrt.f32 %v2475_v54  ;;  %v2423_v12 = vsub.f32 %v2356_v35, %v5918_v40  ;;  %v2422_v47 = vsub.f32 %v2144_v28, %v5922_v33  ;;  %v2358_v45 = vpop.f32.mrb[61].mxu1  ;;  %v6012_v40 = vmul.f32 %v5880_v2, %v5880_v2 }
 0x472   : > { %3843 = vrsqrt.f32 %v2474_v17  ;;  %v2477_v49 = vadd.f32 1e-05, %v2421_v36  ;;  %v2424_v52 = vsub.f32 %v2358_v45, %v5926_v48  ;;  %v6017_v48 = vmul.f32 %v5886_v50, %v5886_v50 }
 0x473   : > { %3845 = vrsqrt.f32 %v2476_v46  ;;  %v2479_v25 = vadd.f32 1e-05, %v2423_v12  ;;  %v2478_v1 = vadd.f32 1e-05, %v2422_v47  ;;  %v2148_v37 = vpop.f32.mrb[62].mxu0  ;;  %v6023_v17 = vmul.f32 %v5888_v24, %v5888_v24 }
 0x474   : > { %3847 = vrsqrt.f32 %v2477_v49  ;;  %v2480_v33 = vadd.f32 1e-05, %v2424_v52  ;;  %v2425_v32 = vsub.f32 %v2148_v37, %v5930_v55  ;;  %v2362_v41 = vpop.f32.mrb[62].mxu1  ;;  %v2150_v43 = vpop.f32.mrb[63].mxu0  ;;  %v6635_v36 = vsub.f32 %v6549_v3, %v5782_v4 }
 0x475   : > { %3849 = vrsqrt.f32 %v2479_v25  ;;  %v2427_v6 = vsub.f32 %v2362_v41, %v5934_v11  ;;  %v2426_v19 = vsub.f32 %v2150_v43, %v5938_v27  ;;  %v2364_v18 = vpop.f32.mrb[63].mxu1  ;;  %v6636_v47 = vsub.f32 %v4954_v7, %v5784_v63 }
 0x476   : > { %v3832_v54 = vpop.eup %3831  ;;  %3851 = vrsqrt.f32 %v2478_v1  ;;  %v2481_v30 = vadd.f32 1e-05, %v2425_v32  ;;  %v2428_v55 = vsub.f32 %v2364_v18, %v5942_v42  ;;  %v6637_v4 = vsub.f32 %v4966_v58, %v5790_v44 }
 0x477   : > { %v3834_v46 = vpop.eup %3833  ;;  %v2525_v35 = vmul.f32 %v3832_v54, %v6635_v36  ;;  %3853 = vrsqrt.f32 %v2480_v33  ;;  %v2483_v28 = vadd.f32 1e-05, %v2427_v6  ;;  %v2482_v11 = vadd.f32 1e-05, %v2426_v19  ;;  %v2154_v12 = vpop.f32.mrb[64].mxu0 }
 0x478   : > { %v3836_v27 = vpop.eup %3835  ;;  %v2527_v45 = vmul.f32 %v3834_v46, %v6636_v47  ;;  %3855 = vrsqrt.f32 %v2481_v30  ;;  %v2484_v49 = vadd.f32 1e-05, %v2428_v55  ;;  %v2429_v52 = vsub.f32 %v2154_v12, %v5946_v0  ;;  %v6033_v25 = vpop.f32.mrb[64].mxu1 }
 0x479   : > { %v6035_v42 = vpop.f32.mrb[65].mxu0  ;;  %v3838_v1 = vpop.eup %3837  ;;  %v2574_v3 = vmul.f32 %v5986_v22, %v2525_v35  ;;  %v2526_v37 = vmul.f32 %v3836_v27, %v6637_v4  ;;  %3857 = vrsqrt.f32 %v2483_v28  ;;  %v2431_v7 = vsub.f32 %v6033_v25, %v5950_v9 }
 0x47a   : > { %v6043_v63 = vpop.f32.mrb[65].mxu1  ;;  %v3840_v33 = vpop.eup %3839  ;;  %v2576_v0 = vmul.f32 %v5990_v53, %v2527_v45  ;;  %v6638_v32 = vsub.f32 %v4968_v14, %v5792_v21  ;;  %3859 = vrsqrt.f32 %v2482_v11  ;;  %v2485_v43 = vadd.f32 1e-05, %v2429_v52 }
 0x47b   : > { %v3842_v6 = vpop.eup %3841  ;;  %v2623_v58 = vadd.f32 %v5988_v38, %v2574_v3  ;;  %v2575_v44 = vmul.f32 %v5994_v20, %v2526_v37  ;;  %v6639_v19 = vsub.f32 %v6555_v8, %v5798_v29  ;;  %3861 = vrsqrt.f32 %v2484_v49  ;;  %v6054_v54 = vpop.f32.mrb[66].mxu0 }
 0x47c   : > { %v2528_v41 = vmul.f32 %v3838_v1, %v6638_v32  ;;  %v3844_v30 = vpop.eup %3843  ;;  %v2625_v14 = vadd.f32 %v5992_v23, %v2576_v0  ;;  %v6640_v55 = vsub.f32 %v5000_v34, %v5800_v31  ;;  %3863 = vrsqrt.f32 %v2485_v43  ;;  %v6068_v8 = vpop.f32.mrb[66].mxu1 }
 0x47d   : > { %v2529_v18 = vmul.f32 %v3840_v33, %v6639_v19  ;;  %v6070_v29 = vpop.f32.mrb[67].mxu0  ;;  %v3846_v36 = vpop.eup %3845  ;;  %v2651_v35 = vmax.f32 %v2623_v58, 0.0  ;;  %v2624_v28 = vadd.f32 %v5996_v10, %v2575_v44  ;;  %v6641_v12 = vsub.f32 %v6552_v56, %v5806_v59 }
 0x47e   : > { %v2577_v21 = vmul.f32 %v5999_v39, %v2528_v41  ;;  %v2531_v46 = vmul.f32 %v3842_v6, %v6640_v55  ;;  %v6077_v47 = vpop.f32.mrb[67].mxu1  ;;  %v3848_v34 = vpop.eup %3847  ;;  %v2653_v31 = vmax.f32 %v2625_v14, 0.0  ;;  %v6642_v52 = vsub.f32 %v5014_v61, %v5808_v62  ;;  %v6646_v14 = vld [vmem:[#allocation2_spill] sm:$0xff] }
 0x47f   : > { %v2578_v11 = vmul.f32 %v5986_v22, %v2529_v18  ;;  %v2530_v27 = vmul.f32 %v3844_v30, %v6641_v12  ;;  %v3850_v3 = vpop.eup %3849  ;;  %2679 = vst [vmem:[%s6061_s11] sm:$0xff] %v2651_v35  ;;  %v2652_v4 = vmax.f32 %v2624_v28, 0.0  ;;  %v6643_v37 = vsub.f32 %v6561_v57, %v5814_v16  ;;  %v6090_v0 = vpop.f32.mrb[68].mxu0  ;;  %v6645_v30 = vld [vmem:[#allocation51_spill] sm:$0xff]  ;;  %v6648_v28 = vld [vmem:[#allocation52_spill] sm:$0xff] }
 0x480   : > { %v2626_v45 = vadd.f32 %v6003_v51, %v2577_v21  ;;  %v2580_v49 = vmul.f32 %v5990_v53, %v2531_v46  ;;  %v2532_v1 = vmul.f32 %v3846_v36, %v6642_v52  ;;  %v3852_v32 = vpop.eup %3851  ;;  %2681 = vst [vmem:[%s6061_s11 + $0x10] sm:$0xff] %v2653_v31  ;;  %v6644_v43 = vsub.f32 %v5048_v5, %v5816_v13  ;;  %v6098_v58 = vpop.f32.mrb[68].mxu1  ;;  %v6651_v52 = vld [vmem:[#allocation55_spill] sm:$0xff] }
 0x481   : > { %v2627_v56 = vadd.f32 %v5988_v38, %v2578_v11  ;;  %v2579_v59 = vmul.f32 %v5994_v20, %v2530_v27  ;;  %v2533_v33 = vmul.f32 %v3848_v34, %v6643_v37  ;;  %v6100_v44 = vpop.f32.mrb[69].mxu0  ;;  %v3854_v57 = vpop.eup %3853  ;;  %2680 = vst [vmem:[%s6061_s11 + $0x8] sm:$0xff] %v2652_v4  ;;  %v6647_v21 = vsub.f32 %v6645_v30, %v6646_v14  ;;  %v6649_v11 = vld [vmem:[#allocation3_spill] sm:$0xff] }
 0x482   : > { %v2654_v41 = vmax.f32 %v2626_v45, 0.0  ;;  %v2629_v61 = vadd.f32 %v5992_v23, %v2580_v49  ;;  %v2581_v62 = vmul.f32 %v5999_v39, %v2532_v1  ;;  %v2535_v6 = vmul.f32 %v3850_v3, %v6644_v43  ;;  %v6108_v46 = vpop.f32.mrb[69].mxu1  ;;  %v3856_v5 = vpop.eup %3855  ;;  %v6652_v1 = vld [vmem:[#allocation4_spill] sm:$0xff] }
 0x483   : > { %v2655_v16 = vmax.f32 %v2627_v56, 0.0  ;;  %v2628_v19 = vadd.f32 %v5996_v10, %v2579_v59  ;;  %v2582_v18 = vmul.f32 %v5986_v22, %v2533_v33  ;;  %v2534_v55 = vmul.f32 %v3852_v32, %v6647_v21  ;;  %v3858_v34 = vpop.eup %3857  ;;  %v6654_v32 = vld [vmem:[#allocation56_spill] sm:$0xff] }
 0x484   : > { %2682 = vst [vmem:[%s6061_s11 + $0x18] sm:$0xff] %v2654_v41  ;;  %v2657_v13 = vmax.f32 %v2629_v61, 0.0  ;;  %v2630_v36 = vadd.f32 %v6003_v51, %v2581_v62  ;;  %v2584_v35 = vmul.f32 %v5990_v53, %v2535_v6  ;;  %v6650_v12 = vsub.f32 %v6648_v28, %v6649_v11  ;;  %v3860_v56 = vpop.eup %3859  ;;  %v6655_v41 = vld [vmem:[#allocation5_spill] sm:$0xff] }
 0x485   : > { %2683 = vst [vmem:[%s6061_s11 + $0x20] sm:$0xff] %v2655_v16  ;;  %v2656_v31 = vmax.f32 %v2628_v19, 0.0  ;;  %v2631_v45 = vadd.f32 %v5988_v38, %v2582_v18  ;;  %v2583_v49 = vmul.f32 %v5994_v20, %v2534_v55  ;;  %v6653_v3 = vsub.f32 %v6651_v52, %v6652_v1  ;;  %v3862_v43 = vpop.eup %3861  ;;  %v6657_v19 = vld [vmem:[#allocation59_spill] sm:$0xff]  ;;  %v6658_v18 = vld [vmem:[#allocation6_spill] sm:$0xff] }
 0x486   : > { %v2536_v27 = vmul.f32 %v3854_v57, %v6650_v12  ;;  %2685 = vst [vmem:[%s6061_s11 + $0x30] sm:$0xff] %v2657_v13  ;;  %v2658_v59 = vmax.f32 %v2630_v36, 0.0  ;;  %v2633_v37 = vadd.f32 %v5992_v23, %v2584_v35  ;;  %v6656_v61 = vsub.f32 %v6654_v32, %v6655_v41  ;;  %v3864_v21 = vpop.eup %3863  ;;  %v6660_v36 = vld [vmem:[#allocation60_spill] sm:$0xff]  ;;  %v6661_v35 = vld [vmem:[#allocation7_spill] sm:$0xff] }
 0x487   : > { %v2537_v4 = vmul.f32 %v3856_v5, %v6653_v3  ;;  %2684 = vst [vmem:[%s6061_s11 + $0x28] sm:$0xff] %v2656_v31  ;;  %v2659_v6 = vmax.f32 %v2631_v45, 0.0  ;;  %v2632_v57 = vadd.f32 %v5996_v10, %v2583_v49  ;;  %v6659_v30 = vsub.f32 %v6657_v19, %v6658_v18  ;;  %v6663_v31 = vld [vmem:[#allocation63_spill] sm:$0xff]  ;;  %v6664_v45 = vld [vmem:[#allocation8_spill] sm:$0xff] }
 0x488   : > { %v2585_v33 = vmul.f32 %v5999_v39, %v2536_v27  ;;  %v2539_v62 = vmul.f32 %v3858_v34, %v6656_v61  ;;  %2686 = vst [vmem:[%s6061_s11 + $0x38] sm:$0xff] %v2658_v59  ;;  %v2661_v55 = vmax.f32 %v2633_v37, 0.0  ;;  %v6662_v28 = vsub.f32 %v6660_v36, %v6661_v35  ;;  %v6666_v32 = vld [vmem:[#allocation16_spill] sm:$0xff]  ;;  %v6669_v18 = vld [vmem:[#allocation19_spill] sm:$0xff] }
 0x489   : > { %v2586_v16 = vmul.f32 %v5986_v22, %v2537_v4  ;;  %v2538_v14 = vmul.f32 %v3860_v56, %v6659_v30  ;;  %2687 = vst [vmem:[%s6061_s11 + $0x40] sm:$0xff] %v2659_v6  ;;  %v2660_v12 = vmax.f32 %v2632_v57, 0.0  ;;  %v6665_v49 = vsub.f32 %v6663_v31, %v6664_v45  ;;  %v6668_v57 = vld [vmem:[#allocation18_spill] sm:$0xff]  ;;  %v6674_v31 = vld [vmem:[#allocation67_spill] sm:$0xff] }
 0x48a   : > { %v2634_v5 = vadd.f32 %v6003_v51, %v2585_v33  ;;  %v2588_v13 = vmul.f32 %v5990_v53, %v2539_v62  ;;  %v2540_v11 = vmul.f32 %v3862_v43, %v6662_v28  ;;  %2689 = vst [vmem:[%s6061_s11 + $0x50] sm:$0xff] %v2661_v55  ;;  %v2487_v56 = vadd.f32 1e-05, %v2431_v7  ;;  %v6667_v43 = vld [vmem:[#allocation17_spill] sm:$0xff]  ;;  %v6670_v55 = vld [vmem:[#allocation20_spill] sm:$0xff] }
 0x48b   : > { %v2635_v27 = vadd.f32 %v5988_v38, %v2586_v16  ;;  %v2587_v34 = vmul.f32 %v5994_v20, %v2538_v14  ;;  %v2541_v52 = vmul.f32 %v3864_v21, %v6665_v49  ;;  %2688 = vst [vmem:[%s6061_s11 + $0x48] sm:$0xff] %v2660_v12  ;;  %v2430_v41 = vsub.f32 %v6035_v42, %v6666_v32  ;;  %v6681_v32 = vld [vmem:[#allocation12_spill] sm:$0xff] }
 0x48c   : > { %v2662_v1 = vmax.f32 %v2634_v5, 0.0  ;;  %v2637_v3 = vadd.f32 %v5992_v23, %v2588_v13  ;;  %v2589_v4 = vmul.f32 %v5999_v39, %v2540_v11  ;;  %3865 = vrsqrt.f32 %v2487_v56 }
 0x48d   : > { %v2663_v59 = vmax.f32 %v2635_v27, 0.0  ;;  %v2636_v37 = vadd.f32 %v5996_v10, %v2587_v34  ;;  %v2590_v33 = vmul.f32 %v5986_v22, %v2541_v52  ;;  %v2432_v9 = vsub.f32 %v6043_v63, %v6667_v43  ;;  %v6672_v27 = vld [vmem:[#allocation9_spill] sm:$0xff] }
 0x48e   : > { %2690 = vst [vmem:[%s6061_s11 + $0x58] sm:$0xff] %v2662_v1  ;;  %v2665_v61 = vmax.f32 %v2637_v3, 0.0  ;;  %v2638_v62 = vadd.f32 %v6003_v51, %v2589_v4  ;;  %v2486_v6 = vadd.f32 1e-05, %v2430_v41  ;;  %v2433_v16 = vsub.f32 %v6054_v54, %v6668_v57  ;;  %v6677_v1 = vld [vmem:[#allocation68_spill] sm:$0xff]  ;;  %v6678_v3 = vld [vmem:[#allocation11_spill] sm:$0xff] }
 0x48f   : > { %2691 = vst [vmem:[%s6061_s11 + $0x60] sm:$0xff] %v2663_v59  ;;  %v2664_v25 = vmax.f32 %v2636_v37, 0.0  ;;  %v2639_v7 = vadd.f32 %v5988_v38, %v2590_v33  ;;  %v2488_v19 = vadd.f32 1e-05, %v2432_v9  ;;  %v2435_v30 = vsub.f32 %v6068_v8, %v6669_v18  ;;  %v6680_v33 = vld [vmem:[#allocation71_spill] sm:$0xff] }
 0x490   : > { %2693 = vst [vmem:[%s6061_s11 + $0x70] sm:$0xff] %v2665_v61  ;;  %v2666_v42 = vmax.f32 %v2638_v62, 0.0  ;;  %v2434_v14 = vsub.f32 %v6070_v29, %v5980_v26  ;;  %3867 = vrsqrt.f32 %v2486_v6  ;;  %v2489_v21 = vadd.f32 1e-05, %v2433_v16  ;;  %v6686_v18 = vld [vmem:[#allocation75_spill] sm:$0xff] }
 0x491   : > { %2692 = vst [vmem:[%s6061_s11 + $0x68] sm:$0xff] %v2664_v25  ;;  %v2667_v63 = vmax.f32 %v2639_v7, 0.0  ;;  %v2436_v5 = vsub.f32 %v6077_v47, %v6670_v55  ;;  %3869 = vrsqrt.f32 %v2488_v19  ;;  %v2491_v54 = vadd.f32 1e-05, %v2435_v30  ;;  %v6683_v25 = vld [vmem:[#allocation72_spill] sm:$0xff]  ;;  %v6684_v7 = vld [vmem:[#allocation13_spill] sm:$0xff] }
 0x492   : > { %2694 = vst [vmem:[%s6061_s11 + $0x78] sm:$0xff] %v2666_v42  ;;  %v2490_v13 = vadd.f32 1e-05, %v2434_v14  ;;  %v2437_v36 = vsub.f32 %v6090_v0, %v6008_v60  ;;  %3871 = vrsqrt.f32 %v2489_v21  ;;  %v2439_v26 = vsub.f32 %v6098_v58, %v6012_v40  ;;  %v6671_v0 = vld [vmem:[#allocation64_spill] sm:$0xff]  ;;  %v6687_v30 = vld [vmem:[#allocation14_spill] sm:$0xff] }
 0x493   : > { %2695 = vst [vmem:[%s6061_s11 + $0x80] sm:$0xff] %v2667_v63  ;;  %v2492_v8 = vadd.f32 1e-05, %v2436_v5  ;;  %v2438_v29 = vsub.f32 %v6100_v44, %v6017_v48  ;;  %3873 = vrsqrt.f32 %v2491_v54  ;;  %v2440_v47 = vsub.f32 %v6108_v46, %v6023_v17  ;;  %v6675_v17 = vld [vmem:[#allocation10_spill] sm:$0xff]  ;;  %v6689_v54 = vld [vmem:[#allocation76_spill] sm:$0xff] }
 0x494   : > { %v2493_v35 = vadd.f32 1e-05, %v2437_v36  ;;  %3875 = vrsqrt.f32 %v2490_v13  ;;  %v2495_v28 = vadd.f32 1e-05, %v2439_v26  ;;  %v6673_v34 = vsub.f32 %v6671_v0, %v6672_v27  ;;  %v6690_v13 = vld [vmem:[#allocation15_spill] sm:$0xff] }
 0x495   : > { %v2494_v11 = vadd.f32 1e-05, %v2438_v29  ;;  %3877 = vrsqrt.f32 %v2492_v8  ;;  %v2496_v12 = vadd.f32 1e-05, %v2440_v47  ;;  %v6676_v46 = vsub.f32 %v6674_v31, %v6675_v17 }
 0x496   : > { %3879 = vrsqrt.f32 %v2493_v35  ;;  %v3866_v60 = vpop.eup %3865  ;;  %v6679_v4 = vsub.f32 %v6677_v1, %v6678_v3  ;;  %v6682_v41 = vsub.f32 %v6680_v33, %v6681_v32  ;;  %v6685_v6 = vsub.f32 %v6683_v25, %v6684_v7  ;;  %v6698_v3 = vld [vmem:[#allocation84_spill] sm:$0xff] }
 0x497   : > { %3881 = vrsqrt.f32 %v2495_v28  ;;  %v2543_v40 = vmul.f32 %v3866_v60, %v6673_v34  ;;  %v6688_v14 = vsub.f32 %v6686_v18, %v6687_v30  ;;  %v6691_v36 = vsub.f32 %v6689_v54, %v6690_v13  ;;  %v6692_v28 = vld [vmem:[#allocation79_spill] sm:$0xff] }
 0x498   : > { %3883 = vrsqrt.f32 %v2494_v11  ;;  %v6693_v11 = vsub.f32 %v6692_v28, %v5878_v15 }
 0x499   : > { %3885 = vrsqrt.f32 %v2496_v12  ;;  %v2592_v58 = vmul.f32 %v5990_v53, %v2543_v40  ;;  %v6694_v40 = vld [vmem:[#allocation80_spill] sm:$0xff] }
 0x49a   : > { %v3868_v48 = vpop.eup %3867 }
 0x49b   : > { %v3870_v44 = vpop.eup %3869  ;;  %v2542_v45 = vmul.f32 %v3868_v48, %v6676_v46  ;;  %v2641_v52 = vadd.f32 %v5992_v23, %v2592_v58  ;;  %v6695_v48 = vsub.f32 %v6694_v40, %v5880_v2  ;;  %v6696_v46 = vld [vmem:[#allocation83_spill] sm:$0xff] }
 0x49c   : > { %v3872_v49 = vpop.eup %3871  ;;  %v2544_v56 = vmul.f32 %v3870_v44, %v6679_v4  ;;  %v6699_v4 = vsub.f32 %v6698_v3, %v5888_v24 }
 0x49d   : > { %v3874_v59 = vpop.eup %3873  ;;  %v2591_v37 = vmul.f32 %v5994_v20, %v2542_v45  ;;  %v2545_v61 = vmul.f32 %v3872_v49, %v6682_v41  ;;  %v2669_v43 = vmax.f32 %v2641_v52, 0.0  ;;  %v6697_v45 = vsub.f32 %v6696_v46, %v5886_v50 }
 0x49e   : > { %v3876_v62 = vpop.eup %3875  ;;  %v2593_v9 = vmul.f32 %v5999_v39, %v2544_v56  ;;  %v2547_v57 = vmul.f32 %v3874_v59, %v6685_v6 }
 0x49f   : > { %v3878_v16 = vpop.eup %3877  ;;  %v2640_v42 = vadd.f32 %v5996_v10, %v2591_v37  ;;  %v2594_v19 = vmul.f32 %v5986_v22, %v2545_v61  ;;  %v2546_v63 = vmul.f32 %v3876_v62, %v6688_v14  ;;  %2697 = vst [vmem:[%s6061_s11 + $0x90] sm:$0xff] %v2669_v43 }
 0x4a0   : > { %v3880_v21 = vpop.eup %3879  ;;  %v2642_v55 = vadd.f32 %v6003_v51, %v2593_v9  ;;  %v2596_v5 = vmul.f32 %v5990_v53, %v2547_v57  ;;  %v2548_v8 = vmul.f32 %v3878_v16, %v6691_v36 }
 0x4a1   : > { %v3882_v26 = vpop.eup %3881  ;;  %v2668_v29 = vmax.f32 %v2640_v42, 0.0  ;;  %v2643_v35 = vadd.f32 %v5988_v38, %v2594_v19  ;;  %v2595_v47 = vmul.f32 %v5994_v20, %v2546_v63  ;;  %v2549_v12 = vmul.f32 %v3880_v21, %v6693_v11 }
 0x4a2   : > { %v3884_v60 = vpop.eup %3883  ;;  %v2670_v0 = vmax.f32 %v2642_v55, 0.0  ;;  %v2645_v27 = vadd.f32 %v5992_v23, %v2596_v5  ;;  %v2597_v34 = vmul.f32 %v5999_v39, %v2548_v8  ;;  %v2551_v58 = vmul.f32 %v3882_v26, %v6695_v48 }
 0x4a3   : > { %v3886_v44 = vpop.eup %3885  ;;  %2696 = vst [vmem:[%s6061_s11 + $0x88] sm:$0xff] %v2668_v29  ;;  %v2671_v31 = vmax.f32 %v2643_v35, 0.0  ;;  %v2644_v17 = vadd.f32 %v5996_v10, %v2595_v47  ;;  %v2598_v15 = vmul.f32 %v5986_v22, %v2549_v12  ;;  %v2550_v49 = vmul.f32 %v3884_v60, %v6697_v45 }
 0x4a4   : > { %2698 = vst [vmem:[%s6061_s11 + $0x98] sm:$0xff] %v2670_v0  ;;  %v2673_v52 = vmax.f32 %v2645_v27, 0.0  ;;  %v2646_v1 = vadd.f32 %v6003_v51, %v2597_v34  ;;  %v2600_v2 = vmul.f32 %v5990_v53, %v2551_v58  ;;  %v2552_v56 = vmul.f32 %v3886_v44, %v6699_v4 }
 0x4a5   : > { %2699 = vst [vmem:[%s6061_s11 + $0xa0] sm:$0xff] %v2671_v31  ;;  %v2672_v59 = vmax.f32 %v2644_v17, 0.0  ;;  %v2647_v22 = vadd.f32 %v5988_v38, %v2598_v15  ;;  %v2599_v50 = vmul.f32 %v5994_v20, %v2550_v49 }
 0x4a6   : > { %2701 = vst [vmem:[%s6061_s11 + $0xb0] sm:$0xff] %v2673_v52  ;;  %v2674_v37 = vmax.f32 %v2646_v1, 0.0  ;;  %v2649_v33 = vadd.f32 %v5992_v23, %v2600_v2  ;;  %v2601_v53 = vmul.f32 %v5999_v39, %v2552_v56 }
 0x4a7   : > { %2700 = vst [vmem:[%s6061_s11 + $0xa8] sm:$0xff] %v2672_v59  ;;  %v2675_v32 = vmax.f32 %v2647_v22, 0.0  ;;  %v2648_v24 = vadd.f32 %v5996_v10, %v2599_v50 }
 0x4a8   : > { %2702 = vst [vmem:[%s6061_s11 + $0xb8] sm:$0xff] %v2674_v37  ;;  %v2677_v41 = vmax.f32 %v2649_v33, 0.0  ;;  %v2650_v61 = vadd.f32 %v6003_v51, %v2601_v53 }
 0x4a9   : > { %2703 = vst [vmem:[%s6061_s11 + $0xc0] sm:$0x1] %v2675_v32  ;;  %v2676_v38 = vmax.f32 %v2648_v24, 0.0 }
 0x4aa   : > { %2705 = vst [vmem:[%s6061_s11 + $0xd0] sm:$0x1] %v2677_v41  ;;  %v2678_v62 = vmax.f32 %v2650_v61, 0.0 }
 0x4ab   : > { %2704 = vst [vmem:[%s6061_s11 + $0xc8] sm:$0x1] %v2676_v38 }
 0x4ac   : > { %2706 = vst [vmem:[%s6061_s11 + $0xd8] sm:$0x1] %v2678_v62 }
 0x4ad PF: > { %s19_s30 = sadd.s32 1, %s3893_s30  }
 0x4ae   : > { %p16_p4 = scmp.ge.s32.totalorder %s19_s30, 5  }
 0x4b0   :  { %18 = sbr.rel (!%p16_p4) target bundleno = 1 (0x1), region = 92 }

// kernel: class_dynamic_conv.3
= control target key start
LH: loop header
LB: loop body
LE: loop exit
PB: predicated region body
PF: predicated region fallthrough
CT: control target
= control target key end

     0   :  { %s4071_s0 = inlined_call_operand.vmem [shape: f32[24,3136], index: 0, kind: input, shape index: {}]   ;;  %s4072_s1 = inlined_call_operand.vmem [shape: f32[3136,64], index: 1, kind: input, shape index: {}]   ;;  %s4073_s2 = inlined_call_operand.vmem [shape: f32[1,64], index: 2, kind: input, shape index: {}]   ;;  %s4074_s3 = inlined_call_operand.vmem [shape: f32[1,64], index: 3, kind: input, shape index: {}]   ;;  %s4075_s4 = inlined_call_operand.vmem [shape: f32[1,64], index: 4, kind: input, shape index: {}]   ;;  %s4076_s5 = inlined_call_operand.hbm [shape: f32[24,64], index: 5, kind: output, shape index: {}]  }
   0x1   :  { %v112_v0 = vld [vmem:[%s4072_s1 + $0x80] sm:$0xff]  ;;  %v113_v1 = vld [vmem:[%s4072_s1 + $0x88] sm:$0xff]  ;;  %v114_v11 = vld [vmem:[%s4072_s1 + $0x90] sm:$0xff] }
   0x2   :  { %v144_v2 = vld [vmem:[%s4072_s1 + $0x180] sm:$0xff]  ;;  %v2161_v3 = vpack.c.bf16 %v113_v1, %v112_v0  ;;  %v145_v4 = vld [vmem:[%s4072_s1 + $0x188] sm:$0xff]  ;;  %v115_v13 = vld [vmem:[%s4072_s1 + $0x98] sm:$0xff] }
   0x3   :  { %v96_v5 = vld [vmem:[%s4072_s1] sm:$0xff]  ;;  %v97_v6 = vld [vmem:[%s4072_s1 + $0x8] sm:$0xff]  ;;  %v2193_v7 = vpack.c.bf16 %v145_v4, %v144_v2  ;;  %v146_v14 = vld [vmem:[%s4072_s1 + $0x190] sm:$0xff]  ;;  %v2165_v16 = vpack.c.bf16 %v115_v13, %v114_v11 }
   0x4   :  { %v2163_v8 = vpack.c.bf16 %v97_v6, %v96_v5  ;;  %v128_v9 = vld [vmem:[%s4072_s1 + $0x100] sm:$0xff]  ;;  %v129_v10 = vld [vmem:[%s4072_s1 + $0x108] sm:$0xff]  ;;  %2162 = vmatprep.subr.bf16.mxu0 %v2161_v3  ;;  %v147_v15 = vld [vmem:[%s4072_s1 + $0x198] sm:$0xff] }
   0x5   :  { %v2195_v12 = vpack.c.bf16 %v129_v10, %v128_v9  ;;  %2194 = vmatprep.subr.bf16.mxu1 %v2193_v7  ;;  %v2197_v17 = vpack.c.bf16 %v147_v15, %v146_v14  ;;  %v98_v18 = vld [vmem:[%s4072_s1 + $0x10] sm:$0xff]  ;;  %v99_v19 = vld [vmem:[%s4072_s1 + $0x18] sm:$0xff]  ;;  %v116_v23 = vld [vmem:[%s4072_s1 + $0xa0] sm:$0xff] }
   0x6   :  { %2164 = vmatpush3.bf16.msra.mxu0 %v2163_v8  ;;  %v130_v20 = vld [vmem:[%s4072_s1 + $0x110] sm:$0xff]  ;;  %v2167_v21 = vpack.c.bf16 %v99_v19, %v98_v18  ;;  %v131_v22 = vld [vmem:[%s4072_s1 + $0x118] sm:$0xff]  ;;  %v117_v24 = vld [vmem:[%s4072_s1 + $0xa8] sm:$0xff] }
   0x7   :  { %2196 = vmatpush3.bf16.msra.mxu1 %v2195_v12  ;;  %2166 = vmatprep.subr.bf16.mxu0 %v2165_v16  ;;  %v2199_v25 = vpack.c.bf16 %v131_v22, %v130_v20  ;;  %v2169_v26 = vpack.c.bf16 %v117_v24, %v116_v23  ;;  %v148_v27 = vld [vmem:[%s4072_s1 + $0x1a0] sm:$0xff]  ;;  %v149_v28 = vld [vmem:[%s4072_s1 + $0x1a8] sm:$0xff]  ;;  %v118_v35 = vld [vmem:[%s4072_s1 + $0xb0] sm:$0xff] }
   0x8   :  { %2198 = vmatprep.subr.bf16.mxu1 %v2197_v17  ;;  %v100_v29 = vld [vmem:[%s4072_s1 + $0x20] sm:$0xff]  ;;  %v2201_v30 = vpack.c.bf16 %v149_v28, %v148_v27  ;;  %v101_v31 = vld [vmem:[%s4072_s1 + $0x28] sm:$0xff]  ;;  %v119_v36 = vld [vmem:[%s4072_s1 + $0xb8] sm:$0xff] }
   0x9   :  { %v132_v32 = vld [vmem:[%s4072_s1 + $0x120] sm:$0xff]  ;;  %v133_v33 = vld [vmem:[%s4072_s1 + $0x128] sm:$0xff]  ;;  %v2171_v34 = vpack.c.bf16 %v101_v31, %v100_v29  ;;  %v150_v37 = vld [vmem:[%s4072_s1 + $0x1b0] sm:$0xff]  ;;  %v2173_v39 = vpack.c.bf16 %v119_v36, %v118_v35 }
   0xa   :  { %2168 = vmatpush3.bf16.msra.mxu0 %v2167_v21  ;;  %v2203_v38 = vpack.c.bf16 %v133_v33, %v132_v32  ;;  %v151_v40 = vld [vmem:[%s4072_s1 + $0x1b8] sm:$0xff]  ;;  %v102_v41 = vld [vmem:[%s4072_s1 + $0x30] sm:$0xff]  ;;  %v120_v46 = vld [vmem:[%s4072_s1 + $0xc0] sm:$0xff] }
   0xb   :  { %2200 = vmatpush3.bf16.msra.mxu1 %v2199_v25  ;;  %2170 = vmatprep.subr.bf16.mxu0 %v2169_v26  ;;  %v103_v42 = vld [vmem:[%s4072_s1 + $0x38] sm:$0xff]  ;;  %v2205_v43 = vpack.c.bf16 %v151_v40, %v150_v37  ;;  %v134_v44 = vld [vmem:[%s4072_s1 + $0x130] sm:$0xff]  ;;  %v121_v47 = vld [vmem:[%s4072_s1 + $0xc8] sm:$0xff] }
   0xc   :  { %2202 = vmatprep.subr.bf16.mxu1 %v2201_v30  ;;  %v135_v45 = vld [vmem:[%s4072_s1 + $0x138] sm:$0xff]  ;;  %v152_v48 = vld [vmem:[%s4072_s1 + $0x1c0] sm:$0xff]  ;;  %v153_v49 = vld [vmem:[%s4072_s1 + $0x1c8] sm:$0xff]  ;;  %v2175_v50 = vpack.c.bf16 %v103_v42, %v102_v41  ;;  %v2177_v52 = vpack.c.bf16 %v121_v47, %v120_v46 }
   0xd   :  { %v2207_v51 = vpack.c.bf16 %v135_v45, %v134_v44  ;;  %v104_v53 = vld [vmem:[%s4072_s1 + $0x40] sm:$0xff]  ;;  %v105_v54 = vld [vmem:[%s4072_s1 + $0x48] sm:$0xff]  ;;  %v2209_v56 = vpack.c.bf16 %v153_v49, %v152_v48  ;;  %v122_v58 = vld [vmem:[%s4072_s1 + $0xd0] sm:$0xff] }
   0xe   :  { %2172 = vmatpush3.bf16.msra.mxu0 %v2171_v34  ;;  %v136_v55 = vld [vmem:[%s4072_s1 + $0x140] sm:$0xff]  ;;  %v137_v57 = vld [vmem:[%s4072_s1 + $0x148] sm:$0xff]  ;;  %v123_v59 = vld [vmem:[%s4072_s1 + $0xd8] sm:$0xff]  ;;  %v2179_v62 = vpack.c.bf16 %v105_v54, %v104_v53 }
   0xf   :  { %2204 = vmatpush3.bf16.msra.mxu1 %v2203_v38  ;;  %2174 = vmatprep.subr.bf16.mxu0 %v2173_v39  ;;  %v154_v60 = vld [vmem:[%s4072_s1 + $0x1d0] sm:$0xff]  ;;  %v155_v61 = vld [vmem:[%s4072_s1 + $0x1d8] sm:$0xff]  ;;  %v2211_v63 = vpack.c.bf16 %v137_v57, %v136_v55  ;;  %v2181_v0 = vpack.c.bf16 %v123_v59, %v122_v58  ;;  %v124_v6 = vld [vmem:[%s4072_s1 + $0xe0] sm:$0xff] }
  0x10   :  { %2206 = vmatprep.subr.bf16.mxu1 %v2205_v43  ;;  %v106_v1 = vld [vmem:[%s4072_s1 + $0x50] sm:$0xff]  ;;  %v107_v2 = vld [vmem:[%s4072_s1 + $0x58] sm:$0xff]  ;;  %v2213_v4 = vpack.c.bf16 %v155_v61, %v154_v60  ;;  %v125_v7 = vld [vmem:[%s4072_s1 + $0xe8] sm:$0xff] }
  0x11   :  { %v138_v3 = vld [vmem:[%s4072_s1 + $0x150] sm:$0xff]  ;;  %v139_v5 = vld [vmem:[%s4072_s1 + $0x158] sm:$0xff]  ;;  %v156_v8 = vld [vmem:[%s4072_s1 + $0x1e0] sm:$0xff]  ;;  %v2183_v10 = vpack.c.bf16 %v107_v2, %v106_v1  ;;  %v2185_v14 = vpack.c.bf16 %v125_v7, %v124_v6 }
  0x12   :  { %2176 = vmatpush3.bf16.msra.mxu0 %v2175_v50  ;;  %v157_v9 = vld [vmem:[%s4072_s1 + $0x1e8] sm:$0xff]  ;;  %v108_v11 = vld [vmem:[%s4072_s1 + $0x60] sm:$0xff]  ;;  %v2215_v13 = vpack.c.bf16 %v139_v5, %v138_v3  ;;  %v24_v17 = vld [vmem:[%s4071_s0 + $0x18] sm:$0xff] }
  0x13   :  { %2208 = vmatpush3.bf16.msra.mxu1 %v2207_v51  ;;  %2178 = vmatprep.subr.bf16.mxu0 %v2177_v52  ;;  %v109_v12 = vld [vmem:[%s4072_s1 + $0x68] sm:$0xff]  ;;  %v140_v15 = vld [vmem:[%s4072_s1 + $0x160] sm:$0xff]  ;;  %v2217_v18 = vpack.c.bf16 %v157_v9, %v156_v8  ;;  %v126_v20 = vld [vmem:[%s4072_s1 + $0xf0] sm:$0xff] }
  0x14   :  { %2210 = vmatprep.subr.bf16.mxu1 %v2209_v56  ;;  %v22_v16 = vld [vmem:[%s4071_s0 + $0x8] sm:$0xff]  ;;  %v127_v21 = vld [vmem:[%s4072_s1 + $0xf8] sm:$0xff]  ;;  %v158_v22 = vld [vmem:[%s4072_s1 + $0x1f0] sm:$0xff]  ;;  %649 = vmatprep.mubr.f32.mxu1 %v24_v17  ;;  %v2187_v24 = vpack.c.bf16 %v109_v12, %v108_v11 }
  0x15   :  { %v141_v19 = vld [vmem:[%s4072_s1 + $0x168] sm:$0xff]  ;;  %569 = vmatprep.mubr.f32.mxu0 %v22_v16  ;;  %v159_v23 = vld [vmem:[%s4072_s1 + $0x1f8] sm:$0xff]  ;;  %v2189_v26 = vpack.c.bf16 %v127_v21, %v126_v20  ;;  %v110_v27 = vld [vmem:[%s4072_s1 + $0x70] sm:$0xff] }
  0x16   :  { %2180 = vmatpush3.bf16.msra.mxu0 %v2179_v62  ;;  %v2219_v25 = vpack.c.bf16 %v141_v19, %v140_v15  ;;  %v111_v28 = vld [vmem:[%s4072_s1 + $0x78] sm:$0xff]  ;;  %v142_v29 = vld [vmem:[%s4072_s1 + $0x170] sm:$0xff]  ;;  %v2221_v30 = vpack.c.bf16 %v159_v23, %v158_v22  ;;  %v176_v32 = vld [vmem:[%s4072_s1 + $0x280] sm:$0xff] }
  0x17   :  { %2212 = vmatpush3.bf16.msra.mxu1 %v2211_v63  ;;  %2182 = vmatprep.subr.bf16.mxu0 %v2181_v0  ;;  %v143_v31 = vld [vmem:[%s4072_s1 + $0x178] sm:$0xff]  ;;  %v177_v33 = vld [vmem:[%s4072_s1 + $0x288] sm:$0xff]  ;;  %v208_v34 = vld [vmem:[%s4072_s1 + $0x380] sm:$0xff]  ;;  %v2191_v36 = vpack.c.bf16 %v111_v28, %v110_v27 }
  0x18   :  { %2214 = vmatprep.subr.bf16.mxu1 %v2213_v4  ;;  %v209_v35 = vld [vmem:[%s4072_s1 + $0x388] sm:$0xff]  ;;  %v2223_v37 = vpack.c.bf16 %v143_v31, %v142_v29  ;;  %v2225_v38 = vpack.c.bf16 %v177_v33, %v176_v32  ;;  %v160_v39 = vld [vmem:[%s4072_s1 + $0x200] sm:$0xff]  ;;  %v178_v44 = vld [vmem:[%s4072_s1 + $0x290] sm:$0xff] }
  0x19   :  { %v161_v40 = vld [vmem:[%s4072_s1 + $0x208] sm:$0xff]  ;;  %v192_v41 = vld [vmem:[%s4072_s1 + $0x300] sm:$0xff]  ;;  %v2257_v42 = vpack.c.bf16 %v209_v35, %v208_v34  ;;  %v179_v45 = vld [vmem:[%s4072_s1 + $0x298] sm:$0xff] }
  0x1a   :  { %2184 = vmatpush3.bf16.msra.mxu0 %v2183_v10  ;;  %v193_v43 = vld [vmem:[%s4072_s1 + $0x308] sm:$0xff]  ;;  %v210_v46 = vld [vmem:[%s4072_s1 + $0x390] sm:$0xff]  ;;  %v211_v47 = vld [vmem:[%s4072_s1 + $0x398] sm:$0xff]  ;;  %v2227_v50 = vpack.c.bf16 %v161_v40, %v160_v39  ;;  %v2229_v52 = vpack.c.bf16 %v179_v45, %v178_v44 }
  0x1b   :  { %2216 = vmatpush3.bf16.msra.mxu1 %v2215_v13  ;;  %2186 = vmatprep.subr.bf16.mxu0 %v2185_v14  ;;  %v21_v48 = vld [vmem:[%s4071_s0] sm:$0xff]  ;;  %v23_v49 = vld [vmem:[%s4071_s0 + $0x10] sm:$0xff]  ;;  %v2259_v51 = vpack.c.bf16 %v193_v43, %v192_v41  ;;  %v163_v54 = vld [vmem:[%s4072_s1 + $0x218] sm:$0xff]  ;;  %v2261_v56 = vpack.c.bf16 %v211_v47, %v210_v46 }
  0x1c   :  { %2218 = vmatprep.subr.bf16.mxu1 %v2217_v18  ;;  %v162_v53 = vld [vmem:[%s4072_s1 + $0x210] sm:$0xff]  ;;  %v195_v57 = vld [vmem:[%s4072_s1 + $0x318] sm:$0xff]  ;;  %v180_v58 = vld [vmem:[%s4072_s1 + $0x2a0] sm:$0xff] }
  0x1d   :  { %v194_v55 = vld [vmem:[%s4072_s1 + $0x310] sm:$0xff]  ;;  %v181_v59 = vld [vmem:[%s4072_s1 + $0x2a8] sm:$0xff]  ;;  %v212_v60 = vld [vmem:[%s4072_s1 + $0x3a0] sm:$0xff]  ;;  %v2231_v62 = vpack.c.bf16 %v163_v54, %v162_v53 }
  0x1e   :  { %2188 = vmatpush3.bf16.msra.mxu0 %v2187_v24  ;;  %v213_v61 = vld [vmem:[%s4072_s1 + $0x3a8] sm:$0xff]  ;;  %v164_v63 = vld [vmem:[%s4072_s1 + $0x220] sm:$0xff]  ;;  %v2263_v1 = vpack.c.bf16 %v195_v57, %v194_v55  ;;  %v2233_v2 = vpack.c.bf16 %v181_v59, %v180_v58  ;;  %v47_v5 = vld [vmem:[%s4071_s0 + $0xd0] sm:$0xff] }
  0x1f   :  { %2220 = vmatpush3.bf16.msra.mxu1 %v2219_v25  ;;  %2190 = vmatprep.subr.bf16.mxu0 %v2189_v26  ;;  %v165_v0 = vld [vmem:[%s4072_s1 + $0x228] sm:$0xff]  ;;  %v196_v3 = vld [vmem:[%s4072_s1 + $0x320] sm:$0xff]  ;;  %v2265_v6 = vpack.c.bf16 %v213_v61, %v212_v60  ;;  %v182_v7 = vld [vmem:[%s4072_s1 + $0x2b0] sm:$0xff] }
  0x20   :  { %2222 = vmatprep.subr.bf16.mxu1 %v2221_v30  ;;  %v197_v4 = vld [vmem:[%s4072_s1 + $0x328] sm:$0xff]  ;;  %v183_v8 = vld [vmem:[%s4072_s1 + $0x2b8] sm:$0xff]  ;;  %v214_v9 = vld [vmem:[%s4072_s1 + $0x3b0] sm:$0xff]  ;;  %v2235_v13 = vpack.c.bf16 %v165_v0, %v164_v63 }
  0x21   :  { %v215_v10 = vld [vmem:[%s4072_s1 + $0x3b8] sm:$0xff]  ;;  %v46_v11 = vld [vmem:[%s4071_s0 + $0xc8] sm:$0xff]  ;;  %v49_v12 = vld [vmem:[%s4071_s0 + $0xe0] sm:$0xff]  ;;  %v2267_v17 = vpack.c.bf16 %v197_v4, %v196_v3  ;;  %v2237_v18 = vpack.c.bf16 %v183_v8, %v182_v7 }
  0x22   :  { %2192 = vmatpush3.bf16.msra.mxu0 %v2191_v36  ;;  %v166_v14 = vld [vmem:[%s4072_s1 + $0x230] sm:$0xff]  ;;  %v167_v15 = vld [vmem:[%s4072_s1 + $0x238] sm:$0xff]  ;;  %v2269_v22 = vpack.c.bf16 %v215_v10, %v214_v9  ;;  %v184_v23 = vld [vmem:[%s4072_s1 + $0x2c0] sm:$0xff] }
  0x23   :  { %2224 = vmatpush3.bf16.msra.mxu1 %v2223_v37  ;;  %2226 = vmatprep.subr.bf16.mxu0 %v2225_v38  ;;  %v48_v16 = vld [vmem:[%s4071_s0 + $0xd8] sm:$0xff]  ;;  %v198_v19 = vld [vmem:[%s4072_s1 + $0x330] sm:$0xff]  ;;  %v185_v24 = vld [vmem:[%s4072_s1 + $0x2c8] sm:$0xff]  ;;  %v2239_v29 = vpack.c.bf16 %v167_v15, %v166_v14 }
  0x24   :  { %2258 = vmatprep.subr.bf16.mxu1 %v2257_v42  ;;  %v199_v20 = vld [vmem:[%s4072_s1 + $0x338] sm:$0xff]  ;;  %v216_v25 = vld [vmem:[%s4072_s1 + $0x3c0] sm:$0xff]  ;;  %v217_v26 = vld [vmem:[%s4072_s1 + $0x3c8] sm:$0xff]  ;;  %v2241_v33 = vpack.c.bf16 %v185_v24, %v184_v23 }
  0x25   :  { %570 = vmatmul.mubr.f32.vlgmr.msra.gmra.mrb[0].mxu0 %v21_v48  ;;  %v72_v21 = vld [vmem:[%s4071_s0 + $0x198] sm:$0xff]  ;;  %v71_v27 = vld [vmem:[%s4071_s0 + $0x190] sm:$0xff]  ;;  %v74_v28 = vld [vmem:[%s4071_s0 + $0x1a8] sm:$0xff]  ;;  %v2271_v32 = vpack.c.bf16 %v199_v20, %v198_v19  ;;  %v2273_v37 = vpack.c.bf16 %v217_v26, %v216_v25 }
  0x26   :  { %650 = vmatmul.mubr.f32.vlgmr.msra.gmra.mrb[0].mxu1 %v23_v49  ;;  %2228 = vmatpush3.bf16.msra.mxu0 %v2227_v50  ;;  %v168_v30 = vld [vmem:[%s4072_s1 + $0x240] sm:$0xff]  ;;  %v169_v34 = vld [vmem:[%s4072_s1 + $0x248] sm:$0xff]  ;;  %v186_v38 = vld [vmem:[%s4072_s1 + $0x2d0] sm:$0xff] }
  0x27   :  { %2260 = vmatpush3.bf16.msra.mxu1 %v2259_v51  ;;  %2230 = vmatprep.subr.bf16.mxu0 %v2229_v52  ;;  %v73_v31 = vld [vmem:[%s4071_s0 + $0x1a0] sm:$0xff]  ;;  %v201_v36 = vld [vmem:[%s4072_s1 + $0x348] sm:$0xff]  ;;  %v187_v39 = vld [vmem:[%s4072_s1 + $0x2d8] sm:$0xff]  ;;  %v2243_v44 = vpack.c.bf16 %v169_v34, %v168_v30 }
  0x28   :  { %2262 = vmatprep.subr.bf16.mxu1 %v2261_v56  ;;  %574 = vmatprep.mubr.f32.mxu0 %v47_v5  ;;  %v200_v35 = vld [vmem:[%s4072_s1 + $0x340] sm:$0xff]  ;;  %v26_v40 = vld [vmem:[%s4071_s0 + $0x28] sm:$0xff]  ;;  %v218_v41 = vld [vmem:[%s4072_s1 + $0x3d0] sm:$0xff]  ;;  %v2245_v46 = vpack.c.bf16 %v187_v39, %v186_v38 }
  0x29   :  { %654 = vmatprep.mubr.f32.mxu1 %v49_v12  ;;  %575 = vmatmul.mubr.f32.gmra.mrb[2].mxu0 %v46_v11  ;;  %v219_v42 = vld [vmem:[%s4072_s1 + $0x3d8] sm:$0xff]  ;;  %v2275_v45 = vpack.c.bf16 %v201_v36, %v200_v35  ;;  %v170_v47 = vld [vmem:[%s4072_s1 + $0x250] sm:$0xff]  ;;  %v188_v52 = vld [vmem:[%s4072_s1 + $0x2e0] sm:$0xff] }
  0x2a   :  { %2232 = vmatpush3.bf16.msra.mxu0 %v2231_v62  ;;  %655 = vmatmul.mubr.f32.gmra.mrb[2].mxu1 %v48_v16  ;;  %v28_v43 = vld [vmem:[%s4071_s0 + $0x38] sm:$0xff]  ;;  %v202_v49 = vld [vmem:[%s4072_s1 + $0x350] sm:$0xff]  ;;  %v2277_v50 = vpack.c.bf16 %v219_v42, %v218_v41  ;;  %v189_v53 = vld [vmem:[%s4072_s1 + $0x2e8] sm:$0xff] }
  0x2b   :  { %2264 = vmatpush3.bf16.msra.mxu1 %v2263_v1  ;;  %2234 = vmatprep.subr.bf16.mxu0 %v2233_v2  ;;  %v171_v48 = vld [vmem:[%s4072_s1 + $0x258] sm:$0xff]  ;;  %v220_v54 = vld [vmem:[%s4072_s1 + $0x3e0] sm:$0xff]  ;;  %v221_v55 = vld [vmem:[%s4072_s1 + $0x3e8] sm:$0xff]  ;;  %v2249_v58 = vpack.c.bf16 %v189_v53, %v188_v52 }
  0x2c   :  { %2266 = vmatprep.subr.bf16.mxu1 %v2265_v6  ;;  %579 = vmatprep.mubr.f32.mxu0 %v72_v21  ;;  %v203_v51 = vld [vmem:[%s4072_s1 + $0x358] sm:$0xff]  ;;  %v2247_v56 = vpack.c.bf16 %v171_v48, %v170_v47  ;;  %v172_v59 = vld [vmem:[%s4072_s1 + $0x260] sm:$0xff]  ;;  %v173_v60 = vld [vmem:[%s4072_s1 + $0x268] sm:$0xff]  ;;  %v2281_v62 = vpack.c.bf16 %v221_v55, %v220_v54 }
  0x2d   :  { %659 = vmatprep.mubr.f32.mxu1 %v74_v28  ;;  %580 = vmatmul.mubr.f32.gmra.mrb[4].mxu0 %v71_v27  ;;  %v2279_v57 = vpack.c.bf16 %v203_v51, %v202_v49  ;;  %v204_v61 = vld [vmem:[%s4072_s1 + $0x360] sm:$0xff]  ;;  %v205_v63 = vld [vmem:[%s4072_s1 + $0x368] sm:$0xff]  ;;  %v190_v0 = vld [vmem:[%s4072_s1 + $0x2f0] sm:$0xff]  ;;  %v2251_v4 = vpack.c.bf16 %v173_v60, %v172_v59 }
  0x2e   :  { %2236 = vmatpush3.bf16.msra.mxu0 %v2235_v13  ;;  %660 = vmatmul.mubr.f32.gmra.mrb[4].mxu1 %v73_v31  ;;  %v191_v1 = vld [vmem:[%s4072_s1 + $0x2f8] sm:$0xff]  ;;  %v222_v2 = vld [vmem:[%s4072_s1 + $0x3f0] sm:$0xff]  ;;  %v2283_v5 = vpack.c.bf16 %v205_v63, %v204_v61  ;;  %v240_v12 = vld [vmem:[%s4072_s1 + $0x480] sm:$0xff] }
  0x2f   :  { %2268 = vmatpush3.bf16.msra.mxu1 %v2267_v17  ;;  %2238 = vmatprep.subr.bf16.mxu0 %v2237_v18  ;;  %v223_v3 = vld [vmem:[%s4072_s1 + $0x3f8] sm:$0xff]  ;;  %v2253_v6 = vpack.c.bf16 %v191_v1, %v190_v0  ;;  %v174_v7 = vld [vmem:[%s4072_s1 + $0x270] sm:$0xff]  ;;  %v241_v13 = vld [vmem:[%s4072_s1 + $0x488] sm:$0xff] }
  0x30   :  { %2270 = vmatprep.subr.bf16.mxu1 %v2269_v22  ;;  %729 = vmatprep.mubr.f32.mxu0 %v26_v40  ;;  %v175_v8 = vld [vmem:[%s4072_s1 + $0x278] sm:$0xff]  ;;  %v206_v9 = vld [vmem:[%s4072_s1 + $0x370] sm:$0xff]  ;;  %v2285_v10 = vpack.c.bf16 %v223_v3, %v222_v2  ;;  %v272_v14 = vld [vmem:[%s4072_s1 + $0x580] sm:$0xff]  ;;  %v2289_v18 = vpack.c.bf16 %v241_v13, %v240_v12 }
  0x31   :  { %809 = vmatprep.mubr.f32.mxu1 %v28_v43  ;;  %v207_v11 = vld [vmem:[%s4072_s1 + $0x378] sm:$0xff]  ;;  %v273_v15 = vld [vmem:[%s4072_s1 + $0x588] sm:$0xff]  ;;  %v2255_v16 = vpack.c.bf16 %v175_v8, %v174_v7  ;;  %v224_v19 = vld [vmem:[%s4072_s1 + $0x400] sm:$0xff] }
  0x32   :  { %2240 = vmatpush3.bf16.msra.mxu0 %v2239_v29  ;;  %v2287_v17 = vpack.c.bf16 %v207_v11, %v206_v9  ;;  %v225_v20 = vld [vmem:[%s4072_s1 + $0x408] sm:$0xff]  ;;  %v2321_v21 = vpack.c.bf16 %v273_v15, %v272_v14  ;;  %v256_v22 = vld [vmem:[%s4072_s1 + $0x500] sm:$0xff]  ;;  %v242_v24 = vld [vmem:[%s4072_s1 + $0x490] sm:$0xff] }
  0x33   :  { %2272 = vmatpush3.bf16.msra.mxu1 %v2271_v32  ;;  %2242 = vmatprep.subr.bf16.mxu0 %v2241_v33  ;;  %v257_v23 = vld [vmem:[%s4072_s1 + $0x508] sm:$0xff]  ;;  %v243_v25 = vld [vmem:[%s4072_s1 + $0x498] sm:$0xff]  ;;  %v274_v26 = vld [vmem:[%s4072_s1 + $0x590] sm:$0xff]  ;;  %v2291_v30 = vpack.c.bf16 %v225_v20, %v224_v19 }
  0x34   :  { %2274 = vmatprep.subr.bf16.mxu1 %v2273_v37  ;;  %v275_v27 = vld [vmem:[%s4072_s1 + $0x598] sm:$0xff]  ;;  %v25_v28 = vld [vmem:[%s4071_s0 + $0x20] sm:$0xff]  ;;  %v27_v29 = vld [vmem:[%s4071_s0 + $0x30] sm:$0xff]  ;;  %v2323_v31 = vpack.c.bf16 %v257_v23, %v256_v22  ;;  %v2293_v36 = vpack.c.bf16 %v243_v25, %v242_v24 }
  0x35   :  { %v51_v32 = vld [vmem:[%s4071_s0 + $0xf0] sm:$0xff]  ;;  %v227_v34 = vld [vmem:[%s4072_s1 + $0x418] sm:$0xff]  ;;  %v50_v35 = vld [vmem:[%s4071_s0 + $0xe8] sm:$0xff]  ;;  %v2325_v37 = vpack.c.bf16 %v275_v27, %v274_v26 }
  0x36   :  { %2244 = vmatpush3.bf16.msra.mxu0 %v2243_v44  ;;  %v226_v33 = vld [vmem:[%s4072_s1 + $0x410] sm:$0xff]  ;;  %v259_v39 = vld [vmem:[%s4072_s1 + $0x518] sm:$0xff]  ;;  %v244_v40 = vld [vmem:[%s4072_s1 + $0x4a0] sm:$0xff] }
  0x37   :  { %2276 = vmatpush3.bf16.msra.mxu1 %v2275_v45  ;;  %2246 = vmatprep.subr.bf16.mxu0 %v2245_v46  ;;  %v258_v38 = vld [vmem:[%s4072_s1 + $0x510] sm:$0xff]  ;;  %v245_v41 = vld [vmem:[%s4072_s1 + $0x4a8] sm:$0xff]  ;;  %v276_v42 = vld [vmem:[%s4072_s1 + $0x5a0] sm:$0xff]  ;;  %v2295_v45 = vpack.c.bf16 %v227_v34, %v226_v33 }
  0x38   :  { %2278 = vmatprep.subr.bf16.mxu1 %v2277_v50  ;;  %v277_v43 = vld [vmem:[%s4072_s1 + $0x5a8] sm:$0xff]  ;;  %v53_v44 = vld [vmem:[%s4071_s0 + $0x100] sm:$0xff]  ;;  %v52_v46 = vld [vmem:[%s4071_s0 + $0xf8] sm:$0xff]  ;;  %v2327_v48 = vpack.c.bf16 %v259_v39, %v258_v38  ;;  %v2297_v52 = vpack.c.bf16 %v245_v41, %v244_v40 }
  0x39   :  { %v76_v47 = vld [vmem:[%s4071_s0 + $0x1b8] sm:$0xff]  ;;  %v228_v49 = vld [vmem:[%s4072_s1 + $0x420] sm:$0xff]  ;;  %v229_v50 = vld [vmem:[%s4072_s1 + $0x428] sm:$0xff]  ;;  %v2329_v53 = vpack.c.bf16 %v277_v43, %v276_v42 }
  0x3a   :  { %2248 = vmatpush3.bf16.msra.mxu0 %v2247_v56  ;;  %v260_v51 = vld [vmem:[%s4072_s1 + $0x520] sm:$0xff]  ;;  %v261_v54 = vld [vmem:[%s4072_s1 + $0x528] sm:$0xff]  ;;  %v246_v55 = vld [vmem:[%s4072_s1 + $0x4b0] sm:$0xff]  ;;  %v2299_v61 = vpack.c.bf16 %v229_v50, %v228_v49 }
  0x3b   :  { %2280 = vmatpush3.bf16.msra.mxu1 %v2279_v57  ;;  %2250 = vmatprep.subr.bf16.mxu0 %v2249_v58  ;;  %v247_v56 = vld [vmem:[%s4072_s1 + $0x4b8] sm:$0xff]  ;;  %v278_v57 = vld [vmem:[%s4072_s1 + $0x5b0] sm:$0xff]  ;;  %v78_v60 = vld [vmem:[%s4071_s0 + $0x1c8] sm:$0xff]  ;;  %v2331_v63 = vpack.c.bf16 %v261_v54, %v260_v51 }
  0x3c   :  { %2282 = vmatprep.subr.bf16.mxu1 %v2281_v62  ;;  %v279_v58 = vld [vmem:[%s4072_s1 + $0x5b8] sm:$0xff]  ;;  %v75_v59 = vld [vmem:[%s4071_s0 + $0x1b0] sm:$0xff]  ;;  %v77_v62 = vld [vmem:[%s4071_s0 + $0x1c0] sm:$0xff]  ;;  %v2301_v0 = vpack.c.bf16 %v247_v56, %v246_v55 }
  0x3d   :  { %v230_v1 = vld [vmem:[%s4072_s1 + $0x430] sm:$0xff]  ;;  %v231_v2 = vld [vmem:[%s4072_s1 + $0x438] sm:$0xff]  ;;  %v249_v7 = vld [vmem:[%s4072_s1 + $0x4c8] sm:$0xff] }
  0x3e   :  { %2252 = vmatpush3.bf16.msra.mxu0 %v2251_v4  ;;  %v262_v3 = vld [vmem:[%s4072_s1 + $0x530] sm:$0xff]  ;;  %v2333_v4 = vpack.c.bf16 %v279_v58, %v278_v57  ;;  %v280_v8 = vld [vmem:[%s4072_s1 + $0x5c0] sm:$0xff]  ;;  %v281_v9 = vld [vmem:[%s4072_s1 + $0x5c8] sm:$0xff]  ;;  %v2303_v11 = vpack.c.bf16 %v231_v2, %v230_v1 }
  0x3f   :  { %2284 = vmatpush3.bf16.msra.mxu1 %v2283_v5  ;;  %2254 = vmatprep.subr.bf16.mxu0 %v2253_v6  ;;  %v263_v5 = vld [vmem:[%s4072_s1 + $0x538] sm:$0xff]  ;;  %v248_v6 = vld [vmem:[%s4072_s1 + $0x4c0] sm:$0xff]  ;;  %v265_v19 = vld [vmem:[%s4072_s1 + $0x548] sm:$0xff] }
  0x40   :  { %2286 = vmatprep.subr.bf16.mxu1 %v2285_v10  ;;  %v30_v10 = vld [vmem:[%s4071_s0 + $0x48] sm:$0xff]  ;;  %v32_v12 = vld [vmem:[%s4071_s0 + $0x58] sm:$0xff]  ;;  %v2335_v13 = vpack.c.bf16 %v263_v5, %v262_v3  ;;  %v2305_v14 = vpack.c.bf16 %v249_v7, %v248_v6  ;;  %v232_v15 = vld [vmem:[%s4072_s1 + $0x440] sm:$0xff] }
  0x41   :  { %v250_v20 = vld [vmem:[%s4072_s1 + $0x4d0] sm:$0xff]  ;;  %v283_v23 = vld [vmem:[%s4072_s1 + $0x5d8] sm:$0xff]  ;;  %v253_v33 = vld [vmem:[%s4072_s1 + $0x4e8] sm:$0xff] }
  0x42   :  { %2256 = vmatpush3.bf16.msra.mxu0 %v2255_v16  ;;  %v233_v16 = vld [vmem:[%s4072_s1 + $0x448] sm:$0xff]  ;;  %v282_v22 = vld [vmem:[%s4072_s1 + $0x5d0] sm:$0xff]  ;;  %v284_v34 = vld [vmem:[%s4072_s1 + $0x5e0] sm:$0xff] }
  0x43   :  { %2288 = vmatpush3.bf16.msra.mxu1 %v2287_v17  ;;  %2290 = vmatprep.subr.bf16.mxu0 %v2289_v18  ;;  %v264_v17 = vld [vmem:[%s4072_s1 + $0x540] sm:$0xff]  ;;  %v2337_v18 = vpack.c.bf16 %v281_v9, %v280_v8  ;;  %v2307_v24 = vpack.c.bf16 %v233_v16, %v232_v15  ;;  %v234_v27 = vld [vmem:[%s4072_s1 + $0x450] sm:$0xff]  ;;  %v237_v40 = vld [vmem:[%s4072_s1 + $0x468] sm:$0xff] }
  0x44   :  { %2322 = vmatprep.subr.bf16.mxu1 %v2321_v21  ;;  %v251_v21 = vld [vmem:[%s4072_s1 + $0x4d8] sm:$0xff]  ;;  %v2339_v25 = vpack.c.bf16 %v265_v19, %v264_v17  ;;  %v236_v39 = vld [vmem:[%s4072_s1 + $0x460] sm:$0xff]  ;;  %v269_v43 = vld [vmem:[%s4072_s1 + $0x568] sm:$0xff] }
  0x45   :  { %730 = vmatmul.mubr.f32.vlgmr.msra.gmra.mrb[6].mxu0 %v25_v28  ;;  %v2309_v26 = vpack.c.bf16 %v251_v21, %v250_v20  ;;  %v235_v28 = vld [vmem:[%s4072_s1 + $0x458] sm:$0xff]  ;;  %v268_v41 = vld [vmem:[%s4072_s1 + $0x560] sm:$0xff]  ;;  %v238_v51 = vld [vmem:[%s4072_s1 + $0x470] sm:$0xff] }
  0x46   :  { %810 = vmatmul.mubr.f32.vlgmr.msra.gmra.mrb[6].mxu1 %v27_v29  ;;  %2292 = vmatpush3.bf16.msra.mxu0 %v2291_v30  ;;  %v266_v29 = vld [vmem:[%s4072_s1 + $0x550] sm:$0xff]  ;;  %v2341_v30 = vpack.c.bf16 %v283_v23, %v282_v22  ;;  %v2347_v49 = vpack.c.bf16 %v269_v43, %v268_v41  ;;  %v271_v55 = vld [vmem:[%s4072_s1 + $0x578] sm:$0xff]  ;;  %v304_v56 = vld [vmem:[%s4072_s1 + $0x680] sm:$0xff] }
  0x47   :  { %2324 = vmatpush3.bf16.msra.mxu1 %v2323_v31  ;;  %734 = vmatprep.mubr.f32.mxu0 %v51_v32  ;;  %v267_v31 = vld [vmem:[%s4072_s1 + $0x558] sm:$0xff]  ;;  %v252_v32 = vld [vmem:[%s4072_s1 + $0x4e0] sm:$0xff]  ;;  %v305_v57 = vld [vmem:[%s4072_s1 + $0x688] sm:$0xff] }
  0x48   :  { %2294 = vmatprep.subr.bf16.mxu0 %v2293_v36  ;;  %2326 = vmatprep.subr.bf16.mxu1 %v2325_v37  ;;  %v2311_v36 = vpack.c.bf16 %v235_v28, %v234_v27  ;;  %v2343_v37 = vpack.c.bf16 %v267_v31, %v266_v29  ;;  %v2313_v38 = vpack.c.bf16 %v253_v33, %v252_v32  ;;  %v336_v58 = vld [vmem:[%s4072_s1 + $0x780] sm:$0xff]  ;;  %v321_v3 = vld [vmem:[%s4072_s1 + $0x708] sm:$0xff]  ;;  %v307_v5 = vld [vmem:[%s4072_s1 + $0x698] sm:$0xff] }
  0x49   :  { %735 = vmatmul.mubr.f32.gmra.mrb[8].mxu0 %v50_v35  ;;  %814 = vmatprep.mubr.f32.mxu1 %v53_v44  ;;  %v285_v35 = vld [vmem:[%s4072_s1 + $0x5e8] sm:$0xff]  ;;  %v254_v44 = vld [vmem:[%s4072_s1 + $0x4f0] sm:$0xff]  ;;  %v320_v2 = vld [vmem:[%s4072_s1 + $0x700] sm:$0xff] }
  0x4a   :  { %2296 = vmatpush3.bf16.msra.mxu0 %v2295_v45  ;;  %815 = vmatmul.mubr.f32.gmra.mrb[8].mxu1 %v52_v46  ;;  %v2345_v42 = vpack.c.bf16 %v285_v35, %v284_v34  ;;  %v255_v45 = vld [vmem:[%s4072_s1 + $0x4f8] sm:$0xff]  ;;  %v286_v46 = vld [vmem:[%s4072_s1 + $0x5f0] sm:$0xff]  ;;  %v29_v8 = vld [vmem:[%s4071_s0 + $0x40] sm:$0xff] }
  0x4b   :  { %2328 = vmatpush3.bf16.msra.mxu1 %v2327_v48  ;;  %739 = vmatprep.mubr.f32.mxu0 %v76_v47  ;;  %v287_v47 = vld [vmem:[%s4072_s1 + $0x5f8] sm:$0xff]  ;;  %v2315_v48 = vpack.c.bf16 %v237_v40, %v236_v39  ;;  %v2317_v50 = vpack.c.bf16 %v255_v45, %v254_v44  ;;  %v338_v6 = vld [vmem:[%s4072_s1 + $0x790] sm:$0xff]  ;;  %v54_v15 = vld [vmem:[%s4071_s0 + $0x108] sm:$0xff] }
  0x4c   :  { %2298 = vmatprep.subr.bf16.mxu0 %v2297_v52  ;;  %2330 = vmatprep.subr.bf16.mxu1 %v2329_v53  ;;  %v239_v52 = vld [vmem:[%s4072_s1 + $0x478] sm:$0xff]  ;;  %v270_v53 = vld [vmem:[%s4072_s1 + $0x570] sm:$0xff]  ;;  %v2349_v54 = vpack.c.bf16 %v287_v47, %v286_v46  ;;  %v308_v20 = vld [vmem:[%s4072_s1 + $0x6a0] sm:$0xff] }
  0x4d   :  { %740 = vmatmul.mubr.f32.gmra.mrb[10].mxu0 %v75_v59  ;;  %819 = vmatprep.mubr.f32.mxu1 %v78_v60  ;;  %v337_v59 = vld [vmem:[%s4072_s1 + $0x788] sm:$0xff]  ;;  %v2319_v60 = vpack.c.bf16 %v239_v52, %v238_v51  ;;  %v339_v7 = vld [vmem:[%s4072_s1 + $0x798] sm:$0xff]  ;;  %v31_v9 = vld [vmem:[%s4071_s0 + $0x50] sm:$0xff] }
  0x4e   :  { %2300 = vmatpush3.bf16.msra.mxu0 %v2299_v61  ;;  %820 = vmatmul.mubr.f32.gmra.mrb[10].mxu1 %v77_v62  ;;  %v2351_v61 = vpack.c.bf16 %v271_v55, %v270_v53  ;;  %v2353_v62 = vpack.c.bf16 %v305_v57, %v304_v56  ;;  %v2385_v1 = vpack.c.bf16 %v337_v59, %v336_v58  ;;  %v323_v19 = vld [vmem:[%s4072_s1 + $0x718] sm:$0xff]  ;;  %v309_v21 = vld [vmem:[%s4072_s1 + $0x6a8] sm:$0xff]  ;;  %v340_v22 = vld [vmem:[%s4072_s1 + $0x7a0] sm:$0xff] }
  0x4f   :  { %2332 = vmatpush3.bf16.msra.mxu1 %v2331_v63  ;;  %2302 = vmatprep.subr.bf16.mxu0 %v2301_v0  ;;  %v288_v63 = vld [vmem:[%s4072_s1 + $0x600] sm:$0xff]  ;;  %v289_v0 = vld [vmem:[%s4072_s1 + $0x608] sm:$0xff]  ;;  %v2389_v17 = vpack.c.bf16 %v339_v7, %v338_v6  ;;  %v80_v27 = vld [vmem:[%s4071_s0 + $0x1d8] sm:$0xff]  ;;  %v2361_v32 = vpack.c.bf16 %v309_v21, %v308_v20 }
  0x50   :  { %2334 = vmatprep.subr.bf16.mxu1 %v2333_v4  ;;  %889 = vmatprep.mubr.f32.mxu0 %v30_v10  ;;  %v306_v4 = vld [vmem:[%s4072_s1 + $0x690] sm:$0xff]  ;;  %v2355_v10 = vpack.c.bf16 %v289_v0, %v288_v63  ;;  %v341_v23 = vld [vmem:[%s4072_s1 + $0x7a8] sm:$0xff]  ;;  %v292_v29 = vld [vmem:[%s4072_s1 + $0x620] sm:$0xff] }
  0x51   :  { %969 = vmatprep.mubr.f32.mxu1 %v32_v12  ;;  %v55_v12 = vld [vmem:[%s4071_s0 + $0x110] sm:$0xff]  ;;  %v2357_v16 = vpack.c.bf16 %v307_v5, %v306_v4  ;;  %v324_v31 = vld [vmem:[%s4072_s1 + $0x720] sm:$0xff]  ;;  %v2393_v33 = vpack.c.bf16 %v341_v23, %v340_v22  ;;  %v325_v34 = vld [vmem:[%s4072_s1 + $0x728] sm:$0xff] }
  0x52   :  { %2304 = vmatpush3.bf16.msra.mxu0 %v2303_v11  ;;  %v2387_v11 = vpack.c.bf16 %v321_v3, %v320_v2  ;;  %v310_v35 = vld [vmem:[%s4072_s1 + $0x6b0] sm:$0xff]  ;;  %v82_v40 = vld [vmem:[%s4071_s0 + $0x1e8] sm:$0xff]  ;;  %v2395_v43 = vpack.c.bf16 %v325_v34, %v324_v31  ;;  %v295_v46 = vld [vmem:[%s4072_s1 + $0x638] sm:$0xff] }
  0x53   :  { %2336 = vmatpush3.bf16.msra.mxu1 %v2335_v13  ;;  %2306 = vmatprep.subr.bf16.mxu0 %v2305_v14  ;;  %v290_v13 = vld [vmem:[%s4072_s1 + $0x610] sm:$0xff]  ;;  %v291_v14 = vld [vmem:[%s4072_s1 + $0x618] sm:$0xff]  ;;  %v313_v51 = vld [vmem:[%s4072_s1 + $0x6c8] sm:$0xff] }
  0x54   :  { %2338 = vmatprep.subr.bf16.mxu1 %v2337_v18  ;;  %v322_v18 = vld [vmem:[%s4072_s1 + $0x710] sm:$0xff]  ;;  %v344_v52 = vld [vmem:[%s4072_s1 + $0x7c0] sm:$0xff]  ;;  %v345_v53 = vld [vmem:[%s4072_s1 + $0x7c8] sm:$0xff] }
  0x55   :  { %v2391_v28 = vpack.c.bf16 %v323_v19, %v322_v18  ;;  %v79_v39 = vld [vmem:[%s4071_s0 + $0x1d0] sm:$0xff]  ;;  %v36_v56 = vld [vmem:[%s4071_s0 + $0x78] sm:$0xff]  ;;  %v296_v59 = vld [vmem:[%s4072_s1 + $0x640] sm:$0xff] }
  0x56   :  { %2308 = vmatpush3.bf16.msra.mxu0 %v2307_v24  ;;  %v57_v24 = vld [vmem:[%s4071_s0 + $0x120] sm:$0xff]  ;;  %v294_v45 = vld [vmem:[%s4072_s1 + $0x630] sm:$0xff]  ;;  %v329_v63 = vld [vmem:[%s4072_s1 + $0x748] sm:$0xff] }
  0x57   :  { %2340 = vmatpush3.bf16.msra.mxu1 %v2339_v25  ;;  %2310 = vmatprep.subr.bf16.mxu0 %v2309_v26  ;;  %v2359_v25 = vpack.c.bf16 %v291_v14, %v290_v13  ;;  %v56_v26 = vld [vmem:[%s4071_s0 + $0x118] sm:$0xff]  ;;  %v326_v47 = vld [vmem:[%s4072_s1 + $0x730] sm:$0xff]  ;;  %v2367_v55 = vpack.c.bf16 %v295_v46, %v294_v45  ;;  %v317_v13 = vld [vmem:[%s4072_s1 + $0x6e8] sm:$0xff] }
  0x58   :  { %2342 = vmatprep.subr.bf16.mxu1 %v2341_v30  ;;  %v293_v30 = vld [vmem:[%s4072_s1 + $0x628] sm:$0xff]  ;;  %v314_v0 = vld [vmem:[%s4072_s1 + $0x6d0] sm:$0xff]  ;;  %v347_v3 = vld [vmem:[%s4072_s1 + $0x7d8] sm:$0xff] }
  0x59   :  { %v2363_v41 = vpack.c.bf16 %v293_v30, %v292_v29  ;;  %v346_v2 = vld [vmem:[%s4072_s1 + $0x7d0] sm:$0xff]  ;;  %v348_v14 = vld [vmem:[%s4072_s1 + $0x7e0] sm:$0xff]  ;;  %v301_v20 = vld [vmem:[%s4072_s1 + $0x668] sm:$0xff] }
  0x5a   :  { %2312 = vmatpush3.bf16.msra.mxu0 %v2311_v36  ;;  %v311_v36 = vld [vmem:[%s4072_s1 + $0x6b8] sm:$0xff]  ;;  %v298_v7 = vld [vmem:[%s4072_s1 + $0x650] sm:$0xff]  ;;  %v300_v19 = vld [vmem:[%s4072_s1 + $0x660] sm:$0xff] }
  0x5b   :  { %2344 = vmatpush3.bf16.msra.mxu1 %v2343_v37  ;;  %2314 = vmatprep.subr.bf16.mxu0 %v2313_v38  ;;  %v342_v37 = vld [vmem:[%s4072_s1 + $0x7b0] sm:$0xff]  ;;  %v343_v38 = vld [vmem:[%s4072_s1 + $0x7b8] sm:$0xff]  ;;  %v2365_v44 = vpack.c.bf16 %v311_v36, %v310_v35  ;;  %v332_v21 = vld [vmem:[%s4072_s1 + $0x760] sm:$0xff] }
  0x5c   :  { %2346 = vmatprep.subr.bf16.mxu1 %v2345_v42  ;;  %v81_v42 = vld [vmem:[%s4071_s0 + $0x1e0] sm:$0xff]  ;;  %v333_v23 = vld [vmem:[%s4072_s1 + $0x768] sm:$0xff]  ;;  %v302_v31 = vld [vmem:[%s4072_s1 + $0x670] sm:$0xff] }
  0x5d   :  { %v2411_v29 = vpack.c.bf16 %v333_v23, %v332_v21  ;;  %v335_v35 = vld [vmem:[%s4072_s1 + $0x778] sm:$0xff]  ;;  %v368_v36 = vld [vmem:[%s4072_s1 + $0x880] sm:$0xff] }
  0x5e   :  { %2316 = vmatpush3.bf16.msra.mxu0 %v2315_v48  ;;  %v2397_v48 = vpack.c.bf16 %v343_v38, %v342_v37  ;;  %v369_v37 = vld [vmem:[%s4072_s1 + $0x888] sm:$0xff]  ;;  %v400_v38 = vld [vmem:[%s4072_s1 + $0x980] sm:$0xff] }
  0x5f   :  { %2348 = vmatpush3.bf16.msra.mxu1 %v2347_v49  ;;  %2318 = vmatprep.subr.bf16.mxu0 %v2317_v50  ;;  %v327_v49 = vld [vmem:[%s4072_s1 + $0x738] sm:$0xff]  ;;  %v312_v50 = vld [vmem:[%s4072_s1 + $0x6c0] sm:$0xff] }
  0x60   :  { %2350 = vmatprep.subr.bf16.mxu1 %v2349_v54  ;;  %v34_v54 = vld [vmem:[%s4071_s0 + $0x68] sm:$0xff]  ;;  %v2399_v57 = vpack.c.bf16 %v327_v49, %v326_v47  ;;  %v2369_v58 = vpack.c.bf16 %v313_v51, %v312_v50  ;;  %v384_v46 = vld [vmem:[%s4072_s1 + $0x900] sm:$0xff]  ;;  %v371_v49 = vld [vmem:[%s4072_s1 + $0x898] sm:$0xff] }
  0x61   :  { %v385_v47 = vld [vmem:[%s4072_s1 + $0x908] sm:$0xff]  ;;  %v402_v50 = vld [vmem:[%s4072_s1 + $0x990] sm:$0xff]  ;;  %v403_v51 = vld [vmem:[%s4072_s1 + $0x998] sm:$0xff] }
  0x62   :  { %2320 = vmatpush3.bf16.msra.mxu0 %v2319_v60  ;;  %v297_v60 = vld [vmem:[%s4072_s1 + $0x648] sm:$0xff] }
  0x63   :  { %2352 = vmatpush3.bf16.msra.mxu1 %v2351_v61  ;;  %2354 = vmatprep.subr.bf16.mxu0 %v2353_v62  ;;  %v328_v61 = vld [vmem:[%s4072_s1 + $0x740] sm:$0xff]  ;;  %v2401_v62 = vpack.c.bf16 %v345_v53, %v344_v52  ;;  %v2371_v4 = vpack.c.bf16 %v297_v60, %v296_v59  ;;  %v35_v53 = vld [vmem:[%s4071_s0 + $0x70] sm:$0xff]  ;;  %v58_v59 = vld [vmem:[%s4071_s0 + $0x128] sm:$0xff] }
  0x64   :  { %2386 = vmatprep.subr.bf16.mxu1 %v2385_v1  ;;  %v315_v1 = vld [vmem:[%s4072_s1 + $0x6d8] sm:$0xff]  ;;  %v2403_v5 = vpack.c.bf16 %v329_v63, %v328_v61  ;;  %v33_v52 = vld [vmem:[%s4071_s0 + $0x60] sm:$0xff]  ;;  %v2453_v61 = vpack.c.bf16 %v403_v51, %v402_v50  ;;  %v362_v51 = vld [vmem:[%s4072_s1 + $0x850] sm:$0xff] }
  0x65   :  { %890 = vmatmul.mubr.f32.vlgmr.msra.gmra.mrb[12].mxu0 %v29_v8  ;;  %v2373_v6 = vpack.c.bf16 %v315_v1, %v314_v0  ;;  %v299_v8 = vld [vmem:[%s4072_s1 + $0x658] sm:$0xff]  ;;  %v372_v0 = vld [vmem:[%s4072_s1 + $0x8a0] sm:$0xff]  ;;  %v373_v1 = vld [vmem:[%s4072_s1 + $0x8a8] sm:$0xff] }
  0x66   :  { %970 = vmatmul.mubr.f32.vlgmr.msra.gmra.mrb[12].mxu1 %v31_v9  ;;  %2356 = vmatpush3.bf16.msra.mxu0 %v2355_v10  ;;  %v330_v9 = vld [vmem:[%s4072_s1 + $0x750] sm:$0xff]  ;;  %v2405_v10 = vpack.c.bf16 %v347_v3, %v346_v2  ;;  %v387_v63 = vld [vmem:[%s4072_s1 + $0x918] sm:$0xff]  ;;  %v404_v2 = vld [vmem:[%s4072_s1 + $0x9a0] sm:$0xff] }
  0x67   :  { %2388 = vmatpush3.bf16.msra.mxu1 %v2387_v11  ;;  %894 = vmatprep.mubr.f32.mxu0 %v55_v12  ;;  %v331_v11 = vld [vmem:[%s4072_s1 + $0x758] sm:$0xff]  ;;  %v316_v12 = vld [vmem:[%s4072_s1 + $0x6e0] sm:$0xff]  ;;  %v405_v3 = vld [vmem:[%s4072_s1 + $0x9a8] sm:$0xff] }
  0x68   :  { %2358 = vmatprep.subr.bf16.mxu0 %v2357_v16  ;;  %2390 = vmatprep.subr.bf16.mxu1 %v2389_v17  ;;  %v2375_v16 = vpack.c.bf16 %v299_v8, %v298_v7  ;;  %v2407_v17 = vpack.c.bf16 %v331_v11, %v330_v9  ;;  %v2377_v18 = vpack.c.bf16 %v317_v13, %v316_v12  ;;  %v84_v7 = vld [vmem:[%s4071_s0 + $0x1f8] sm:$0xff]  ;;  %v356_v9 = vld [vmem:[%s4072_s1 + $0x820] sm:$0xff] }
  0x69   :  { %895 = vmatmul.mubr.f32.gmra.mrb[14].mxu0 %v54_v15  ;;  %974 = vmatprep.mubr.f32.mxu1 %v57_v24  ;;  %v349_v15 = vld [vmem:[%s4072_s1 + $0x7e8] sm:$0xff]  ;;  %v318_v24 = vld [vmem:[%s4072_s1 + $0x6f0] sm:$0xff]  ;;  %v388_v11 = vld [vmem:[%s4072_s1 + $0x920] sm:$0xff]  ;;  %v2425_v12 = vpack.c.bf16 %v373_v1, %v372_v0  ;;  %v2457_v13 = vpack.c.bf16 %v405_v3, %v404_v2 }
  0x6a   :  { %2360 = vmatpush3.bf16.msra.mxu0 %v2359_v25  ;;  %975 = vmatmul.mubr.f32.gmra.mrb[14].mxu1 %v56_v26  ;;  %v2409_v22 = vpack.c.bf16 %v349_v15, %v348_v14  ;;  %v319_v25 = vld [vmem:[%s4072_s1 + $0x6f8] sm:$0xff]  ;;  %v350_v26 = vld [vmem:[%s4072_s1 + $0x7f0] sm:$0xff]  ;;  %v389_v14 = vld [vmem:[%s4072_s1 + $0x928] sm:$0xff] }
  0x6b   :  { %2392 = vmatpush3.bf16.msra.mxu1 %v2391_v28  ;;  %899 = vmatprep.mubr.f32.mxu0 %v80_v27  ;;  %v351_v27 = vld [vmem:[%s4072_s1 + $0x7f8] sm:$0xff]  ;;  %v2379_v28 = vpack.c.bf16 %v301_v20, %v300_v19  ;;  %v2381_v30 = vpack.c.bf16 %v319_v25, %v318_v24  ;;  %v374_v15 = vld [vmem:[%s4072_s1 + $0x8b0] sm:$0xff]  ;;  %v86_v20 = vld [vmem:[%s4071_s0 + $0x208] sm:$0xff]  ;;  %v2459_v23 = vpack.c.bf16 %v389_v14, %v388_v11 }
  0x6c   :  { %2362 = vmatprep.subr.bf16.mxu0 %v2361_v32  ;;  %2394 = vmatprep.subr.bf16.mxu1 %v2393_v33  ;;  %v303_v32 = vld [vmem:[%s4072_s1 + $0x678] sm:$0xff]  ;;  %v334_v33 = vld [vmem:[%s4072_s1 + $0x770] sm:$0xff]  ;;  %v2413_v34 = vpack.c.bf16 %v351_v27, %v350_v26  ;;  %v365_v0 = vld [vmem:[%s4072_s1 + $0x868] sm:$0xff] }
  0x6d   :  { %900 = vmatmul.mubr.f32.gmra.mrb[16].mxu0 %v79_v39  ;;  %979 = vmatprep.mubr.f32.mxu1 %v82_v40  ;;  %v401_v39 = vld [vmem:[%s4072_s1 + $0x988] sm:$0xff]  ;;  %v2383_v40 = vpack.c.bf16 %v303_v32, %v302_v31  ;;  %v83_v19 = vld [vmem:[%s4071_s0 + $0x1f0] sm:$0xff]  ;;  %v359_v26 = vld [vmem:[%s4072_s1 + $0x838] sm:$0xff] }
  0x6e   :  { %2364 = vmatpush3.bf16.msra.mxu0 %v2363_v41  ;;  %980 = vmatmul.mubr.f32.gmra.mrb[16].mxu1 %v81_v42  ;;  %v2415_v41 = vpack.c.bf16 %v335_v35, %v334_v33  ;;  %v2417_v42 = vpack.c.bf16 %v369_v37, %v368_v36  ;;  %v2449_v45 = vpack.c.bf16 %v401_v39, %v400_v38  ;;  %v358_v25 = vld [vmem:[%s4072_s1 + $0x830] sm:$0xff]  ;;  %v377_v31 = vld [vmem:[%s4072_s1 + $0x8c8] sm:$0xff]  ;;  %v408_v32 = vld [vmem:[%s4072_s1 + $0x9c0] sm:$0xff] }
  0x6f   :  { %2396 = vmatpush3.bf16.msra.mxu1 %v2395_v43  ;;  %2366 = vmatprep.subr.bf16.mxu0 %v2365_v44  ;;  %v352_v43 = vld [vmem:[%s4072_s1 + $0x800] sm:$0xff]  ;;  %v353_v44 = vld [vmem:[%s4072_s1 + $0x808] sm:$0xff]  ;;  %v390_v27 = vld [vmem:[%s4072_s1 + $0x930] sm:$0xff]  ;;  %v2431_v35 = vpack.c.bf16 %v359_v26, %v358_v25 }
  0x70   :  { %2398 = vmatprep.subr.bf16.mxu1 %v2397_v48  ;;  %1049 = vmatprep.mubr.f32.mxu0 %v34_v54  ;;  %v370_v48 = vld [vmem:[%s4072_s1 + $0x890] sm:$0xff]  ;;  %v2419_v54 = vpack.c.bf16 %v353_v44, %v352_v43  ;;  %v409_v33 = vld [vmem:[%s4072_s1 + $0x9c8] sm:$0xff]  ;;  %v40_v36 = vld [vmem:[%s4071_s0 + $0x98] sm:$0xff] }
  0x71   :  { %1129 = vmatprep.mubr.f32.mxu1 %v36_v56  ;;  %v59_v56 = vld [vmem:[%s4071_s0 + $0x130] sm:$0xff]  ;;  %v2421_v60 = vpack.c.bf16 %v371_v49, %v370_v48  ;;  %v360_v39 = vld [vmem:[%s4072_s1 + $0x840] sm:$0xff]  ;;  %v393_v43 = vld [vmem:[%s4072_s1 + $0x948] sm:$0xff] }
  0x72   :  { %2368 = vmatpush3.bf16.msra.mxu0 %v2367_v55  ;;  %v2451_v55 = vpack.c.bf16 %v385_v47, %v384_v46  ;;  %v378_v44 = vld [vmem:[%s4072_s1 + $0x8d0] sm:$0xff]  ;;  %v411_v47 = vld [vmem:[%s4072_s1 + $0x9d8] sm:$0xff]  ;;  %v396_v1 = vld [vmem:[%s4072_s1 + $0x960] sm:$0xff] }
  0x73   :  { %2400 = vmatpush3.bf16.msra.mxu1 %v2399_v57  ;;  %2370 = vmatprep.subr.bf16.mxu0 %v2369_v58  ;;  %v354_v57 = vld [vmem:[%s4072_s1 + $0x810] sm:$0xff]  ;;  %v355_v58 = vld [vmem:[%s4072_s1 + $0x818] sm:$0xff]  ;;  %v397_v3 = vld [vmem:[%s4072_s1 + $0x968] sm:$0xff] }
  0x74   :  { %2402 = vmatprep.subr.bf16.mxu1 %v2401_v62  ;;  %v386_v62 = vld [vmem:[%s4072_s1 + $0x910] sm:$0xff] }
  0x75   :  { %v2455_v8 = vpack.c.bf16 %v387_v63, %v386_v62  ;;  %v410_v46 = vld [vmem:[%s4072_s1 + $0x9d0] sm:$0xff]  ;;  %v364_v63 = vld [vmem:[%s4072_s1 + $0x860] sm:$0xff] }
  0x76   :  { %2372 = vmatpush3.bf16.msra.mxu0 %v2371_v4  ;;  %v61_v4 = vld [vmem:[%s4071_s0 + $0x140] sm:$0xff]  ;;  %v366_v11 = vld [vmem:[%s4072_s1 + $0x870] sm:$0xff] }
  0x77   :  { %2404 = vmatpush3.bf16.msra.mxu1 %v2403_v5  ;;  %2374 = vmatprep.subr.bf16.mxu0 %v2373_v6  ;;  %v2423_v5 = vpack.c.bf16 %v355_v58, %v354_v57  ;;  %v60_v6 = vld [vmem:[%s4071_s0 + $0x138] sm:$0xff]  ;;  %v381_v57 = vld [vmem:[%s4072_s1 + $0x8e8] sm:$0xff]  ;;  %v412_v58 = vld [vmem:[%s4072_s1 + $0x9e0] sm:$0xff] }
  0x78   :  { %2406 = vmatprep.subr.bf16.mxu1 %v2405_v10  ;;  %v357_v10 = vld [vmem:[%s4072_s1 + $0x828] sm:$0xff] }
  0x79   :  { %v2427_v21 = vpack.c.bf16 %v357_v10, %v356_v9  ;;  %v2475_v9 = vpack.c.bf16 %v397_v3, %v396_v1 }
  0x7a   :  { %2376 = vmatpush3.bf16.msra.mxu0 %v2375_v16  ;;  %v375_v16 = vld [vmem:[%s4072_s1 + $0x8b8] sm:$0xff] }
  0x7b   :  { %2408 = vmatpush3.bf16.msra.mxu1 %v2407_v17  ;;  %2378 = vmatprep.subr.bf16.mxu0 %v2377_v18  ;;  %v406_v17 = vld [vmem:[%s4072_s1 + $0x9b0] sm:$0xff]  ;;  %v407_v18 = vld [vmem:[%s4072_s1 + $0x9b8] sm:$0xff]  ;;  %v2429_v24 = vpack.c.bf16 %v375_v16, %v374_v15  ;;  %v432_v16 = vld [vmem:[%s4072_s1 + $0xa80] sm:$0xff] }
  0x7c   :  { %2410 = vmatprep.subr.bf16.mxu1 %v2409_v22  ;;  %v85_v22 = vld [vmem:[%s4071_s0 + $0x200] sm:$0xff]  ;;  %v399_v15 = vld [vmem:[%s4072_s1 + $0x978] sm:$0xff] }
  0x7e   :  { %2380 = vmatpush3.bf16.msra.mxu0 %v2379_v28  ;;  %v2461_v28 = vpack.c.bf16 %v407_v18, %v406_v17  ;;  %v433_v17 = vld [vmem:[%s4072_s1 + $0xa88] sm:$0xff]  ;;  %v464_v18 = vld [vmem:[%s4072_s1 + $0xb80] sm:$0xff] }
  0x7f   :  { %2412 = vmatpush3.bf16.msra.mxu1 %v2411_v29  ;;  %2382 = vmatprep.subr.bf16.mxu0 %v2381_v30  ;;  %v391_v29 = vld [vmem:[%s4072_s1 + $0x938] sm:$0xff]  ;;  %v376_v30 = vld [vmem:[%s4072_s1 + $0x8c0] sm:$0xff] }
  0x80   :  { %2414 = vmatprep.subr.bf16.mxu1 %v2413_v34  ;;  %v38_v34 = vld [vmem:[%s4071_s0 + $0x88] sm:$0xff]  ;;  %v2463_v37 = vpack.c.bf16 %v391_v29, %v390_v27  ;;  %v2433_v38 = vpack.c.bf16 %v377_v31, %v376_v30 }
  0x82   :  { %2384 = vmatpush3.bf16.msra.mxu0 %v2383_v40  ;;  %v361_v40 = vld [vmem:[%s4072_s1 + $0x848] sm:$0xff] }
  0x83   :  { %2416 = vmatpush3.bf16.msra.mxu1 %v2415_v41  ;;  %2418 = vmatprep.subr.bf16.mxu0 %v2417_v42  ;;  %v392_v41 = vld [vmem:[%s4072_s1 + $0x940] sm:$0xff]  ;;  %v2465_v42 = vpack.c.bf16 %v409_v33, %v408_v32  ;;  %v2435_v48 = vpack.c.bf16 %v361_v40, %v360_v39 }
  0x84   :  { %2450 = vmatprep.subr.bf16.mxu1 %v2449_v45  ;;  %v379_v45 = vld [vmem:[%s4072_s1 + $0x8d8] sm:$0xff]  ;;  %v2467_v49 = vpack.c.bf16 %v393_v43, %v392_v41 }
  0x85   :  { %1050 = vmatmul.mubr.f32.vlgmr.msra.gmra.mrb[18].mxu0 %v33_v52  ;;  %v2437_v50 = vpack.c.bf16 %v379_v45, %v378_v44  ;;  %v363_v52 = vld [vmem:[%s4072_s1 + $0x858] sm:$0xff] }
  0x86   :  { %1130 = vmatmul.mubr.f32.vlgmr.msra.gmra.mrb[18].mxu1 %v35_v53  ;;  %2420 = vmatpush3.bf16.msra.mxu0 %v2419_v54  ;;  %v394_v53 = vld [vmem:[%s4072_s1 + $0x950] sm:$0xff]  ;;  %v2469_v54 = vpack.c.bf16 %v411_v47, %v410_v46 }
  0x87   :  { %2452 = vmatpush3.bf16.msra.mxu1 %v2451_v55  ;;  %1054 = vmatprep.mubr.f32.mxu0 %v59_v56  ;;  %v395_v55 = vld [vmem:[%s4072_s1 + $0x958] sm:$0xff]  ;;  %v380_v56 = vld [vmem:[%s4072_s1 + $0x8e0] sm:$0xff] }
  0x88   :  { %2422 = vmatprep.subr.bf16.mxu0 %v2421_v60  ;;  %2454 = vmatprep.subr.bf16.mxu1 %v2453_v61  ;;  %v2439_v60 = vpack.c.bf16 %v363_v52, %v362_v51  ;;  %v2471_v61 = vpack.c.bf16 %v395_v55, %v394_v53  ;;  %v2441_v62 = vpack.c.bf16 %v381_v57, %v380_v56 }
  0x89   :  { %1055 = vmatmul.mubr.f32.gmra.mrb[20].mxu0 %v58_v59  ;;  %1134 = vmatprep.mubr.f32.mxu1 %v61_v4  ;;  %v413_v59 = vld [vmem:[%s4072_s1 + $0x9e8] sm:$0xff]  ;;  %v382_v4 = vld [vmem:[%s4072_s1 + $0x8f0] sm:$0xff] }
  0x8a   :  { %2424 = vmatpush3.bf16.msra.mxu0 %v2423_v5  ;;  %1135 = vmatmul.mubr.f32.gmra.mrb[20].mxu1 %v60_v6  ;;  %v2473_v2 = vpack.c.bf16 %v413_v59, %v412_v58  ;;  %v383_v5 = vld [vmem:[%s4072_s1 + $0x8f8] sm:$0xff]  ;;  %v414_v6 = vld [vmem:[%s4072_s1 + $0x9f0] sm:$0xff] }
  0x8b   :  { %2456 = vmatpush3.bf16.msra.mxu1 %v2455_v8  ;;  %1059 = vmatprep.mubr.f32.mxu0 %v84_v7  ;;  %v415_v7 = vld [vmem:[%s4072_s1 + $0x9f8] sm:$0xff]  ;;  %v2443_v8 = vpack.c.bf16 %v365_v0, %v364_v63  ;;  %v2445_v10 = vpack.c.bf16 %v383_v5, %v382_v4 }
  0x8c   :  { %2426 = vmatprep.subr.bf16.mxu0 %v2425_v12  ;;  %2458 = vmatprep.subr.bf16.mxu1 %v2457_v13  ;;  %v367_v12 = vld [vmem:[%s4072_s1 + $0x878] sm:$0xff]  ;;  %v398_v13 = vld [vmem:[%s4072_s1 + $0x970] sm:$0xff]  ;;  %v2477_v14 = vpack.c.bf16 %v415_v7, %v414_v6 }
  0x8d   :  { %1060 = vmatmul.mubr.f32.gmra.mrb[22].mxu0 %v83_v19  ;;  %1139 = vmatprep.mubr.f32.mxu1 %v86_v20  ;;  %v465_v19 = vld [vmem:[%s4072_s1 + $0xb88] sm:$0xff]  ;;  %v2447_v20 = vpack.c.bf16 %v367_v12, %v366_v11 }
  0x8e   :  { %2428 = vmatpush3.bf16.msra.mxu0 %v2427_v21  ;;  %1140 = vmatmul.mubr.f32.gmra.mrb[22].mxu1 %v85_v22 }
  0x8f   :  { %2460 = vmatpush3.bf16.msra.mxu1 %v2459_v23  ;;  %2430 = vmatprep.subr.bf16.mxu0 %v2429_v24 }
  0x90   :  { %2462 = vmatprep.subr.bf16.mxu1 %v2461_v28  ;;  %1209 = vmatprep.mubr.f32.mxu0 %v38_v34 }
  0x91   :  { %1289 = vmatprep.mubr.f32.mxu1 %v40_v36 }
  0x92   :  { %2432 = vmatpush3.bf16.msra.mxu0 %v2431_v35 }
  0x93   :  { %2464 = vmatpush3.bf16.msra.mxu1 %v2463_v37  ;;  %2434 = vmatprep.subr.bf16.mxu0 %v2433_v38 }
  0x94   :  { %2466 = vmatprep.subr.bf16.mxu1 %v2465_v42 }
  0x96   :  { %2436 = vmatpush3.bf16.msra.mxu0 %v2435_v48 }
  0x97   :  { %2468 = vmatpush3.bf16.msra.mxu1 %v2467_v49  ;;  %2438 = vmatprep.subr.bf16.mxu0 %v2437_v50 }
  0x98   :  { %2470 = vmatprep.subr.bf16.mxu1 %v2469_v54 }
  0x9a   :  { %2440 = vmatpush3.bf16.msra.mxu0 %v2439_v60 }
  0x9b   :  { %2472 = vmatpush3.bf16.msra.mxu1 %v2471_v61  ;;  %2442 = vmatprep.subr.bf16.mxu0 %v2441_v62 }
  0x9c   :  { %2474 = vmatprep.subr.bf16.mxu1 %v2473_v2 }
  0x9e   :  { %2444 = vmatpush3.bf16.msra.mxu0 %v2443_v8 }
  0x9f   :  { %10 = vsyncpa [#allocation3], 0  ;;  %2476 = vmatpush3.bf16.msra.mxu1 %v2475_v9  ;;  %2446 = vmatprep.subr.bf16.mxu0 %v2445_v10  ;;  %v2479_v21 = vpack.c.bf16 %v399_v15, %v398_v13  ;;  %v2481_v22 = vpack.c.bf16 %v433_v17, %v432_v16  ;;  %v416_v23 = vld [vmem:[%s4072_s1 + $0xa00] sm:$0xff]  ;;  %v417_v24 = vld [vmem:[%s4072_s1 + $0xa08] sm:$0xff]  ;;  %v2513_v25 = vpack.c.bf16 %v465_v19, %v464_v18  ;;  %vm2602_vm0 = vmmov 0   ;;  %s2604_s30 = smov [#allocation2]  }
  0xa0   :  { %2478 = vmatprep.subr.bf16.mxu1 %v2477_v14  ;;  %v448_v26 = vld [vmem:[%s4072_s1 + $0xb00] sm:$0xff]  ;;  %v449_v27 = vld [vmem:[%s4072_s1 + $0xb08] sm:$0xff]  ;;  %v434_v28 = vld [vmem:[%s4072_s1 + $0xa90] sm:$0xff]  ;;  %v2483_v34 = vpack.c.bf16 %v417_v24, %v416_v23  ;;  %vm495_vm1 = vcmask 523264   ;;  %s1616_s6 = sshll.u32 %s2604_s30, 4  ;;  %s1617_s6 = int_to_ptr.vmem [resolvable:$true] %s1616_s6 }
  0xa1   :  { %v435_v29 = vld [vmem:[%s4072_s1 + $0xa98] sm:$0xff]  ;;  %v466_v30 = vld [vmem:[%s4072_s1 + $0xb90] sm:$0xff]  ;;  %v37_v32 = vld [vmem:[%s4071_s0 + $0x80] sm:$0xff]  ;;  %v2515_v35 = vpack.c.bf16 %v449_v27, %v448_v26  ;;  %p2582_p1 = scmp.lt.s32.totalorder %s1617_s6, %s1617_s6 }
  0xa2   :  { %v467_v31 = vld [vmem:[%s4072_s1 + $0xb98] sm:$0xff]  ;;  %2448 = vmatpush3.bf16.msra.mxu0 %v2447_v20  ;;  %v39_v33 = vld [vmem:[%s4071_s0 + $0x90] sm:$0xff]  ;;  %v62_v39 = vld [vmem:[%s4071_s0 + $0x148] sm:$0xff]  ;;  %v2485_v40 = vpack.c.bf16 %v435_v29, %v434_v28 }
  0xa3   :  { %2480 = vmatpush3.bf16.msra.mxu1 %v2479_v21  ;;  %2482 = vmatprep.subr.bf16.mxu0 %v2481_v22  ;;  %v63_v36 = vld [vmem:[%s4071_s0 + $0x150] sm:$0xff]  ;;  %v419_v38 = vld [vmem:[%s4072_s1 + $0xa18] sm:$0xff]  ;;  %v2517_v41 = vpack.c.bf16 %v467_v31, %v466_v30  ;;  %v436_v44 = vld [vmem:[%s4072_s1 + $0xaa0] sm:$0xff] }
  0xa4   :  { %v418_v37 = vld [vmem:[%s4072_s1 + $0xa10] sm:$0xff]  ;;  %2514 = vmatprep.subr.bf16.mxu1 %v2513_v25  ;;  %v451_v43 = vld [vmem:[%s4072_s1 + $0xb18] sm:$0xff]  ;;  %v437_v45 = vld [vmem:[%s4072_s1 + $0xaa8] sm:$0xff] }
  0xa5   :  { %v450_v42 = vld [vmem:[%s4072_s1 + $0xb10] sm:$0xff]  ;;  %1210 = vmatmul.mubr.f32.vlgmr.msra.gmra.mrb[24].mxu0 %v37_v32  ;;  %v468_v46 = vld [vmem:[%s4072_s1 + $0xba0] sm:$0xff]  ;;  %v469_v47 = vld [vmem:[%s4072_s1 + $0xba8] sm:$0xff]  ;;  %v2487_v49 = vpack.c.bf16 %v419_v38, %v418_v37  ;;  %v2489_v56 = vpack.c.bf16 %v437_v45, %v436_v44 }
  0xa6   :  { %1290 = vmatmul.mubr.f32.vlgmr.msra.gmra.mrb[24].mxu1 %v39_v33  ;;  %2484 = vmatpush3.bf16.msra.mxu0 %v2483_v34  ;;  %v65_v48 = vld [vmem:[%s4071_s0 + $0x160] sm:$0xff]  ;;  %v64_v50 = vld [vmem:[%s4071_s0 + $0x158] sm:$0xff]  ;;  %v2519_v52 = vpack.c.bf16 %v451_v43, %v450_v42  ;;  %v421_v54 = vld [vmem:[%s4072_s1 + $0xa28] sm:$0xff]  ;;  %v2521_v57 = vpack.c.bf16 %v469_v47, %v468_v46 }
  0xa7   :  { %v88_v51 = vld [vmem:[%s4071_s0 + $0x218] sm:$0xff]  ;;  %2516 = vmatpush3.bf16.msra.mxu1 %v2515_v35  ;;  %1214 = vmatprep.mubr.f32.mxu0 %v63_v36  ;;  %v420_v53 = vld [vmem:[%s4072_s1 + $0xa20] sm:$0xff]  ;;  %v453_v58 = vld [vmem:[%s4072_s1 + $0xb28] sm:$0xff] }
  0xa8   :  { %v452_v55 = vld [vmem:[%s4072_s1 + $0xb20] sm:$0xff]  ;;  %2486 = vmatprep.subr.bf16.mxu0 %v2485_v40  ;;  %2518 = vmatprep.subr.bf16.mxu1 %v2517_v41  ;;  %v438_v59 = vld [vmem:[%s4072_s1 + $0xab0] sm:$0xff]  ;;  %v439_v60 = vld [vmem:[%s4072_s1 + $0xab8] sm:$0xff]  ;;  %v2491_v1 = vpack.c.bf16 %v421_v54, %v420_v53 }
  0xa9   :  { %1215 = vmatmul.mubr.f32.gmra.mrb[26].mxu0 %v62_v39  ;;  %1294 = vmatprep.mubr.f32.mxu1 %v65_v48  ;;  %v470_v61 = vld [vmem:[%s4072_s1 + $0xbb0] sm:$0xff]  ;;  %v471_v62 = vld [vmem:[%s4072_s1 + $0xbb8] sm:$0xff]  ;;  %v90_v0 = vld [vmem:[%s4071_s0 + $0x228] sm:$0xff]  ;;  %v2523_v3 = vpack.c.bf16 %v453_v58, %v452_v55  ;;  %v2493_v4 = vpack.c.bf16 %v439_v60, %v438_v59 }
  0xaa   :  { %2488 = vmatpush3.bf16.msra.mxu0 %v2487_v49  ;;  %1295 = vmatmul.mubr.f32.gmra.mrb[26].mxu1 %v64_v50  ;;  %v87_v63 = vld [vmem:[%s4071_s0 + $0x210] sm:$0xff]  ;;  %v89_v2 = vld [vmem:[%s4071_s0 + $0x220] sm:$0xff]  ;;  %v423_v6 = vld [vmem:[%s4072_s1 + $0xa38] sm:$0xff]  ;;  %v2525_v8 = vpack.c.bf16 %v471_v62, %v470_v61 }
  0xab   :  { %2520 = vmatpush3.bf16.msra.mxu1 %v2519_v52  ;;  %1219 = vmatprep.mubr.f32.mxu0 %v88_v51  ;;  %v422_v5 = vld [vmem:[%s4072_s1 + $0xa30] sm:$0xff]  ;;  %v455_v9 = vld [vmem:[%s4072_s1 + $0xb38] sm:$0xff]  ;;  %v440_v10 = vld [vmem:[%s4072_s1 + $0xac0] sm:$0xff] }
  0xac   :  { %v454_v7 = vld [vmem:[%s4072_s1 + $0xb30] sm:$0xff]  ;;  %2490 = vmatprep.subr.bf16.mxu0 %v2489_v56  ;;  %2522 = vmatprep.subr.bf16.mxu1 %v2521_v57  ;;  %v441_v11 = vld [vmem:[%s4072_s1 + $0xac8] sm:$0xff]  ;;  %v472_v12 = vld [vmem:[%s4072_s1 + $0xbc0] sm:$0xff]  ;;  %v2495_v15 = vpack.c.bf16 %v423_v6, %v422_v5 }
  0xad   :  { %1220 = vmatmul.mubr.f32.gmra.mrb[28].mxu0 %v87_v63  ;;  %1299 = vmatprep.mubr.f32.mxu1 %v90_v0  ;;  %v473_v13 = vld [vmem:[%s4072_s1 + $0xbc8] sm:$0xff]  ;;  %v44_v16 = vld [vmem:[%s4071_s0 + $0xb8] sm:$0xff]  ;;  %v2527_v17 = vpack.c.bf16 %v455_v9, %v454_v7  ;;  %v2497_v18 = vpack.c.bf16 %v441_v11, %v440_v10  ;;  %v424_v19 = vld [vmem:[%s4072_s1 + $0xa40] sm:$0xff] }
  0xae   :  { %v42_v14 = vld [vmem:[%s4071_s0 + $0xa8] sm:$0xff]  ;;  %2492 = vmatpush3.bf16.msra.mxu0 %v2491_v1  ;;  %1300 = vmatmul.mubr.f32.gmra.mrb[28].mxu1 %v89_v2  ;;  %v456_v21 = vld [vmem:[%s4072_s1 + $0xb40] sm:$0xff]  ;;  %v2529_v22 = vpack.c.bf16 %v473_v13, %v472_v12  ;;  %v442_v24 = vld [vmem:[%s4072_s1 + $0xad0] sm:$0xff] }
  0xaf   :  { %2524 = vmatpush3.bf16.msra.mxu1 %v2523_v3  ;;  %2494 = vmatprep.subr.bf16.mxu0 %v2493_v4  ;;  %v425_v20 = vld [vmem:[%s4072_s1 + $0xa48] sm:$0xff]  ;;  %v443_v25 = vld [vmem:[%s4072_s1 + $0xad8] sm:$0xff]  ;;  %v474_v26 = vld [vmem:[%s4072_s1 + $0xbd0] sm:$0xff]  ;;  %v2601_v3 = vmov 0.0|0.0  }
  0xb0   :  { %2526 = vmatprep.subr.bf16.mxu1 %v2525_v8  ;;  %v457_v23 = vld [vmem:[%s4072_s1 + $0xb48] sm:$0xff]  ;;  %1369 = vmatprep.mubr.f32.mxu0 %v42_v14  ;;  %v475_v27 = vld [vmem:[%s4072_s1 + $0xbd8] sm:$0xff]  ;;  %v2499_v28 = vpack.c.bf16 %v425_v20, %v424_v19  ;;  %v2501_v30 = vpack.c.bf16 %v443_v25, %v442_v24  ;;  %v426_v31 = vld [vmem:[%s4072_s1 + $0xa50] sm:$0xff] }
  0xb1   :  { %1449 = vmatprep.mubr.f32.mxu1 %v44_v16  ;;  %v2531_v29 = vpack.c.bf16 %v457_v23, %v456_v21  ;;  %v427_v32 = vld [vmem:[%s4072_s1 + $0xa58] sm:$0xff]  ;;  %v458_v33 = vld [vmem:[%s4072_s1 + $0xb50] sm:$0xff]  ;;  %v2533_v34 = vpack.c.bf16 %v475_v27, %v474_v26  ;;  %v444_v36 = vld [vmem:[%s4072_s1 + $0xae0] sm:$0xff]  ;;  %v2603_v21 = vmov 0.0  }
  0xb2   :  { %2496 = vmatpush3.bf16.msra.mxu0 %v2495_v15  ;;  %v459_v35 = vld [vmem:[%s4072_s1 + $0xb58] sm:$0xff]  ;;  %v445_v37 = vld [vmem:[%s4072_s1 + $0xae8] sm:$0xff]  ;;  %v476_v38 = vld [vmem:[%s4072_s1 + $0xbe0] sm:$0xff]  ;;  %v2503_v40 = vpack.c.bf16 %v427_v32, %v426_v31 }
  0xb3   :  { %2528 = vmatpush3.bf16.msra.mxu1 %v2527_v17  ;;  %2498 = vmatprep.subr.bf16.mxu0 %v2497_v18  ;;  %v477_v39 = vld [vmem:[%s4072_s1 + $0xbe8] sm:$0xff]  ;;  %v2535_v41 = vpack.c.bf16 %v459_v35, %v458_v33  ;;  %v2505_v42 = vpack.c.bf16 %v445_v37, %v444_v36  ;;  %v428_v43 = vld [vmem:[%s4072_s1 + $0xa60] sm:$0xff]  ;;  %v446_v48 = vld [vmem:[%s4072_s1 + $0xaf0] sm:$0xff] }
  0xb4   :  { %2530 = vmatprep.subr.bf16.mxu1 %v2529_v22  ;;  %v429_v44 = vld [vmem:[%s4072_s1 + $0xa68] sm:$0xff]  ;;  %v460_v45 = vld [vmem:[%s4072_s1 + $0xb60] sm:$0xff]  ;;  %v2537_v46 = vpack.c.bf16 %v477_v39, %v476_v38  ;;  %v447_v49 = vld [vmem:[%s4072_s1 + $0xaf8] sm:$0xff] }
  0xb5   :  { %v461_v47 = vld [vmem:[%s4072_s1 + $0xb68] sm:$0xff]  ;;  %v478_v50 = vld [vmem:[%s4072_s1 + $0xbf0] sm:$0xff]  ;;  %v479_v51 = vld [vmem:[%s4072_s1 + $0xbf8] sm:$0xff]  ;;  %v2507_v52 = vpack.c.bf16 %v429_v44, %v428_v43  ;;  %v2509_v54 = vpack.c.bf16 %v447_v49, %v446_v48 }
  0xb6   :  { %2500 = vmatpush3.bf16.msra.mxu0 %v2499_v28  ;;  %v2539_v53 = vpack.c.bf16 %v461_v47, %v460_v45  ;;  %v430_v55 = vld [vmem:[%s4072_s1 + $0xa70] sm:$0xff]  ;;  %v431_v56 = vld [vmem:[%s4072_s1 + $0xa78] sm:$0xff]  ;;  %v2541_v57 = vpack.c.bf16 %v479_v51, %v478_v50  ;;  %v480_v62 = vld [vmem:[%s4072_s1 + $0xc00] sm:$0xff] }
  0xb7   :  { %2532 = vmatpush3.bf16.msra.mxu1 %v2531_v29  ;;  %2502 = vmatprep.subr.bf16.mxu0 %v2501_v30  ;;  %v462_v58 = vld [vmem:[%s4072_s1 + $0xb70] sm:$0xff]  ;;  %v463_v59 = vld [vmem:[%s4072_s1 + $0xb78] sm:$0xff]  ;;  %v2511_v60 = vpack.c.bf16 %v431_v56, %v430_v55  ;;  %v481_v63 = vld [vmem:[%s4072_s1 + $0xc08] sm:$0xff] }
  0xb8   :  { %2534 = vmatprep.subr.bf16.mxu1 %v2533_v34  ;;  %v2543_v61 = vpack.c.bf16 %v463_v59, %v462_v58  ;;  %v41_v0 = vld [vmem:[%s4071_s0 + $0xa0] sm:$0xff]  ;;  %v2546_v1 = vpack.c.bf16 %v481_v63, %v480_v62  ;;  %v43_v2 = vld [vmem:[%s4071_s0 + $0xb0] sm:$0xff]  ;;  %v483_v5 = vld [vmem:[%s4072_s1 + $0xc18] sm:$0xff] }
  0xb9   :  { %v482_v4 = vld [vmem:[%s4072_s1 + $0xc10] sm:$0xff]  ;;  %v66_v7 = vld [vmem:[%s4071_s0 + $0x168] sm:$0xff]  ;;  %v69_v8 = vld [vmem:[%s4071_s0 + $0x180] sm:$0xff] }
  0xba   :  { %2504 = vmatpush3.bf16.msra.mxu0 %v2503_v40  ;;  %v67_v6 = vld [vmem:[%s4071_s0 + $0x170] sm:$0xff]  ;;  %v2549_v9 = vpack.c.bf16 %v483_v5, %v482_v4  ;;  %v68_v10 = vld [vmem:[%s4071_s0 + $0x178] sm:$0xff]  ;;  %v484_v11 = vld [vmem:[%s4072_s1 + $0xc20] sm:$0xff] }
  0xbb   :  { %2536 = vmatpush3.bf16.msra.mxu1 %v2535_v41  ;;  %2506 = vmatprep.subr.bf16.mxu0 %v2505_v42  ;;  %v485_v12 = vld [vmem:[%s4072_s1 + $0xc28] sm:$0xff]  ;;  %v92_v13 = vld [vmem:[%s4071_s0 + $0x238] sm:$0xff]  ;;  %v91_v14 = vld [vmem:[%s4071_s0 + $0x230] sm:$0xff] }
  0xbc   :  { %2538 = vmatprep.subr.bf16.mxu1 %v2537_v46  ;;  %v94_v15 = vld [vmem:[%s4071_s0 + $0x248] sm:$0xff]  ;;  %v2552_v16 = vpack.c.bf16 %v485_v12, %v484_v11  ;;  %v93_v17 = vld [vmem:[%s4071_s0 + $0x240] sm:$0xff]  ;;  %v486_v18 = vld [vmem:[%s4072_s1 + $0xc30] sm:$0xff] }
  0xbd   :  { %v487_v19 = vld [vmem:[%s4072_s1 + $0xc38] sm:$0xff]  ;;  %v45_v22 = vld [vmem:[%s4071_s0 + $0xc0] sm:$0xff]  ;;  %v70_v23 = vld [vmem:[%s4071_s0 + $0x188] sm:$0xff] }
  0xbe   :  { %2508 = vmatpush3.bf16.msra.mxu0 %v2507_v52  ;;  %v2555_v20 = vpack.c.bf16 %v487_v19, %v486_v18  ;;  %v95_v24 = vld [vmem:[%s4071_s0 + $0x250] sm:$0xff]  ;;  %v1627_v27 = vld [vmem:[%s4073_s2] ss:$0 sm:$0xff] }
  0xbf   :  { %2540 = vmatpush3.bf16.msra.mxu1 %v2539_v53  ;;  %2510 = vmatprep.subr.bf16.mxu0 %v2509_v54 }
  0xc0   :  { %2542 = vmatprep.subr.bf16.mxu1 %v2541_v57 }
  0xc2   :  { %2512 = vmatpush3.bf16.msra.mxu0 %v2511_v60 }
  0xc3   :  { %2544 = vmatpush3.bf16.msra.mxu1 %v2543_v61  ;;  %2545 = vmatprep.subr.bf16.mxu0 %v2601_v3 }
  0xc4   :  { %2557 = vmatprep.subr.bf16.mxu1 %v2601_v3 }
  0xc5   :  { %1370 = vmatmul.mubr.f32.vlgmr.msra.gmra.mrb[30].mxu0 %v41_v0 }
  0xc6   :  { %1450 = vmatmul.mubr.f32.vlgmr.msra.gmra.mrb[30].mxu1 %v43_v2  ;;  %2547 = vmatpush3.bf16.msra.mxu0 %v2546_v1 }
  0xc7   :  { %2561 = vmatpush3.bf16.msra.mxu1 %v2546_v1  ;;  %1374 = vmatprep.mubr.f32.mxu0 %v67_v6 }
  0xc8   :  { %2548 = vmatprep.subr.bf16.mxu0 %v2601_v3  ;;  %2558 = vmatprep.subr.bf16.mxu1 %v2601_v3 }
  0xc9   :  { %1375 = vmatmul.mubr.f32.gmra.mrb[32].mxu0 %v66_v7  ;;  %1454 = vmatprep.mubr.f32.mxu1 %v69_v8 }
  0xca   :  { %2550 = vmatpush3.bf16.msra.mxu0 %v2549_v9  ;;  %1455 = vmatmul.mubr.f32.gmra.mrb[32].mxu1 %v68_v10 }
  0xcb   :  { %2562 = vmatpush3.bf16.msra.mxu1 %v2549_v9  ;;  %1379 = vmatprep.mubr.f32.mxu0 %v92_v13 }
  0xcc   :  { %2551 = vmatprep.subr.bf16.mxu0 %v2601_v3  ;;  %2559 = vmatprep.subr.bf16.mxu1 %v2601_v3 }
  0xcd   :  { %1380 = vmatmul.mubr.f32.gmra.mrb[34].mxu0 %v91_v14  ;;  %1459 = vmatprep.mubr.f32.mxu1 %v94_v15 }
  0xce   :  { %2553 = vmatpush3.bf16.msra.mxu0 %v2552_v16  ;;  %1460 = vmatmul.mubr.f32.gmra.mrb[34].mxu1 %v93_v17 }
  0xcf   :  { %2563 = vmatpush3.bf16.msra.mxu1 %v2552_v16  ;;  %2554 = vmatprep.subr.bf16.mxu0 %v2601_v3 }
  0xd0   :  { %2560 = vmatprep.subr.bf16.mxu1 %v2601_v3  ;;  %2152 = vmatprep.mubr.msk.f32.mxu0 %vm2602_vm0, %v2603_v21 }
  0xd1   :  { %2155 = vmatprep.mubr.msk.f32.mxu1 %vm2602_vm0, %v2603_v21 }
  0xd2   :  { %2556 = vmatpush3.bf16.msra.mxu0 %v2555_v20 }
  0xd3   :  { %2564 = vmatpush3.bf16.msra.mxu1 %v2555_v20 }
  0xd5   :  { %2153 = vmatmul.mubr.msk.f32.vlgmr.msra.gmra.mrb[36].mxu0 %vm495_vm1, %v45_v22 }
  0xd6   :  { %2156 = vmatmul.mubr.msk.f32.vlgmr.msra.gmra.mrb[36].mxu1 %vm495_vm1, %v70_v23 }
  0xd7   :  { %2158 = vmatprep.mubr.msk.f32.mxu1 %vm2602_vm0, %v2603_v21 }
  0xda   :  { %2159 = vmatmul.mubr.msk.f32.gmra.mrb[38].mxu1 %vm495_vm1, %v95_v24 }
  0xf8   :  { %v1665_v25 = vpop.f32.mrb[0].mxu0 }
  0xf9   :  { %v1706_v26 = vpop.f32.mrb[0].mxu1  ;;  %v1666_v28 = vpop.f32.mrb[1].mxu0 }
  0xfa   :  { %v1667_v29 = vadd.f32 %v1666_v28, %v1665_v25  ;;  %v1707_v30 = vpop.f32.mrb[1].mxu1 }
  0xfb   :  { %v1708_v31 = vadd.f32 %v1707_v30, %v1706_v26 }
  0xfc   :  { %v572_v32 = vadd.f32 %v1667_v29, %v1627_v27  ;;  %v1668_v34 = vpop.f32.mrb[2].mxu0 }
  0xfd   :  { %v1669_v35 = vpop.f32.mrb[3].mxu0  ;;  %v1709_v36 = vpop.f32.mrb[2].mxu1 }
  0xfe   :  { %v652_v33 = vadd.f32 %v1708_v31, %v572_v32  ;;  %v1670_v37 = vadd.f32 %v1669_v35, %v1668_v34  ;;  %v1710_v38 = vpop.f32.mrb[3].mxu1 }
  0xff   :  { %v1711_v39 = vadd.f32 %v1710_v38, %v1709_v36 }
 0x100   :  { %v577_v40 = vadd.f32 %v1670_v37, %v1627_v27  ;;  %v1671_v41 = vpop.f32.mrb[4].mxu0 }
 0x101   :  { %v1672_v42 = vpop.f32.mrb[5].mxu0  ;;  %v1712_v43 = vpop.f32.mrb[4].mxu1 }
 0x102   :  { %v657_v44 = vadd.f32 %v1711_v39, %v577_v40  ;;  %v1673_v45 = vadd.f32 %v1672_v42, %v1671_v41  ;;  %v1713_v46 = vpop.f32.mrb[5].mxu1 }
 0x103   :  { %v1714_v47 = vadd.f32 %v1713_v46, %v1712_v43 }
 0x104   :  { %v582_v48 = vadd.f32 %v1673_v45, %v1627_v27 }
 0x106   :  { %v662_v49 = vadd.f32 %v1714_v47, %v582_v48 }
 0x118   :  { %v1747_v50 = vpop.f32.mrb[6].mxu0 }
 0x119   :  { %v1788_v51 = vpop.f32.mrb[6].mxu1  ;;  %v1748_v52 = vpop.f32.mrb[7].mxu0 }
 0x11a   :  { %v1749_v53 = vadd.f32 %v1748_v52, %v1747_v50  ;;  %v1789_v54 = vpop.f32.mrb[7].mxu1 }
 0x11b   :  { %v1790_v55 = vadd.f32 %v1789_v54, %v1788_v51 }
 0x11c   :  { %v732_v56 = vadd.f32 %v1749_v53, %v652_v33  ;;  %v1750_v57 = vpop.f32.mrb[8].mxu0 }
 0x11d   :  { %v1751_v58 = vpop.f32.mrb[9].mxu0  ;;  %v1791_v59 = vpop.f32.mrb[8].mxu1 }
 0x11e   :  { %v812_v60 = vadd.f32 %v1790_v55, %v732_v56  ;;  %v1752_v61 = vadd.f32 %v1751_v58, %v1750_v57  ;;  %v1792_v62 = vpop.f32.mrb[9].mxu1 }
 0x11f   :  { %v1793_v63 = vadd.f32 %v1792_v62, %v1791_v59 }
 0x120   :  { %v737_v0 = vadd.f32 %v1752_v61, %v657_v44  ;;  %v1753_v1 = vpop.f32.mrb[10].mxu0 }
 0x121   :  { %v1754_v2 = vpop.f32.mrb[11].mxu0  ;;  %v1794_v3 = vpop.f32.mrb[10].mxu1 }
 0x122   :  { %v817_v4 = vadd.f32 %v1793_v63, %v737_v0  ;;  %v1755_v5 = vadd.f32 %v1754_v2, %v1753_v1  ;;  %v1795_v6 = vpop.f32.mrb[11].mxu1 }
 0x123   :  { %v1796_v7 = vadd.f32 %v1795_v6, %v1794_v3 }
 0x124   :  { %v742_v8 = vadd.f32 %v1755_v5, %v662_v49 }
 0x126   :  { %v822_v9 = vadd.f32 %v1796_v7, %v742_v8 }
 0x138   :  { %v1829_v10 = vpop.f32.mrb[12].mxu0 }
 0x139   :  { %v1870_v11 = vpop.f32.mrb[12].mxu1  ;;  %v1830_v12 = vpop.f32.mrb[13].mxu0 }
 0x13a   :  { %v1831_v13 = vadd.f32 %v1830_v12, %v1829_v10  ;;  %v1871_v14 = vpop.f32.mrb[13].mxu1 }
 0x13b   :  { %v1872_v15 = vadd.f32 %v1871_v14, %v1870_v11 }
 0x13c   :  { %v892_v16 = vadd.f32 %v1831_v13, %v812_v60  ;;  %v1832_v17 = vpop.f32.mrb[14].mxu0 }
 0x13d   :  { %v1833_v18 = vpop.f32.mrb[15].mxu0  ;;  %v1873_v19 = vpop.f32.mrb[14].mxu1 }
 0x13e   :  { %v972_v20 = vadd.f32 %v1872_v15, %v892_v16  ;;  %v1834_v21 = vadd.f32 %v1833_v18, %v1832_v17  ;;  %v1874_v22 = vpop.f32.mrb[15].mxu1 }
 0x13f   :  { %v1875_v23 = vadd.f32 %v1874_v22, %v1873_v19 }
 0x140   :  { %v897_v24 = vadd.f32 %v1834_v21, %v817_v4  ;;  %v1835_v25 = vpop.f32.mrb[16].mxu0 }
 0x141   :  { %v1836_v26 = vpop.f32.mrb[17].mxu0  ;;  %v1876_v27 = vpop.f32.mrb[16].mxu1 }
 0x142   :  { %v977_v28 = vadd.f32 %v1875_v23, %v897_v24  ;;  %v1837_v29 = vadd.f32 %v1836_v26, %v1835_v25  ;;  %v1877_v30 = vpop.f32.mrb[17].mxu1 }
 0x143   :  { %v1878_v31 = vadd.f32 %v1877_v30, %v1876_v27 }
 0x144   :  { %v902_v32 = vadd.f32 %v1837_v29, %v822_v9 }
 0x146   :  { %v982_v33 = vadd.f32 %v1878_v31, %v902_v32 }
 0x158   :  { %v1911_v34 = vpop.f32.mrb[18].mxu0 }
 0x159   :  { %v1952_v35 = vpop.f32.mrb[18].mxu1  ;;  %v1912_v36 = vpop.f32.mrb[19].mxu0 }
 0x15a   :  { %v1913_v37 = vadd.f32 %v1912_v36, %v1911_v34  ;;  %v1953_v38 = vpop.f32.mrb[19].mxu1 }
 0x15b   :  { %v1954_v39 = vadd.f32 %v1953_v38, %v1952_v35 }
 0x15c   :  { %v1052_v40 = vadd.f32 %v1913_v37, %v972_v20  ;;  %v1914_v41 = vpop.f32.mrb[20].mxu0 }
 0x15d   :  { %v1915_v42 = vpop.f32.mrb[21].mxu0  ;;  %v1955_v43 = vpop.f32.mrb[20].mxu1 }
 0x15e   :  { %v1132_v44 = vadd.f32 %v1954_v39, %v1052_v40  ;;  %v1916_v45 = vadd.f32 %v1915_v42, %v1914_v41  ;;  %v1956_v46 = vpop.f32.mrb[21].mxu1 }
 0x15f   :  { %v1957_v47 = vadd.f32 %v1956_v46, %v1955_v43 }
 0x160   :  { %v1057_v48 = vadd.f32 %v1916_v45, %v977_v28  ;;  %v1917_v49 = vpop.f32.mrb[22].mxu0 }
 0x161   :  { %v1918_v50 = vpop.f32.mrb[23].mxu0  ;;  %v1958_v51 = vpop.f32.mrb[22].mxu1 }
 0x162   :  { %v1137_v52 = vadd.f32 %v1957_v47, %v1057_v48  ;;  %v1919_v53 = vadd.f32 %v1918_v50, %v1917_v49  ;;  %v1959_v54 = vpop.f32.mrb[23].mxu1 }
 0x163   :  { %v1960_v55 = vadd.f32 %v1959_v54, %v1958_v51 }
 0x164   :  { %v1062_v56 = vadd.f32 %v1919_v53, %v982_v33 }
 0x166   :  { %v1142_v57 = vadd.f32 %v1960_v55, %v1062_v56 }
 0x178   :  { %v1993_v58 = vpop.f32.mrb[24].mxu0 }
 0x179   :  { %v2034_v59 = vpop.f32.mrb[24].mxu1  ;;  %v1994_v60 = vpop.f32.mrb[25].mxu0 }
 0x17a   :  { %v1995_v61 = vadd.f32 %v1994_v60, %v1993_v58  ;;  %v2035_v62 = vpop.f32.mrb[25].mxu1 }
 0x17b   :  { %v2036_v63 = vadd.f32 %v2035_v62, %v2034_v59 }
 0x17c   :  { %v1212_v0 = vadd.f32 %v1995_v61, %v1132_v44  ;;  %v1996_v1 = vpop.f32.mrb[26].mxu0 }
 0x17d   :  { %v1997_v2 = vpop.f32.mrb[27].mxu0  ;;  %v2037_v3 = vpop.f32.mrb[26].mxu1 }
 0x17e   :  { %v1292_v4 = vadd.f32 %v2036_v63, %v1212_v0  ;;  %v1998_v5 = vadd.f32 %v1997_v2, %v1996_v1  ;;  %v2038_v6 = vpop.f32.mrb[27].mxu1 }
 0x17f   :  { %v2039_v7 = vadd.f32 %v2038_v6, %v2037_v3 }
 0x180   :  { %v1217_v8 = vadd.f32 %v1998_v5, %v1137_v52  ;;  %v1999_v9 = vpop.f32.mrb[28].mxu0 }
 0x181   :  { %v2000_v10 = vpop.f32.mrb[29].mxu0  ;;  %v2040_v11 = vpop.f32.mrb[28].mxu1 }
 0x182   :  { %v1297_v12 = vadd.f32 %v2039_v7, %v1217_v8  ;;  %v2001_v13 = vadd.f32 %v2000_v10, %v1999_v9  ;;  %v2041_v14 = vpop.f32.mrb[29].mxu1 }
 0x183   :  { %v2042_v15 = vadd.f32 %v2041_v14, %v2040_v11 }
 0x184   :  { %v1222_v16 = vadd.f32 %v2001_v13, %v1142_v57 }
 0x186   :  { %v1302_v17 = vadd.f32 %v2042_v15, %v1222_v16  ;;  %v1631_v15 = vld [vmem:[%s4074_s3] ss:$0 sm:$0xff]  ;;  %s2577_s3 = scalar_lea.vmem %s1617_s6, 384 }
 0x187   :  { %p2578_p0 = scmp.ne.s32.totalorder %s1617_s6, %s2577_s3  ;;  %p2583_p2 = scmp.lt.s32.totalorder %s2577_s3, %s2577_s3 }
 0x189   :  { %p2584_p3 = por %p2583_p2, %p2582_p1 }
 0x18b   :  { %p2585_p4 = pnand %p2584_p3, %p2578_p0 }
 0x198   :  { %v2075_v18 = vpop.f32.mrb[30].mxu0 }
 0x199   :  { %v2116_v19 = vpop.f32.mrb[30].mxu1  ;;  %v2076_v20 = vpop.f32.mrb[31].mxu0 }
 0x19a   :  { %v2077_v21 = vadd.f32 %v2076_v20, %v2075_v18  ;;  %v2117_v22 = vpop.f32.mrb[31].mxu1 }
 0x19b   :  { %v2118_v23 = vadd.f32 %v2117_v22, %v2116_v19 }
 0x19c   :  { %v1372_v24 = vadd.f32 %v2077_v21, %v1292_v4  ;;  %v2078_v25 = vpop.f32.mrb[32].mxu0 }
 0x19d   :  { %v2079_v26 = vpop.f32.mrb[33].mxu0  ;;  %v2119_v27 = vpop.f32.mrb[32].mxu1 }
 0x19e   :  { %v2080_v28 = vadd.f32 %v2079_v26, %v2078_v25  ;;  %v2120_v29 = vpop.f32.mrb[33].mxu1  ;;  %v1452_v30 = vadd.f32 %v2118_v23, %v1372_v24 }
 0x19f   :  { %v2121_v31 = vadd.f32 %v2120_v29, %v2119_v27 }
 0x1a0   :  { %v1377_v32 = vadd.f32 %v2080_v28, %v1297_v12  ;;  %v2081_v33 = vpop.f32.mrb[34].mxu0 }
 0x1a1   :  { %v2082_v34 = vpop.f32.mrb[35].mxu0  ;;  %v2122_v35 = vpop.f32.mrb[34].mxu1 }
 0x1a2   :  { %v2083_v36 = vadd.f32 %v2082_v34, %v2081_v33  ;;  %v2123_v37 = vpop.f32.mrb[35].mxu1  ;;  %v1457_v38 = vadd.f32 %v2121_v31, %v1377_v32 }
 0x1a3   :  { %v2124_v39 = vadd.f32 %v2123_v37, %v2122_v35 }
 0x1a4   :  { %v1382_v40 = vadd.f32 %v2083_v36, %v1302_v17  ;;  %v1632_v17 = vld [vmem:[%s4075_s4] ss:$0 sm:$0xff] }
 0x1a6   :  { %v1462_v41 = vadd.f32 %v2124_v39, %v1382_v40 }
 0x1a8   :  { %v1531_v42 = vpop.f32.mrb[36].mxu0 }
 0x1a9   :  { %v1532_v43 = vadd.f32 %v1531_v42, %v1452_v30  ;;  %v1536_v44 = vpop.f32.mrb[36].mxu1  ;;  %v2154_v45 = vpop.f32.mrb[37].mxu0 }
 0x1aa   :  { %v1537_v46 = vadd.f32 %v1536_v44, %v1457_v38  ;;  %v2157_v47 = vpop.f32.mrb[37].mxu1 }
 0x1ab   :  { %v1547_v48 = vsel %vm495_vm1, %v1532_v43, 0.0 }
 0x1ac   :  { %1548 = vadd.xlane.f32.xlu0 %v1547_v48  ;;  %v1550_v52 = vsel %vm495_vm1, %v1537_v46, 0.0 }
 0x1ad   :  { %v1541_v49 = vpop.f32.mrb[38].mxu1 }
 0x1ae   :  { %v1542_v50 = vadd.f32 %v1541_v49, %v1462_v41  ;;  %v2160_v51 = vpop.f32.mrb[39].mxu1 }
 0x1b0   :  { %v1553_v53 = vsel %vm495_vm1, %v1542_v50, 0.0  ;;  %1551 = vadd.xlane.f32.xlu0 %v1550_v52 }
 0x1b1   :  { %1554 = vadd.xlane.f32.xlu1 %v1553_v53 }
 0x239   :  { %v1549_v54 = vpop.xlane.xlu0 %1548 }
 0x23a   :  { %v1557_v55 = vmul.f32 0.015625, %v1549_v54 }
 0x23c   :  { %v1560_v56 = vsub.f32 %v1532_v43, %v1557_v55 }
 0x23d   :  { %v1552_v57 = vpop.xlane.xlu0 %1551 }
 0x23e   :  { %v1555_v58 = vpop.xlane.xlu1 %1554  ;;  %v1558_v59 = vmul.f32 0.015625, %v1552_v57  ;;  %v1563_v60 = vmul.f32 %v1560_v56, %v1560_v56 }
 0x23f   :  { %v1559_v61 = vmul.f32 0.015625, %v1555_v58 }
 0x240   :  { %v1561_v62 = vsub.f32 %v1537_v46, %v1558_v59  ;;  %v1566_v63 = vsel %vm495_vm1, %v1563_v60, 0.0 }
 0x241   :  { %v1562_v0 = vsub.f32 %v1542_v50, %v1559_v61  ;;  %1567 = vadd.xlane.f32.xlu1 %v1566_v63 }
 0x242   :  { %v1564_v1 = vmul.f32 %v1561_v62, %v1561_v62 }
 0x243   :  { %v1565_v2 = vmul.f32 %v1562_v0, %v1562_v0 }
 0x244   :  { %v1569_v3 = vsel %vm495_vm1, %v1564_v1, 0.0 }
 0x245   :  { %v1572_v4 = vsel %vm495_vm1, %v1565_v2, 0.0  ;;  %1570 = vadd.xlane.f32.xlu0 %v1569_v3 }
 0x246   :  { %1573 = vadd.xlane.f32.xlu1 %v1572_v4 }
 0x2ce   :  { %v1568_v5 = vpop.xlane.xlu1 %1567 }
 0x2cf   :  { %v1575_v6 = vmul.f32 0.015625, %v1568_v5 }
 0x2d1   :  { %v1578_v7 = vadd.f32 1e-05, %v1575_v6 }
 0x2d2   :  { %v1571_v8 = vpop.xlane.xlu0 %1570 }
 0x2d3   :  { %2571 = vrsqrt.f32 %v1578_v7  ;;  %v1574_v9 = vpop.xlane.xlu1 %1573  ;;  %v1576_v10 = vmul.f32 0.015625, %v1571_v8 }
 0x2d4   :  { %v1577_v11 = vmul.f32 0.015625, %v1574_v9 }
 0x2d5   :  { %v1579_v12 = vadd.f32 1e-05, %v1576_v10 }
 0x2d6   :  { %v1580_v13 = vadd.f32 1e-05, %v1577_v11 }
 0x2d7   :  { %2573 = vrsqrt.f32 %v1579_v12 }
 0x2d8   :  { %2575 = vrsqrt.f32 %v1580_v13 }
 0x2dd   :  { %v2572_v14 = vpop.eup %2571 }
 0x2de   :  { %v1584_v16 = vmul.f32 %v2572_v14, %v1560_v56 }
 0x2e0   :  { %v1593_v18 = vmul.f32 %v1631_v15, %v1584_v16 }
 0x2e1   :  { %v2574_v19 = vpop.eup %2573 }
 0x2e2   :  { %v2576_v20 = vpop.eup %2575  ;;  %v1585_v21 = vmul.f32 %v2574_v19, %v1561_v62  ;;  %v1602_v22 = vadd.f32 %v1632_v17, %v1593_v18 }
 0x2e3   :  { %v1586_v23 = vmul.f32 %v2576_v20, %v1562_v0 }
 0x2e4   :  { %v1594_v24 = vmul.f32 %v1631_v15, %v1585_v21  ;;  %v1605_v25 = vmax.f32 %v1602_v22, 0.0 }
 0x2e5   :  { %v1595_v26 = vmul.f32 %v1631_v15, %v1586_v23 }
 0x2e6   :  { %v1603_v27 = vadd.f32 %v1632_v17, %v1594_v24  ;;  %1608 = vst.msk [vmem:[#allocation2] sm:$0xff] %vm495_vm1, %v1605_v25 }
 0x2e7   :  { %v1604_v28 = vadd.f32 %v1632_v17, %v1595_v26 }
 0x2e8   :  { %v1606_v29 = vmax.f32 %v1603_v27, 0.0 }
 0x2e9   :  { %v1607_v30 = vmax.f32 %v1604_v28, 0.0 }
 0x2ea   :  { %1609 = vst.msk [vmem:[#allocation2 + $0x8] sm:$0xff] %vm495_vm1, %v1606_v29 }
 0x2eb   :  { %1610 = vst.msk [vmem:[#allocation2 + $0x10] sm:$0xff] %vm495_vm1, %v1607_v30 }
 0x2ec   :  { %2588 = shalt.err (!%p2585_p4)
}
 0x2ed   :  { %s2589_s8 = scalar_lea.hbm %s4076_s5, 384 }
 0x2ee   :  { %p2590_p5 = scmp.ne.s32.totalorder %s4076_s5, %s2589_s8  ;;  %p2593_p6 = scmp.lt.u32.totalorder %s2589_s8, %s4076_s5 }
 0x2f0   :  { %p2595_p7 = pnand %p2593_p6, %p2590_p5 }
 0x2f2   :  { %2598 = shalt.err (!%p2595_p7)
}
 0x2f3   :  { %s2605_s13 = smov 128   ;;  %s2606_s14 = smov 8  }
 0x2f4   :  { %1622 = dma.vmem_to_hbm [thread:$0]  %s1617_s6, 384, %s4076_s5, [#allocation3], %s2605_s13, %s2605_s13, %s2606_s14  }
 0x2f5   :  { %2599 = dma.done.wait [#allocation3], 384  }
 0x2f6   :  { %2600 = vsyncadd [#allocation3], 4294966912 }
 0x2f7   :  { %1626 = vsyncpa [#allocation3], 1 }

</bundles_post_ra>
